<compile_context>
chip_gen: v7x
topology: tpu7x:2x2x1
jax: 0.10.0
libtpu: 0.0.40
codegen_flags: <defaults>
</compile_context>

<pallas_src>
import jax
import jax.numpy as jnp
from jax.experimental import pallas as pl
from jax.experimental.pallas import tpu as pltpu


# ----------------------------------------------------------------------------
# Fused Pallas kernel: whole NoiseNet forward for ONE image (NHWC in VMEM).
# ----------------------------------------------------------------------------
def _noisenet_fused_kernel(x_ref, *refs):
    # x_ref : (1, H, W, C0) input image (NHWC)
    # refs  : w1,b1, w2,b2, w3,b3, w4,b4, o_ref, xp0, xp1, xp2, xp3
    #   wL : (9*CinL, CoutL) im2col-layout weights (tap order (kw, kh, cin))
    #   bL : (1, CoutL)
    #   o_ref : (1, H*W, 1) final activation (Cout=1)
    #   xpL   : (H+2, W+2, CinL) VMEM scratch for the zero-padded layer input
    n_layers = 4
    wb_refs = refs[:2 * n_layers]
    o_ref = refs[2 * n_layers]
    xp_refs = refs[2 * n_layers + 1:]

    H = x_ref.shape[1]
    W = x_ref.shape[2]

    act = x_ref[0]                                         # (H, W, Cin0), fp32
    for li in range(n_layers):
        w_ref = wb_refs[2 * li]                            # (9*Cin, Cout)
        b_ref = wb_refs[2 * li + 1]                        # (1, Cout)
        xp_ref = xp_refs[li]                               # (H+2, W+2, Cin)

        # ---- in-kernel zero padding into VMEM scratch ----------------------
        xp_ref[...] = jnp.zeros(xp_ref.shape, xp_ref.dtype)
        xp_ref[1:H + 1, 1:W + 1, :] = act
        xp = xp_ref[...]                                   # (H+2, W+2, Cin)

        # ---- im2col: patches[h*W+w, kw*3C + kh*C + c] = xp[h+kh, w+kw, c] --
        rows = jnp.concatenate(
            [xp[0:H], xp[1:H + 1], xp[2:H + 2]], axis=-1)  # (H, W+2, 3*Cin)
        patches = jnp.concatenate(
            [rows[:, 0:W], rows[:, 1:W + 1], rows[:, 2:W + 2]],
            axis=-1)                                       # (H, W, 9*Cin)
        patches = patches.reshape(H * W, patches.shape[-1])

        # ---- single MXU matmul per layer, then bias + ReLU on the VPU ------
        acc = jnp.dot(patches, w_ref[...],
                      preferred_element_type=jnp.float32)  # (H*W, Cout)
        acc = jnp.maximum(acc + b_ref[...], 0.0)

        if li + 1 < n_layers:
            act = acc.reshape(H, W, acc.shape[-1])         # next layer's input
        else:
            o_ref[0] = acc.astype(o_ref.dtype)             # (H*W, 1)


# ----------------------------------------------------------------------------
# Wrapper: NCHW in -> NCHW out (matches the PyTorch module).
# ----------------------------------------------------------------------------
def noisenet_forward_pallas(x_nchw, params):
    N, C0, H, W = x_nchw.shape
    x_nhwc = jnp.transpose(x_nchw, (0, 2, 3, 1))           # NCHW -> NHWC (tiny)

    wmats, bvecs, cins = [], [], []
    for (w, b) in params:                                  # w: (3,3,Cin,Cout) HWIO
        cin, cout = w.shape[2], w.shape[3]
        cins.append(cin)
        # Tap order (kw, kh, cin) to match the kernel's patch construction.
        wmats.append(jnp.transpose(w, (1, 0, 2, 3)).reshape(9 * cin, cout))
        bvecs.append(b.reshape(1, cout))

    in_specs = [pl.BlockSpec((1, H, W, C0), lambda n: (n, 0, 0, 0))]
    flat_params = []
    for wm, bv in zip(wmats, bvecs):
        in_specs.append(pl.BlockSpec(wm.shape, lambda n: (0, 0)))
        in_specs.append(pl.BlockSpec(bv.shape, lambda n: (0, 0)))
        flat_params.extend([wm, bv])

    out_flat = pl.pallas_call(
        _noisenet_fused_kernel,
        out_shape=jax.ShapeDtypeStruct((N, H * W, 1), jnp.float32),
        grid=(N,),
        in_specs=in_specs,
        out_specs=pl.BlockSpec((1, H * W, 1), lambda n: (n, 0, 0)),
        scratch_shapes=[pltpu.VMEM((H + 2, W + 2, c), jnp.float32)
                        for c in cins],
        compiler_params=pltpu.CompilerParams(
            dimension_semantics=("parallel",)),
    )(x_nhwc, *flat_params)

    # Final layer has Cout=1: row-major NHWC flat == NCHW flat -> free reshape.
    return out_flat.reshape(N, 1, H, W)


noisenet_forward = jax.jit(noisenet_forward_pallas)


# ----------------------------------------------------------------------------
# Parameter init (deterministic, PyTorch Conv2d default-like uniform bounds).
# ----------------------------------------------------------------------------
def init_noisenet_params(key):
    times = 2
    layer_io = [(4, 8 * times), (8 * times, 16 * times),
                (16 * times, 8 * times), (8 * times, 1)]
    params = []
    for cin, cout in layer_io:
        key, kw, kb = jax.random.split(key, 3)
        fan_in = cin * 3 * 3
        bound = 1.0 / jnp.sqrt(fan_in)
        w = jax.random.uniform(kw, (3, 3, cin, cout), jnp.float32,
                               minval=-bound, maxval=bound)   # HWIO
        b = jax.random.uniform(kb, (cout,), jnp.float32,
                               minval=-bound, maxval=bound)
        params.append((w, b))
    return params


# Pure-JAX reference (XLA conv) for correctness check.
def noisenet_reference(x_nchw, params):
    x = jnp.transpose(x_nchw, (0, 2, 3, 1))
    for (w, b) in params:
        x = jax.lax.conv_general_dilated(
            x, w, window_strides=(1, 1), padding="SAME",
            dimension_numbers=("NHWC", "HWIO", "NHWC"))
        x = jnp.maximum(x + b[None, None, None, :], 0.0)
    return jnp.transpose(x, (0, 3, 1, 2))


if __name__ == "__main__":
    key = jax.random.PRNGKey(0)
    key, kx = jax.random.split(key)

    # Small deterministic input consistent with Conv2d(4, ...): NCHW.
    x = jax.random.normal(kx, (2, 4, 16, 16), dtype=jnp.float32)
    params = init_noisenet_params(key)

    out = jax.block_until_ready(noisenet_forward(x, params))
    ref = jax.block_until_ready(noisenet_reference(x, params))

    assert out.shape == (2, 1, 16, 16), out.shape
    assert jnp.allclose(out, ref, rtol=1e-3, atol=1e-3), \
        f"max abs err {jnp.max(jnp.abs(out - ref))}"

    print("KERNEL_OK")
</pallas_src>

<mosaic_0001>
module attributes {stable_mosaic.version = 11 : i64} {
  func.func @_noisenet_fused_kernel(%arg0: i32, %arg1: memref<1x16x16x4xf32, #tpu.memory_space<vmem>>, %arg2: memref<36x16xf32, #tpu.memory_space<vmem>>, %arg3: memref<1x16xf32, #tpu.memory_space<vmem>>, %arg4: memref<144x32xf32, #tpu.memory_space<vmem>>, %arg5: memref<1x32xf32, #tpu.memory_space<vmem>>, %arg6: memref<288x16xf32, #tpu.memory_space<vmem>>, %arg7: memref<1x16xf32, #tpu.memory_space<vmem>>, %arg8: memref<144x1xf32, #tpu.memory_space<vmem>>, %arg9: memref<1x1xf32, #tpu.memory_space<vmem>>, %arg10: memref<1x256x1xf32, #tpu.memory_space<vmem>>, %arg11: memref<18x18x4xf32, #tpu.memory_space<vmem>>, %arg12: memref<18x18x16xf32, #tpu.memory_space<vmem>>, %arg13: memref<18x18x32xf32, #tpu.memory_space<vmem>>, %arg14: memref<18x18x16xf32, #tpu.memory_space<vmem>>) attributes {dimension_semantics = [#tpu.dimension_semantics<parallel>], iteration_bounds = array<i64: 2>, scalar_prefetch = 0 : i64, scratch_operands = 4 : i64, tpu.core_type = #tpu.core_type<tc>, window_params = [{transform_indices = @transform_0, window_bounds = array<i64: 1, 16, 16, 4>}, {pipeline_mode = #tpu.pipeline_mode<synchronous>, transform_indices = @transform_1, window_bounds = array<i64: 36, 16>}, {pipeline_mode = #tpu.pipeline_mode<synchronous>, transform_indices = @transform_2, window_bounds = array<i64: 1, 16>}, {pipeline_mode = #tpu.pipeline_mode<synchronous>, transform_indices = @transform_3, window_bounds = array<i64: 144, 32>}, {pipeline_mode = #tpu.pipeline_mode<synchronous>, transform_indices = @transform_4, window_bounds = array<i64: 1, 32>}, {pipeline_mode = #tpu.pipeline_mode<synchronous>, transform_indices = @transform_5, window_bounds = array<i64: 288, 16>}, {pipeline_mode = #tpu.pipeline_mode<synchronous>, transform_indices = @transform_6, window_bounds = array<i64: 1, 16>}, {pipeline_mode = #tpu.pipeline_mode<synchronous>, transform_indices = @transform_7, window_bounds = array<i64: 144, 1>}, {pipeline_mode = #tpu.pipeline_mode<synchronous>, transform_indices = @transform_8, window_bounds = array<i64: 1, 1>}, {transform_indices = @transform_9, window_bounds = array<i64: 1, 256, 1>}]} {
    %c0 = arith.constant 0 : index
    %c0_0 = arith.constant 0 : index
    %c0_1 = arith.constant 0 : index
    %c0_2 = arith.constant 0 : index
    %0 = vector.load %arg1[%c0, %c0_0, %c0_1, %c0_2] : memref<1x16x16x4xf32, #tpu.memory_space<vmem>>, vector<1x16x16x4xf32>
    %1 = vector.shape_cast %0 : vector<1x16x16x4xf32> to vector<16x16x4xf32>
    %cst = arith.constant 0.000000e+00 : f32
    %2 = vector.broadcast %cst : f32 to vector<18x18x4xf32>
    %c0_3 = arith.constant 0 : index
    %c0_4 = arith.constant 0 : index
    %c0_5 = arith.constant 0 : index
    %3 = vector.load %arg11[%c0_3, %c0_4, %c0_5] : memref<18x18x4xf32, #tpu.memory_space<vmem>>, vector<18x18x4xf32>
    tpu.vector_store %arg11[%c0_3, %c0_4, %c0_5], %2 {strides = array<i32>} : memref<18x18x4xf32, #tpu.memory_space<vmem>>, vector<18x18x4xf32>,
    %c1 = arith.constant 1 : index
    %c1_6 = arith.constant 1 : index
    %c0_7 = arith.constant 0 : index
    %4 = vector.load %arg11[%c1, %c1_6, %c0_7] : memref<18x18x4xf32, #tpu.memory_space<vmem>>, vector<16x16x4xf32>
    tpu.vector_store %arg11[%c1, %c1_6, %c0_7], %1 {strides = array<i32>} : memref<18x18x4xf32, #tpu.memory_space<vmem>>, vector<16x16x4xf32>,
    %c0_8 = arith.constant 0 : index
    %c0_9 = arith.constant 0 : index
    %c0_10 = arith.constant 0 : index
    %5 = vector.load %arg11[%c0_8, %c0_9, %c0_10] : memref<18x18x4xf32, #tpu.memory_space<vmem>>, vector<18x18x4xf32>
    %6 = vector.extract_strided_slice %5 {offsets = [0, 0, 0], sizes = [16, 18, 4], strides = [1, 1, 1]} : vector<18x18x4xf32> to vector<16x18x4xf32>
    %7 = vector.extract_strided_slice %5 {offsets = [1, 0, 0], sizes = [16, 18, 4], strides = [1, 1, 1]} : vector<18x18x4xf32> to vector<16x18x4xf32>
    %8 = vector.extract_strided_slice %5 {offsets = [2, 0, 0], sizes = [16, 18, 4], strides = [1, 1, 1]} : vector<18x18x4xf32> to vector<16x18x4xf32>
    %9 = tpu.concatenate %6, %7, %8 in 2 : vector<16x18x4xf32>, vector<16x18x4xf32>, vector<16x18x4xf32> -> vector<16x18x12xf32>
    %10 = vector.extract_strided_slice %9 {offsets = [0, 0, 0], sizes = [16, 16, 12], strides = [1, 1, 1]} : vector<16x18x12xf32> to vector<16x16x12xf32>
    %11 = vector.extract_strided_slice %9 {offsets = [0, 1, 0], sizes = [16, 16, 12], strides = [1, 1, 1]} : vector<16x18x12xf32> to vector<16x16x12xf32>
    %12 = vector.extract_strided_slice %9 {offsets = [0, 2, 0], sizes = [16, 16, 12], strides = [1, 1, 1]} : vector<16x18x12xf32> to vector<16x16x12xf32>
    %13 = tpu.concatenate %10, %11, %12 in 2 : vector<16x16x12xf32>, vector<16x16x12xf32>, vector<16x16x12xf32> -> vector<16x16x36xf32>
    %14 = vector.shape_cast %13 : vector<16x16x36xf32> to vector<256x36xf32>
    %c0_11 = arith.constant 0 : index
    %c0_12 = arith.constant 0 : index
    %15 = vector.load %arg2[%c0_11, %c0_12] : memref<36x16xf32, #tpu.memory_space<vmem>>, vector<36x16xf32>
    %cst_13 = arith.constant dense<0.000000e+00> : vector<256x16xf32>
    %16 = tpu.matmul %14, %15, %cst_13 {dimension_numbers = #tpu.dot_dimension_numbers<[1], [0], [0], [1], [0, 0, 1, 1], [], []>} : vector<256x36xf32>, vector<36x16xf32>, vector<256x16xf32> -> vector<256x16xf32>
    %c0_14 = arith.constant 0 : index
    %c0_15 = arith.constant 0 : index
    %17 = vector.load %arg3[%c0_14, %c0_15] : memref<1x16xf32, #tpu.memory_space<vmem>>, vector<1x16xf32>
    %18 = vector.broadcast %17 : vector<1x16xf32> to vector<256x16xf32>
    %19 = arith.addf %16, %18 : vector<256x16xf32>
    %cst_16 = arith.constant 0.000000e+00 : f32
    %20 = vector.broadcast %cst_16 : f32 to vector<256x16xf32>
    %21 = arith.maximumf %19, %20 : vector<256x16xf32>
    %22 = vector.shape_cast %21 : vector<256x16xf32> to vector<16x16x16xf32>
    %cst_17 = arith.constant 0.000000e+00 : f32
    %23 = vector.broadcast %cst_17 : f32 to vector<18x18x16xf32>
    %c0_18 = arith.constant 0 : index
    %c0_19 = arith.constant 0 : index
    %c0_20 = arith.constant 0 : index
    %24 = vector.load %arg12[%c0_18, %c0_19, %c0_20] : memref<18x18x16xf32, #tpu.memory_space<vmem>>, vector<18x18x16xf32>
    tpu.vector_store %arg12[%c0_18, %c0_19, %c0_20], %23 {strides = array<i32>} : memref<18x18x16xf32, #tpu.memory_space<vmem>>, vector<18x18x16xf32>,
    %c1_21 = arith.constant 1 : index
    %c1_22 = arith.constant 1 : index
    %c0_23 = arith.constant 0 : index
    %25 = vector.load %arg12[%c1_21, %c1_22, %c0_23] : memref<18x18x16xf32, #tpu.memory_space<vmem>>, vector<16x16x16xf32>
    tpu.vector_store %arg12[%c1_21, %c1_22, %c0_23], %22 {strides = array<i32>} : memref<18x18x16xf32, #tpu.memory_space<vmem>>, vector<16x16x16xf32>,
    %c0_24 = arith.constant 0 : index
    %c0_25 = arith.constant 0 : index
    %c0_26 = arith.constant 0 : index
    %26 = vector.load %arg12[%c0_24, %c0_25, %c0_26] : memref<18x18x16xf32, #tpu.memory_space<vmem>>, vector<18x18x16xf32>
    %27 = vector.extract_strided_slice %26 {offsets = [0, 0, 0], sizes = [16, 18, 16], strides = [1, 1, 1]} : vector<18x18x16xf32> to vector<16x18x16xf32>
    %28 = vector.extract_strided_slice %26 {offsets = [1, 0, 0], sizes = [16, 18, 16], strides = [1, 1, 1]} : vector<18x18x16xf32> to vector<16x18x16xf32>
    %29 = vector.extract_strided_slice %26 {offsets = [2, 0, 0], sizes = [16, 18, 16], strides = [1, 1, 1]} : vector<18x18x16xf32> to vector<16x18x16xf32>
    %30 = tpu.concatenate %27, %28, %29 in 2 : vector<16x18x16xf32>, vector<16x18x16xf32>, vector<16x18x16xf32> -> vector<16x18x48xf32>
    %31 = vector.extract_strided_slice %30 {offsets = [0, 0, 0], sizes = [16, 16, 48], strides = [1, 1, 1]} : vector<16x18x48xf32> to vector<16x16x48xf32>
    %32 = vector.extract_strided_slice %30 {offsets = [0, 1, 0], sizes = [16, 16, 48], strides = [1, 1, 1]} : vector<16x18x48xf32> to vector<16x16x48xf32>
    %33 = vector.extract_strided_slice %30 {offsets = [0, 2, 0], sizes = [16, 16, 48], strides = [1, 1, 1]} : vector<16x18x48xf32> to vector<16x16x48xf32>
    %34 = tpu.concatenate %31, %32, %33 in 2 : vector<16x16x48xf32>, vector<16x16x48xf32>, vector<16x16x48xf32> -> vector<16x16x144xf32>
    %35 = vector.shape_cast %34 : vector<16x16x144xf32> to vector<256x144xf32>
    %c0_27 = arith.constant 0 : index
    %c0_28 = arith.constant 0 : index
    %36 = vector.load %arg4[%c0_27, %c0_28] : memref<144x32xf32, #tpu.memory_space<vmem>>, vector<144x32xf32>
    %cst_29 = arith.constant dense<0.000000e+00> : vector<256x32xf32>
    %37 = tpu.matmul %35, %36, %cst_29 {dimension_numbers = #tpu.dot_dimension_numbers<[1], [0], [0], [1], [0, 0, 1, 1], [], []>} : vector<256x144xf32>, vector<144x32xf32>, vector<256x32xf32> -> vector<256x32xf32>
    %c0_30 = arith.constant 0 : index
    %c0_31 = arith.constant 0 : index
    %38 = vector.load %arg5[%c0_30, %c0_31] : memref<1x32xf32, #tpu.memory_space<vmem>>, vector<1x32xf32>
    %39 = vector.broadcast %38 : vector<1x32xf32> to vector<256x32xf32>
    %40 = arith.addf %37, %39 : vector<256x32xf32>
    %cst_32 = arith.constant 0.000000e+00 : f32
    %41 = vector.broadcast %cst_32 : f32 to vector<256x32xf32>
    %42 = arith.maximumf %40, %41 : vector<256x32xf32>
    %43 = vector.shape_cast %42 : vector<256x32xf32> to vector<16x16x32xf32>
    %cst_33 = arith.constant 0.000000e+00 : f32
    %44 = vector.broadcast %cst_33 : f32 to vector<18x18x32xf32>
    %c0_34 = arith.constant 0 : index
    %c0_35 = arith.constant 0 : index
    %c0_36 = arith.constant 0 : index
    %45 = vector.load %arg13[%c0_34, %c0_35, %c0_36] : memref<18x18x32xf32, #tpu.memory_space<vmem>>, vector<18x18x32xf32>
    tpu.vector_store %arg13[%c0_34, %c0_35, %c0_36], %44 {strides = array<i32>} : memref<18x18x32xf32, #tpu.memory_space<vmem>>, vector<18x18x32xf32>,
    %c1_37 = arith.constant 1 : index
    %c1_38 = arith.constant 1 : index
    %c0_39 = arith.constant 0 : index
    %46 = vector.load %arg13[%c1_37, %c1_38, %c0_39] : memref<18x18x32xf32, #tpu.memory_space<vmem>>, vector<16x16x32xf32>
    tpu.vector_store %arg13[%c1_37, %c1_38, %c0_39], %43 {strides = array<i32>} : memref<18x18x32xf32, #tpu.memory_space<vmem>>, vector<16x16x32xf32>,
    %c0_40 = arith.constant 0 : index
    %c0_41 = arith.constant 0 : index
    %c0_42 = arith.constant 0 : index
    %47 = vector.load %arg13[%c0_40, %c0_41, %c0_42] : memref<18x18x32xf32, #tpu.memory_space<vmem>>, vector<18x18x32xf32>
    %48 = vector.extract_strided_slice %47 {offsets = [0, 0, 0], sizes = [16, 18, 32], strides = [1, 1, 1]} : vector<18x18x32xf32> to vector<16x18x32xf32>
    %49 = vector.extract_strided_slice %47 {offsets = [1, 0, 0], sizes = [16, 18, 32], strides = [1, 1, 1]} : vector<18x18x32xf32> to vector<16x18x32xf32>
    %50 = vector.extract_strided_slice %47 {offsets = [2, 0, 0], sizes = [16, 18, 32], strides = [1, 1, 1]} : vector<18x18x32xf32> to vector<16x18x32xf32>
    %51 = tpu.concatenate %48, %49, %50 in 2 : vector<16x18x32xf32>, vector<16x18x32xf32>, vector<16x18x32xf32> -> vector<16x18x96xf32>
    %52 = vector.extract_strided_slice %51 {offsets = [0, 0, 0], sizes = [16, 16, 96], strides = [1, 1, 1]} : vector<16x18x96xf32> to vector<16x16x96xf32>
    %53 = vector.extract_strided_slice %51 {offsets = [0, 1, 0], sizes = [16, 16, 96], strides = [1, 1, 1]} : vector<16x18x96xf32> to vector<16x16x96xf32>
    %54 = vector.extract_strided_slice %51 {offsets = [0, 2, 0], sizes = [16, 16, 96], strides = [1, 1, 1]} : vector<16x18x96xf32> to vector<16x16x96xf32>
    %55 = tpu.concatenate %52, %53, %54 in 2 : vector<16x16x96xf32>, vector<16x16x96xf32>, vector<16x16x96xf32> -> vector<16x16x288xf32>
    %56 = vector.shape_cast %55 : vector<16x16x288xf32> to vector<256x288xf32>
    %c0_43 = arith.constant 0 : index
    %c0_44 = arith.constant 0 : index
    %57 = vector.load %arg6[%c0_43, %c0_44] : memref<288x16xf32, #tpu.memory_space<vmem>>, vector<288x16xf32>
    %cst_45 = arith.constant dense<0.000000e+00> : vector<256x16xf32>
    %58 = tpu.matmul %56, %57, %cst_45 {dimension_numbers = #tpu.dot_dimension_numbers<[1], [0], [0], [1], [0, 0, 1, 1], [], []>} : vector<256x288xf32>, vector<288x16xf32>, vector<256x16xf32> -> vector<256x16xf32>
    %c0_46 = arith.constant 0 : index
    %c0_47 = arith.constant 0 : index
    %59 = vector.load %arg7[%c0_46, %c0_47] : memref<1x16xf32, #tpu.memory_space<vmem>>, vector<1x16xf32>
    %60 = vector.broadcast %59 : vector<1x16xf32> to vector<256x16xf32>
    %61 = arith.addf %58, %60 : vector<256x16xf32>
    %cst_48 = arith.constant 0.000000e+00 : f32
    %62 = vector.broadcast %cst_48 : f32 to vector<256x16xf32>
    %63 = arith.maximumf %61, %62 : vector<256x16xf32>
    %64 = vector.shape_cast %63 : vector<256x16xf32> to vector<16x16x16xf32>
    %cst_49 = arith.constant 0.000000e+00 : f32
    %65 = vector.broadcast %cst_49 : f32 to vector<18x18x16xf32>
    %c0_50 = arith.constant 0 : index
    %c0_51 = arith.constant 0 : index
    %c0_52 = arith.constant 0 : index
    %66 = vector.load %arg14[%c0_50, %c0_51, %c0_52] : memref<18x18x16xf32, #tpu.memory_space<vmem>>, vector<18x18x16xf32>
    tpu.vector_store %arg14[%c0_50, %c0_51, %c0_52], %65 {strides = array<i32>} : memref<18x18x16xf32, #tpu.memory_space<vmem>>, vector<18x18x16xf32>,
    %c1_53 = arith.constant 1 : index
    %c1_54 = arith.constant 1 : index
    %c0_55 = arith.constant 0 : index
    %67 = vector.load %arg14[%c1_53, %c1_54, %c0_55] : memref<18x18x16xf32, #tpu.memory_space<vmem>>, vector<16x16x16xf32>
    tpu.vector_store %arg14[%c1_53, %c1_54, %c0_55], %64 {strides = array<i32>} : memref<18x18x16xf32, #tpu.memory_space<vmem>>, vector<16x16x16xf32>,
    %c0_56 = arith.constant 0 : index
    %c0_57 = arith.constant 0 : index
    %c0_58 = arith.constant 0 : index
    %68 = vector.load %arg14[%c0_56, %c0_57, %c0_58] : memref<18x18x16xf32, #tpu.memory_space<vmem>>, vector<18x18x16xf32>
    %69 = vector.extract_strided_slice %68 {offsets = [0, 0, 0], sizes = [16, 18, 16], strides = [1, 1, 1]} : vector<18x18x16xf32> to vector<16x18x16xf32>
    %70 = vector.extract_strided_slice %68 {offsets = [1, 0, 0], sizes = [16, 18, 16], strides = [1, 1, 1]} : vector<18x18x16xf32> to vector<16x18x16xf32>
    %71 = vector.extract_strided_slice %68 {offsets = [2, 0, 0], sizes = [16, 18, 16], strides = [1, 1, 1]} : vector<18x18x16xf32> to vector<16x18x16xf32>
    %72 = tpu.concatenate %69, %70, %71 in 2 : vector<16x18x16xf32>, vector<16x18x16xf32>, vector<16x18x16xf32> -> vector<16x18x48xf32>
    %73 = vector.extract_strided_slice %72 {offsets = [0, 0, 0], sizes = [16, 16, 48], strides = [1, 1, 1]} : vector<16x18x48xf32> to vector<16x16x48xf32>
    %74 = vector.extract_strided_slice %72 {offsets = [0, 1, 0], sizes = [16, 16, 48], strides = [1, 1, 1]} : vector<16x18x48xf32> to vector<16x16x48xf32>
    %75 = vector.extract_strided_slice %72 {offsets = [0, 2, 0], sizes = [16, 16, 48], strides = [1, 1, 1]} : vector<16x18x48xf32> to vector<16x16x48xf32>
    %76 = tpu.concatenate %73, %74, %75 in 2 : vector<16x16x48xf32>, vector<16x16x48xf32>, vector<16x16x48xf32> -> vector<16x16x144xf32>
    %77 = vector.shape_cast %76 : vector<16x16x144xf32> to vector<256x144xf32>
    %c0_59 = arith.constant 0 : index
    %c0_60 = arith.constant 0 : index
    %78 = vector.load %arg8[%c0_59, %c0_60] : memref<144x1xf32, #tpu.memory_space<vmem>>, vector<144x1xf32>
    %cst_61 = arith.constant dense<0.000000e+00> : vector<256x1xf32>
    %79 = tpu.matmul %77, %78, %cst_61 {dimension_numbers = #tpu.dot_dimension_numbers<[1], [0], [0], [1], [0, 0, 1, 1], [], []>} : vector<256x144xf32>, vector<144x1xf32>, vector<256x1xf32> -> vector<256x1xf32>
    %c0_62 = arith.constant 0 : index
    %c0_63 = arith.constant 0 : index
    %80 = vector.load %arg9[%c0_62, %c0_63] : memref<1x1xf32, #tpu.memory_space<vmem>>, vector<1x1xf32>
    %81 = vector.broadcast %80 : vector<1x1xf32> to vector<256x1xf32>
    %82 = arith.addf %79, %81 : vector<256x1xf32>
    %cst_64 = arith.constant 0.000000e+00 : f32
    %83 = vector.broadcast %cst_64 : f32 to vector<256x1xf32>
    %84 = arith.maximumf %82, %83 : vector<256x1xf32>
    %c0_65 = arith.constant 0 : index
    %c0_66 = arith.constant 0 : index
    %c0_67 = arith.constant 0 : index
    %85 = vector.load %arg10[%c0_65, %c0_66, %c0_67] : memref<1x256x1xf32, #tpu.memory_space<vmem>>, vector<1x256x1xf32>
    %86 = vector.shape_cast %85 : vector<1x256x1xf32> to vector<256x1xf32>
    %87 = vector.shape_cast %84 : vector<256x1xf32> to vector<1x256x1xf32>
    tpu.vector_store %arg10[%c0_65, %c0_66, %c0_67], %87 {strides = array<i32>} : memref<1x256x1xf32, #tpu.memory_space<vmem>>, vector<1x256x1xf32>,
    return
  }
  func.func @transform_0(%arg0: i32) -> (i32, i32, i32, i32) {
    %c0_i32 = arith.constant 0 : i32
    %c0_i32_0 = arith.constant 0 : i32
    %c0_i32_1 = arith.constant 0 : i32
    %c0_i32_2 = arith.constant 0 : i32
    return %arg0, %c0_i32, %c0_i32_0, %c0_i32_1 : i32, i32, i32, i32
  }
  func.func @transform_1(%arg0: i32) -> (i32, i32) {
    %c0_i32 = arith.constant 0 : i32
    %c0_i32_0 = arith.constant 0 : i32
    %c0_i32_1 = arith.constant 0 : i32
    return %c0_i32, %c0_i32_0 : i32, i32
  }
  func.func @transform_2(%arg0: i32) -> (i32, i32) {
    %c0_i32 = arith.constant 0 : i32
    %c0_i32_0 = arith.constant 0 : i32
    %c0_i32_1 = arith.constant 0 : i32
    return %c0_i32, %c0_i32_0 : i32, i32
  }
  func.func @transform_3(%arg0: i32) -> (i32, i32) {
    %c0_i32 = arith.constant 0 : i32
    %c0_i32_0 = arith.constant 0 : i32
    %c0_i32_1 = arith.constant 0 : i32
    return %c0_i32, %c0_i32_0 : i32, i32
  }
  func.func @transform_4(%arg0: i32) -> (i32, i32) {
    %c0_i32 = arith.constant 0 : i32
    %c0_i32_0 = arith.constant 0 : i32
    %c0_i32_1 = arith.constant 0 : i32
    return %c0_i32, %c0_i32_0 : i32, i32
  }
  func.func @transform_5(%arg0: i32) -> (i32, i32) {
    %c0_i32 = arith.constant 0 : i32
    %c0_i32_0 = arith.constant 0 : i32
    %c0_i32_1 = arith.constant 0 : i32
    return %c0_i32, %c0_i32_0 : i32, i32
  }
  func.func @transform_6(%arg0: i32) -> (i32, i32) {
    %c0_i32 = arith.constant 0 : i32
    %c0_i32_0 = arith.constant 0 : i32
    %c0_i32_1 = arith.constant 0 : i32
    return %c0_i32, %c0_i32_0 : i32, i32
  }
  func.func @transform_7(%arg0: i32) -> (i32, i32) {
    %c0_i32 = arith.constant 0 : i32
    %c0_i32_0 = arith.constant 0 : i32
    %c0_i32_1 = arith.constant 0 : i32
    return %c0_i32, %c0_i32_0 : i32, i32
  }
  func.func @transform_8(%arg0: i32) -> (i32, i32) {
    %c0_i32 = arith.constant 0 : i32
    %c0_i32_0 = arith.constant 0 : i32
    %c0_i32_1 = arith.constant 0 : i32
    return %c0_i32, %c0_i32_0 : i32, i32
  }
  func.func @transform_9(%arg0: i32) -> (i32, i32, i32) {
    %c0_i32 = arith.constant 0 : i32
    %c0_i32_0 = arith.constant 0 : i32
    %c0_i32_1 = arith.constant 0 : i32
    return %arg0, %c0_i32, %c0_i32_0 : i32, i32, i32
  }
}

</mosaic_0001>

<bundles_post_ra>
// kernel: noisenet_forward_pallas.1
= control target key start
LH: loop header
LB: loop body
LE: loop exit
PB: predicated region body
PF: predicated region fallthrough
CT: control target
= control target key end

     0   :  { %s6998_s11 = smov 0   ;;  %s11904_s0 = inlined_call_operand.vmem [shape: f32[2,16,16,4], index: 0, kind: input, shape index: {}]   ;;  %s11905_s1 = inlined_call_operand.vmem [shape: f32[36,16], index: 1, kind: input, shape index: {}]   ;;  %s11906_s2 = inlined_call_operand.vmem [shape: f32[1,16], index: 2, kind: input, shape index: {}]   ;;  %s11907_s3 = inlined_call_operand.vmem [shape: f32[144,32], index: 3, kind: input, shape index: {}]   ;;  %s11908_s4 = inlined_call_operand.vmem [shape: f32[1,32], index: 4, kind: input, shape index: {}]   ;;  %s11909_s5 = inlined_call_operand.vmem [shape: f32[288,16], index: 5, kind: input, shape index: {}]   ;;  %s11910_s6 = inlined_call_operand.vmem [shape: f32[1,16], index: 6, kind: input, shape index: {}]   ;;  %s11911_s7 = inlined_call_operand.vmem [shape: f32[144,1], index: 7, kind: input, shape index: {}]   ;;  %s11912_s8 = inlined_call_operand.<no memory space> [shape: f32[1,1], index: 8, kind: input, shape index: {}]   ;;  %s11913_s9 = inlined_call_operand.vmem [shape: f32[2,256,1], index: 9, kind: output, shape index: {}]  }
   0x1   :  { %v14_v0 = vstv %s11912_s8 }
   0x2   :  { %15 = vst [vmem:[#allocation6] sm:$0x1] %v14_v0 }
   0x3 LB: > { %s6280_s12 = sadd.s32 4294967295, %s6932_s11   ;;  %p6284_p0 = scmp.ge.s32.totalorder %s6932_s11, 1  ;;  %s6932_s11 = sphi %s6998_s11, %s21_s11  }
   0x4   : > { %p289_p1 = scmp.lt.s32.totalorder %s6932_s11, 3 }
   0x6   : > { %p290_p2 = pnand %p6284_p0, %p289_p1 }
   0x8   : > { %293 = sbr.rel (%p290_p2) target bundleno = 2499 (0x9c3), region = 56 }
   0xf   : > { %p7008_p3 = scmp.lt.s32.totalorder %s6280_s12, 1  ;;  %vm367_vm0 = vcmask 31744   ;;  %vm370_vm1 = vcmask 25600   ;;  %v11914_v1 = vmov 0.0   ;;  %s6935_s17 = smov 4   ;;  %v1414_v0 = vld [vmem:[%s11905_s1] sm:$0xff] }
  0x10   : > { %373 = vst.msk [vmem:[#allocation2 + $0x20] sm:$0xff] %vm367_vm0, %v11914_v1  ;;  %368 = vst.msk [vmem:[#allocation2] sm:$0xff] %vm367_vm0, %v11914_v1  ;;  %s6936_s18 = smov 8   ;;  %vm1523_vm2 = vcmask 1043456   ;;  %vm897_vm3 = vcmask 64512   ;;  %vm994_vm4 = vcmask 1046528  }
  0x11   : > { %374 = vst.msk [vmem:[#allocation2 + $0x28] sm:$0x3] %vm370_vm1, %v11914_v1  ;;  %371 = vst.msk [vmem:[#allocation2 + $0x10] sm:$0x3] %vm370_vm1, %v11914_v1  ;;  %s12159_s12 = smov (!%p7008_p3, %s6280_s12), 1  ;;  %s6937_s29 = smov 12  }
  0x12   : > { %369 = vst.msk [vmem:[#allocation2 + $0x8] sm:$0xff] %vm367_vm0, %v11914_v1  ;;  %372 = vst.msk [vmem:[#allocation2 + $0x18] sm:$0xff] %vm367_vm0, %v11914_v1  ;;  %s6424_s13 = sshll.u32 %s12159_s12, 8  ;;  %vm1171_vm5 = vcmask 1045504   ;;  %s6938_s30 = smov 24   ;;  %vm1348_vm6 = vcmask 97280  }
  0x13   : > { %375 = vst.msk [vmem:[#allocation2 + $0x30] sm:$0xff] %vm367_vm0, %v11914_v1  ;;  %376 = vst.msk [vmem:[#allocation2 + $0x38] sm:$0xff] %vm367_vm0, %v11914_v1  ;;  %s7132_s16 = scalar_lea.vmem %s11904_s0, %s6424_s13  ;;  %vm1381_vm7 = vcmask 195584   ;;  %vm1426_vm8 = vcmask 293888   ;;  %vm1784_vm9 = vcmask 130048   ;;  %vm1787_vm10 = vcmask 123904  }
  0x14   : > { %377 = vst.msk [vmem:[#allocation2 + $0x40] sm:$0x3] %vm370_vm1, %v11914_v1  ;;  %380 = vst.msk [vmem:[#allocation2 + $0x58] sm:$0x3] %vm370_vm1, %v11914_v1  ;;  %v336_v2 = vld [vmem:[%s7132_s16 + $0x8] sm:$0xff]  ;;  %v335_v3 = vld [vmem:[%s7132_s16] sm:$0xff] }
  0x15   : > { %378 = vst.msk [vmem:[#allocation2 + $0x48] sm:$0xff] %vm367_vm0, %v11914_v1  ;;  %379 = vst.msk [vmem:[#allocation2 + $0x50] sm:$0xff] %vm367_vm0, %v11914_v1  ;;  %v337_v4 = vld [vmem:[%s7132_s16 + $0x10] sm:$0xff]  ;;  %v338_v5 = vld [vmem:[%s7132_s16 + $0x18] sm:$0xff]  ;;  %vm2314_vm11 = vcmask 261120   ;;  %s6939_s14 = smov 16  }
  0x16   : > { %381 = vst.msk [vmem:[#allocation2 + $0x60] sm:$0xff] %vm367_vm0, %v11914_v1  ;;  %382 = vst.msk [vmem:[#allocation2 + $0x68] sm:$0xff] %vm367_vm0, %v11914_v1  ;;  %v339_v6 = vld [vmem:[%s7132_s16 + $0x20] sm:$0xff]  ;;  %v340_v7 = vld [vmem:[%s7132_s16 + $0x28] sm:$0xff]  ;;  %s6940_s15 = smov 32   ;;  %s6943_s19 = smov 48  }
  0x17   : > { %383 = vst.msk [vmem:[#allocation2 + $0x70] sm:$0x3] %vm370_vm1, %v11914_v1  ;;  %386 = vst.msk [vmem:[#allocation2 + $0x88] sm:$0x3] %vm370_vm1, %v11914_v1  ;;  %v341_v8 = vld [vmem:[%s7132_s16 + $0x30] sm:$0xff]  ;;  %v342_v9 = vld [vmem:[%s7132_s16 + $0x38] sm:$0xff] }
  0x18   : > { %384 = vst.msk [vmem:[#allocation2 + $0x78] sm:$0xff] %vm367_vm0, %v11914_v1  ;;  %385 = vst.msk [vmem:[#allocation2 + $0x80] sm:$0xff] %vm367_vm0, %v11914_v1  ;;  %v343_v10 = vld [vmem:[%s7132_s16 + $0x40] sm:$0xff]  ;;  %v344_v11 = vld [vmem:[%s7132_s16 + $0x48] sm:$0xff]  ;;  %vm2796_vm12 = vcmask 785408   ;;  %vm2763_vm13 = vcmask 392192  }
  0x19   : > { %387 = vst.msk [vmem:[#allocation2 + $0x90] sm:$0xff] %vm367_vm0, %v11914_v1  ;;  %388 = vst.msk [vmem:[#allocation2 + $0x98] sm:$0xff] %vm367_vm0, %v11914_v1  ;;  %v345_v12 = vld [vmem:[%s7132_s16 + $0x50] sm:$0xff]  ;;  %v346_v13 = vld [vmem:[%s7132_s16 + $0x58] sm:$0xff]  ;;  %vm3177_vm14 = vcmask 254976   ;;  %s6944_s20 = smov 64  }
  0x1a   : > { %389 = vst.msk [vmem:[#allocation2 + $0xa0] sm:$0x3] %vm370_vm1, %v11914_v1  ;;  %392 = vst.msk [vmem:[#allocation2 + $0xb8] sm:$0x3] %vm370_vm1, %v11914_v1  ;;  %v347_v14 = vld [vmem:[%s7132_s16 + $0x60] sm:$0xff]  ;;  %v348_v15 = vld [vmem:[%s7132_s16 + $0x68] sm:$0xff] }
  0x1b   : > { %390 = vst.msk [vmem:[#allocation2 + $0xa8] sm:$0xff] %vm367_vm0, %v11914_v1  ;;  %391 = vst.msk [vmem:[#allocation2 + $0xb0] sm:$0xff] %vm367_vm0, %v11914_v1  ;;  %v349_v16 = vld [vmem:[%s7132_s16 + $0x70] sm:$0xff]  ;;  %v350_v17 = vld [vmem:[%s7132_s16 + $0x78] sm:$0xff]  ;;  %vm3704_vm15 = vcmask 523264  }
  0x1c   : > { %393 = vst.msk [vmem:[#allocation2 + $0xc0] sm:$0xff] %vm367_vm0, %v11914_v1  ;;  %394 = vst.msk [vmem:[#allocation2 + $0xc8] sm:$0xff] %vm367_vm0, %v11914_v1  ;;  %v351_v18 = vld [vmem:[%s7132_s16 + $0x80] sm:$0xff]  ;;  %v352_v19 = vld [vmem:[%s7132_s16 + $0x88] sm:$0xff] }
  0x1d   : > { %395 = vst.msk [vmem:[#allocation2 + $0xd0] sm:$0x3] %vm370_vm1, %v11914_v1  ;;  %398 = vst.msk [vmem:[#allocation2 + $0xe8] sm:$0x3] %vm370_vm1, %v11914_v1  ;;  %v353_v20 = vld [vmem:[%s7132_s16 + $0x90] sm:$0xff]  ;;  %v354_v21 = vld [vmem:[%s7132_s16 + $0x98] sm:$0xff] }
  0x1e   : > { %396 = vst.msk [vmem:[#allocation2 + $0xd8] sm:$0xff] %vm367_vm0, %v11914_v1  ;;  %397 = vst.msk [vmem:[#allocation2 + $0xe0] sm:$0xff] %vm367_vm0, %v11914_v1  ;;  %v355_v22 = vld [vmem:[%s7132_s16 + $0xa0] sm:$0xff]  ;;  %v356_v29 = vld [vmem:[%s7132_s16 + $0xa8] sm:$0xff] }
  0x1f   : > { %399 = vst.msk [vmem:[#allocation2 + $0xf0] sm:$0xff] %vm367_vm0, %v11914_v1  ;;  %400 = vst.msk [vmem:[#allocation2 + $0xf8] sm:$0xff] %vm367_vm0, %v11914_v1  ;;  %v357_v33 = vld [vmem:[%s7132_s16 + $0xb0] sm:$0xff]  ;;  %v358_v34 = vld [vmem:[%s7132_s16 + $0xb8] sm:$0xff] }
  0x20   : > { %401 = vst.msk [vmem:[#allocation2 + $0x100] sm:$0x3] %vm370_vm1, %v11914_v1  ;;  %404 = vst.msk [vmem:[#allocation2 + $0x118] sm:$0x3] %vm370_vm1, %v11914_v1  ;;  %v359_v41 = vld [vmem:[%s7132_s16 + $0xc0] sm:$0xff]  ;;  %v360_v42 = vld [vmem:[%s7132_s16 + $0xc8] sm:$0xff] }
  0x21   : > { %402 = vst.msk [vmem:[#allocation2 + $0x108] sm:$0xff] %vm367_vm0, %v11914_v1  ;;  %403 = vst.msk [vmem:[#allocation2 + $0x110] sm:$0xff] %vm367_vm0, %v11914_v1  ;;  %v361_v47 = vld [vmem:[%s7132_s16 + $0xd0] sm:$0xff]  ;;  %v362_v48 = vld [vmem:[%s7132_s16 + $0xd8] sm:$0xff] }
  0x22   : > { %405 = vst.msk [vmem:[#allocation2 + $0x120] sm:$0xff] %vm367_vm0, %v11914_v1  ;;  %406 = vst.msk [vmem:[#allocation2 + $0x128] sm:$0xff] %vm367_vm0, %v11914_v1  ;;  %v363_v54 = vld [vmem:[%s7132_s16 + $0xe0] sm:$0xff]  ;;  %v364_v55 = vld [vmem:[%s7132_s16 + $0xe8] sm:$0xff] }
  0x23   : > { %407 = vst.msk [vmem:[#allocation2 + $0x130] sm:$0x3] %vm370_vm1, %v11914_v1  ;;  %410 = vst.msk [vmem:[#allocation2 + $0x148] sm:$0x3] %vm370_vm1, %v11914_v1  ;;  %v365_v62 = vld [vmem:[%s7132_s16 + $0xf0] sm:$0xff]  ;;  %v366_v63 = vld [vmem:[%s7132_s16 + $0xf8] sm:$0xff] }
  0x24   : > { %408 = vst.msk [vmem:[#allocation2 + $0x138] sm:$0xff] %vm367_vm0, %v11914_v1  ;;  %409 = vst.msk [vmem:[#allocation2 + $0x140] sm:$0xff] %vm367_vm0, %v11914_v1 }
  0x25   : > { %411 = vst.msk [vmem:[#allocation2 + $0x150] sm:$0xff] %vm367_vm0, %v11914_v1  ;;  %412 = vst.msk [vmem:[#allocation2 + $0x158] sm:$0xff] %vm367_vm0, %v11914_v1 }
  0x26   : > { %413 = vst.msk [vmem:[#allocation2 + $0x160] sm:$0x3] %vm370_vm1, %v11914_v1  ;;  %416 = vst.msk [vmem:[#allocation2 + $0x178] sm:$0x3] %vm370_vm1, %v11914_v1 }
  0x27   : > { %414 = vst.msk [vmem:[#allocation2 + $0x168] sm:$0xff] %vm367_vm0, %v11914_v1  ;;  %415 = vst.msk [vmem:[#allocation2 + $0x170] sm:$0xff] %vm367_vm0, %v11914_v1 }
  0x28   : > { %417 = vst.msk [vmem:[#allocation2 + $0x180] sm:$0xff] %vm367_vm0, %v11914_v1  ;;  %418 = vst.msk [vmem:[#allocation2 + $0x188] sm:$0xff] %vm367_vm0, %v11914_v1 }
  0x29   : > { %419 = vst.msk [vmem:[#allocation2 + $0x190] sm:$0x3] %vm370_vm1, %v11914_v1  ;;  %422 = vst.msk [vmem:[#allocation2 + $0x1a8] sm:$0x3] %vm370_vm1, %v11914_v1 }
  0x2a   : > { %420 = vst.msk [vmem:[#allocation2 + $0x198] sm:$0xff] %vm367_vm0, %v11914_v1  ;;  %421 = vst.msk [vmem:[#allocation2 + $0x1a0] sm:$0xff] %vm367_vm0, %v11914_v1 }
  0x2b   : > { %425 = vst.msk [vmem:[#allocation2 + $0x21] sm:$0xff] %vm367_vm0, %v336_v2  ;;  %424 = vst.msk [vmem:[#allocation2 + $0x19] sm:$0xff] %vm367_vm0, %v335_v3  ;;  %v1415_v2 = vld [vmem:[%s11905_s1 + $0x8] sm:$0xff] }
  0x2c   : > { %426 = vst.msk [vmem:[#allocation2 + $0x31] sm:$0xff] %vm367_vm0, %v337_v4  ;;  %427 = vst.msk [vmem:[#allocation2 + $0x39] sm:$0xff] %vm367_vm0, %v338_v5  ;;  %v6613_v3 = vpack.c.bf16 %v1415_v2, %v1414_v0  ;;  %v1416_v5 = vld [vmem:[%s11905_s1 + $0x10] sm:$0xff] }
  0x2d   : > { %428 = vst.msk [vmem:[#allocation2 + $0x49] sm:$0xff] %vm367_vm0, %v339_v6  ;;  %429 = vst.msk [vmem:[#allocation2 + $0x51] sm:$0xff] %vm367_vm0, %v340_v7  ;;  %v1417_v6 = vld [vmem:[%s11905_s1 + $0x18] sm:$0xff] }
  0x2e   : > { %430 = vst.msk [vmem:[#allocation2 + $0x61] sm:$0xff] %vm367_vm0, %v341_v8  ;;  %431 = vst.msk [vmem:[#allocation2 + $0x69] sm:$0xff] %vm367_vm0, %v342_v9  ;;  %6614 = vmatprep.subr.bf16.mxu0 %v6613_v3  ;;  %v6617_v7 = vpack.c.bf16 %v1417_v6, %v1416_v5 }
  0x2f   : > { %432 = vst.msk [vmem:[#allocation2 + $0x79] sm:$0xff] %vm367_vm0, %v343_v10  ;;  %433 = vst.msk [vmem:[#allocation2 + $0x81] sm:$0xff] %vm367_vm0, %v344_v11  ;;  %6616 = vmatpush3.bf16.msra.mxu0 %v6613_v3  ;;  %v456_v11 = vld [vmem:[#allocation2] sm:$0xff] }
  0x30   : > { %434 = vst.msk [vmem:[#allocation2 + $0x91] sm:$0xff] %vm367_vm0, %v345_v12  ;;  %435 = vst.msk [vmem:[#allocation2 + $0x99] sm:$0xff] %vm367_vm0, %v346_v13  ;;  %6618 = vmatprep.subr.bf16.mxu0 %v6617_v7  ;;  %v1418_v13 = vld [vmem:[%s11905_s1 + $0x20] sm:$0xf] }
  0x31   : > { %436 = vst.msk [vmem:[#allocation2 + $0xa9] sm:$0xff] %vm367_vm0, %v347_v14  ;;  %437 = vst.msk [vmem:[#allocation2 + $0xb1] sm:$0xff] %vm367_vm0, %v348_v15 }
  0x32   : > { %438 = vst.msk [vmem:[#allocation2 + $0xc1] sm:$0xff] %vm367_vm0, %v349_v16  ;;  %439 = vst.msk [vmem:[#allocation2 + $0xc9] sm:$0xff] %vm367_vm0, %v350_v17  ;;  %v7175_v23 = vld [vmem:[#allocation2 + $0x28] sm:$0x3]  ;;  %v7177_v24 = vld [vmem:[#allocation2 + $0x18] sm:$0xff] }
  0x33   : > { %440 = vst.msk [vmem:[#allocation2 + $0xd9] sm:$0xff] %vm367_vm0, %v351_v18  ;;  %441 = vst.msk [vmem:[#allocation2 + $0xe1] sm:$0xff] %vm367_vm0, %v352_v19  ;;  %562 = vrot.lane.b32.xlu1 %v7175_v23, %s6935_s17  ;;  %558 = vrot.lane.b32.xlu0 %v7177_v24, %s6935_s17  ;;  %v7184_v25 = vld [vmem:[#allocation2 + $0x30] sm:$0xff]  ;;  %v7186_v26 = vld [vmem:[#allocation2 + $0x20] sm:$0xff] }
  0x34   : > { %442 = vst.msk [vmem:[#allocation2 + $0xf1] sm:$0xff] %vm367_vm0, %v353_v20  ;;  %443 = vst.msk [vmem:[#allocation2 + $0xf9] sm:$0xff] %vm367_vm0, %v354_v21  ;;  %v7192_v27 = vld [vmem:[#allocation2 + $0x40] sm:$0x3]  ;;  %v7194_v28 = vld [vmem:[#allocation2 + $0x38] sm:$0xff]  ;;  %6620 = vmatpush3.bf16.msra.mxu0 %v6617_v7 }
  0x35   : > { %444 = vst.msk [vmem:[#allocation2 + $0x109] sm:$0xff] %vm367_vm0, %v355_v22  ;;  %445 = vst.msk [vmem:[#allocation2 + $0x111] sm:$0xff] %vm367_vm0, %v356_v29  ;;  %v7206_v30 = vld [vmem:[#allocation2 + $0x48] sm:$0xff]  ;;  %v7212_v31 = vld [vmem:[#allocation2 + $0x58] sm:$0x3]  ;;  %6507 = vmatprep.subr.msk.mxu0 %vm1523_vm2, %v1418_v13 }
  0x36   : > { %v7214_v32 = vld [vmem:[#allocation2 + $0x50] sm:$0xff]  ;;  %446 = vst.msk [vmem:[#allocation2 + $0x121] sm:$0xff] %vm367_vm0, %v357_v33  ;;  %447 = vst.msk [vmem:[#allocation2 + $0x129] sm:$0xff] %vm367_vm0, %v358_v34  ;;  %v7228_v35 = vld [vmem:[#allocation2 + $0x60] sm:$0xff] }
  0x37   : > { %705 = vrot.lane.b32.xlu1 %v7184_v25, %s6936_s18  ;;  %560 = vrot.lane.b32.xlu0 %v7186_v26, %s6935_s17  ;;  %v7234_v36 = vld [vmem:[#allocation2 + $0x70] sm:$0x3]  ;;  %v7236_v37 = vld [vmem:[#allocation2 + $0x68] sm:$0xff]  ;;  %v7246_v38 = vld [vmem:[#allocation2 + $0x78] sm:$0xff]  ;;  %448 = vst.msk [vmem:[#allocation2 + $0x139] sm:$0xff] %vm367_vm0, %v359_v41 }
  0x38   : > { %v7252_v39 = vld [vmem:[#allocation2 + $0x80] sm:$0xff]  ;;  %v7254_v40 = vld [vmem:[#allocation2 + $0x88] sm:$0x3]  ;;  %449 = vst.msk [vmem:[#allocation2 + $0x141] sm:$0xff] %vm367_vm0, %v360_v42  ;;  %v7268_v43 = vld [vmem:[#allocation2 + $0x90] sm:$0xff]  ;;  %6508 = vmatpush3.msk.msra.mxu0 %vm1523_vm2, %v1418_v13 }
  0x39   : > { %v7274_v44 = vld [vmem:[#allocation2 + $0xa0] sm:$0x3]  ;;  %v7276_v45 = vld [vmem:[#allocation2 + $0x98] sm:$0xff]  ;;  %v7286_v46 = vld [vmem:[#allocation2 + $0xa8] sm:$0xff]  ;;  %450 = vst.msk [vmem:[#allocation2 + $0x151] sm:$0xff] %vm367_vm0, %v361_v47 }
  0x3a   : > { %451 = vst.msk [vmem:[#allocation2 + $0x159] sm:$0xff] %vm367_vm0, %v362_v48  ;;  %v7296_v49 = vld [vmem:[#allocation2 + $0xb8] sm:$0x3]  ;;  %v7298_v50 = vld [vmem:[#allocation2 + $0xb0] sm:$0xff]  ;;  %v7308_v51 = vld [vmem:[#allocation2 + $0xc0] sm:$0xff] }
  0x3b   : > { %709 = vrot.lane.b32.xlu1 %v7192_v27, %s6936_s18  ;;  %707 = vrot.lane.b32.xlu0 %v7194_v28, %s6936_s18  ;;  %v7314_v52 = vld [vmem:[#allocation2 + $0xd0] sm:$0x3]  ;;  %v7316_v53 = vld [vmem:[#allocation2 + $0xc8] sm:$0xff]  ;;  %452 = vst.msk [vmem:[#allocation2 + $0x169] sm:$0xff] %vm367_vm0, %v363_v54  ;;  %453 = vst.msk [vmem:[#allocation2 + $0x171] sm:$0xff] %vm367_vm0, %v364_v55 }
  0x3c   : > { %v7330_v56 = vld [vmem:[#allocation2 + $0xd8] sm:$0xff]  ;;  %v7336_v57 = vld [vmem:[#allocation2 + $0xe8] sm:$0x3]  ;;  %v7338_v58 = vld [vmem:[#allocation2 + $0xe0] sm:$0xff]  ;;  %454 = vst.msk [vmem:[#allocation2 + $0x181] sm:$0xff] %vm367_vm0, %v365_v62 }
  0x3d   : > { %v7348_v59 = vld [vmem:[#allocation2 + $0xf0] sm:$0xff]  ;;  %v7354_v60 = vld [vmem:[#allocation2 + $0x100] sm:$0x3]  ;;  %v7356_v61 = vld [vmem:[#allocation2 + $0xf8] sm:$0xff]  ;;  %455 = vst.msk [vmem:[#allocation2 + $0x189] sm:$0xff] %vm367_vm0, %v366_v63 }
  0x3e   : > { %v7376_v4 = vld [vmem:[#allocation2 + $0x108] sm:$0xff]  ;;  %v7388_v8 = vld [vmem:[#allocation2 + $0x110] sm:$0xff]  ;;  %v7392_v12 = vld [vmem:[#allocation2 + $0x118] sm:$0x3] }
  0x3f   : > { %566 = vrot.lane.b32.xlu1 %v7194_v28, %s6935_s17  ;;  %564 = vrot.lane.b32.xlu0 %v7184_v25, %s6935_s17  ;;  %v458_v16 = vld [vmem:[#allocation2 + $0x10] sm:$0x3]  ;;  %v457_v17 = vld [vmem:[#allocation2 + $0x8] sm:$0xff] }
  0x42   : > { %v7634_v1 = vld [vmem:[#allocation2 + $0x178] sm:$0x3] }
  0x43   : > { %711 = vrot.lane.b32.xlu1 %v7206_v30, %s6936_s18  ;;  %568 = vrot.lane.b32.xlu0 %v7192_v27, %s6935_s17  ;;  %11988 = vst [vmem:[#allocation11_spill] sm:$0xff] %v7634_v1 }
  0x47   : > { %715 = vrot.lane.b32.xlu1 %v7212_v31, %s6936_s18  ;;  %713 = vrot.lane.b32.xlu0 %v7214_v32, %s6936_s18 }
  0x4b   : > { %572 = vrot.lane.b32.xlu1 %v7214_v32, %s6935_s17  ;;  %570 = vrot.lane.b32.xlu0 %v7206_v30, %s6935_s17 }
  0x4f   : > { %717 = vrot.lane.b32.xlu1 %v7228_v35, %s6936_s18  ;;  %574 = vrot.lane.b32.xlu0 %v7212_v31, %s6935_s17 }
  0x53   : > { %721 = vrot.lane.b32.xlu1 %v7234_v36, %s6936_s18  ;;  %719 = vrot.lane.b32.xlu0 %v7236_v37, %s6936_s18 }
  0x57   : > { %576 = vrot.lane.b32.xlu0 %v7228_v35, %s6935_s17  ;;  %578 = vrot.lane.b32.xlu1 %v7236_v37, %s6935_s17 }
  0x5b   : > { %580 = vrot.lane.b32.xlu0 %v7234_v36, %s6935_s17  ;;  %723 = vrot.lane.b32.xlu1 %v7246_v38, %s6936_s18 }
  0x5f   : > { %725 = vrot.lane.b32.xlu0 %v7252_v39, %s6936_s18  ;;  %727 = vrot.lane.b32.xlu1 %v7254_v40, %s6936_s18 }
  0x63   : > { %584 = vrot.lane.b32.xlu1 %v7252_v39, %s6935_s17  ;;  %582 = vrot.lane.b32.xlu0 %v7246_v38, %s6935_s17 }
  0x67   : > { %729 = vrot.lane.b32.xlu1 %v7268_v43, %s6936_s18  ;;  %586 = vrot.lane.b32.xlu0 %v7254_v40, %s6935_s17 }
  0x6b   : > { %733 = vrot.lane.b32.xlu1 %v7274_v44, %s6936_s18  ;;  %731 = vrot.lane.b32.xlu0 %v7276_v45, %s6936_s18 }
  0x6f   : > { %590 = vrot.lane.b32.xlu1 %v7276_v45, %s6935_s17  ;;  %588 = vrot.lane.b32.xlu0 %v7268_v43, %s6935_s17 }
  0x73   : > { %735 = vrot.lane.b32.xlu1 %v7286_v46, %s6936_s18  ;;  %592 = vrot.lane.b32.xlu0 %v7274_v44, %s6935_s17 }
  0x77   : > { %739 = vrot.lane.b32.xlu1 %v7296_v49, %s6936_s18  ;;  %737 = vrot.lane.b32.xlu0 %v7298_v50, %s6936_s18 }
  0x7b   : > { %596 = vrot.lane.b32.xlu1 %v7298_v50, %s6935_s17  ;;  %594 = vrot.lane.b32.xlu0 %v7286_v46, %s6935_s17 }
  0x7f   : > { %741 = vrot.lane.b32.xlu1 %v7308_v51, %s6936_s18  ;;  %598 = vrot.lane.b32.xlu0 %v7296_v49, %s6935_s17 }
  0x83   : > { %745 = vrot.lane.b32.xlu1 %v7314_v52, %s6936_s18  ;;  %743 = vrot.lane.b32.xlu0 %v7316_v53, %s6936_s18 }
  0x87   : > { %602 = vrot.lane.b32.xlu1 %v7316_v53, %s6935_s17  ;;  %600 = vrot.lane.b32.xlu0 %v7308_v51, %s6935_s17 }
  0x8b   : > { %747 = vrot.lane.b32.xlu1 %v7330_v56, %s6936_s18  ;;  %604 = vrot.lane.b32.xlu0 %v7314_v52, %s6935_s17 }
  0x8f   : > { %751 = vrot.lane.b32.xlu1 %v7336_v57, %s6936_s18  ;;  %749 = vrot.lane.b32.xlu0 %v7338_v58, %s6936_s18 }
  0x93   : > { %608 = vrot.lane.b32.xlu1 %v7338_v58, %s6935_s17  ;;  %606 = vrot.lane.b32.xlu0 %v7330_v56, %s6935_s17 }
  0x97   : > { %753 = vrot.lane.b32.xlu1 %v7348_v59, %s6936_s18  ;;  %610 = vrot.lane.b32.xlu0 %v7336_v57, %s6935_s17 }
  0x9b   : > { %757 = vrot.lane.b32.xlu1 %v7354_v60, %s6936_s18  ;;  %755 = vrot.lane.b32.xlu0 %v7356_v61, %s6936_s18 }
  0x9f   : > { %612 = vrot.lane.b32.xlu1 %v7348_v59, %s6935_s17  ;;  %614 = vrot.lane.b32.xlu0 %v7356_v61, %s6935_s17 }
  0xa3   : > { %616 = vrot.lane.b32.xlu1 %v7354_v60, %s6935_s17  ;;  %759 = vrot.lane.b32.xlu0 %v7376_v4, %s6936_s18 }
  0xa5   : > { %v563_v9 = vpop.permute.xlu1 %562  ;;  %v559_v10 = vpop.permute.xlu0 %558 }
  0xa6   : > { %v849_v18 = vsel %vm367_vm0, %v456_v11, %v559_v10  ;;  %v851_v20 = vsel %vm367_vm0, %v458_v16, %v563_v9 }
  0xa7   : > { %761 = vrot.lane.b32.xlu1 %v7388_v8, %s6936_s18 }
  0xa9   : > { %v706_v14 = vpop.permute.xlu1 %705  ;;  %v561_v15 = vpop.permute.xlu0 %560 }
  0xaa   : > { %v7401_v19 = vsel %vm897_vm3, %v849_v18, %v706_v14  ;;  %v850_v21 = vsel %vm367_vm0, %v457_v17, %v561_v15 }
  0xab   : > { %763 = vrot.lane.b32.xlu1 %v7392_v12, %s6936_s18  ;;  %v995_v41 = vrot.slane %v7401_v19, 1  ;;  %v1172_v2 = vrot.slane %v7401_v19, 2 }
  0xad   : > { %v710_v22 = vpop.permute.xlu1 %709  ;;  %v708_v29 = vpop.permute.xlu0 %707 }
  0xae   : > { %v900_v33 = vsel %vm897_vm3, %v851_v20, %v710_v22  ;;  %v7407_v34 = vsel %vm897_vm3, %v850_v21, %v708_v29 }
  0xaf   : > { %v998_v42 = vrot.slane %v900_v33, 1  ;;  %v996_v47 = vrot.slane %v7407_v34, 1  ;;  %v1175_v48 = vrot.slane %v900_v33, 2  ;;  %v1173_v54 = vrot.slane %v7407_v34, 2 }
  0xb1   : > { %v567_v55 = vpop.permute.xlu1 %566  ;;  %v565_v62 = vpop.permute.xlu0 %564  ;;  %v999_v63 = vsel %vm994_vm4, %v996_v47, %v998_v42  ;;  %v997_v0 = vsel %vm994_vm4, %v995_v41, %v996_v47  ;;  %v1176_v6 = vsel %vm1171_vm5, %v1173_v54, %v1175_v48  ;;  %v1174_v7 = vsel %vm1171_vm5, %v1172_v2, %v1173_v54 }
  0xb2   : > { %1077 = vrot.lane.b32.xlu1 %v999_v63, %s6937_s29  ;;  %1075 = vrot.lane.b32.xlu0 %v997_v0, %s6937_s29  ;;  %v852_v9 = vsel %vm367_vm0, %v7177_v24, %v565_v62  ;;  %v853_v11 = vsel %vm367_vm0, %v7186_v26, %v567_v55 }
  0xb5   : > { %v712_v3 = vpop.permute.xlu1 %711  ;;  %v569_v5 = vpop.permute.xlu0 %568 }
  0xb6   : > { %1254 = vrot.lane.b32.xlu1 %v1176_v6, %s6938_s30  ;;  %1252 = vrot.lane.b32.xlu0 %v1174_v7, %s6938_s30  ;;  %v7424_v10 = vsel %vm897_vm3, %v852_v9, %v712_v3  ;;  %v854_v13 = vsel %vm367_vm0, %v7175_v23, %v569_v5 }
  0xb7   : > { %v1000_v18 = vrot.slane %v7424_v10, 1  ;;  %v1177_v33 = vrot.slane %v7424_v10, 2 }
  0xb9   : > { %v716_v14 = vpop.permute.xlu1 %715  ;;  %v714_v15 = vpop.permute.xlu0 %713 }
  0xba   : > { %v903_v16 = vsel %vm897_vm3, %v854_v13, %v716_v14  ;;  %v7432_v17 = vsel %vm897_vm3, %v853_v11, %v714_v15 }
  0xbb   : > { %v1003_v20 = vrot.slane %v903_v16, 1  ;;  %v1001_v24 = vrot.slane %v7432_v17, 1  ;;  %v1178_v21 = vrot.slane %v7432_v17, 2  ;;  %v1180_v41 = vrot.slane %v903_v16, 2 }
  0xbd   : > { %v573_v22 = vpop.permute.xlu1 %572  ;;  %v571_v29 = vpop.permute.xlu0 %570  ;;  %v1004_v26 = vsel %vm994_vm4, %v1001_v24, %v1003_v20  ;;  %v1002_v23 = vsel %vm994_vm4, %v1000_v18, %v1001_v24  ;;  %v1179_v48 = vsel %vm1171_vm5, %v1177_v33, %v1178_v21  ;;  %v1181_v3 = vsel %vm1171_vm5, %v1178_v21, %v1180_v41  ;;  %v7473_v20 = vld [vmem:[#allocation2 + $0x128] sm:$0xff]  ;;  %v7485_v33 = vld [vmem:[#allocation2 + $0x130] sm:$0x3]  ;;  %v7487_v41 = vld [vmem:[#allocation2 + $0x120] sm:$0xff] }
  0xbe   : > { %1081 = vrot.lane.b32.xlu1 %v1004_v26, %s6937_s29  ;;  %1079 = vrot.lane.b32.xlu0 %v1002_v23, %s6937_s29  ;;  %v855_v54 = vsel %vm367_vm0, %v7184_v25, %v571_v29  ;;  %v856_v62 = vsel %vm367_vm0, %v7194_v28, %v573_v22 }
  0xc1   : > { %v718_v42 = vpop.permute.xlu1 %717  ;;  %v575_v47 = vpop.permute.xlu0 %574 }
  0xc2   : > { %1256 = vrot.lane.b32.xlu0 %v1179_v48, %s6938_s30  ;;  %618 = vrot.lane.b32.xlu1 %v7376_v4, %s6935_s17  ;;  %v7449_v55 = vsel %vm897_vm3, %v855_v54, %v718_v42  ;;  %v857_v63 = vsel %vm367_vm0, %v7192_v27, %v575_v47 }
  0xc3   : > { %v1005_v25 = vrot.slane %v7449_v55, 1  ;;  %v1182_v18 = vrot.slane %v7449_v55, 2 }
  0xc5   : > { %v722_v0 = vpop.permute.xlu1 %721  ;;  %v720_v2 = vpop.permute.xlu0 %719 }
  0xc6   : > { %v906_v5 = vsel %vm897_vm3, %v857_v63, %v722_v0  ;;  %v7458_v6 = vsel %vm897_vm3, %v856_v62, %v720_v2  ;;  %1258 = vrot.lane.b32.xlu0 %v1181_v3, %s6938_s30 }
  0xc7   : > { %v1008_v7 = vrot.slane %v906_v5, 1  ;;  %v1006_v9 = vrot.slane %v7458_v6, 1  ;;  %v1183_v14 = vrot.slane %v7458_v6, 2  ;;  %v1185_v42 = vrot.slane %v906_v5, 2 }
  0xc9   : > { %v1009_v28 = vsel %vm994_vm4, %v1006_v9, %v1008_v7  ;;  %v1007_v27 = vsel %vm994_vm4, %v1005_v25, %v1006_v9  ;;  %v577_v11 = vpop.permute.xlu0 %576  ;;  %v579_v13 = vpop.permute.xlu1 %578  ;;  %v1184_v24 = vsel %vm1171_vm5, %v1182_v18, %v1183_v14  ;;  %v1186_v0 = vsel %vm1171_vm5, %v1183_v14, %v1185_v42  ;;  %v7516_v14 = vld [vmem:[#allocation2 + $0x140] sm:$0xff] }
  0xca   : > { %1085 = vrot.lane.b32.xlu1 %v1009_v28, %s6937_s29  ;;  %1083 = vrot.lane.b32.xlu0 %v1007_v27, %s6937_s29  ;;  %v858_v29 = vsel %vm367_vm0, %v7206_v30, %v577_v11  ;;  %v859_v26 = vsel %vm367_vm0, %v7214_v32, %v579_v13 }
  0xcd   : > { %v581_v15 = vpop.permute.xlu0 %580  ;;  %v724_v16 = vpop.permute.xlu1 %723 }
  0xce   : > { %622 = vrot.lane.b32.xlu1 %v7392_v12, %s6935_s17  ;;  %620 = vrot.lane.b32.xlu0 %v7388_v8, %s6935_s17  ;;  %v860_v23 = vsel %vm367_vm0, %v7212_v31, %v581_v15  ;;  %v7490_v54 = vsel %vm897_vm3, %v858_v29, %v724_v16  ;;  %v7528_v29 = vld [vmem:[#allocation2 + $0x148] sm:$0x3] }
  0xcf   : > { %v1010_v31 = vrot.slane %v7490_v54, 1  ;;  %v1187_v28 = vrot.slane %v7490_v54, 2 }
  0xd1   : > { %v726_v21 = vpop.permute.xlu0 %725  ;;  %v728_v22 = vpop.permute.xlu1 %727 }
  0xd2   : > { %767 = vrot.lane.b32.xlu1 %v7473_v20, %s6936_s18  ;;  %1260 = vrot.lane.b32.xlu0 %v1184_v24, %s6938_s30  ;;  %v7493_v62 = vsel %vm897_vm3, %v859_v26, %v726_v21  ;;  %v909_v30 = vsel %vm897_vm3, %v860_v23, %v728_v22  ;;  %v7530_v26 = vld [vmem:[#allocation2 + $0x138] sm:$0xff] }
  0xd3   : > { %v1011_v32 = vrot.slane %v7493_v62, 1  ;;  %v1013_v63 = vrot.slane %v909_v30, 1  ;;  %v1188_v27 = vrot.slane %v7493_v62, 2  ;;  %v1190_v23 = vrot.slane %v909_v30, 2 }
  0xd5   : > { %v585_v47 = vpop.permute.xlu1 %584  ;;  %v583_v48 = vpop.permute.xlu0 %582  ;;  %v1014_v5 = vsel %vm994_vm4, %v1011_v32, %v1013_v63  ;;  %v1012_v25 = vsel %vm994_vm4, %v1010_v31, %v1011_v32  ;;  %v1189_v15 = vsel %vm1171_vm5, %v1187_v28, %v1188_v27 }
  0xd6   : > { %769 = vrot.lane.b32.xlu1 %v7485_v33, %s6936_s18  ;;  %765 = vrot.lane.b32.xlu0 %v7487_v41, %s6936_s18  ;;  %v862_v24 = vsel %vm367_vm0, %v7236_v37, %v585_v47  ;;  %v861_v21 = vsel %vm367_vm0, %v7228_v35, %v583_v48  ;;  %v1191_v48 = vsel %vm1171_vm5, %v1188_v27, %v1190_v23 }
  0xd9   : > { %v730_v2 = vpop.permute.xlu1 %729  ;;  %v587_v3 = vpop.permute.xlu0 %586 }
  0xda   : > { %624 = vrot.lane.b32.xlu1 %v7487_v41, %s6935_s17  ;;  %1262 = vrot.lane.b32.xlu0 %v1186_v0, %s6938_s30  ;;  %v863_v22 = vsel %vm367_vm0, %v7234_v36, %v587_v3  ;;  %v7533_v32 = vsel %vm897_vm3, %v861_v21, %v730_v2 }
  0xdb   : > { %v1015_v35 = vrot.slane %v7533_v32, 1 }
  0xdd   : > { %v734_v7 = vpop.permute.xlu1 %733  ;;  %v732_v9 = vpop.permute.xlu0 %731 }
  0xde   : > { %1089 = vrot.lane.b32.xlu1 %v1014_v5, %s6937_s29  ;;  %1087 = vrot.lane.b32.xlu0 %v1012_v25, %s6937_s29  ;;  %v912_v63 = vsel %vm897_vm3, %v863_v22, %v734_v7  ;;  %v7537_v37 = vsel %vm897_vm3, %v862_v24, %v732_v9  ;;  %v1192_v7 = vrot.slane %v7533_v32, 2 }
  0xdf   : > { %v1018_v36 = vrot.slane %v912_v63, 1  ;;  %v1016_v47 = vrot.slane %v7537_v37, 1  ;;  %v1193_v9 = vrot.slane %v7537_v37, 2 }
  0xe1   : > { %v591_v11 = vpop.permute.xlu1 %590  ;;  %v589_v13 = vpop.permute.xlu0 %588  ;;  %v1019_v2 = vsel %vm994_vm4, %v1016_v47, %v1018_v36  ;;  %v1017_v3 = vsel %vm994_vm4, %v1015_v35, %v1016_v47  ;;  %v1194_v24 = vsel %vm1171_vm5, %v1192_v7, %v1193_v9  ;;  %v7575_v47 = vld [vmem:[#allocation2 + $0x160] sm:$0x3] }
  0xe2   : > { %628 = vrot.lane.b32.xlu1 %v7485_v33, %s6935_s17  ;;  %626 = vrot.lane.b32.xlu0 %v7473_v20, %s6935_s17  ;;  %v865_v23 = vsel %vm367_vm0, %v7252_v39, %v591_v11  ;;  %v864_v35 = vsel %vm367_vm0, %v7246_v38, %v589_v13  ;;  %11985 = vst [vmem:[#allocation8_spill] sm:$0xff] %v7575_v47 }
  0xe5   : > { %v736_v16 = vpop.permute.xlu1 %735  ;;  %v593_v18 = vpop.permute.xlu0 %592 }
  0xe6   : > { %773 = vrot.lane.b32.xlu1 %v7516_v14, %s6936_s18  ;;  %1264 = vrot.lane.b32.xlu0 %v1189_v15, %s6938_s30  ;;  %v7559_v15 = vld [vmem:[#allocation2 + $0x158] sm:$0xff]  ;;  %v866_v36 = vsel %vm367_vm0, %v7254_v40, %v593_v18  ;;  %v7582_v7 = vsel %vm897_vm3, %v864_v35, %v736_v16 }
  0xe7   : > { %11984 = vst [vmem:[#allocation7_spill] sm:$0xff] %v7559_v15  ;;  %v1020_v40 = vrot.slane %v7582_v7, 1 }
  0xe9   : > { %v740_v42 = vpop.permute.xlu1 %739  ;;  %v738_v31 = vpop.permute.xlu0 %737 }
  0xea   : > { %775 = vrot.lane.b32.xlu1 %v7528_v29, %s6936_s18  ;;  %771 = vrot.lane.b32.xlu0 %v7530_v26, %s6936_s18  ;;  %v7586_v39 = vsel %vm897_vm3, %v865_v23, %v738_v31 }
  0xeb   : > { %v1021_v13 = vrot.slane %v7586_v39, 1  ;;  %v1198_v35 = vrot.slane %v7586_v39, 2 }
  0xed   : > { %v597_v30 = vpop.permute.xlu1 %596  ;;  %v595_v0 = vpop.permute.xlu0 %594 }
  0xee   : > { %630 = vrot.lane.b32.xlu1 %v7530_v26, %s6935_s17  ;;  %1266 = vrot.lane.b32.xlu0 %v1191_v48, %s6938_s30  ;;  %v7577_v48 = vld [vmem:[#allocation2 + $0x150] sm:$0xff] }
  0xef   : > { %11986 = vst [vmem:[#allocation9_spill] sm:$0xff] %v7577_v48 }
  0xf1   : > { %v742_v5 = vpop.permute.xlu1 %741  ;;  %v599_v25 = vpop.permute.xlu0 %598 }
  0xf2   : > { %1093 = vrot.lane.b32.xlu1 %v1019_v2, %s6937_s29  ;;  %1091 = vrot.lane.b32.xlu0 %v1017_v3, %s6937_s29  ;;  %v1195_v2 = vrot.slane %v912_v63, 2  ;;  %v1022_v63 = vsel %vm994_vm4, %v1020_v40, %v1021_v13  ;;  %v7620_v40 = vld [vmem:[#allocation2 + $0x170] sm:$0xff] }
  0xf3   : > { %11987 = vst [vmem:[#allocation10_spill] sm:$0xff] %v7620_v40 }
  0xf4   : > { %v1196_v16 = vsel %vm1171_vm5, %v1193_v9, %v1195_v2  ;;  %v1197_v9 = vrot.slane %v7582_v7, 2 }
  0xf5   : > { %v746_v28 = vpop.permute.xlu1 %745  ;;  %v744_v27 = vpop.permute.xlu0 %743 }
  0xf6   : > { %634 = vrot.lane.b32.xlu1 %v7528_v29, %s6935_s17  ;;  %632 = vrot.lane.b32.xlu0 %v7516_v14, %s6935_s17 }
  0xf9   : > { %v7562_v21 = vpop.permute.xlu1 %602  ;;  %v7564_v22 = vpop.permute.xlu0 %600 }
  0xfa   : > { %779 = vrot.lane.b32.xlu1 %v7559_v15, %s6936_s18  ;;  %1268 = vrot.lane.b32.xlu0 %v1194_v24, %s6938_s30  ;;  %v915_v24 = vsel %vm897_vm3, %v866_v36, %v740_v42 }
  0xfb   : > { %v1023_v11 = vrot.slane %v915_v24, 1 }
  0xfd   : > { %v7579_v3 = vpop.permute.xlu1 %747  ;;  %v7592_v38 = vpop.permute.xlu0 %604  ;;  %v1024_v31 = vsel %vm994_vm4, %v1021_v13, %v1023_v11  ;;  %v1199_v11 = vsel %vm1171_vm5, %v1197_v9, %v1198_v35 }
  0xfe   : > { %781 = vrot.lane.b32.xlu1 %v7575_v47, %s6936_s18  ;;  %777 = vrot.lane.b32.xlu0 %v7577_v48, %s6936_s18 }
 0x101   : > { %v7597_v18 = vpop.permute.xlu1 %751  ;;  %v7602_v42 = vpop.permute.xlu0 %749 }
 0x102   : > { %636 = vrot.lane.b32.xlu1 %v7577_v48, %s6935_s17  ;;  %1270 = vrot.lane.b32.xlu0 %v1196_v16, %s6938_s30  ;;  %v868_v16 = vsel %vm367_vm0, %v7276_v45, %v597_v30  ;;  %v1200_v48 = vrot.slane %v915_v24, 2 }
 0x103   : > { %v7647_v30 = vsel %vm897_vm3, %v868_v16, %v744_v27 }
 0x104   : > { %11990 = vst [vmem:[#allocation13_spill] sm:$0xff] %v7647_v30 }
 0x105   : > { %v7606_v23 = vpop.permute.xlu1 %608  ;;  %v7618_v2 = vpop.permute.xlu0 %606 }
 0x106   : > { %1097 = vrot.lane.b32.xlu1 %v1024_v31, %s6937_s29  ;;  %1095 = vrot.lane.b32.xlu0 %v1022_v63, %s6937_s29  ;;  %v867_v31 = vsel %vm367_vm0, %v7268_v43, %v595_v0  ;;  %v869_v63 = vsel %vm367_vm0, %v7274_v44, %v599_v25  ;;  %v1026_v0 = vrot.slane %v7647_v30, 1  ;;  %v1201_v25 = vsel %vm1171_vm5, %v1198_v35, %v1200_v48 }
 0x107   : > { %v918_v45 = vsel %vm897_vm3, %v869_v63, %v746_v28 }
 0x108   : > { %v1028_v44 = vrot.slane %v918_v45, 1 }
 0x109   : > { %v7612_v36 = vpop.permute.xlu1 %753  ;;  %v7638_v9 = vpop.permute.xlu0 %610 }
 0x10a   : > { %640 = vrot.lane.b32.xlu1 %v7575_v47, %s6935_s17  ;;  %638 = vrot.lane.b32.xlu0 %v7559_v15, %s6935_s17  ;;  %v7636_v47 = vld [vmem:[#allocation2 + $0x168] sm:$0xff]  ;;  %v1029_v28 = vsel %vm994_vm4, %v1026_v0, %v1028_v44 }
 0x10b   : > { %11989 = vst [vmem:[#allocation12_spill] sm:$0xff] %v7636_v47 }
 0x10d   : > { %v7623_v13 = vpop.permute.xlu1 %757  ;;  %v7658_v24 = vpop.permute.xlu0 %755 }
 0x10e   : > { %785 = vrot.lane.b32.xlu1 %v7620_v40, %s6936_s18  ;;  %1272 = vrot.lane.b32.xlu0 %v1199_v11, %s6938_s30  ;;  %v7643_v11 = vsel %vm897_vm3, %v867_v31, %v742_v5  ;;  %v1203_v31 = vrot.slane %v7647_v30, 2 }
 0x10f   : > { %v1025_v43 = vrot.slane %v7643_v11, 1  ;;  %v1202_v35 = vrot.slane %v7643_v11, 2 }
 0x111   : > { %v7640_v15 = vpop.permute.xlu1 %612  ;;  %v1027_v27 = vsel %vm994_vm4, %v1025_v43, %v1026_v0  ;;  %v7669_v48 = vpop.permute.xlu0 %614  ;;  %v505_v43 = vld [vmem:[#allocation2 + $0x188] sm:$0xff]  ;;  %v1204_v0 = vsel %vm1171_vm5, %v1202_v35, %v1203_v31 }
 0x112   : > { %787 = vrot.lane.b32.xlu1 %v7634_v1, %s6936_s18  ;;  %783 = vrot.lane.b32.xlu0 %v7636_v47, %s6936_s18 }
 0x115   : > { %v7656_v5 = vpop.permute.xlu1 %616  ;;  %v7679_v44 = vpop.permute.xlu0 %759 }
 0x116   : > { %642 = vrot.lane.b32.xlu1 %v7636_v47, %s6935_s17  ;;  %1274 = vrot.lane.b32.xlu0 %v1201_v25, %s6938_s30  ;;  %v870_v25 = vsel %vm367_vm0, %v7286_v46, %v7564_v22  ;;  %v504_v47 = vld [vmem:[#allocation2 + $0x180] sm:$0xff] }
 0x117   : > { %v7695_v46 = vsel %vm897_vm3, %v870_v25, %v7579_v3 }
 0x119   : > { %v7665_v16 = vpop.permute.xlu1 %761 }
 0x11a   : > { %1101 = vrot.lane.b32.xlu1 %v1029_v28, %s6937_s29  ;;  %1099 = vrot.lane.b32.xlu0 %v1027_v27, %s6937_s29  ;;  %v871_v28 = vsel %vm367_vm0, %v7298_v50, %v7562_v21  ;;  %v872_v27 = vsel %vm367_vm0, %v7296_v49, %v7592_v38  ;;  %v1030_v49 = vrot.slane %v7695_v46, 1 }
 0x11b   : > { %v921_v22 = vsel %vm897_vm3, %v872_v27, %v7597_v18  ;;  %v7701_v50 = vsel %vm897_vm3, %v871_v28, %v7602_v42  ;;  %v874_v27 = vsel %vm367_vm0, %v7316_v53, %v7606_v23 }
 0x11c   : > { %v1033_v42 = vrot.slane %v921_v22, 1  ;;  %v7743_v23 = vsel %vm897_vm3, %v874_v27, %v7658_v24 }
 0x11d   : > { %v7677_v63 = vpop.permute.xlu1 %763 }
 0x11e   : > { %646 = vrot.lane.b32.xlu1 %v7634_v1, %s6935_s17  ;;  %644 = vrot.lane.b32.xlu0 %v7620_v40, %s6935_s17  ;;  %v506_v1 = vld [vmem:[#allocation2 + $0x190] sm:$0x3]  ;;  %v1205_v40 = vrot.slane %v918_v45, 2 }
 0x120   : > { %v1206_v45 = vsel %vm1171_vm5, %v1203_v31, %v1205_v40  ;;  %v1208_v31 = vrot.slane %v7701_v50, 2 }
 0x122   : > { %791 = vrot.lane.b32.xlu1 %v505_v43, %s6936_s18  ;;  %1276 = vrot.lane.b32.xlu0 %v1204_v0, %s6938_s30  ;;  %v1031_v0 = vrot.slane %v7701_v50, 1 }
 0x124   : > { %v1078_v35 = vpop.permute.xlu1 %1077  ;;  %v1076_v30 = vpop.permute.xlu0 %1075 }
 0x125   : > { %v1350_v21 = vsel %vm1348_vm6, %v7407_v34, %v1078_v35  ;;  %v1349_v3 = vsel %vm1348_vm6, %v7401_v19, %v1076_v30  ;;  %v1034_v19 = vsel %vm994_vm4, %v1031_v0, %v1033_v42  ;;  %v1032_v34 = vsel %vm994_vm4, %v1030_v49, %v1031_v0  ;;  %v508_v49 = vld [vmem:[#allocation2 + $0x1a0] sm:$0xff] }
 0x126   : > { %793 = vrot.lane.b32.xlu1 %v506_v1, %s6936_s18  ;;  %789 = vrot.lane.b32.xlu0 %v504_v47, %s6936_s18  ;;  %v1207_v30 = vrot.slane %v7695_v46, 2  ;;  %v875_v35 = vsel %vm367_vm0, %v7314_v52, %v7638_v9  ;;  %v507_v9 = vld [vmem:[#allocation2 + $0x198] sm:$0xff] }
 0x127   : > { %v924_v53 = vsel %vm897_vm3, %v875_v35, %v7623_v13 }
 0x128   : > { %v1255_v38 = vpop.permute.xlu1 %1254  ;;  %v1253_v18 = vpop.permute.xlu0 %1252  ;;  %v1038_v24 = vrot.slane %v924_v53, 1 }
 0x129   : > { %v1383_v25 = vsel %vm1381_vm7, %v1350_v21, %v1255_v38  ;;  %v1382_v28 = vsel %vm1381_vm7, %v1349_v3, %v1253_v18  ;;  %v1209_v18 = vsel %vm1171_vm5, %v1207_v30, %v1208_v31 }
 0x12a   : > { %648 = vrot.lane.b32.xlu1 %v504_v47, %s6935_s17  ;;  %1278 = vrot.lane.b32.xlu0 %v1206_v45, %s6938_s30  ;;  %v1036_v45 = vrot.slane %v7743_v23, 1 }
 0x12b   : > { %6509 = vmatprep.mubr.msk.f32.mxu0 %vm1426_vm8, %v1382_v28  ;;  %v1215_v28 = vrot.slane %v924_v53, 2 }
 0x12c   : > { %6510 = vmatmul.mubr.msk.f32.vlgmr.msra.gmra.mrb[0].mxu0 %vm1426_vm8, %v1383_v25 }
 0x12e   : > { %1105 = vrot.lane.b32.xlu1 %v1034_v19, %s6937_s29  ;;  %1103 = vrot.lane.b32.xlu0 %v1032_v34, %s6937_s29  ;;  %v1213_v19 = vrot.slane %v7743_v23, 2  ;;  %v877_v34 = vsel %vm367_vm0, %v7338_v58, %v7669_v48 }
 0x130   : > { %v1080_v40 = vpop.permute.xlu0 %1079  ;;  %v1082_v47 = vpop.permute.xlu1 %1081  ;;  %v1216_v27 = vsel %vm1171_vm5, %v1213_v19, %v1215_v28 }
 0x131   : > { %v1351_v21 = vsel %vm1348_vm6, %v7424_v10, %v1080_v40  ;;  %v509_v10 = vld [vmem:[#allocation2 + $0x1a8] sm:$0x3]  ;;  %v1039_v40 = vsel %vm994_vm4, %v1036_v45, %v1038_v24 }
 0x132   : > { %652 = vrot.lane.b32.xlu1 %v506_v1, %s6935_s17  ;;  %650 = vrot.lane.b32.xlu0 %v505_v43, %s6935_s17  ;;  %v873_v1 = vsel %vm367_vm0, %v7308_v51, %v7618_v2  ;;  %v1210_v43 = vrot.slane %v921_v22, 2  ;;  %v1352_v51 = vsel %vm1348_vm6, %v7432_v17, %v1082_v47  ;;  %v878_v22 = vsel %vm367_vm0, %v7336_v57, %v7656_v5 }
 0x133   : > { %v7752_v13 = vsel %vm897_vm3, %v873_v1, %v7612_v36  ;;  %v927_v57 = vsel %vm897_vm3, %v878_v22, %v7677_v63  ;;  %v876_v5 = vsel %vm367_vm0, %v7330_v56, %v7640_v15 }
 0x134   : > { %v1257_v3 = vpop.permute.xlu0 %1256  ;;  %v619_v52 = vpop.permute.xlu1 %618  ;;  %v1035_v17 = vrot.slane %v7752_v13, 1  ;;  %v1211_v25 = vsel %vm1171_vm5, %v1208_v31, %v1210_v43  ;;  %v1212_v30 = vrot.slane %v7752_v13, 2  ;;  %v7779_v31 = vsel %vm897_vm3, %v877_v34, %v7665_v16 }
 0x135   : > { %v1384_v38 = vsel %vm1381_vm7, %v1351_v21, %v1257_v3  ;;  %v1043_v47 = vrot.slane %v927_v57, 1  ;;  %v7785_v35 = vsel %vm897_vm3, %v876_v5, %v7679_v44  ;;  %v1041_v56 = vrot.slane %v7779_v31, 1 }
 0x136   : > { %797 = vrot.lane.b32.xlu1 %v508_v49, %s6936_s18  ;;  %1280 = vrot.lane.b32.xlu0 %v1209_v18, %s6938_s30  ;;  %v1037_v63 = vsel %vm994_vm4, %v1035_v17, %v1036_v45  ;;  %v1214_v21 = vsel %vm1171_vm5, %v1212_v30, %v1213_v19  ;;  %v1040_v3 = vrot.slane %v7785_v35, 1 }
 0x137   : > { %6512 = vmatprep.mubr.msk.f32.mxu0 %vm1426_vm8, %v1384_v38  ;;  %v1220_v38 = vrot.slane %v927_v57, 2  ;;  %v1044_v44 = vsel %vm994_vm4, %v1041_v56, %v1043_v47 }
 0x138   : > { %v1259_v2 = vpop.permute.xlu0 %1258  ;;  %v1042_v45 = vsel %vm994_vm4, %v1040_v3, %v1041_v56 }
 0x139   : > { %v1385_v42 = vsel %vm1381_vm7, %v1352_v51, %v1259_v2 }
 0x13a   : > { %799 = vrot.lane.b32.xlu1 %v509_v10, %s6936_s18  ;;  %795 = vrot.lane.b32.xlu0 %v507_v9, %s6936_s18  ;;  %v1217_v10 = vrot.slane %v7785_v35, 2  ;;  %s6942_s18 = smov 96  }
 0x13b   : > { %6513 = vmatmul.mubr.msk.f32.gmra.mrb[2].mxu0 %vm1426_vm8, %v1385_v42 }
 0x13c   : > { %v1086_v0 = vpop.permute.xlu1 %1085  ;;  %v1084_v36 = vpop.permute.xlu0 %1083 }
 0x13d   : > { %v1353_v15 = vsel %vm1348_vm6, %v7449_v55, %v1084_v36  ;;  %v1218_v55 = vrot.slane %v7779_v31, 2 }
 0x13e   : > { %1282 = vrot.lane.b32.xlu0 %v1211_v25, %s6938_s30  ;;  %1109 = vrot.lane.b32.xlu1 %v1039_v40, %s6937_s29 }
 0x13f   : > { %v1221_v24 = vsel %vm1171_vm5, %v1218_v55, %v1220_v38  ;;  %v1219_v34 = vsel %vm1171_vm5, %v1217_v10, %v1218_v55 }
 0x140   : > { %v623_v58 = vpop.permute.xlu1 %622  ;;  %v621_v48 = vpop.permute.xlu0 %620 }
 0x141   : > { %v880_v1 = vsel %vm367_vm0, %v7356_v61, %v621_v48  ;;  %v881_v9 = vsel %vm367_vm0, %v7354_v60, %v623_v58  ;;  %v879_v61 = vsel %vm367_vm0, %v7348_v59, %v619_v52  ;;  %v1354_v60 = vsel %vm1348_vm6, %v7458_v6, %v1086_v0 }
 0x142   : > { %1286 = vrot.lane.b32.xlu1 %v1216_v27, %s6938_s30  ;;  %1107 = vrot.lane.b32.xlu0 %v1037_v63, %s6937_s29 }
 0x144   : > { %v768_v16 = vpop.permute.xlu1 %767  ;;  %v1261_v49 = vpop.permute.xlu0 %1260 }
 0x145   : > { %v1386_v18 = vsel %vm1381_vm7, %v1353_v15, %v1261_v49  ;;  %v7802_v53 = vsel %vm897_vm3, %v880_v1, %v768_v16 }
 0x146   : > { %1284 = vrot.lane.b32.xlu0 %v1214_v21, %s6938_s30  ;;  %1113 = vrot.lane.b32.xlu1 %v1044_v44, %s6937_s29  ;;  %v1046_v42 = vrot.slane %v7802_v53, 1  ;;  %v1223_v40 = vrot.slane %v7802_v53, 2 }
 0x147   : > { %6515 = vmatprep.mubr.msk.f32.mxu0 %vm1426_vm8, %v1386_v18 }
 0x148   : > { %v770_v43 = vpop.permute.xlu1 %769  ;;  %v766_v51 = vpop.permute.xlu0 %765 }
 0x149   : > { %v930_v2 = vsel %vm897_vm3, %v881_v9, %v770_v43  ;;  %v7815_v17 = vsel %vm897_vm3, %v879_v61, %v766_v51 }
 0x14a   : > { %v1048_v22 = vrot.slane %v930_v2, 1  ;;  %1290 = vrot.lane.b32.xlu1 %v1221_v24, %s6938_s30  ;;  %1111 = vrot.lane.b32.xlu0 %v1042_v45, %s6937_s29  ;;  %v1225_v25 = vrot.slane %v930_v2, 2  ;;  %v1045_v28 = vrot.slane %v7815_v17, 1  ;;  %v1222_v57 = vrot.slane %v7815_v17, 2 }
 0x14c   : > { %v625_v59 = vpop.permute.xlu1 %624  ;;  %v1263_v52 = vpop.permute.xlu0 %1262  ;;  %v1049_v36 = vsel %vm994_vm4, %v1046_v42, %v1048_v22  ;;  %v1226_v5 = vsel %vm1171_vm5, %v1223_v40, %v1225_v25  ;;  %v1047_v30 = vsel %vm994_vm4, %v1045_v28, %v1046_v42  ;;  %v1224_v47 = vsel %vm1171_vm5, %v1222_v57, %v1223_v40 }
 0x14d   : > { %v1387_v19 = vsel %vm1381_vm7, %v1354_v60, %v1263_v52  ;;  %v882_v21 = vsel %vm367_vm0, %v7376_v4, %v625_v59 }
 0x14e   : > { %1288 = vrot.lane.b32.xlu0 %v1219_v34, %s6938_s30  ;;  %1117 = vrot.lane.b32.xlu1 %v1049_v36, %s6937_s29 }
 0x14f   : > { %6516 = vmatmul.mubr.msk.f32.gmra.mrb[4].mxu0 %vm1426_vm8, %v1387_v19 }
 0x150   : > { %v1090_v6 = vpop.permute.xlu1 %1089  ;;  %v1088_v0 = vpop.permute.xlu0 %1087 }
 0x151   : > { %v1355_v27 = vsel %vm1348_vm6, %v7490_v54, %v1088_v0  ;;  %v1356_v10 = vsel %vm1348_vm6, %v7493_v62, %v1090_v6 }
 0x152   : > { %1294 = vrot.lane.b32.xlu1 %v1226_v5, %s6938_s30  ;;  %1115 = vrot.lane.b32.xlu0 %v1047_v30, %s6937_s29 }
 0x154   : > { %v629_v58 = vpop.permute.xlu1 %628  ;;  %v627_v48 = vpop.permute.xlu0 %626 }
 0x155   : > { %v883_v16 = vsel %vm367_vm0, %v7388_v8, %v627_v48  ;;  %v884_v3 = vsel %vm367_vm0, %v7392_v12, %v629_v58 }
 0x156   : > { %1292 = vrot.lane.b32.xlu0 %v1224_v47, %s6938_s30 }
 0x158   : > { %v774_v63 = vpop.permute.xlu1 %773  ;;  %v1265_v56 = vpop.permute.xlu0 %1264 }
 0x159   : > { %v1388_v15 = vsel %vm1381_vm7, %v1355_v27, %v1265_v56  ;;  %v7843_v49 = vsel %vm897_vm3, %v883_v16, %v774_v63 }
 0x15a   : > { %6518 = vmatprep.mubr.msk.f32.mxu0 %vm1426_vm8, %v1388_v15  ;;  %v1051_v8 = vrot.slane %v7843_v49, 1  ;;  %v1228_v24 = vrot.slane %v7843_v49, 2 }
 0x15c   : > { %v776_v38 = vpop.permute.xlu1 %775  ;;  %v772_v54 = vpop.permute.xlu0 %771 }
 0x15d   : > { %v933_v18 = vsel %vm897_vm3, %v884_v3, %v776_v38  ;;  %v7851_v44 = vsel %vm897_vm3, %v882_v21, %v772_v54 }
 0x15e   : > { %v1053_v1 = vrot.slane %v933_v18, 1  ;;  %v1050_v55 = vrot.slane %v7851_v44, 1  ;;  %v1230_v9 = vrot.slane %v933_v18, 2  ;;  %v1227_v4 = vrot.slane %v7851_v44, 2 }
 0x160   : > { %v631_v43 = vpop.permute.xlu1 %630  ;;  %v1267_v12 = vpop.permute.xlu0 %1266  ;;  %v1054_v51 = vsel %vm994_vm4, %v1051_v8, %v1053_v1  ;;  %v1052_v61 = vsel %vm994_vm4, %v1050_v55, %v1051_v8  ;;  %v1231_v42 = vsel %vm1171_vm5, %v1228_v24, %v1230_v9  ;;  %v1229_v22 = vsel %vm1171_vm5, %v1227_v4, %v1228_v24 }
 0x161   : > { %v1389_v2 = vsel %vm1381_vm7, %v1356_v10, %v1267_v12  ;;  %1121 = vrot.lane.b32.xlu1 %v1054_v51, %s6937_s29  ;;  %1119 = vrot.lane.b32.xlu0 %v1052_v61, %s6937_s29  ;;  %v885_v40 = vsel %vm367_vm0, %v7487_v41, %v631_v43  ;;  %v11991_v43 = vmov 0.0  }
 0x162   : > { %6519 = vmatmul.mubr.msk.f32.gmra.mrb[6].mxu0 %vm1426_vm8, %v1389_v2  ;;  %1790 = vst.msk [vmem:[#allocation3 + $0x20] sm:$0xff] %vm1784_vm9, %v11991_v43  ;;  %1785 = vst.msk [vmem:[#allocation3] sm:$0xff] %vm1784_vm9, %v11991_v43 }
 0x163   : > { %1791 = vst.msk [vmem:[#allocation3 + $0x28] sm:$0x3] %vm1787_vm10, %v11991_v43  ;;  %1788 = vst.msk [vmem:[#allocation3 + $0x10] sm:$0x3] %vm1787_vm10, %v11991_v43 }
 0x164   : > { %v1094_v62 = vpop.permute.xlu1 %1093  ;;  %v1092_v45 = vpop.permute.xlu0 %1091  ;;  %1786 = vst.msk [vmem:[#allocation3 + $0x8] sm:$0xff] %vm1784_vm9, %v11991_v43  ;;  %1789 = vst.msk [vmem:[#allocation3 + $0x18] sm:$0xff] %vm1784_vm9, %v11991_v43 }
 0x165   : > { %1298 = vrot.lane.b32.xlu1 %v1231_v42, %s6938_s30  ;;  %1296 = vrot.lane.b32.xlu0 %v1229_v22, %s6938_s30  ;;  %v1357_v52 = vsel %vm1348_vm6, %v7533_v32, %v1092_v45  ;;  %v1358_v48 = vsel %vm1348_vm6, %v7537_v37, %v1094_v62  ;;  %1792 = vst.msk [vmem:[#allocation3 + $0x30] sm:$0xff] %vm1784_vm9, %v11991_v43  ;;  %1793 = vst.msk [vmem:[#allocation3 + $0x38] sm:$0xff] %vm1784_vm9, %v11991_v43 }
 0x166   : > { %1794 = vst.msk [vmem:[#allocation3 + $0x40] sm:$0x3] %vm1787_vm10, %v11991_v43  ;;  %1797 = vst.msk [vmem:[#allocation3 + $0x58] sm:$0x3] %vm1787_vm10, %v11991_v43 }
 0x167   : > { %1795 = vst.msk [vmem:[#allocation3 + $0x48] sm:$0xff] %vm1784_vm9, %v11991_v43  ;;  %1796 = vst.msk [vmem:[#allocation3 + $0x50] sm:$0xff] %vm1784_vm9, %v11991_v43 }
 0x168   : > { %v635_v60 = vpop.permute.xlu1 %634  ;;  %v633_v59 = vpop.permute.xlu0 %632  ;;  %1798 = vst.msk [vmem:[#allocation3 + $0x60] sm:$0xff] %vm1784_vm9, %v11991_v43  ;;  %1799 = vst.msk [vmem:[#allocation3 + $0x68] sm:$0xff] %vm1784_vm9, %v11991_v43 }
 0x169   : > { %v886_v19 = vsel %vm367_vm0, %v7473_v20, %v633_v59  ;;  %v887_v6 = vsel %vm367_vm0, %v7485_v33, %v635_v60  ;;  %1800 = vst.msk [vmem:[#allocation3 + $0x70] sm:$0x3] %vm1787_vm10, %v11991_v43  ;;  %1803 = vst.msk [vmem:[#allocation3 + $0x88] sm:$0x3] %vm1787_vm10, %v11991_v43 }
 0x16a   : > { %1801 = vst.msk [vmem:[#allocation3 + $0x78] sm:$0xff] %vm1784_vm9, %v11991_v43  ;;  %1802 = vst.msk [vmem:[#allocation3 + $0x80] sm:$0xff] %vm1784_vm9, %v11991_v43 }
 0x16b   : > { %1804 = vst.msk [vmem:[#allocation3 + $0x90] sm:$0xff] %vm1784_vm9, %v11991_v43  ;;  %1805 = vst.msk [vmem:[#allocation3 + $0x98] sm:$0xff] %vm1784_vm9, %v11991_v43 }
 0x16c   : > { %v780_v36 = vpop.permute.xlu1 %779  ;;  %v1269_v25 = vpop.permute.xlu0 %1268  ;;  %1806 = vst.msk [vmem:[#allocation3 + $0xa0] sm:$0x3] %vm1787_vm10, %v11991_v43  ;;  %1809 = vst.msk [vmem:[#allocation3 + $0xb8] sm:$0x3] %vm1787_vm10, %v11991_v43 }
 0x16d   : > { %v1390_v28 = vsel %vm1381_vm7, %v1357_v52, %v1269_v25  ;;  %v7876_v34 = vsel %vm897_vm3, %v886_v19, %v780_v36  ;;  %1807 = vst.msk [vmem:[#allocation3 + $0xa8] sm:$0xff] %vm1784_vm9, %v11991_v43  ;;  %1808 = vst.msk [vmem:[#allocation3 + $0xb0] sm:$0xff] %vm1784_vm9, %v11991_v43 }
 0x16e   : > { %6521 = vmatprep.mubr.msk.f32.mxu0 %vm1426_vm8, %v1390_v28  ;;  %v1056_v20 = vrot.slane %v7876_v34, 1  ;;  %v1233_v16 = vrot.slane %v7876_v34, 2  ;;  %1810 = vst.msk [vmem:[#allocation3 + $0xc0] sm:$0xff] %vm1784_vm9, %v11991_v43  ;;  %1811 = vst.msk [vmem:[#allocation3 + $0xc8] sm:$0xff] %vm1784_vm9, %v11991_v43 }
 0x16f   : > { %1812 = vst.msk [vmem:[#allocation3 + $0xd0] sm:$0x3] %vm1787_vm10, %v11991_v43  ;;  %1815 = vst.msk [vmem:[#allocation3 + $0xe8] sm:$0x3] %vm1787_vm10, %v11991_v43 }
 0x170   : > { %v782_v0 = vpop.permute.xlu1 %781  ;;  %v778_v32 = vpop.permute.xlu0 %777  ;;  %1813 = vst.msk [vmem:[#allocation3 + $0xd8] sm:$0xff] %vm1784_vm9, %v11991_v43  ;;  %1814 = vst.msk [vmem:[#allocation3 + $0xe0] sm:$0xff] %vm1784_vm9, %v11991_v43 }
 0x171   : > { %v936_v57 = vsel %vm897_vm3, %v887_v6, %v782_v0  ;;  %v7884_v5 = vsel %vm897_vm3, %v885_v40, %v778_v32  ;;  %1816 = vst.msk [vmem:[#allocation3 + $0xf0] sm:$0xff] %vm1784_vm9, %v11991_v43  ;;  %1817 = vst.msk [vmem:[#allocation3 + $0xf8] sm:$0xff] %vm1784_vm9, %v11991_v43 }
 0x172   : > { %v1058_v30 = vrot.slane %v936_v57, 1  ;;  %v1055_v58 = vrot.slane %v7884_v5, 1  ;;  %v1235_v47 = vrot.slane %v936_v57, 2  ;;  %v1232_v41 = vrot.slane %v7884_v5, 2  ;;  %1818 = vst.msk [vmem:[#allocation3 + $0x100] sm:$0x3] %vm1787_vm10, %v11991_v43 }
 0x173   : > { %1819 = vst.msk [vmem:[#allocation3 + $0x108] sm:$0xff] %vm1784_vm9, %v11991_v43  ;;  %1820 = vst.msk [vmem:[#allocation3 + $0x110] sm:$0xff] %vm1784_vm9, %v11991_v43 }
 0x174   : > { %v7891_v27 = vpop.permute.xlu1 %636  ;;  %v1271_v33 = vpop.permute.xlu0 %1270  ;;  %v1059_v63 = vsel %vm994_vm4, %v1056_v20, %v1058_v30  ;;  %v1057_v56 = vsel %vm994_vm4, %v1055_v58, %v1056_v20  ;;  %v1236_v3 = vsel %vm1171_vm5, %v1233_v16, %v1235_v47  ;;  %v1234_v38 = vsel %vm1171_vm5, %v1232_v41, %v1233_v16  ;;  %1821 = vst.msk [vmem:[#allocation3 + $0x118] sm:$0x3] %vm1787_vm10, %v11991_v43  ;;  %v11992_v58 = vld [vmem:[#allocation7_spill] sm:$0xff]  ;;  %v11993_v41 = vld [vmem:[#allocation9_spill] sm:$0xff] }
 0x175   : > { %v1391_v15 = vsel %vm1381_vm7, %v1358_v48, %v1271_v33  ;;  %1125 = vrot.lane.b32.xlu1 %v1059_v63, %s6937_s29  ;;  %1123 = vrot.lane.b32.xlu0 %v1057_v56, %s6937_s29  ;;  %1822 = vst.msk [vmem:[#allocation3 + $0x120] sm:$0xff] %vm1784_vm9, %v11991_v43  ;;  %1823 = vst.msk [vmem:[#allocation3 + $0x128] sm:$0xff] %vm1784_vm9, %v11991_v43  ;;  %v11994_v33 = vld [vmem:[#allocation8_spill] sm:$0xff] }
 0x176   : > { %6522 = vmatmul.mubr.msk.f32.gmra.mrb[8].mxu0 %vm1426_vm8, %v1391_v15  ;;  %1824 = vst.msk [vmem:[#allocation3 + $0x130] sm:$0x3] %vm1787_vm10, %v11991_v43  ;;  %1827 = vst.msk [vmem:[#allocation3 + $0x148] sm:$0x3] %vm1787_vm10, %v11991_v43 }
 0x177   : > { %1825 = vst.msk [vmem:[#allocation3 + $0x138] sm:$0xff] %vm1784_vm9, %v11991_v43  ;;  %1826 = vst.msk [vmem:[#allocation3 + $0x140] sm:$0xff] %vm1784_vm9, %v11991_v43 }
 0x178   : > { %v7900_v37 = vpop.permute.xlu1 %1097  ;;  %v1096_v21 = vpop.permute.xlu0 %1095  ;;  %1828 = vst.msk [vmem:[#allocation3 + $0x150] sm:$0xff] %vm1784_vm9, %v11991_v43  ;;  %1829 = vst.msk [vmem:[#allocation3 + $0x158] sm:$0xff] %vm1784_vm9, %v11991_v43 }
 0x179   : > { %1302 = vrot.lane.b32.xlu1 %v1236_v3, %s6938_s30  ;;  %1300 = vrot.lane.b32.xlu0 %v1234_v38, %s6938_s30  ;;  %v1359_v8 = vsel %vm1348_vm6, %v7582_v7, %v1096_v21  ;;  %1830 = vst.msk [vmem:[#allocation3 + $0x160] sm:$0x3] %vm1787_vm10, %v11991_v43  ;;  %1833 = vst.msk [vmem:[#allocation3 + $0x178] sm:$0x3] %vm1787_vm10, %v11991_v43  ;;  %v11995_v38 = vld [vmem:[#allocation13_spill] sm:$0xff] }
 0x17a   : > { %1831 = vst.msk [vmem:[#allocation3 + $0x168] sm:$0xff] %vm1784_vm9, %v11991_v43  ;;  %1832 = vst.msk [vmem:[#allocation3 + $0x170] sm:$0xff] %vm1784_vm9, %v11991_v43 }
 0x17b   : > { %1834 = vst.msk [vmem:[#allocation3 + $0x180] sm:$0xff] %vm1784_vm9, %v11991_v43  ;;  %1835 = vst.msk [vmem:[#allocation3 + $0x188] sm:$0xff] %vm1784_vm9, %v11991_v43 }
 0x17c   : > { %v7906_v54 = vpop.permute.xlu1 %640  ;;  %v639_v18 = vpop.permute.xlu0 %638  ;;  %1836 = vst.msk [vmem:[#allocation3 + $0x190] sm:$0x3] %vm1787_vm10, %v11991_v43  ;;  %1839 = vst.msk [vmem:[#allocation3 + $0x1a8] sm:$0x3] %vm1787_vm10, %v11991_v43 }
 0x17d   : > { %v889_v9 = vsel %vm367_vm0, %v7516_v14, %v639_v18  ;;  %1837 = vst.msk [vmem:[#allocation3 + $0x198] sm:$0xff] %vm1784_vm9, %v11991_v43  ;;  %1838 = vst.msk [vmem:[#allocation3 + $0x1a0] sm:$0xff] %vm1784_vm9, %v11991_v43  ;;  %v888_v14 = vsel %vm367_vm0, %v7530_v26, %v7891_v27  ;;  %v890_v7 = vsel %vm367_vm0, %v7528_v29, %v7906_v54 }
 0x17e   : > { %4806 = vst.msk [vmem:[#allocation5] sm:$0xff] %vm1784_vm9, %v11991_v43  ;;  %4807 = vst.msk [vmem:[#allocation5 + $0x8] sm:$0xff] %vm1784_vm9, %v11991_v43  ;;  %v1360_v26 = vsel %vm1348_vm6, %v7586_v39, %v7900_v37 }
 0x17f   : > { %4808 = vst.msk [vmem:[#allocation5 + $0x10] sm:$0x3] %vm1787_vm10, %v11991_v43  ;;  %4811 = vst.msk [vmem:[#allocation5 + $0x28] sm:$0x3] %vm1787_vm10, %v11991_v43 }
 0x180   : > { %v786_v1 = vpop.permute.xlu1 %785  ;;  %v1273_v55 = vpop.permute.xlu0 %1272  ;;  %4809 = vst.msk [vmem:[#allocation5 + $0x18] sm:$0xff] %vm1784_vm9, %v11991_v43  ;;  %4810 = vst.msk [vmem:[#allocation5 + $0x20] sm:$0xff] %vm1784_vm9, %v11991_v43 }
 0x181   : > { %v1392_v10 = vsel %vm1381_vm7, %v1359_v8, %v1273_v55  ;;  %v7915_v4 = vsel %vm897_vm3, %v889_v9, %v786_v1  ;;  %4812 = vst.msk [vmem:[#allocation5 + $0x30] sm:$0xff] %vm1784_vm9, %v11991_v43  ;;  %4813 = vst.msk [vmem:[#allocation5 + $0x38] sm:$0xff] %vm1784_vm9, %v11991_v43 }
 0x182   : > { %6524 = vmatprep.mubr.msk.f32.mxu0 %vm1426_vm8, %v1392_v10  ;;  %4814 = vst.msk [vmem:[#allocation5 + $0x40] sm:$0x3] %vm1787_vm10, %v11991_v43  ;;  %4817 = vst.msk [vmem:[#allocation5 + $0x58] sm:$0x3] %vm1787_vm10, %v11991_v43  ;;  %v1061_v24 = vrot.slane %v7915_v4, 1  ;;  %v1238_v25 = vrot.slane %v7915_v4, 2 }
 0x183   : > { %4815 = vst.msk [vmem:[#allocation5 + $0x48] sm:$0xff] %vm1784_vm9, %v11991_v43  ;;  %4816 = vst.msk [vmem:[#allocation5 + $0x50] sm:$0xff] %vm1784_vm9, %v11991_v43 }
 0x184   : > { %4818 = vst.msk [vmem:[#allocation5 + $0x60] sm:$0xff] %vm1784_vm9, %v11991_v43  ;;  %4819 = vst.msk [vmem:[#allocation5 + $0x68] sm:$0xff] %vm1784_vm9, %v11991_v43  ;;  %v788_v12 = vpop.permute.xlu1 %787  ;;  %v784_v51 = vpop.permute.xlu0 %783 }
 0x185   : > { %4820 = vst.msk [vmem:[#allocation5 + $0x70] sm:$0x3] %vm1787_vm10, %v11991_v43  ;;  %4823 = vst.msk [vmem:[#allocation5 + $0x88] sm:$0x3] %vm1787_vm10, %v11991_v43  ;;  %v939_v61 = vsel %vm897_vm3, %v890_v7, %v788_v12  ;;  %v8141_v2 = vsel %vm897_vm3, %v888_v14, %v784_v51 }
 0x186   : > { %4821 = vst.msk [vmem:[#allocation5 + $0x78] sm:$0xff] %vm1784_vm9, %v11991_v43  ;;  %4822 = vst.msk [vmem:[#allocation5 + $0x80] sm:$0xff] %vm1784_vm9, %v11991_v43  ;;  %v1063_v62 = vrot.slane %v939_v61, 1  ;;  %v1060_v45 = vrot.slane %v8141_v2, 1  ;;  %v1240_v42 = vrot.slane %v939_v61, 2  ;;  %v1237_v22 = vrot.slane %v8141_v2, 2 }
 0x187   : > { %4824 = vst.msk [vmem:[#allocation5 + $0x90] sm:$0xff] %vm1784_vm9, %v11991_v43  ;;  %4825 = vst.msk [vmem:[#allocation5 + $0x98] sm:$0xff] %vm1784_vm9, %v11991_v43 }
 0x188   : > { %4826 = vst.msk [vmem:[#allocation5 + $0xa0] sm:$0x3] %vm1787_vm10, %v11991_v43  ;;  %4829 = vst.msk [vmem:[#allocation5 + $0xb8] sm:$0x3] %vm1787_vm10, %v11991_v43  ;;  %v643_v29 = vpop.permute.xlu1 %642  ;;  %v1275_v60 = vpop.permute.xlu0 %1274  ;;  %v1064_v59 = vsel %vm994_vm4, %v1061_v24, %v1063_v62  ;;  %v1062_v52 = vsel %vm994_vm4, %v1060_v45, %v1061_v24  ;;  %v1241_v19 = vsel %vm1171_vm5, %v1238_v25, %v1240_v42 }
 0x189   : > { %4827 = vst.msk [vmem:[#allocation5 + $0xa8] sm:$0xff] %vm1784_vm9, %v11991_v43  ;;  %4828 = vst.msk [vmem:[#allocation5 + $0xb0] sm:$0xff] %vm1784_vm9, %v11991_v43  ;;  %v1393_v36 = vsel %vm1381_vm7, %v1360_v26, %v1275_v60  ;;  %1129 = vrot.lane.b32.xlu1 %v1064_v59, %s6937_s29  ;;  %1127 = vrot.lane.b32.xlu0 %v1062_v52, %s6937_s29  ;;  %v1239_v40 = vsel %vm1171_vm5, %v1237_v22, %v1238_v25  ;;  %v11996_v60 = vld [vmem:[#allocation10_spill] sm:$0xff] }
 0x18a   : > { %4830 = vst.msk [vmem:[#allocation5 + $0xc0] sm:$0xff] %vm1784_vm9, %v11991_v43  ;;  %4831 = vst.msk [vmem:[#allocation5 + $0xc8] sm:$0xff] %vm1784_vm9, %v11991_v43  ;;  %6525 = vmatmul.mubr.msk.f32.gmra.mrb[10].mxu0 %vm1426_vm8, %v1393_v36  ;;  %v891_v27 = vsel %vm367_vm0, %v11993_v41, %v643_v29  ;;  %v11997_v36 = vld [vmem:[#allocation12_spill] sm:$0xff] }
 0x18b   : > { %4832 = vst.msk [vmem:[#allocation5 + $0xd0] sm:$0x3] %vm1787_vm10, %v11991_v43  ;;  %4835 = vst.msk [vmem:[#allocation5 + $0xe8] sm:$0x3] %vm1787_vm10, %v11991_v43 }
 0x18c   : > { %4833 = vst.msk [vmem:[#allocation5 + $0xd8] sm:$0xff] %vm1784_vm9, %v11991_v43  ;;  %4834 = vst.msk [vmem:[#allocation5 + $0xe0] sm:$0xff] %vm1784_vm9, %v11991_v43  ;;  %v1102_v39 = vpop.permute.xlu1 %1101  ;;  %v1100_v28 = vpop.permute.xlu0 %1099 }
 0x18d   : > { %4836 = vst.msk [vmem:[#allocation5 + $0xf0] sm:$0xff] %vm1784_vm9, %v11991_v43  ;;  %4837 = vst.msk [vmem:[#allocation5 + $0xf8] sm:$0xff] %vm1784_vm9, %v11991_v43  ;;  %1306 = vrot.lane.b32.xlu1 %v1241_v19, %s6938_s30  ;;  %1304 = vrot.lane.b32.xlu0 %v1239_v40, %s6938_s30  ;;  %v1361_v32 = vsel %vm1348_vm6, %v7643_v11, %v1100_v28  ;;  %v1362_v54 = vsel %vm1348_vm6, %v11995_v38, %v1102_v39  ;;  %v11998_v39 = vld [vmem:[#allocation11_spill] sm:$0xff] }
 0x18e   : > { %4838 = vst.msk [vmem:[#allocation5 + $0x100] sm:$0x3] %vm1787_vm10, %v11991_v43  ;;  %4841 = vst.msk [vmem:[#allocation5 + $0x118] sm:$0x3] %vm1787_vm10, %v11991_v43 }
 0x18f   : > { %4839 = vst.msk [vmem:[#allocation5 + $0x108] sm:$0xff] %vm1784_vm9, %v11991_v43  ;;  %4840 = vst.msk [vmem:[#allocation5 + $0x110] sm:$0xff] %vm1784_vm9, %v11991_v43 }
 0x190   : > { %4842 = vst.msk [vmem:[#allocation5 + $0x120] sm:$0xff] %vm1784_vm9, %v11991_v43  ;;  %4843 = vst.msk [vmem:[#allocation5 + $0x128] sm:$0xff] %vm1784_vm9, %v11991_v43  ;;  %v647_v6 = vpop.permute.xlu1 %646  ;;  %v645_v0 = vpop.permute.xlu0 %644 }
 0x191   : > { %4844 = vst.msk [vmem:[#allocation5 + $0x130] sm:$0x3] %vm1787_vm10, %v11991_v43  ;;  %4847 = vst.msk [vmem:[#allocation5 + $0x148] sm:$0x3] %vm1787_vm10, %v11991_v43  ;;  %v892_v48 = vsel %vm367_vm0, %v11992_v58, %v645_v0  ;;  %v893_v63 = vsel %vm367_vm0, %v11994_v33, %v647_v6 }
 0x192   : > { %4845 = vst.msk [vmem:[#allocation5 + $0x138] sm:$0xff] %vm1784_vm9, %v11991_v43  ;;  %4846 = vst.msk [vmem:[#allocation5 + $0x140] sm:$0xff] %vm1784_vm9, %v11991_v43 }
 0x193   : > { %4848 = vst.msk [vmem:[#allocation5 + $0x150] sm:$0xff] %vm1784_vm9, %v11991_v43  ;;  %4849 = vst.msk [vmem:[#allocation5 + $0x158] sm:$0xff] %vm1784_vm9, %v11991_v43 }
 0x194   : > { %4850 = vst.msk [vmem:[#allocation5 + $0x160] sm:$0x3] %vm1787_vm10, %v11991_v43  ;;  %4853 = vst.msk [vmem:[#allocation5 + $0x178] sm:$0x3] %vm1787_vm10, %v11991_v43  ;;  %v792_v57 = vpop.permute.xlu1 %791  ;;  %v1277_v20 = vpop.permute.xlu0 %1276 }
 0x195   : > { %4851 = vst.msk [vmem:[#allocation5 + $0x168] sm:$0xff] %vm1784_vm9, %v11991_v43  ;;  %4852 = vst.msk [vmem:[#allocation5 + $0x170] sm:$0xff] %vm1784_vm9, %v11991_v43  ;;  %v1394_v30 = vsel %vm1381_vm7, %v1361_v32, %v1277_v20  ;;  %v8167_v47 = vsel %vm897_vm3, %v892_v48, %v792_v57 }
 0x196   : > { %4854 = vst.msk [vmem:[#allocation5 + $0x180] sm:$0xff] %vm1784_vm9, %v11991_v43  ;;  %4855 = vst.msk [vmem:[#allocation5 + $0x188] sm:$0xff] %vm1784_vm9, %v11991_v43  ;;  %6527 = vmatprep.mubr.msk.f32.mxu0 %vm1426_vm8, %v1394_v30  ;;  %v1066_v37 = vrot.slane %v8167_v47, 1  ;;  %v1243_v7 = vrot.slane %v8167_v47, 2 }
 0x197   : > { %4856 = vst.msk [vmem:[#allocation5 + $0x190] sm:$0x3] %vm1787_vm10, %v11991_v43  ;;  %4859 = vst.msk [vmem:[#allocation5 + $0x1a8] sm:$0x3] %vm1787_vm10, %v11991_v43 }
 0x198   : > { %4857 = vst.msk [vmem:[#allocation5 + $0x198] sm:$0xff] %vm1784_vm9, %v11991_v43  ;;  %4858 = vst.msk [vmem:[#allocation5 + $0x1a0] sm:$0xff] %vm1784_vm9, %v11991_v43  ;;  %v794_v56 = vpop.permute.xlu1 %793  ;;  %v790_v11 = vpop.permute.xlu0 %789 }
 0x199   : > { %v942_v15 = vsel %vm897_vm3, %v893_v63, %v794_v56  ;;  %v8175_v16 = vsel %vm897_vm3, %v891_v27, %v790_v11  ;;  %3175 = vst.msk [vmem:[#allocation4] sm:$0xff] %vm2314_vm11, %v11991_v43  ;;  %3176 = vst.msk [vmem:[#allocation4 + $0x8] sm:$0xff] %vm2314_vm11, %v11991_v43 }
 0x19a   : > { %v1068_v21 = vrot.slane %v942_v15, 1  ;;  %v1065_v3 = vrot.slane %v8175_v16, 1  ;;  %v1245_v18 = vrot.slane %v942_v15, 2  ;;  %v1242_v8 = vrot.slane %v8175_v16, 2  ;;  %3179 = vst.msk [vmem:[#allocation4 + $0x18] sm:$0xff] %vm2314_vm11, %v11991_v43  ;;  %3180 = vst.msk [vmem:[#allocation4 + $0x20] sm:$0xff] %vm2314_vm11, %v11991_v43 }
 0x19b   : > { %3182 = vst.msk [vmem:[#allocation4 + $0x30] sm:$0xff] %vm2314_vm11, %v11991_v43  ;;  %3183 = vst.msk [vmem:[#allocation4 + $0x38] sm:$0xff] %vm2314_vm11, %v11991_v43 }
 0x19c   : > { %v649_v1 = vpop.permute.xlu1 %648  ;;  %v1279_v55 = vpop.permute.xlu0 %1278  ;;  %v1069_v10 = vsel %vm994_vm4, %v1066_v37, %v1068_v21  ;;  %v1067_v9 = vsel %vm994_vm4, %v1065_v3, %v1066_v37  ;;  %v1246_v61 = vsel %vm1171_vm5, %v1243_v7, %v1245_v18  ;;  %v1244_v24 = vsel %vm1171_vm5, %v1242_v8, %v1243_v7  ;;  %3185 = vst.msk [vmem:[#allocation4 + $0x48] sm:$0xff] %vm2314_vm11, %v11991_v43 }
 0x19d   : > { %v1395_v14 = vsel %vm1381_vm7, %v1362_v54, %v1279_v55  ;;  %1133 = vrot.lane.b32.xlu1 %v1069_v10, %s6937_s29  ;;  %1131 = vrot.lane.b32.xlu0 %v1067_v9, %s6937_s29  ;;  %v894_v25 = vsel %vm367_vm0, %v11997_v36, %v649_v1  ;;  %3186 = vst.msk [vmem:[#allocation4 + $0x50] sm:$0xff] %vm2314_vm11, %v11991_v43  ;;  %3188 = vst.msk [vmem:[#allocation4 + $0x60] sm:$0xff] %vm2314_vm11, %v11991_v43 }
 0x19e   : > { %6528 = vmatmul.mubr.msk.f32.gmra.mrb[12].mxu0 %vm1426_vm8, %v1395_v14  ;;  %3189 = vst.msk [vmem:[#allocation4 + $0x68] sm:$0xff] %vm2314_vm11, %v11991_v43  ;;  %3191 = vst.msk [vmem:[#allocation4 + $0x78] sm:$0xff] %vm2314_vm11, %v11991_v43 }
 0x19f   : > { %3192 = vst.msk [vmem:[#allocation4 + $0x80] sm:$0xff] %vm2314_vm11, %v11991_v43  ;;  %3194 = vst.msk [vmem:[#allocation4 + $0x90] sm:$0xff] %vm2314_vm11, %v11991_v43 }
 0x1a0   : > { %v1106_v12 = vpop.permute.xlu1 %1105  ;;  %v1104_v51 = vpop.permute.xlu0 %1103  ;;  %3195 = vst.msk [vmem:[#allocation4 + $0x98] sm:$0xff] %vm2314_vm11, %v11991_v43  ;;  %3197 = vst.msk [vmem:[#allocation4 + $0xa8] sm:$0xff] %vm2314_vm11, %v11991_v43 }
 0x1a1   : > { %1310 = vrot.lane.b32.xlu1 %v1246_v61, %s6938_s30  ;;  %1308 = vrot.lane.b32.xlu0 %v1244_v24, %s6938_s30  ;;  %v1363_v26 = vsel %vm1348_vm6, %v7695_v46, %v1104_v51  ;;  %v1364_v20 = vsel %vm1348_vm6, %v7701_v50, %v1106_v12  ;;  %3198 = vst.msk [vmem:[#allocation4 + $0xb0] sm:$0xff] %vm2314_vm11, %v11991_v43  ;;  %3200 = vst.msk [vmem:[#allocation4 + $0xc0] sm:$0xff] %vm2314_vm11, %v11991_v43 }
 0x1a2   : > { %3201 = vst.msk [vmem:[#allocation4 + $0xc8] sm:$0xff] %vm2314_vm11, %v11991_v43  ;;  %3203 = vst.msk [vmem:[#allocation4 + $0xd8] sm:$0xff] %vm2314_vm11, %v11991_v43 }
 0x1a3   : > { %3204 = vst.msk [vmem:[#allocation4 + $0xe0] sm:$0xff] %vm2314_vm11, %v11991_v43  ;;  %3206 = vst.msk [vmem:[#allocation4 + $0xf0] sm:$0xff] %vm2314_vm11, %v11991_v43 }
 0x1a4   : > { %v653_v62 = vpop.permute.xlu1 %652  ;;  %v651_v45 = vpop.permute.xlu0 %650  ;;  %3207 = vst.msk [vmem:[#allocation4 + $0xf8] sm:$0xff] %vm2314_vm11, %v11991_v43  ;;  %3209 = vst.msk [vmem:[#allocation4 + $0x108] sm:$0xff] %vm2314_vm11, %v11991_v43 }
 0x1a5   : > { %v895_v59 = vsel %vm367_vm0, %v11996_v60, %v651_v45  ;;  %v896_v28 = vsel %vm367_vm0, %v11998_v39, %v653_v62  ;;  %3210 = vst.msk [vmem:[#allocation4 + $0x110] sm:$0xff] %vm2314_vm11, %v11991_v43  ;;  %3212 = vst.msk [vmem:[#allocation4 + $0x120] sm:$0xff] %vm2314_vm11, %v11991_v43  ;;  %vm6192_vm0 = vcmask 7168  }
 0x1a6   : > { %3213 = vst.msk [vmem:[#allocation4 + $0x128] sm:$0xff] %vm2314_vm11, %v11991_v43  ;;  %3215 = vst.msk [vmem:[#allocation4 + $0x138] sm:$0xff] %vm2314_vm11, %v11991_v43 }
 0x1a7   : > { %3216 = vst.msk [vmem:[#allocation4 + $0x140] sm:$0xff] %vm2314_vm11, %v11991_v43  ;;  %3218 = vst.msk [vmem:[#allocation4 + $0x150] sm:$0xff] %vm2314_vm11, %v11991_v43 }
 0x1a8   : > { %v798_v42 = vpop.permute.xlu1 %797  ;;  %v1281_v22 = vpop.permute.xlu0 %1280  ;;  %3219 = vst.msk [vmem:[#allocation4 + $0x158] sm:$0xff] %vm2314_vm11, %v11991_v43  ;;  %3221 = vst.msk [vmem:[#allocation4 + $0x168] sm:$0xff] %vm2314_vm11, %v11991_v43 }
 0x1a9   : > { %v1396_v29 = vsel %vm1381_vm7, %v1363_v26, %v1281_v22  ;;  %v8200_v52 = vsel %vm897_vm3, %v895_v59, %v798_v42  ;;  %3222 = vst.msk [vmem:[#allocation4 + $0x170] sm:$0xff] %vm2314_vm11, %v11991_v43  ;;  %3224 = vst.msk [vmem:[#allocation4 + $0x180] sm:$0xff] %vm2314_vm11, %v11991_v43 }
 0x1aa   : > { %6530 = vmatprep.mubr.msk.f32.mxu0 %vm1426_vm8, %v1396_v29  ;;  %v1071_v0 = vrot.slane %v8200_v52, 1  ;;  %v1248_v56 = vrot.slane %v8200_v52, 2  ;;  %3225 = vst.msk [vmem:[#allocation4 + $0x188] sm:$0xff] %vm2314_vm11, %v11991_v43  ;;  %3227 = vst.msk [vmem:[#allocation4 + $0x198] sm:$0xff] %vm2314_vm11, %v11991_v43 }
 0x1ab   : > { %3228 = vst.msk [vmem:[#allocation4 + $0x1a0] sm:$0xff] %vm2314_vm11, %v11991_v43 }
 0x1ac   : > { %v800_v19 = vpop.permute.xlu1 %799  ;;  %v796_v46 = vpop.permute.xlu0 %795 }
 0x1ad   : > { %v945_v40 = vsel %vm897_vm3, %v896_v28, %v800_v19  ;;  %v8208_v6 = vsel %vm897_vm3, %v894_v25, %v796_v46 }
 0x1ae   : > { %v1073_v32 = vrot.slane %v945_v40, 1  ;;  %v1070_v57 = vrot.slane %v8208_v6, 1  ;;  %v1250_v30 = vrot.slane %v945_v40, 2  ;;  %v1247_v58 = vrot.slane %v8208_v6, 2 }
 0x1b0   : > { %v1110_v48 = vpop.permute.xlu1 %1109  ;;  %v1283_v41 = vpop.permute.xlu0 %1282  ;;  %v1074_v27 = vsel %vm994_vm4, %v1071_v0, %v1073_v32  ;;  %v1072_v33 = vsel %vm994_vm4, %v1070_v57, %v1071_v0  ;;  %v1251_v15 = vsel %vm1171_vm5, %v1248_v56, %v1250_v30  ;;  %v1249_v37 = vsel %vm1171_vm5, %v1247_v58, %v1248_v56  ;;  %v8269_v0 = vld [vmem:[%s11906_s2] ss:$0 sm:$0xff] }
 0x1b1   : > { %v1397_v63 = vsel %vm1381_vm7, %v1364_v20, %v1283_v41  ;;  %1137 = vrot.lane.b32.xlu1 %v1074_v27, %s6937_s29  ;;  %1135 = vrot.lane.b32.xlu0 %v1072_v33, %s6937_s29  ;;  %v1366_v54 = vsel %vm1348_vm6, %v7743_v23, %v1110_v48 }
 0x1b2   : > { %6531 = vmatmul.mubr.msk.f32.gmra.mrb[14].mxu0 %vm1426_vm8, %v1397_v63 }
 0x1b4   : > { %v1287_v50 = vpop.permute.xlu1 %1286  ;;  %v1108_v11 = vpop.permute.xlu0 %1107 }
 0x1b5   : > { %1314 = vrot.lane.b32.xlu1 %v1251_v15, %s6938_s30  ;;  %1312 = vrot.lane.b32.xlu0 %v1249_v37, %s6938_s30  ;;  %v1365_v21 = vsel %vm1348_vm6, %v7752_v13, %v1108_v11  ;;  %v1399_v8 = vsel %vm1381_vm7, %v1366_v54, %v1287_v50 }
 0x1b8   : > { %v1114_v3 = vpop.permute.xlu1 %1113  ;;  %v1285_v38 = vpop.permute.xlu0 %1284 }
 0x1b9   : > { %v1398_v18 = vsel %vm1381_vm7, %v1365_v21, %v1285_v38  ;;  %v1368_v13 = vsel %vm1348_vm6, %v7779_v31, %v1114_v3 }
 0x1ba   : > { %6533 = vmatprep.mubr.msk.f32.mxu0 %vm1426_vm8, %v1398_v18 }
 0x1bb   : > { %6534 = vmatmul.mubr.msk.f32.gmra.mrb[16].mxu0 %vm1426_vm8, %v1399_v8 }
 0x1bc   : > { %v1291_v1 = vpop.permute.xlu1 %1290  ;;  %v1112_v55 = vpop.permute.xlu0 %1111 }
 0x1bd   : > { %v1367_v10 = vsel %vm1348_vm6, %v7785_v35, %v1112_v55  ;;  %v1401_v7 = vsel %vm1381_vm7, %v1368_v13, %v1291_v1 }
 0x1c0   : > { %v1289_v9 = vpop.permute.xlu0 %1288  ;;  %v1118_v14 = vpop.permute.xlu1 %1117 }
 0x1c1   : > { %v1400_v23 = vsel %vm1381_vm7, %v1367_v10, %v1289_v9  ;;  %v1370_v35 = vsel %vm1348_vm6, %v7802_v53, %v1118_v14 }
 0x1c2   : > { %6536 = vmatprep.mubr.msk.f32.mxu0 %vm1426_vm8, %v1400_v23 }
 0x1c3   : > { %6537 = vmatmul.mubr.msk.f32.gmra.mrb[18].mxu0 %vm1426_vm8, %v1401_v7 }
 0x1c4   : > { %v1116_v12 = vpop.permute.xlu0 %1115  ;;  %v1295_v51 = vpop.permute.xlu1 %1294 }
 0x1c5   : > { %v1369_v61 = vsel %vm1348_vm6, %v7815_v17, %v1116_v12  ;;  %v1403_v62 = vsel %vm1381_vm7, %v1370_v35, %v1295_v51 }
 0x1c8   : > { %v1293_v24 = vpop.permute.xlu0 %1292 }
 0x1c9   : > { %v1402_v31 = vsel %vm1381_vm7, %v1369_v61, %v1293_v24 }
 0x1ca   : > { %6539 = vmatprep.mubr.msk.f32.mxu0 %vm1426_vm8, %v1402_v31 }
 0x1cb   : > { %6540 = vmatmul.mubr.msk.f32.gmra.mrb[20].mxu0 %vm1426_vm8, %v1403_v62 }
 0x1d3   : > { %v1122_v45 = vpop.permute.xlu1 %1121  ;;  %v1120_v26 = vpop.permute.xlu0 %1119 }
 0x1d4   : > { %v1372_v42 = vsel %vm1348_vm6, %v7843_v49, %v1122_v45  ;;  %v1371_v17 = vsel %vm1348_vm6, %v7851_v44, %v1120_v26 }
 0x1d7   : > { %v1299_v22 = vpop.permute.xlu1 %1298  ;;  %v1297_v29 = vpop.permute.xlu0 %1296 }
 0x1d8   : > { %v1405_v53 = vsel %vm1381_vm7, %v1372_v42, %v1299_v22  ;;  %v1404_v60 = vsel %vm1381_vm7, %v1371_v17, %v1297_v29 }
 0x1d9   : > { %6542 = vmatprep.mubr.msk.f32.mxu0 %vm1426_vm8, %v1404_v60 }
 0x1da   : > { %6543 = vmatmul.mubr.msk.f32.gmra.mrb[22].mxu0 %vm1426_vm8, %v1405_v53 }
 0x1e7   : > { %v1126_v59 = vpop.permute.xlu1 %1125  ;;  %v1124_v36 = vpop.permute.xlu0 %1123 }
 0x1e8   : > { %v1374_v25 = vsel %vm1348_vm6, %v7876_v34, %v1126_v59  ;;  %v1373_v49 = vsel %vm1348_vm6, %v7884_v5, %v1124_v36 }
 0x1eb   : > { %v1303_v39 = vpop.permute.xlu1 %1302  ;;  %v1301_v44 = vpop.permute.xlu0 %1300 }
 0x1ec   : > { %v1407_v28 = vsel %vm1381_vm7, %v1374_v25, %v1303_v39  ;;  %v1406_v19 = vsel %vm1381_vm7, %v1373_v49, %v1301_v44 }
 0x1ed   : > { %6545 = vmatprep.mubr.msk.f32.mxu0 %vm1426_vm8, %v1406_v19 }
 0x1ee   : > { %6546 = vmatmul.mubr.msk.f32.gmra.mrb[24].mxu0 %vm1426_vm8, %v1407_v28 }
 0x1fb   : > { %v1130_v46 = vpop.permute.xlu1 %1129  ;;  %v1128_v40 = vpop.permute.xlu0 %1127 }
 0x1fc   : > { %v1376_v34 = vsel %vm1348_vm6, %v7915_v4, %v1130_v46  ;;  %v1375_v57 = vsel %vm1348_vm6, %v8141_v2, %v1128_v40 }
 0x1ff   : > { %v6511_v5 = vpop.f32.mrb[0].mxu0  ;;  %v1307_v32 = vpop.permute.xlu1 %1306 }
 0x200   : > { %v1599_v20 = vadd.f32 %v6511_v5, %v8269_v0  ;;  %v1593_v30 = vpop.f32.mrb[1].mxu0  ;;  %v1409_v58 = vsel %vm1381_vm7, %v1376_v34, %v1307_v32  ;;  %v1305_v48 = vpop.permute.xlu0 %1304 }
 0x201   : > { %v1594_v41 = vadd.f32 %v8269_v0, %v1593_v30  ;;  %v1408_v27 = vsel %vm1381_vm7, %v1375_v57, %v1305_v48 }
 0x202   : > { %v1753_v33 = vmax.f32 %v1599_v20, 0.0  ;;  %6548 = vmatprep.mubr.msk.f32.mxu0 %vm1426_vm8, %v1408_v27 }
 0x203   : > { %v1752_v63 = vmax.f32 %v1594_v41, 0.0  ;;  %6549 = vmatmul.mubr.msk.f32.gmra.mrb[26].mxu0 %vm1426_vm8, %v1409_v58 }
 0x204   : > { %1842 = vst.msk [vmem:[#allocation3 + $0x21] sm:$0xff] %vm1784_vm9, %v1753_v33 }
 0x205   : > { %1841 = vst.msk [vmem:[#allocation3 + $0x19] sm:$0xff] %vm1784_vm9, %v1752_v63 }
 0x20b   : > { %v8283_v4 = vld [vmem:[#allocation3 + $0x28] sm:$0x3] }
 0x20c   : > { %1979 = vrot.lane.b32.xlu0 %v8283_v4, %s6939_s14  ;;  %v8287_v2 = vld [vmem:[#allocation3 + $0x20] sm:$0xff]  ;;  %v8364_v37 = vld [vmem:[#allocation3 + $0x18] sm:$0xff] }
 0x20d   : > { %1977 = vrot.lane.b32.xlu1 %v8287_v2, %s6939_s14 }
 0x20e   : > { %v6514_v56 = vpop.f32.mrb[2].mxu0 }
 0x20f   : > { %v1609_v50 = vadd.f32 %v6514_v56, %v8269_v0  ;;  %v1603_v11 = vpop.f32.mrb[3].mxu0  ;;  %v1134_v15 = vpop.permute.xlu1 %1133 }
 0x210   : > { %v1604_v21 = vadd.f32 %v8269_v0, %v1603_v11  ;;  %1975 = vrot.lane.b32.xlu0 %v8364_v37, %s6939_s14  ;;  %v1132_v3 = vpop.permute.xlu0 %1131  ;;  %v1378_v18 = vsel %vm1348_vm6, %v8167_v47, %v1134_v15 }
 0x211   : > { %v1755_v38 = vmax.f32 %v1609_v50, 0.0  ;;  %v1377_v1 = vsel %vm1348_vm6, %v8175_v16, %v1132_v3 }
 0x212   : > { %v1754_v54 = vmax.f32 %v1604_v21, 0.0 }
 0x213   : > { %1844 = vst.msk [vmem:[#allocation3 + $0x39] sm:$0xff] %vm1784_vm9, %v1755_v38  ;;  %v1311_v8 = vpop.permute.xlu1 %1310 }
 0x214   : > { %1843 = vst.msk [vmem:[#allocation3 + $0x31] sm:$0xff] %vm1784_vm9, %v1754_v54  ;;  %v1411_v55 = vsel %vm1381_vm7, %v1378_v18, %v1311_v8  ;;  %v1309_v10 = vpop.permute.xlu0 %1308 }
 0x215   : > { %v1410_v9 = vsel %vm1381_vm7, %v1377_v1, %v1309_v10 }
 0x216   : > { %6551 = vmatprep.mubr.msk.f32.mxu0 %vm1426_vm8, %v1410_v9 }
 0x217   : > { %6552 = vmatmul.mubr.msk.f32.gmra.mrb[28].mxu0 %vm1426_vm8, %v1411_v55 }
 0x21a   : > { %v8379_v13 = vld [vmem:[#allocation3 + $0x40] sm:$0x3] }
 0x21b   : > { %2126 = vrot.lane.b32.xlu1 %v8379_v13, %s6940_s15  ;;  %1985 = vrot.lane.b32.xlu0 %v8379_v13, %s6939_s14  ;;  %v8385_v47 = vld [vmem:[#allocation3 + $0x38] sm:$0xff]  ;;  %v8387_v16 = vld [vmem:[#allocation3 + $0x30] sm:$0xff] }
 0x21f   : > { %2124 = vrot.lane.b32.xlu1 %v8385_v47, %s6940_s15  ;;  %2122 = vrot.lane.b32.xlu0 %v8387_v16, %s6940_s15 }
 0x222   : > { %v6517_v14 = vpop.f32.mrb[4].mxu0 }
 0x223   : > { %v1619_v23 = vadd.f32 %v6517_v14, %v8269_v0  ;;  %v1613_v7 = vpop.f32.mrb[5].mxu0  ;;  %1983 = vrot.lane.b32.xlu1 %v8385_v47, %s6939_s14  ;;  %1981 = vrot.lane.b32.xlu0 %v8387_v16, %s6939_s14  ;;  %v1138_v12 = vpop.permute.xlu1 %1137 }
 0x224   : > { %v1614_v51 = vadd.f32 %v8269_v0, %v1613_v7  ;;  %v1136_v61 = vpop.permute.xlu0 %1135  ;;  %v1380_v31 = vsel %vm1348_vm6, %v8200_v52, %v1138_v12 }
 0x225   : > { %v1757_v24 = vmax.f32 %v1619_v23, 0.0  ;;  %v1379_v45 = vsel %vm1348_vm6, %v8208_v6, %v1136_v61 }
 0x226   : > { %v1756_v35 = vmax.f32 %v1614_v51, 0.0 }
 0x227   : > { %1846 = vst.msk [vmem:[#allocation3 + $0x51] sm:$0xff] %vm1784_vm9, %v1757_v24  ;;  %v1315_v62 = vpop.permute.xlu1 %1314 }
 0x228   : > { %1845 = vst.msk [vmem:[#allocation3 + $0x49] sm:$0xff] %vm1784_vm9, %v1756_v35  ;;  %v1413_v26 = vsel %vm1381_vm7, %v1380_v31, %v1315_v62  ;;  %v1313_v42 = vpop.permute.xlu0 %1312 }
 0x229   : > { %v1412_v17 = vsel %vm1381_vm7, %v1379_v45, %v1313_v42 }
 0x22a   : > { %6554 = vmatprep.mubr.msk.f32.mxu0 %vm1426_vm8, %v1412_v17 }
 0x22b   : > { %6555 = vmatmul.mubr.msk.f32.gmra.mrb[30].mxu0 %vm1426_vm8, %v1413_v26 }
 0x22e   : > { %v8409_v22 = vld [vmem:[#allocation3 + $0x58] sm:$0x3] }
 0x22f   : > { %2132 = vrot.lane.b32.xlu1 %v8409_v22, %s6940_s15  ;;  %1991 = vrot.lane.b32.xlu0 %v8409_v22, %s6939_s14  ;;  %v8415_v52 = vld [vmem:[#allocation3 + $0x50] sm:$0xff]  ;;  %v8417_v6 = vld [vmem:[#allocation3 + $0x48] sm:$0xff] }
 0x233   : > { %2130 = vrot.lane.b32.xlu1 %v8415_v52, %s6940_s15  ;;  %2128 = vrot.lane.b32.xlu0 %v8417_v6, %s6940_s15 }
 0x235   : > { %v6520_v29 = vpop.f32.mrb[6].mxu0 }
 0x236   : > { %v1629_v53 = vadd.f32 %v6520_v29, %v8269_v0  ;;  %v1623_v60 = vpop.f32.mrb[7].mxu0 }
 0x237   : > { %v1624_v59 = vadd.f32 %v8269_v0, %v1623_v60  ;;  %1989 = vrot.lane.b32.xlu1 %v8415_v52, %s6939_s14  ;;  %1987 = vrot.lane.b32.xlu0 %v8417_v6, %s6939_s14 }
 0x238   : > { %v1759_v36 = vmax.f32 %v1629_v53, 0.0 }
 0x239   : > { %v1758_v25 = vmax.f32 %v1624_v59, 0.0 }
 0x23a   : > { %1848 = vst.msk [vmem:[#allocation3 + $0x69] sm:$0xff] %vm1784_vm9, %v1759_v36 }
 0x23b   : > { %1847 = vst.msk [vmem:[#allocation3 + $0x61] sm:$0xff] %vm1784_vm9, %v1758_v25 }
 0x241   : > { %v8431_v49 = vld [vmem:[#allocation3 + $0x70] sm:$0x3] }
 0x242   : > { %2138 = vrot.lane.b32.xlu1 %v8431_v49, %s6940_s15  ;;  %1997 = vrot.lane.b32.xlu0 %v8431_v49, %s6939_s14  ;;  %v8437_v39 = vld [vmem:[#allocation3 + $0x68] sm:$0xff]  ;;  %v8439_v44 = vld [vmem:[#allocation3 + $0x60] sm:$0xff] }
 0x246   : > { %2136 = vrot.lane.b32.xlu1 %v8437_v39, %s6940_s15  ;;  %2134 = vrot.lane.b32.xlu0 %v8439_v44, %s6940_s15 }
 0x249   : > { %v6523_v28 = vpop.f32.mrb[8].mxu0 }
 0x24a   : > { %v1639_v19 = vadd.f32 %v6523_v28, %v8269_v0  ;;  %v1633_v46 = vpop.f32.mrb[9].mxu0  ;;  %1995 = vrot.lane.b32.xlu1 %v8437_v39, %s6939_s14  ;;  %1993 = vrot.lane.b32.xlu0 %v8439_v44, %s6939_s14 }
 0x24b   : > { %v1634_v40 = vadd.f32 %v8269_v0, %v1633_v46 }
 0x24c   : > { %v1761_v34 = vmax.f32 %v1639_v19, 0.0 }
 0x24d   : > { %v1760_v5 = vmax.f32 %v1634_v40, 0.0 }
 0x24e   : > { %1850 = vst.msk [vmem:[#allocation3 + $0x81] sm:$0xff] %vm1784_vm9, %v1761_v34 }
 0x24f   : > { %1849 = vst.msk [vmem:[#allocation3 + $0x79] sm:$0xff] %vm1784_vm9, %v1760_v5 }
 0x255   : > { %v8453_v32 = vld [vmem:[#allocation3 + $0x88] sm:$0x3] }
 0x256   : > { %2144 = vrot.lane.b32.xlu1 %v8453_v32, %s6940_s15  ;;  %2003 = vrot.lane.b32.xlu0 %v8453_v32, %s6939_s14  ;;  %v8459_v57 = vld [vmem:[#allocation3 + $0x80] sm:$0xff]  ;;  %v8461_v20 = vld [vmem:[#allocation3 + $0x78] sm:$0xff] }
 0x25a   : > { %2142 = vrot.lane.b32.xlu1 %v8459_v57, %s6940_s15  ;;  %2140 = vrot.lane.b32.xlu0 %v8461_v20, %s6940_s15 }
 0x25d   : > { %v6526_v30 = vpop.f32.mrb[10].mxu0 }
 0x25e   : > { %v1649_v58 = vadd.f32 %v6526_v30, %v8269_v0  ;;  %v1643_v48 = vpop.f32.mrb[11].mxu0  ;;  %2001 = vrot.lane.b32.xlu1 %v8459_v57, %s6939_s14  ;;  %1999 = vrot.lane.b32.xlu0 %v8461_v20, %s6939_s14 }
 0x25f   : > { %v1644_v41 = vadd.f32 %v8269_v0, %v1643_v48 }
 0x260   : > { %v1763_v27 = vmax.f32 %v1649_v58, 0.0 }
 0x261   : > { %v1762_v33 = vmax.f32 %v1644_v41, 0.0 }
 0x262   : > { %1852 = vst.msk [vmem:[#allocation3 + $0x99] sm:$0xff] %vm1784_vm9, %v1763_v27 }
 0x263   : > { %1851 = vst.msk [vmem:[#allocation3 + $0x91] sm:$0xff] %vm1784_vm9, %v1762_v33 }
 0x269   : > { %v8475_v63 = vld [vmem:[#allocation3 + $0xa0] sm:$0x3] }
 0x26a   : > { %11999 = vst [vmem:[#allocation7_spill] sm:$0xff] %v8475_v63  ;;  %2150 = vrot.lane.b32.xlu1 %v8475_v63, %s6940_s15  ;;  %2009 = vrot.lane.b32.xlu0 %v8475_v63, %s6939_s14  ;;  %v8481_v56 = vld [vmem:[#allocation3 + $0x98] sm:$0xff]  ;;  %v8483_v50 = vld [vmem:[#allocation3 + $0x90] sm:$0xff] }
 0x26b   : > { %12000 = vst [vmem:[#allocation9_spill] sm:$0xff] %v8481_v56  ;;  %12001 = vst [vmem:[#allocation8_spill] sm:$0xff] %v8483_v50 }
 0x26e   : > { %2148 = vrot.lane.b32.xlu1 %v8481_v56, %s6940_s15  ;;  %2146 = vrot.lane.b32.xlu0 %v8483_v50, %s6940_s15 }
 0x271   : > { %v6529_v11 = vpop.f32.mrb[12].mxu0 }
 0x272   : > { %v1659_v15 = vadd.f32 %v6529_v11, %v8269_v0  ;;  %v1653_v21 = vpop.f32.mrb[13].mxu0  ;;  %2007 = vrot.lane.b32.xlu1 %v8481_v56, %s6939_s14  ;;  %2005 = vrot.lane.b32.xlu0 %v8483_v50, %s6939_s14 }
 0x273   : > { %v1654_v3 = vadd.f32 %v8269_v0, %v1653_v21 }
 0x274   : > { %v1765_v38 = vmax.f32 %v1659_v15, 0.0 }
 0x275   : > { %v1764_v54 = vmax.f32 %v1654_v3, 0.0 }
 0x276   : > { %1854 = vst.msk [vmem:[#allocation3 + $0xb1] sm:$0xff] %vm1784_vm9, %v1765_v38 }
 0x277   : > { %1853 = vst.msk [vmem:[#allocation3 + $0xa9] sm:$0xff] %vm1784_vm9, %v1764_v54 }
 0x27d   : > { %v8497_v18 = vld [vmem:[#allocation3 + $0xb8] sm:$0x3] }
 0x27e   : > { %12002 = vst [vmem:[#allocation13_spill] sm:$0xff] %v8497_v18  ;;  %2156 = vrot.lane.b32.xlu1 %v8497_v18, %s6940_s15  ;;  %2015 = vrot.lane.b32.xlu0 %v8497_v18, %s6939_s14  ;;  %v8503_v8 = vld [vmem:[#allocation3 + $0xb0] sm:$0xff]  ;;  %v8505_v1 = vld [vmem:[#allocation3 + $0xa8] sm:$0xff]  ;;  %v8539_v59 = vpop.permute.xlu0 %1979  ;;  %v2835_v18 = vld [vmem:[%s11907_s3 + $0x30] sm:$0xff] }
 0x27f   : > { %12003 = vst [vmem:[#allocation10_spill] sm:$0xff] %v8503_v8  ;;  %12004 = vst [vmem:[#allocation12_spill] sm:$0xff] %v8505_v1  ;;  %v8553_v19 = vpop.permute.xlu1 %1977 }
 0x282   : > { %2154 = vrot.lane.b32.xlu1 %v8503_v8, %s6940_s15  ;;  %2152 = vrot.lane.b32.xlu0 %v8505_v1, %s6940_s15  ;;  %v8556_v34 = vpop.permute.xlu0 %1975 }
 0x285   : > { %v6532_v55 = vpop.f32.mrb[14].mxu0 }
 0x286   : > { %v1669_v10 = vadd.f32 %v6532_v55, %v8269_v0  ;;  %2013 = vrot.lane.b32.xlu1 %v8503_v8, %s6939_s14  ;;  %2011 = vrot.lane.b32.xlu0 %v8505_v1, %s6939_s14  ;;  %v1663_v9 = vpop.f32.mrb[15].mxu0  ;;  %v2841_v1 = vld [vmem:[%s11907_s3 + $0x60] sm:$0xff]  ;;  %v2842_v8 = vld [vmem:[%s11907_s3 + $0x68] sm:$0xff] }
 0x287   : > { %v1664_v14 = vadd.f32 %v8269_v0, %v1663_v9 }
 0x288   : > { %v1767_v23 = vmax.f32 %v1669_v10, 0.0 }
 0x289   : > { %v1766_v7 = vmax.f32 %v1664_v14, 0.0 }
 0x28a   : > { %1856 = vst.msk [vmem:[#allocation3 + $0xc9] sm:$0xff] %vm1784_vm9, %v1767_v23 }
 0x28b   : > { %1855 = vst.msk [vmem:[#allocation3 + $0xc1] sm:$0xff] %vm1784_vm9, %v1766_v7 }
 0x28d   : > { %v8567_v27 = vpop.permute.xlu1 %2126  ;;  %v8570_v33 = vpop.permute.xlu0 %1985 }
 0x28e   : > { %v6535_v12 = vpop.f32.mrb[16].mxu0 }
 0x28f   : > { %v1679_v51 = vadd.f32 %v6535_v12, %v8269_v0  ;;  %v1673_v61 = vpop.f32.mrb[17].mxu0 }
 0x290   : > { %v1674_v24 = vadd.f32 %v8269_v0, %v1673_v61 }
 0x291   : > { %v1769_v35 = vmax.f32 %v1679_v51, 0.0  ;;  %v8521_v31 = vld [vmem:[#allocation3 + $0xd0] sm:$0x3]  ;;  %v8577_v11 = vpop.permute.xlu1 %2124  ;;  %v8581_v21 = vpop.permute.xlu0 %2122 }
 0x292   : > { %12005 = vst [vmem:[#allocation11_spill] sm:$0xff] %v8521_v31  ;;  %v1768_v62 = vmax.f32 %v1674_v24, 0.0  ;;  %2021 = vrot.lane.b32.xlu0 %v8521_v31, %s6939_s14  ;;  %2162 = vrot.lane.b32.xlu1 %v8521_v31, %s6940_s15  ;;  %v8529_v45 = vld [vmem:[#allocation3 + $0xc8] sm:$0xff]  ;;  %v8531_v26 = vld [vmem:[#allocation3 + $0xc0] sm:$0xff] }
 0x293   : > { %1858 = vst.msk [vmem:[#allocation3 + $0xe1] sm:$0xff] %vm1784_vm9, %v1769_v35  ;;  %12006 = vst [vmem:[#allocation14_spill] sm:$0xff] %v8529_v45 }
 0x294   : > { %1857 = vst.msk [vmem:[#allocation3 + $0xd9] sm:$0xff] %vm1784_vm9, %v1768_v62  ;;  %12007 = vst [vmem:[#allocation15_spill] sm:$0xff] %v8531_v26 }
 0x295   : > { %v8596_v9 = vpop.permute.xlu1 %1983  ;;  %v8599_v23 = vpop.permute.xlu0 %1981 }
 0x296   : > { %2160 = vrot.lane.b32.xlu1 %v8529_v45, %s6940_s15  ;;  %2158 = vrot.lane.b32.xlu0 %v8531_v26, %s6940_s15  ;;  %v6538_v42 = vpop.f32.mrb[18].mxu0 }
 0x297   : > { %v1689_v17 = vadd.f32 %v6538_v42, %v8269_v0  ;;  %v1683_v29 = vpop.f32.mrb[19].mxu0 }
 0x298   : > { %v1684_v53 = vadd.f32 %v8269_v0, %v1683_v29 }
 0x299   : > { %v1771_v60 = vmax.f32 %v1689_v17, 0.0 }
 0x29a   : > { %v1770_v36 = vmax.f32 %v1684_v53, 0.0  ;;  %2019 = vrot.lane.b32.xlu1 %v8529_v45, %s6939_s14  ;;  %2017 = vrot.lane.b32.xlu0 %v8531_v26, %s6939_s14  ;;  %v8547_v25 = vld [vmem:[#allocation3 + $0xe8] sm:$0x3] }
 0x29b   : > { %1860 = vst.msk [vmem:[#allocation3 + $0xf9] sm:$0xff] %vm1784_vm9, %v1771_v60  ;;  %12008 = vst [vmem:[#allocation16_spill] sm:$0xff] %v8547_v25  ;;  %v8559_v58 = vld [vmem:[#allocation3 + $0xe0] sm:$0xff]  ;;  %v8561_v48 = vld [vmem:[#allocation3 + $0xd8] sm:$0xff] }
 0x29c   : > { %1859 = vst.msk [vmem:[#allocation3 + $0xf1] sm:$0xff] %vm1784_vm9, %v1770_v36  ;;  %12009 = vst [vmem:[#allocation17_spill] sm:$0xff] %v8559_v58 }
 0x29d   : > { %12010 = vst [vmem:[#allocation18_spill] sm:$0xff] %v8561_v48 }
 0x29e   : > { %2027 = vrot.lane.b32.xlu0 %v8547_v25, %s6939_s14  ;;  %2168 = vrot.lane.b32.xlu1 %v8547_v25, %s6940_s15  ;;  %v6541_v28 = vpop.f32.mrb[20].mxu0 }
 0x29f   : > { %v1699_v46 = vadd.f32 %v6541_v28, %v8269_v0  ;;  %v1693_v40 = vpop.f32.mrb[21].mxu0 }
 0x2a0   : > { %v1694_v5 = vadd.f32 %v8269_v0, %v1693_v40 }
 0x2a1   : > { %v1773_v30 = vmax.f32 %v1699_v46, 0.0  ;;  %v8606_v51 = vpop.permute.xlu1 %2132  ;;  %v8609_v61 = vpop.permute.xlu0 %1991 }
 0x2a2   : > { %v1772_v41 = vmax.f32 %v1694_v5, 0.0  ;;  %2166 = vrot.lane.b32.xlu1 %v8559_v58, %s6940_s15  ;;  %2164 = vrot.lane.b32.xlu0 %v8561_v48, %s6940_s15  ;;  %v8579_v15 = vld [vmem:[#allocation3 + $0x100] sm:$0x3] }
 0x2a3   : > { %1862 = vst.msk [vmem:[#allocation3 + $0x111] sm:$0xff] %vm1784_vm9, %v1773_v30  ;;  %12011 = vst [vmem:[#allocation19_spill] sm:$0xff] %v8579_v15  ;;  %v8587_v38 = vld [vmem:[#allocation3 + $0xf8] sm:$0xff]  ;;  %v8589_v54 = vld [vmem:[#allocation3 + $0xf0] sm:$0xff] }
 0x2a4   : > { %1861 = vst.msk [vmem:[#allocation3 + $0x109] sm:$0xff] %vm1784_vm9, %v1772_v41  ;;  %12012 = vst [vmem:[#allocation20_spill] sm:$0xff] %v8587_v38 }
 0x2a5   : > { %12013 = vst [vmem:[#allocation21_spill] sm:$0xff] %v8589_v54  ;;  %v8617_v35 = vpop.permute.xlu1 %2130  ;;  %v8623_v17 = vpop.permute.xlu0 %2128 }
 0x2a6   : > { %2023 = vrot.lane.b32.xlu1 %v8561_v48, %s6939_s14  ;;  %2025 = vrot.lane.b32.xlu0 %v8559_v58, %s6939_s14  ;;  %v12026_v48 = vmov 0.0|0.0  }
 0x2a9   : > { %v8633_v29 = vpop.permute.xlu1 %1989  ;;  %v8635_v53 = vpop.permute.xlu0 %1987 }
 0x2aa   : > { %2033 = vrot.lane.b32.xlu1 %v8579_v15, %s6939_s14  ;;  %2174 = vrot.lane.b32.xlu0 %v8579_v15, %s6940_s15  ;;  %v8611_v24 = vld [vmem:[#allocation3 + $0x118] sm:$0x3] }
 0x2ab   : > { %12014 = vst [vmem:[#allocation22_spill] sm:$0xff] %v8611_v24  ;;  %v8619_v62 = vld [vmem:[#allocation3 + $0x110] sm:$0xff]  ;;  %v8621_v42 = vld [vmem:[#allocation3 + $0x108] sm:$0xff] }
 0x2ac   : > { %12015 = vst [vmem:[#allocation23_spill] sm:$0xff] %v8619_v62  ;;  %12016 = vst [vmem:[#allocation24_spill] sm:$0xff] %v8621_v42 }
 0x2ad   : > { %v6544_v3 = vpop.f32.mrb[22].mxu0 }
 0x2ae   : > { %v1709_v55 = vadd.f32 %v6544_v3, %v8269_v0  ;;  %2172 = vrot.lane.b32.xlu1 %v8587_v38, %s6940_s15  ;;  %2170 = vrot.lane.b32.xlu0 %v8589_v54, %s6940_s15  ;;  %v1703_v10 = vpop.f32.mrb[23].mxu0 }
 0x2af   : > { %v1704_v14 = vadd.f32 %v8269_v0, %v1703_v10 }
 0x2b0   : > { %v1775_v7 = vmax.f32 %v1709_v55, 0.0 }
 0x2b1   : > { %v1774_v12 = vmax.f32 %v1704_v14, 0.0 }
 0x2b2   : > { %1864 = vst.msk [vmem:[#allocation3 + $0x129] sm:$0xff] %vm1784_vm9, %v1775_v7  ;;  %2031 = vrot.lane.b32.xlu1 %v8587_v38, %s6939_s14  ;;  %2029 = vrot.lane.b32.xlu0 %v8589_v54, %s6939_s14  ;;  %v2831_v38 = vld [vmem:[%s11907_s3 + $0x10] sm:$0xff] }
 0x2b3   : > { %1863 = vst.msk [vmem:[#allocation3 + $0x121] sm:$0xff] %vm1784_vm9, %v1774_v12 }
 0x2b4   : > { %v8644_v40 = vpop.permute.xlu1 %2138  ;;  %v8647_v30 = vpop.permute.xlu0 %1997 }
 0x2b6   : > { %2039 = vrot.lane.b32.xlu0 %v8611_v24, %s6939_s14  ;;  %2180 = vrot.lane.b32.xlu1 %v8611_v24, %s6940_s15 }
 0x2b8   : > { %v8659_v14 = vpop.permute.xlu1 %2136  ;;  %v8661_v7 = vpop.permute.xlu0 %2134 }
 0x2b9   : > { %v8637_v36 = vld [vmem:[#allocation3 + $0x130] sm:$0x3] }
 0x2ba   : > { %2178 = vrot.lane.b32.xlu0 %v8619_v62, %s6940_s15  ;;  %2176 = vrot.lane.b32.xlu1 %v8621_v42, %s6940_s15  ;;  %12017 = vst [vmem:[#allocation25_spill] sm:$0xff] %v8637_v36  ;;  %v8649_v55 = vld [vmem:[#allocation3 + $0x128] sm:$0xff]  ;;  %v8651_v10 = vld [vmem:[#allocation3 + $0x120] sm:$0xff] }
 0x2bb   : > { %12018 = vst [vmem:[#allocation26_spill] sm:$0xff] %v8649_v55  ;;  %12019 = vst [vmem:[#allocation27_spill] sm:$0xff] %v8651_v10 }
 0x2be   : > { %2037 = vrot.lane.b32.xlu0 %v8619_v62, %s6939_s14  ;;  %2035 = vrot.lane.b32.xlu1 %v8621_v42, %s6939_s14 }
 0x2c1   : > { %v6547_v60 = vpop.f32.mrb[24].mxu0 }
 0x2c2   : > { %v1719_v28 = vadd.f32 %v6547_v60, %v8269_v0  ;;  %2045 = vrot.lane.b32.xlu1 %v8637_v36, %s6939_s14  ;;  %2186 = vrot.lane.b32.xlu0 %v8637_v36, %s6940_s15  ;;  %v1713_v46 = vpop.f32.mrb[25].mxu0  ;;  %v8673_v60 = vpop.permute.xlu1 %1995 }
 0x2c3   : > { %v1714_v5 = vadd.f32 %v8269_v0, %v1713_v46 }
 0x2c4   : > { %v1777_v41 = vmax.f32 %v1719_v28, 0.0  ;;  %v8675_v28 = vpop.permute.xlu0 %1993 }
 0x2c5   : > { %v1776_v3 = vmax.f32 %v1714_v5, 0.0 }
 0x2c6   : > { %1866 = vst.msk [vmem:[#allocation3 + $0x141] sm:$0xff] %vm1784_vm9, %v1777_v41  ;;  %2184 = vrot.lane.b32.xlu1 %v8649_v55, %s6940_s15  ;;  %2182 = vrot.lane.b32.xlu0 %v8651_v10, %s6940_s15 }
 0x2c7   : > { %1865 = vst.msk [vmem:[#allocation3 + $0x139] sm:$0xff] %vm1784_vm9, %v1776_v3 }
 0x2c8   : > { %v8685_v41 = vpop.permute.xlu1 %2144  ;;  %v8687_v3 = vpop.permute.xlu0 %2003 }
 0x2ca   : > { %2043 = vrot.lane.b32.xlu1 %v8649_v55, %s6939_s14  ;;  %2041 = vrot.lane.b32.xlu0 %v8651_v10, %s6939_s14 }
 0x2cc   : > { %v8695_v10 = vpop.permute.xlu1 %2142  ;;  %v8697_v42 = vpop.permute.xlu0 %2140 }
 0x2cd   : > { %v8667_v12 = vld [vmem:[#allocation3 + $0x148] sm:$0x3] }
 0x2ce   : > { %12020 = vst [vmem:[#allocation28_spill] sm:$0xff] %v8667_v12  ;;  %2051 = vrot.lane.b32.xlu0 %v8667_v12, %s6939_s14  ;;  %2192 = vrot.lane.b32.xlu1 %v8667_v12, %s6940_s15  ;;  %v8677_v46 = vld [vmem:[#allocation3 + $0x140] sm:$0xff]  ;;  %v8679_v5 = vld [vmem:[#allocation3 + $0x138] sm:$0xff] }
 0x2cf   : > { %12021 = vst [vmem:[#allocation29_spill] sm:$0xff] %v8677_v46  ;;  %12022 = vst [vmem:[#allocation30_spill] sm:$0xff] %v8679_v5 }
 0x2d0   : > { %v8701_v15 = vpop.permute.xlu1 %2001 }
 0x2d2   : > { %2190 = vrot.lane.b32.xlu0 %v8677_v46, %s6940_s15  ;;  %2188 = vrot.lane.b32.xlu1 %v8679_v5, %s6940_s15 }
 0x2d6   : > { %v6550_v43 = vpop.f32.mrb[26].mxu0  ;;  %2049 = vrot.lane.b32.xlu0 %v8677_v46, %s6939_s14  ;;  %2047 = vrot.lane.b32.xlu1 %v8679_v5, %s6939_s14  ;;  %v8703_v46 = vpop.permute.xlu0 %1999  ;;  %v11935_v5 = vmov 0.0|0.0  }
 0x2d7   : > { %v1729_v12 = vadd.f32 %v6550_v43, %v8269_v0  ;;  %v1723_v36 = vpop.f32.mrb[27].mxu0  ;;  %6621 = vmatprep.subr.bf16.mxu1 %v11935_v5  ;;  %v2829_v43 = vld [vmem:[%s11907_s3] sm:$0xff]  ;;  %6648 = vmatprep.subr.bf16.mxu0 %v11935_v5  ;;  %v2832_v5 = vld [vmem:[%s11907_s3 + $0x18] sm:$0xff] }
 0x2d8   : > { %v1724_v55 = vadd.f32 %v8269_v0, %v1723_v36  ;;  %v2830_v36 = vld [vmem:[%s11907_s3 + $0x8] sm:$0xff]  ;;  %v6625_v58 = vpack.c.bf16 %v2832_v5, %v2831_v38 }
 0x2d9   : > { %v1779_v24 = vmax.f32 %v1729_v12, 0.0 }
 0x2da   : > { %v1778_v62 = vmax.f32 %v1724_v55, 0.0  ;;  %v6622_v55 = vpack.c.bf16 %v2830_v36, %v2829_v43  ;;  %v2833_v36 = vld [vmem:[%s11907_s3 + $0x20] sm:$0xff] }
 0x2db   : > { %1868 = vst.msk [vmem:[#allocation3 + $0x159] sm:$0xff] %vm1784_vm9, %v1779_v24 }
 0x2dc   : > { %1867 = vst.msk [vmem:[#allocation3 + $0x151] sm:$0xff] %vm1784_vm9, %v1778_v62  ;;  %v8715_v62 = vpop.permute.xlu1 %2150  ;;  %v8721_v12 = vpop.permute.xlu0 %2009  ;;  %6623 = vmatpush1.bf16.msra.mxu1 %v6622_v55  ;;  %v2834_v55 = vld [vmem:[%s11907_s3 + $0x28] sm:$0xff] }
 0x2dd   : > { %6624 = vmatprep.subr.bf16.mxu1 %v12026_v48  ;;  %v6628_v5 = vpack.c.bf16 %v2834_v55, %v2833_v36  ;;  %v2836_v36 = vld [vmem:[%s11907_s3 + $0x38] sm:$0xff] }
 0x2e0   : > { %v8738_v43 = vpop.permute.xlu1 %2148  ;;  %6626 = vmatpush1.bf16.msra.mxu1 %v6625_v58 }
 0x2e1   : > { %6627 = vmatprep.subr.bf16.mxu1 %v12026_v48 }
 0x2e2   : > { %v8713_v24 = vld [vmem:[#allocation3 + $0x160] sm:$0x3] }
 0x2e3   : > { %12023 = vst [vmem:[#allocation31_spill] sm:$0xff] %v8713_v24  ;;  %2057 = vrot.lane.b32.xlu1 %v8713_v24, %s6939_s14  ;;  %2198 = vrot.lane.b32.xlu0 %v8713_v24, %s6940_s15  ;;  %v8729_v54 = vld [vmem:[#allocation3 + $0x158] sm:$0xff]  ;;  %v8731_v25 = vld [vmem:[#allocation3 + $0x150] sm:$0xff]  ;;  %v8746_v24 = vpop.permute.xlu0 %2146 }
 0x2e4   : > { %12024 = vst [vmem:[#allocation32_spill] sm:$0xff] %v8729_v54  ;;  %12025 = vst [vmem:[#allocation33_spill] sm:$0xff] %v8731_v25  ;;  %6629 = vmatpush1.bf16.msra.mxu1 %v6628_v5 }
 0x2e5   : > { %6630 = vmatprep.subr.bf16.mxu1 %v12026_v48 }
 0x2e7   : > { %2196 = vrot.lane.b32.xlu1 %v8729_v54, %s6940_s15  ;;  %2194 = vrot.lane.b32.xlu0 %v8731_v25, %s6940_s15 }
 0x2ea   : > { %v6553_v38 = vpop.f32.mrb[28].mxu0 }
 0x2eb   : > { %v1739_v31 = vadd.f32 %v6553_v38, %v8269_v0  ;;  %2055 = vrot.lane.b32.xlu1 %v8729_v54, %s6939_s14  ;;  %2053 = vrot.lane.b32.xlu0 %v8731_v25, %s6939_s14  ;;  %v1733_v58 = vpop.f32.mrb[29].mxu0  ;;  %v6631_v38 = vpack.c.bf16 %v2836_v36, %v2835_v18  ;;  %v8763_v54 = vpop.permute.xlu1 %2007  ;;  %v2840_v36 = vld [vmem:[%s11907_s3 + $0x58] sm:$0xff] }
 0x2ec   : > { %v1734_v45 = vadd.f32 %v8269_v0, %v1733_v58  ;;  %v8765_v25 = vpop.permute.xlu0 %2005  ;;  %v2839_v58 = vld [vmem:[%s11907_s3 + $0x50] sm:$0xff] }
 0x2ed   : > { %v1781_v26 = vmax.f32 %v1739_v31, 0.0  ;;  %6632 = vmatpush1.bf16.msra.mxu1 %v6631_v38  ;;  %v2837_v31 = vld [vmem:[%s11907_s3 + $0x40] sm:$0xff]  ;;  %v1873_v38 = vld [vmem:[#allocation3] sm:$0xff] }
 0x2ee   : > { %v1780_v55 = vmax.f32 %v1734_v45, 0.0  ;;  %v2838_v45 = vld [vmem:[%s11907_s3 + $0x48] sm:$0xff]  ;;  %6633 = vmatprep.subr.bf16.mxu1 %v12026_v48 }
 0x2ef   : > { %1870 = vst.msk [vmem:[#allocation3 + $0x171] sm:$0xff] %vm1784_vm9, %v1781_v26  ;;  %v6634_v18 = vpack.c.bf16 %v2838_v45, %v2837_v31  ;;  %v6637_v45 = vpack.c.bf16 %v2840_v36, %v2839_v58 }
 0x2f0   : > { %1869 = vst.msk [vmem:[#allocation3 + $0x169] sm:$0xff] %vm1784_vm9, %v1780_v55  ;;  %v8775_v5 = vpop.permute.xlu1 %2156  ;;  %v8777_v26 = vpop.permute.xlu0 %2015  ;;  %v1874_v55 = vld [vmem:[#allocation3 + $0x8] sm:$0xff] }
 0x2f1   : > { %12027 = vst [vmem:[#allocation34_spill] sm:$0xff] %v8775_v5  ;;  %12028 = vst [vmem:[#allocation35_spill] sm:$0xff] %v8777_v26  ;;  %6635 = vmatpush1.bf16.msra.mxu1 %v6634_v18  ;;  %v2267_v18 = vsel %vm1784_vm9, %v1874_v55, %v8553_v19  ;;  %v2266_v26 = vsel %vm1784_vm9, %v1873_v38, %v8556_v34  ;;  %v6640_v38 = vpack.c.bf16 %v2842_v8, %v2841_v1  ;;  %v2844_v8 = vld [vmem:[%s11907_s3 + $0x78] sm:$0xff] }
 0x2f2   : > { %6636 = vmatprep.subr.bf16.mxu1 %v12026_v48  ;;  %v8806_v58 = vsel %vm2314_vm11, %v2267_v18, %v8577_v11  ;;  %v8810_v36 = vsel %vm2314_vm11, %v2266_v26, %v8581_v21  ;;  %v1875_v11 = vld [vmem:[#allocation3 + $0x10] sm:$0x3]  ;;  %v2843_v26 = vld [vmem:[%s11907_s3 + $0x70] sm:$0xff]  ;;  %v2270_v1 = vsel %vm1784_vm9, %v8287_v2, %v8596_v9  ;;  %v2269_v18 = vsel %vm1784_vm9, %v8364_v37, %v8599_v23 }
 0x2f3   : > { %v2587_v21 = vrot.slane %v8810_v36, 2  ;;  %v8840_v50 = vsel %vm2314_vm11, %v2270_v1, %v8617_v35  ;;  %v8844_v56 = vsel %vm2314_vm11, %v2269_v18, %v8623_v17  ;;  %v2268_v37 = vsel %vm1784_vm9, %v1875_v11, %v8539_v59 }
 0x2f4   : > { %v8812_v19 = vpop.permute.xlu1 %2154  ;;  %v8814_v34 = vpop.permute.xlu0 %2152  ;;  %v2271_v9 = vsel %vm1784_vm9, %v8283_v4, %v8570_v33  ;;  %v2845_v4 = vld [vmem:[%s11907_s3 + $0x80] sm:$0xff]  ;;  %v2846_v33 = vld [vmem:[%s11907_s3 + $0x88] sm:$0xff] }
 0x2f5   : > { %6638 = vmatpush1.bf16.msra.mxu1 %v6637_v45  ;;  %v2588_v45 = vrot.slane %v8806_v58, 2 }
 0x2f6   : > { %v8785_v63 = vld [vmem:[#allocation3 + $0x178] sm:$0x3]  ;;  %6639 = vmatprep.subr.bf16.mxu1 %v12026_v48 }
 0x2f7   : > { %2204 = vrot.lane.b32.xlu1 %v8785_v63, %s6940_s15  ;;  %v8790_v31 = vld [vmem:[#allocation3 + $0x170] sm:$0xff]  ;;  %v8816_v55 = vld [vmem:[#allocation3 + $0x168] sm:$0xff]  ;;  %v2589_v59 = vsel %vm1171_vm5, %v2587_v21, %v2588_v45 }
 0x2f8   : > { %12029 = vst [vmem:[#allocation36_spill] sm:$0xff] %v8790_v31  ;;  %2202 = vrot.lane.b32.xlu0 %v8790_v31, %s6940_s15  ;;  %v8854_v23 = vpop.permute.xlu1 %2013  ;;  %v8856_v35 = vpop.permute.xlu0 %2011 }
 0x2f9   : > { %6641 = vmatpush1.bf16.msra.mxu1 %v6640_v38  ;;  %v6643_v38 = vpack.c.bf16 %v2844_v8, %v2843_v26  ;;  %v8863_v26 = vsel %vm2314_vm11, %v2271_v9, %v8606_v51  ;;  %v6646_v51 = vpack.c.bf16 %v2846_v33, %v2845_v4 }
 0x2fa   : > { %6642 = vmatprep.subr.bf16.mxu1 %v12026_v48  ;;  %v2419_v21 = vrot.slane %v8863_v26, 1 }
 0x2fb   : > { %2200 = vrot.lane.b32.xlu1 %v8816_v55, %s6940_s15 }
 0x2fc   : > { %2061 = vrot.lane.b32.xlu0 %v8790_v31, %s6939_s14 }
 0x2fd   : > { %6644 = vmatpush1.bf16.msra.mxu1 %v6643_v38  ;;  %v2412_v38 = vrot.slane %v8806_v58, 1 }
 0x2fe   : > { %v6556_v31 = vpop.f32.mrb[30].mxu0  ;;  %6645 = vmatprep.subr.bf16.mxu1 %v12026_v48 }
 0x2ff   : > { %v1749_v5 = vadd.f32 %v6556_v31, %v8269_v0  ;;  %2059 = vrot.lane.b32.xlu1 %v8816_v55, %s6939_s14  ;;  %v1743_v2 = vpop.f32.mrb[31].mxu0  ;;  %v2317_v31 = vsel %vm2314_vm11, %v2268_v37, %v8567_v27  ;;  %v2416_v27 = vrot.slane %v8844_v56, 1 }
 0x300   : > { %v1744_v17 = vadd.f32 %v8269_v0, %v1743_v2  ;;  %v2417_v0 = vrot.slane %v8840_v50, 1  ;;  %v2411_v2 = vrot.slane %v8810_v36, 1 }
 0x301   : > { %v1783_v8 = vmax.f32 %v1749_v5, 0.0  ;;  %v2590_v5 = vrot.slane %v2317_v31, 2  ;;  %6647 = vmatpush1.bf16.msra.mxu1 %v6646_v51 }
 0x302   : > { %v1782_v11 = vmax.f32 %v1744_v17, 0.0  ;;  %v2418_v9 = vsel %vm994_vm4, %v2416_v27, %v2417_v0  ;;  %v2420_v17 = vsel %vm994_vm4, %v2417_v0, %v2419_v21  ;;  %6731 = vmatprep.subr.bf16.mxu1 %v12026_v48  ;;  %v2413_v0 = vsel %vm994_vm4, %v2411_v2, %v2412_v38 }
 0x303   : > { %1872 = vst.msk [vmem:[#allocation3 + $0x189] sm:$0xff] %vm1784_vm9, %v1783_v8  ;;  %2667 = vrot.lane.b32.xlu1 %v2589_v59, %s6942_s18  ;;  %v2591_v37 = vsel %vm1171_vm5, %v2588_v45, %v2590_v5  ;;  %v2414_v8 = vrot.slane %v2317_v31, 1  ;;  %v6787_v33 = vpack.i.bf16 %v2420_v17, %v2418_v9  ;;  %v2272_v45 = vsel %vm1784_vm9, %v8387_v16, %v8635_v53 }
 0x304   : > { %1871 = vst.msk [vmem:[#allocation3 + $0x181] sm:$0xff] %vm1784_vm9, %v1782_v11  ;;  %v8879_v1 = vpop.permute.xlu1 %2162  ;;  %v8881_v18 = vpop.permute.xlu0 %2021  ;;  %v2273_v11 = vsel %vm1784_vm9, %v8385_v47, %v8633_v29  ;;  %v8908_v51 = vsel %vm2314_vm11, %v2272_v45, %v8661_v7  ;;  %v2276_v7 = vsel %vm1784_vm9, %v8415_v52, %v8673_v60  ;;  %v2275_v21 = vsel %vm1784_vm9, %v8417_v6, %v8675_v28 }
 0x305   : > { %v2415_v27 = vsel %vm994_vm4, %v2412_v38, %v2414_v8  ;;  %v8904_v31 = vsel %vm2314_vm11, %v2273_v11, %v8659_v14  ;;  %v2597_v5 = vrot.slane %v8908_v51, 2  ;;  %v8929_v2 = vsel %vm2314_vm11, %v2276_v7, %v8695_v10 }
 0x306   : > { %v6782_v53 = vpack.i.bf16 %v2415_v27, %v2413_v0  ;;  %v2598_v14 = vrot.slane %v8904_v31, 2  ;;  %v2274_v9 = vsel %vm1784_vm9, %v8379_v13, %v8609_v61  ;;  %v2277_v52 = vsel %vm1784_vm9, %v8409_v22, %v8647_v30 }
 0x307   : > { %2669 = vrot.lane.b32.xlu1 %v2591_v37, %s6942_s18  ;;  %v8933_v37 = vsel %vm2314_vm11, %v2275_v21, %v8697_v42  ;;  %v2323_v42 = vsel %vm2314_vm11, %v2274_v9, %v8644_v40  ;;  %v8951_v60 = vsel %vm2314_vm11, %v2277_v52, %v8685_v41  ;;  %v2427_v28 = vrot.slane %v8929_v2, 1 }
 0x308   : > { %v8890_v59 = vpop.permute.xlu1 %2160  ;;  %v8892_v4 = vpop.permute.xlu0 %2158  ;;  %v2426_v13 = vrot.slane %v8933_v37, 1  ;;  %v2599_v61 = vsel %vm1171_vm5, %v2597_v5, %v2598_v14  ;;  %v2593_v22 = vrot.slane %v8840_v50, 2  ;;  %v2592_v30 = vrot.slane %v8844_v56, 2 }
 0x309   : > { %v2600_v17 = vrot.slane %v2323_v42, 2  ;;  %v2429_v8 = vrot.slane %v8951_v60, 1  ;;  %v2421_v11 = vrot.slane %v8908_v51, 1  ;;  %v2424_v5 = vrot.slane %v2323_v42, 1 }
 0x30a   : > { %v2428_v0 = vsel %vm994_vm4, %v2426_v13, %v2427_v28  ;;  %v2595_v9 = vrot.slane %v8863_v26, 2 }
 0x30b   : > { %6788 = vrot.lane.b32.xlu1 %v6787_v33, %s6943_s19  ;;  %v8911_v47 = vld [vmem:[#allocation3 + $0x180] sm:$0xff]  ;;  %v1922_v38 = vld [vmem:[#allocation3 + $0x188] sm:$0xff]  ;;  %v2422_v33 = vrot.slane %v8904_v31, 1  ;;  %v2601_v45 = vsel %vm1171_vm5, %v2598_v14, %v2600_v17  ;;  %v2430_v27 = vsel %vm994_vm4, %v2427_v28, %v2429_v8  ;;  %v2279_v14 = vsel %vm1784_vm9, %v8437_v39, %v8701_v15 }
 0x30c   : > { %2206 = vrot.lane.b32.xlu0 %v8911_v47, %s6940_s15  ;;  %v8915_v16 = vpop.permute.xlu1 %2019  ;;  %v8917_v29 = vpop.permute.xlu0 %2017  ;;  %v6797_v52 = vpack.i.bf16 %v2430_v27, %v2428_v0  ;;  %v2278_v28 = vsel %vm1784_vm9, %v8439_v44, %v8703_v46  ;;  %v2596_v39 = vsel %vm1171_vm5, %v2593_v22, %v2595_v9  ;;  %v2281_v17 = vsel %vm1784_vm9, %v8461_v20, %v8765_v25 }
 0x30d   : > { %v2423_v13 = vsel %vm994_vm4, %v2421_v11, %v2422_v33  ;;  %v2425_v42 = vsel %vm994_vm4, %v2422_v33, %v2424_v5  ;;  %v8993_v26 = vsel %vm2314_vm11, %v2278_v28, %v8746_v24  ;;  %v2282_v24 = vsel %vm1784_vm9, %v8459_v57, %v8763_v54  ;;  %v9042_v11 = vld [vmem:[#allocation3 + $0x190] sm:$0x3] }
 0x30e   : > { %v6792_v46 = vpack.i.bf16 %v2425_v42, %v2423_v13  ;;  %v9016_v8 = vsel %vm2314_vm11, %v2281_v17, %v8814_v34  ;;  %v2280_v33 = vsel %vm1784_vm9, %v8431_v49, %v8687_v3  ;;  %v2283_v57 = vsel %vm1784_vm9, %v8453_v32, %v8721_v12  ;;  %v12032_v17 = vld [vmem:[#allocation8_spill] sm:$0xff] }
 0x30f   : > { %2208 = vrot.lane.b32.xlu1 %v1922_v38, %s6940_s15  ;;  %v2329_v54 = vsel %vm2314_vm11, %v2280_v33, %v8715_v62  ;;  %v2436_v49 = vrot.slane %v9016_v8, 1  ;;  %v2603_v32 = vrot.slane %v8929_v2, 2  ;;  %v2602_v12 = vrot.slane %v8933_v37, 2 }
 0x310   : > { %6783 = vrot.lane.b32.xlu0 %v6782_v53, %s6943_s19  ;;  %v8943_v6 = vpop.permute.xlu1 %2168  ;;  %v8945_v10 = vpop.permute.xlu0 %2027  ;;  %v2594_v53 = vsel %vm1171_vm5, %v2592_v30, %v2593_v22  ;;  %v9012_v22 = vsel %vm2314_vm11, %v2282_v24, %v8812_v19  ;;  %v12030_v19 = vld [vmem:[#allocation34_spill] sm:$0xff]  ;;  %v2431_v5 = vrot.slane %v8993_v26, 1  ;;  %v2434_v13 = vrot.slane %v2329_v54, 1 }
 0x311   : > { %v9034_v34 = vsel %vm2314_vm11, %v2283_v57, %v12030_v19  ;;  %v2604_v28 = vsel %vm1171_vm5, %v2602_v12, %v2603_v32  ;;  %v2284_v33 = vsel %vm1784_vm9, %v12032_v17, %v8856_v35 }
 0x312   : > { %v2439_v62 = vrot.slane %v9034_v34, 1 }
 0x313   : > { %2675 = vrot.lane.b32.xlu1 %v2599_v61, %s6942_s18  ;;  %v8989_v61 = vsel %vm2314_vm11, %v2279_v14, %v8738_v43  ;;  %v2607_v43 = vrot.slane %v8993_v26, 2 }
 0x314   : > { %2063 = vrot.lane.b32.xlu0 %v8785_v63, %s6939_s14  ;;  %v8962_v40 = vpop.permute.xlu1 %2166  ;;  %v8964_v41 = vpop.permute.xlu0 %2164  ;;  %v2608_v30 = vrot.slane %v8989_v61, 2 }
 0x316   : > { %v2609_v3 = vsel %vm1171_vm5, %v2607_v43, %v2608_v30 }
 0x317   : > { %2677 = vrot.lane.b32.xlu1 %v2601_v45, %s6942_s18  ;;  %v2610_v45 = vrot.slane %v2329_v54, 2 }
 0x318   : > { %2671 = vrot.lane.b32.xlu0 %v2594_v53, %s6942_s18  ;;  %v8974_v7 = vpop.permute.xlu1 %2023  ;;  %v8976_v21 = vpop.permute.xlu0 %2025  ;;  %v2432_v53 = vrot.slane %v8989_v61, 1 }
 0x319   : > { %v2611_v9 = vsel %vm1171_vm5, %v2608_v30, %v2610_v45  ;;  %v12031_v30 = vld [vmem:[#allocation9_spill] sm:$0xff]  ;;  %v12033_v45 = vld [vmem:[#allocation10_spill] sm:$0xff] }
 0x31a   : > { %v2285_v24 = vsel %vm1784_vm9, %v12031_v30, %v8854_v23  ;;  %v2433_v57 = vsel %vm994_vm4, %v2431_v5, %v2432_v53  ;;  %v2435_v54 = vsel %vm994_vm4, %v2432_v53, %v2434_v13 }
 0x31b   : > { %6798 = vrot.lane.b32.xlu1 %v6797_v52, %s6943_s19  ;;  %v9074_v19 = vsel %vm2314_vm11, %v2285_v24, %v8890_v59  ;;  %v2612_v24 = vrot.slane %v9016_v8, 2 }
 0x31c   : > { %2673 = vrot.lane.b32.xlu0 %v2596_v39, %s6942_s18  ;;  %v8998_v15 = vpop.permute.xlu1 %2033  ;;  %v9000_v44 = vpop.permute.xlu0 %2174  ;;  %v2618_v12 = vrot.slane %v9074_v19, 2 }
 0x31f   : > { %2067 = vrot.lane.b32.xlu1 %v1922_v38, %s6939_s14  ;;  %v2437_v38 = vrot.slane %v9012_v22, 1 }
 0x320   : > { %6793 = vrot.lane.b32.xlu0 %v6792_v46, %s6943_s19  ;;  %v9026_v20 = vpop.permute.xlu1 %2172  ;;  %v9028_v25 = vpop.permute.xlu0 %2170  ;;  %v2605_v46 = vrot.slane %v8951_v60, 2  ;;  %v9078_v60 = vsel %vm2314_vm11, %v2284_v33, %v8892_v4  ;;  %v2288_v4 = vsel %vm1784_vm9, %v12033_v45, %v8915_v16  ;;  %v12037_v16 = vld [vmem:[#allocation13_spill] sm:$0xff] }
 0x321   : > { %v2438_v52 = vsel %vm994_vm4, %v2436_v49, %v2437_v38  ;;  %v2440_v14 = vsel %vm994_vm4, %v2437_v38, %v2439_v62  ;;  %v1924_v49 = vld [vmem:[#allocation3 + $0x198] sm:$0xff]  ;;  %v2617_v59 = vrot.slane %v9078_v60, 2  ;;  %v9097_v53 = vsel %vm2314_vm11, %v2288_v4, %v8962_v40 }
 0x322   : > { %v6807_v43 = vpack.i.bf16 %v2440_v14, %v2438_v52  ;;  %v2606_v23 = vsel %vm1171_vm5, %v2603_v32, %v2605_v46  ;;  %v12034_v62 = vld [vmem:[#allocation12_spill] sm:$0xff]  ;;  %v12036_v52 = vld [vmem:[#allocation7_spill] sm:$0xff]  ;;  %v2447_v46 = vrot.slane %v9097_v53, 1 }
 0x323   : > { %2683 = vrot.lane.b32.xlu1 %v2609_v3, %s6942_s18  ;;  %v6802_v3 = vpack.i.bf16 %v2435_v54, %v2433_v57  ;;  %v2287_v32 = vsel %vm1784_vm9, %v12034_v62, %v8917_v29  ;;  %v2619_v30 = vsel %vm1171_vm5, %v2617_v59, %v2618_v12 }
 0x324   : > { %2210 = vrot.lane.b32.xlu0 %v9042_v11, %s6940_s15  ;;  %v9047_v0 = vpop.permute.xlu1 %2031  ;;  %v9049_v27 = vpop.permute.xlu0 %2029  ;;  %v9101_v5 = vsel %vm2314_vm11, %v2287_v32, %v8964_v41 }
 0x327   : > { %2685 = vrot.lane.b32.xlu1 %v2611_v9, %s6942_s18  ;;  %v12035_v9 = vld [vmem:[#allocation35_spill] sm:$0xff] }
 0x328   : > { %2679 = vrot.lane.b32.xlu0 %v2604_v28, %s6942_s18  ;;  %v9059_v42 = vpop.permute.xlu1 %2180  ;;  %v9061_v39 = vpop.permute.xlu0 %2039  ;;  %v2286_v14 = vsel %vm1784_vm9, %v12036_v52, %v12035_v9  ;;  %v2289_v28 = vsel %vm1784_vm9, %v12037_v16, %v8881_v18  ;;  %v2613_v18 = vrot.slane %v9012_v22, 2 }
 0x329   : > { %v2335_v41 = vsel %vm2314_vm11, %v2286_v14, %v8879_v1  ;;  %v9119_v13 = vsel %vm2314_vm11, %v2289_v28, %v8943_v6  ;;  %v12038_v14 = vld [vmem:[#allocation15_spill] sm:$0xff] }
 0x32a   : > { %v2620_v17 = vrot.slane %v2335_v41, 2  ;;  %v2449_v33 = vrot.slane %v9119_v13, 1  ;;  %v2614_v59 = vsel %vm1171_vm5, %v2612_v24, %v2613_v18  ;;  %v2444_v45 = vrot.slane %v2335_v41, 1  ;;  %v1925_v24 = vld [vmem:[#allocation3 + $0x1a0] sm:$0xff] }
 0x32b   : > { %6808 = vrot.lane.b32.xlu1 %v6807_v43, %s6943_s19  ;;  %v2446_v43 = vrot.slane %v9101_v5, 1  ;;  %v2290_v16 = vsel %vm1784_vm9, %v12038_v14, %v8974_v7  ;;  %v1926_v7 = vld [vmem:[#allocation3 + $0x1a8] sm:$0x3] }
 0x32c   : > { %2681 = vrot.lane.b32.xlu0 %v2606_v23, %s6942_s18  ;;  %v9083_v38 = vpop.permute.xlu1 %2176  ;;  %v9085_v35 = vpop.permute.xlu0 %2178  ;;  %v2621_v57 = vsel %vm1171_vm5, %v2618_v12, %v2620_v17  ;;  %v2450_v23 = vsel %vm994_vm4, %v2447_v46, %v2449_v33  ;;  %v2622_v33 = vrot.slane %v9101_v5, 2 }
 0x32d   : > { %v2448_v54 = vsel %vm994_vm4, %v2446_v43, %v2447_v46  ;;  %v9160_v43 = vsel %vm2314_vm11, %v2290_v16, %v9028_v25  ;;  %v12040_v25 = vld [vmem:[#allocation11_spill] sm:$0xff]  ;;  %v12043_v16 = vld [vmem:[#allocation16_spill] sm:$0xff] }
 0x32e   : > { %v6817_v4 = vpack.i.bf16 %v2450_v23, %v2448_v54  ;;  %v2627_v17 = vrot.slane %v9160_v43, 2  ;;  %v12041_v54 = vld [vmem:[#allocation17_spill] sm:$0xff] }
 0x32f   : > { %2212 = vrot.lane.b32.xlu1 %v1924_v49, %s6940_s15  ;;  %v2442_v49 = vrot.slane %v9074_v19, 1  ;;  %v2294_v23 = vsel %vm1784_vm9, %v12041_v54, %v9047_v0 }
 0x330   : > { %6803 = vrot.lane.b32.xlu0 %v6802_v3, %s6943_s19  ;;  %v9111_v29 = vpop.permute.xlu1 %2035  ;;  %v9113_v40 = vpop.permute.xlu0 %2037  ;;  %v2441_v3 = vrot.slane %v9078_v60, 1 }
 0x331   : > { %v2445_v52 = vsel %vm994_vm4, %v2442_v49, %v2444_v45 }
 0x332   : > { %v2443_v9 = vsel %vm994_vm4, %v2441_v3, %v2442_v49  ;;  %v12042_v49 = vld [vmem:[#allocation18_spill] sm:$0xff] }
 0x333   : > { %2691 = vrot.lane.b32.xlu1 %v2619_v30, %s6942_s18  ;;  %v6812_v41 = vpack.i.bf16 %v2445_v52, %v2443_v9  ;;  %v2293_v3 = vsel %vm1784_vm9, %v12042_v49, %v9049_v27  ;;  %v2625_v27 = vrot.slane %v9119_v13, 2 }
 0x334   : > { %2065 = vrot.lane.b32.xlu0 %v8911_v47, %s6939_s14  ;;  %v9130_v1 = vpop.permute.xlu1 %2045  ;;  %v9132_v6 = vpop.permute.xlu0 %2186  ;;  %v2615_v47 = vrot.slane %v9034_v34, 2  ;;  %v12039_v34 = vld [vmem:[#allocation14_spill] sm:$0xff] }
 0x335   : > { %v2291_v28 = vsel %vm1784_vm9, %v12039_v34, %v8976_v21  ;;  %v2295_v34 = vsel %vm1784_vm9, %v12043_v16, %v8998_v15 }
 0x336   : > { %v2616_v32 = vsel %vm1171_vm5, %v2613_v18, %v2615_v47  ;;  %v9156_v46 = vsel %vm2314_vm11, %v2291_v28, %v9026_v20  ;;  %v2623_v20 = vrot.slane %v9097_v53, 2 }
 0x337   : > { %2693 = vrot.lane.b32.xlu1 %v2621_v57, %s6942_s18  ;;  %v2628_v21 = vrot.slane %v9156_v46, 2  ;;  %v2452_v52 = vrot.slane %v9156_v46, 1 }
 0x338   : > { %2687 = vrot.lane.b32.xlu0 %v2614_v59, %s6942_s18  ;;  %v2185_v62 = vpop.permute.xlu1 %2184  ;;  %v2183_v12 = vpop.permute.xlu0 %2182  ;;  %v2624_v0 = vsel %vm1171_vm5, %v2622_v33, %v2623_v20  ;;  %v2626_v14 = vsel %vm1171_vm5, %v2623_v20, %v2625_v27 }
 0x339   : > { %v2629_v45 = vsel %vm1171_vm5, %v2627_v17, %v2628_v21 }
 0x33b   : > { %6818 = vrot.lane.b32.xlu1 %v6817_v4, %s6943_s19 }
 0x33c   : > { %2689 = vrot.lane.b32.xlu0 %v2616_v32, %s6942_s18  ;;  %v2044_v30 = vpop.permute.xlu1 %2043  ;;  %v2042_v18 = vpop.permute.xlu0 %2041 }
 0x33f   : > { %2069 = vrot.lane.b32.xlu1 %v9042_v11, %s6939_s14  ;;  %v2292_v11 = vsel %vm1784_vm9, %v12040_v25, %v8945_v10  ;;  %v9189_v10 = vsel %vm2314_vm11, %v2293_v3, %v9083_v38 }
 0x340   : > { %6813 = vrot.lane.b32.xlu0 %v6812_v41, %s6943_s19  ;;  %v2341_v57 = vsel %vm2314_vm11, %v2292_v11, %v9000_v44  ;;  %v9182_v59 = vpop.permute.xlu1 %2192  ;;  %v9184_v47 = vpop.permute.xlu0 %2051  ;;  %v9193_v44 = vsel %vm2314_vm11, %v2294_v23, %v9085_v35  ;;  %v2632_v32 = vrot.slane %v9189_v10, 2  ;;  %v2451_v35 = vrot.slane %v9160_v43, 1 }
 0x341   : > { %v2630_v4 = vrot.slane %v2341_v57, 2  ;;  %v2633_v9 = vrot.slane %v9193_v44, 2  ;;  %v2344_v41 = vsel %vm2314_vm11, %v2295_v34, %v9059_v42  ;;  %v2456_v49 = vrot.slane %v9189_v10, 1 }
 0x342   : > { %v2453_v42 = vsel %vm994_vm4, %v2451_v35, %v2452_v52  ;;  %v2635_v25 = vrot.slane %v2344_v41, 2 }
 0x343   : > { %2216 = vrot.lane.b32.xlu1 %v1926_v7, %s6940_s15  ;;  %v2631_v38 = vsel %vm1171_vm5, %v2628_v21, %v2630_v4  ;;  %v12044_v7 = vld [vmem:[#allocation21_spill] sm:$0xff]  ;;  %v12045_v21 = vld [vmem:[#allocation20_spill] sm:$0xff]  ;;  %v2634_v20 = vsel %vm1171_vm5, %v2632_v32, %v2633_v9  ;;  %v12047_v4 = vld [vmem:[#allocation23_spill] sm:$0xff] }
 0x344   : > { %2214 = vrot.lane.b32.xlu0 %v1925_v24, %s6940_s15  ;;  %v2189_v28 = vpop.permute.xlu1 %2188  ;;  %v2191_v13 = vpop.permute.xlu0 %2190  ;;  %v2296_v24 = vsel %vm1784_vm9, %v12044_v7, %v9111_v29  ;;  %v2297_v17 = vsel %vm1784_vm9, %v12045_v21, %v9113_v40  ;;  %v2454_v29 = vrot.slane %v2341_v57, 1  ;;  %v2300_v27 = vsel %vm1784_vm9, %v12047_v4, %v2044_v30  ;;  %v12048_v32 = vld [vmem:[#allocation24_spill] sm:$0xff]  ;;  %v12049_v21 = vld [vmem:[#allocation22_spill] sm:$0xff] }
 0x345   : > { %v9220_v33 = vsel %vm2314_vm11, %v2297_v17, %v2185_v62  ;;  %v9223_v15 = vsel %vm2314_vm11, %v2296_v24, %v2183_v12  ;;  %v2636_v62 = vsel %vm1171_vm5, %v2633_v9, %v2635_v25  ;;  %v2457_v12 = vrot.slane %v9193_v44, 1  ;;  %v12050_v25 = vld [vmem:[#allocation27_spill] sm:$0xff] }
 0x346   : > { %v2638_v11 = vrot.slane %v9220_v33, 2  ;;  %v2637_v40 = vrot.slane %v9223_v15, 2  ;;  %v2455_v3 = vsel %vm994_vm4, %v2452_v52, %v2454_v29  ;;  %v2299_v9 = vsel %vm1784_vm9, %v12048_v32, %v2042_v18  ;;  %v12052_v32 = vld [vmem:[#allocation25_spill] sm:$0xff] }
 0x347   : > { %2699 = vrot.lane.b32.xlu1 %v2629_v45, %s6942_s18  ;;  %v12046_v45 = vld [vmem:[#allocation19_spill] sm:$0xff]  ;;  %v9247_v52 = vsel %vm2314_vm11, %v2299_v9, %v2189_v28  ;;  %v2459_v30 = vrot.slane %v2344_v41, 1  ;;  %v2462_v28 = vrot.slane %v9220_v33, 1  ;;  %v2461_v24 = vrot.slane %v9223_v15, 1 }
 0x348   : > { %2695 = vrot.lane.b32.xlu0 %v2624_v0, %s6942_s18  ;;  %v2048_v54 = vpop.permute.xlu1 %2047  ;;  %v2050_v23 = vpop.permute.xlu0 %2049  ;;  %v2298_v57 = vsel %vm1784_vm9, %v12046_v45, %v9061_v39  ;;  %v9250_v39 = vsel %vm2314_vm11, %v2300_v27, %v2191_v13  ;;  %v2642_v18 = vrot.slane %v9247_v52, 2  ;;  %v2301_v17 = vsel %vm1784_vm9, %v12049_v21, %v9130_v1 }
 0x349   : > { %v2347_v0 = vsel %vm2314_vm11, %v2298_v57, %v9132_v6  ;;  %v2458_v6 = vsel %vm994_vm4, %v2456_v49, %v2457_v12  ;;  %v2643_v34 = vrot.slane %v9250_v39, 2  ;;  %v2460_v13 = vsel %vm994_vm4, %v2457_v12, %v2459_v30 }
 0x34a   : > { %v2640_v16 = vrot.slane %v2347_v0, 2  ;;  %v2302_v29 = vsel %vm1784_vm9, %v12050_v25, %v2048_v54  ;;  %v2463_v12 = vsel %vm994_vm4, %v2461_v24, %v2462_v28  ;;  %v2466_v57 = vrot.slane %v9247_v52, 1  ;;  %v12055_v25 = vld [vmem:[#allocation30_spill] sm:$0xff] }
 0x34b   : > { %2701 = vrot.lane.b32.xlu1 %v2631_v38, %s6942_s18  ;;  %v2467_v4 = vrot.slane %v9250_v39, 1  ;;  %v2304_v9 = vsel %vm1784_vm9, %v12052_v32, %v9184_v47 }
 0x34c   : > { %2697 = vrot.lane.b32.xlu0 %v2626_v14, %s6942_s18  ;;  %v2639_v14 = vsel %vm1171_vm5, %v2637_v40, %v2638_v11  ;;  %v2641_v7 = vsel %vm1171_vm5, %v2638_v11, %v2640_v16  ;;  %v12051_v11 = vld [vmem:[#allocation26_spill] sm:$0xff] }
 0x34d   : > { %v2303_v40 = vsel %vm1784_vm9, %v12051_v11, %v2050_v23  ;;  %v2468_v30 = vsel %vm994_vm4, %v2466_v57, %v2467_v4 }
 0x34f   : > { %2703 = vrot.lane.b32.xlu1 %v2634_v20, %s6942_s18 }
 0x350   : > { %2523 = vrot.lane.b32.xlu0 %v2453_v42, %s6943_s19  ;;  %v2350_v42 = vsel %vm2314_vm11, %v2301_v17, %v9182_v59  ;;  %v2464_v59 = vrot.slane %v2347_v0, 1 }
 0x352   : > { %v2465_v27 = vsel %vm994_vm4, %v2462_v28, %v2464_v59 }
 0x353   : > { %2705 = vrot.lane.b32.xlu1 %v2636_v62, %s6942_s18  ;;  %v2644_v62 = vsel %vm1171_vm5, %v2642_v18, %v2643_v34 }
 0x354   : > { %2525 = vrot.lane.b32.xlu0 %v2455_v3, %s6943_s19  ;;  %v2645_v3 = vrot.slane %v2350_v42, 2 }
 0x355   : > { %v2058_v38 = vpop.permute.xlu1 %2057  ;;  %v2199_v35 = vpop.permute.xlu0 %2198 }
 0x356   : > { %v2646_v45 = vsel %vm1171_vm5, %v2643_v34, %v2645_v3  ;;  %v2353_v0 = vsel %vm2314_vm11, %v2304_v9, %v2199_v35  ;;  %v2469_v34 = vrot.slane %v2350_v42, 1 }
 0x357   : > { %2707 = vrot.lane.b32.xlu1 %v2639_v14, %s6942_s18  ;;  %v2650_v18 = vrot.slane %v2353_v0, 2 }
 0x358   : > { %2527 = vrot.lane.b32.xlu0 %v2458_v6, %s6943_s19  ;;  %v2470_v17 = vsel %vm994_vm4, %v2467_v4, %v2469_v34  ;;  %v12056_v34 = vld [vmem:[#allocation33_spill] sm:$0xff] }
 0x359   : > { %v2197_v20 = vpop.permute.xlu1 %2196  ;;  %v2195_v41 = vpop.permute.xlu0 %2194 }
 0x35a   : > { %v9274_v49 = vsel %vm2314_vm11, %v2303_v40, %v2197_v20  ;;  %v9277_v1 = vsel %vm2314_vm11, %v2302_v29, %v2195_v41  ;;  %v12054_v41 = vld [vmem:[#allocation28_spill] sm:$0xff] }
 0x35b   : > { %2709 = vrot.lane.b32.xlu1 %v2641_v7, %s6942_s18  ;;  %v2648_v54 = vrot.slane %v9274_v49, 2  ;;  %v2647_v23 = vrot.slane %v9277_v1, 2  ;;  %v2472_v24 = vrot.slane %v9274_v49, 1  ;;  %v2471_v35 = vrot.slane %v9277_v1, 1 }
 0x35c   : > { %2529 = vrot.lane.b32.xlu0 %v2460_v13, %s6943_s19  ;;  %v12053_v13 = vld [vmem:[#allocation29_spill] sm:$0xff]  ;;  %v2307_v42 = vsel %vm1784_vm9, %v12054_v41, %v2058_v38 }
 0x35d   : > { %v2056_v14 = vpop.permute.xlu1 %2055  ;;  %v2054_v6 = vpop.permute.xlu0 %2053  ;;  %v2649_v16 = vsel %vm1171_vm5, %v2647_v23, %v2648_v54  ;;  %v2651_v47 = vsel %vm1171_vm5, %v2648_v54, %v2650_v18  ;;  %v2473_v59 = vsel %vm994_vm4, %v2471_v35, %v2472_v24  ;;  %v2474_v54 = vrot.slane %v2353_v0, 1 }
 0x35e   : > { %v2306_v21 = vsel %vm1784_vm9, %v12053_v13, %v2056_v14  ;;  %v2305_v29 = vsel %vm1784_vm9, %v12055_v25, %v2054_v6 }
 0x35f   : > { %2711 = vrot.lane.b32.xlu1 %v2644_v62, %s6942_s18  ;;  %v2475_v4 = vsel %vm994_vm4, %v2472_v24, %v2474_v54  ;;  %v12057_v24 = vld [vmem:[#allocation32_spill] sm:$0xff] }
 0x360   : > { %2531 = vrot.lane.b32.xlu0 %v2463_v12, %s6943_s19 }
 0x363   : > { %2713 = vrot.lane.b32.xlu1 %v2646_v45, %s6942_s18 }
 0x364   : > { %2533 = vrot.lane.b32.xlu0 %v2465_v27, %s6943_s19 }
 0x367   : > { %2715 = vrot.lane.b32.xlu1 %v2649_v16, %s6942_s18 }
 0x368   : > { %2535 = vrot.lane.b32.xlu0 %v2468_v30, %s6943_s19 }
 0x369   : > { %v2205_v7 = vpop.permute.xlu1 %2204 }
 0x36a   : > { %v2203_v28 = vpop.permute.xlu0 %2202  ;;  %v2356_v40 = vsel %vm2314_vm11, %v2307_v42, %v2205_v7 }
 0x36b   : > { %2717 = vrot.lane.b32.xlu1 %v2651_v47, %s6942_s18  ;;  %v9306_v20 = vsel %vm2314_vm11, %v2306_v21, %v2203_v28  ;;  %v2655_v23 = vrot.slane %v2356_v40, 2  ;;  %v2479_v0 = vrot.slane %v2356_v40, 1 }
 0x36c   : > { %2537 = vrot.lane.b32.xlu0 %v2470_v17, %s6943_s19  ;;  %v2653_v12 = vrot.slane %v9306_v20, 2  ;;  %v2477_v27 = vrot.slane %v9306_v20, 1 }
 0x36d   : > { %v2201_v11 = vpop.permute.xlu1 %2200 }
 0x36e   : > { %v9315_v62 = vsel %vm2314_vm11, %v2305_v29, %v2201_v11  ;;  %v2656_v9 = vsel %vm1171_vm5, %v2653_v12, %v2655_v23  ;;  %v2062_v16 = vpop.permute.xlu0 %2061  ;;  %v2480_v30 = vsel %vm994_vm4, %v2477_v27, %v2479_v0 }
 0x36f   : > { %v2652_v3 = vrot.slane %v9315_v62, 2  ;;  %v2476_v57 = vrot.slane %v9315_v62, 1  ;;  %v2309_v35 = vsel %vm1784_vm9, %v12057_v24, %v2062_v16  ;;  %v12058_v24 = vld [vmem:[#allocation31_spill] sm:$0xff] }
 0x370   : > { %2539 = vrot.lane.b32.xlu0 %v2473_v59, %s6943_s19 }
 0x371   : > { %v2060_v38 = vpop.permute.xlu1 %2059  ;;  %v2654_v45 = vsel %vm1171_vm5, %v2652_v3, %v2653_v12  ;;  %v2478_v14 = vsel %vm994_vm4, %v2476_v57, %v2477_v27 }
 0x372   : > { %2719 = vrot.lane.b32.xlu1 %v2654_v45, %s6942_s18  ;;  %v2308_v7 = vsel %vm1784_vm9, %v12056_v34, %v2060_v38 }
 0x374   : > { %2541 = vrot.lane.b32.xlu0 %v2475_v4, %s6943_s19 }
 0x375   : > { %v2668_v32 = vpop.permute.xlu1 %2667 }
 0x376   : > { %6324 = vmatprep.mubr.msk.f32.mxu1 %vm1784_vm9, %v2668_v32  ;;  %2721 = vrot.lane.b32.xlu1 %v2656_v9, %s6942_s18 }
 0x378   : > { %2543 = vrot.lane.b32.xlu0 %v2478_v14, %s6943_s19 }
 0x379   : > { %v2670_v6 = vpop.permute.xlu1 %2669 }
 0x37c   : > { %2545 = vrot.lane.b32.xlu0 %v2480_v30, %s6943_s19 }
 0x37d   : > { %v6789_v18 = vpop.permute.xlu1 %6788 }
 0x37e   : > { %v2207_v28 = vpop.permute.xlu0 %2206  ;;  %v6790_v57 = vunpack.i.l.bf16 %v6789_v18 }
 0x37f   : > { %v9337_v47 = vsel %vm2314_vm11, %v2308_v7, %v2207_v28 }
 0x380   : > { %v2481_v21 = vrot.slane %v9337_v47, 1  ;;  %v2657_v17 = vrot.slane %v9337_v47, 2  ;;  %v2766_v14 = vsel %vm2763_vm13, %v8844_v56, %v6790_v57 }
 0x381   : > { %v2209_v13 = vpop.permute.xlu1 %2208 }
 0x382   : > { %v9344_v41 = vsel %vm2314_vm11, %v2309_v35, %v2209_v13  ;;  %v6784_v42 = vpop.permute.xlu0 %6783 }
 0x383   : > { %v2482_v25 = vrot.slane %v9344_v41, 1  ;;  %v2658_v29 = vrot.slane %v9344_v41, 2  ;;  %v6786_v11 = vunpack.i.h.bf16 %v6784_v42  ;;  %v6785_v40 = vunpack.i.l.bf16 %v6784_v42 }
 0x385   : > { %v2676_v12 = vpop.permute.xlu1 %2675  ;;  %v2659_v3 = vsel %vm1171_vm5, %v2657_v17, %v2658_v29  ;;  %v2483_v59 = vsel %vm994_vm4, %v2481_v21, %v2482_v25  ;;  %v2764_v54 = vsel %vm2763_vm13, %v8810_v36, %v6785_v40  ;;  %v2765_v45 = vsel %vm2763_vm13, %v8806_v58, %v6786_v11 }
 0x386   : > { %2723 = vrot.lane.b32.xlu1 %v2659_v3, %s6942_s18  ;;  %2547 = vrot.lane.b32.xlu0 %v2483_v59, %s6943_s19  ;;  %v2064_v23 = vpop.permute.xlu0 %2063  ;;  %v2797_v38 = vsel %vm2796_vm12, %v2764_v54, %v2668_v32  ;;  %v2798_v9 = vsel %vm2796_vm12, %v2765_v45, %v2670_v6  ;;  %v6791_v36 = vunpack.i.h.bf16 %v6789_v18 }
 0x387   : > { %2983 = vmatmul.mubr.f32.vlgmr.msra.gmra.mrb[0].mxu1 %v2797_v38  ;;  %v2310_v35 = vsel %vm1784_vm9, %v12058_v24, %v2064_v23 }
 0x388   : > { %6325 = vmatprep.mubr.msk.f32.mxu1 %vm1784_vm9, %v2670_v6  ;;  %v2767_v30 = vsel %vm2763_vm13, %v8840_v50, %v6791_v36 }
 0x389   : > { %v2678_v4 = vpop.permute.xlu1 %2677 }
 0x38a   : > { %v2672_v27 = vpop.permute.xlu0 %2671 }
 0x38b   : > { %2988 = vmatmul.mubr.f32.gmra.mrb[2].mxu1 %v2798_v9  ;;  %v2799_v16 = vsel %vm2796_vm12, %v2766_v14, %v2672_v27 }
 0x38c   : > { %6326 = vmatprep.mubr.msk.f32.mxu1 %vm1784_vm9, %v2672_v27 }
 0x38d   : > { %v6799_v0 = vpop.permute.xlu1 %6798 }
 0x38e   : > { %v2674_v32 = vpop.permute.xlu0 %2673  ;;  %v6800_v3 = vunpack.i.l.bf16 %v6799_v0  ;;  %v6801_v38 = vunpack.i.h.bf16 %v6799_v0 }
 0x38f   : > { %2993 = vmatmul.mubr.f32.gmra.mrb[4].mxu1 %v2799_v16  ;;  %v2800_v34 = vsel %vm2796_vm12, %v2767_v30, %v2674_v32 }
 0x390   : > { %6327 = vmatprep.mubr.msk.f32.mxu1 %vm1784_vm9, %v2674_v32  ;;  %v2771_v27 = vsel %vm2763_vm13, %v8929_v2, %v6801_v38 }
 0x391   : > { %v9364_v58 = vpop.permute.xlu1 %2067 }
 0x392   : > { %v6794_v6 = vpop.permute.xlu0 %6793 }
 0x393   : > { %v6795_v7 = vunpack.i.l.bf16 %v6794_v6  ;;  %2998 = vmatmul.mubr.f32.gmra.mrb[6].mxu1 %v2800_v34  ;;  %v6796_v18 = vunpack.i.h.bf16 %v6794_v6 }
 0x394   : > { %6328 = vmatprep.mubr.msk.f32.mxu1 %vm1784_vm9, %v2676_v12 }
 0x395   : > { %v2684_v56 = vpop.permute.xlu1 %2683  ;;  %v2768_v28 = vsel %vm2763_vm13, %v8908_v51, %v6795_v7  ;;  %v2769_v11 = vsel %vm2763_vm13, %v8904_v31, %v6796_v18  ;;  %v2770_v31 = vsel %vm2763_vm13, %v8933_v37, %v6800_v3 }
 0x396   : > { %v2211_v13 = vpop.permute.xlu0 %2210  ;;  %v2801_v21 = vsel %vm2796_vm12, %v2768_v28, %v2676_v12  ;;  %v2802_v12 = vsel %vm2796_vm12, %v2769_v11, %v2678_v4  ;;  %v12059_v11 = vld [vmem:[#allocation36_spill] sm:$0xff] }
 0x397   : > { %v2359_v50 = vsel %vm2314_vm11, %v2310_v35, %v2211_v13  ;;  %3003 = vmatmul.mubr.f32.gmra.mrb[8].mxu1 %v2801_v21 }
 0x398   : > { %v2484_v17 = vrot.slane %v2359_v50, 1  ;;  %v2660_v42 = vrot.slane %v2359_v50, 2  ;;  %6329 = vmatprep.mubr.msk.f32.mxu1 %vm1784_vm9, %v2678_v4 }
 0x399   : > { %v2686_v40 = vpop.permute.xlu1 %2685 }
 0x39a   : > { %v2680_v59 = vpop.permute.xlu0 %2679  ;;  %v2661_v51 = vsel %vm1171_vm5, %v2658_v29, %v2660_v42  ;;  %v2485_v54 = vsel %vm994_vm4, %v2482_v25, %v2484_v17 }
 0x39b   : > { %2725 = vrot.lane.b32.xlu1 %v2661_v51, %s6942_s18  ;;  %2549 = vrot.lane.b32.xlu0 %v2485_v54, %s6943_s19  ;;  %v2803_v57 = vsel %vm2796_vm12, %v2770_v31, %v2680_v59 }
 0x39c   : > { %3008 = vmatmul.mubr.f32.gmra.mrb[10].mxu1 %v2802_v12 }
 0x39d   : > { %6330 = vmatprep.mubr.msk.f32.mxu1 %vm1784_vm9, %v2680_v59  ;;  %v6809_v23 = vpop.permute.xlu1 %6808 }
 0x39e   : > { %v2682_v45 = vpop.permute.xlu0 %2681  ;;  %v6810_v30 = vunpack.i.l.bf16 %v6809_v23  ;;  %v6811_v18 = vunpack.i.h.bf16 %v6809_v23 }
 0x39f   : > { %v2804_v9 = vsel %vm2796_vm12, %v2771_v27, %v2682_v45 }
 0x3a0   : > { %3013 = vmatmul.mubr.f32.gmra.mrb[12].mxu1 %v2803_v57  ;;  %v2775_v13 = vsel %vm2763_vm13, %v9012_v22, %v6811_v18 }
 0x3a1   : > { %6331 = vmatprep.mubr.msk.f32.mxu1 %vm1784_vm9, %v2682_v45  ;;  %v2213_v25 = vpop.permute.xlu1 %2212 }
 0x3a2   : > { %v6804_v29 = vpop.permute.xlu0 %6803 }
 0x3a3   : > { %v6805_v4 = vunpack.i.l.bf16 %v6804_v29  ;;  %v6806_v36 = vunpack.i.h.bf16 %v6804_v29 }
 0x3a4   : > { %3018 = vmatmul.mubr.f32.gmra.mrb[14].mxu1 %v2804_v9 }
 0x3a5   : > { %6332 = vmatprep.mubr.msk.f32.mxu1 %vm1784_vm9, %v2684_v56  ;;  %v2692_v0 = vpop.permute.xlu1 %2691  ;;  %v2772_v37 = vsel %vm2763_vm13, %v8993_v26, %v6805_v4  ;;  %v2773_v16 = vsel %vm2763_vm13, %v8989_v61, %v6806_v36 }
 0x3a6   : > { %v2066_v14 = vpop.permute.xlu0 %2065  ;;  %v2805_v32 = vsel %vm2796_vm12, %v2772_v37, %v2684_v56  ;;  %v2806_v34 = vsel %vm2796_vm12, %v2773_v16, %v2686_v40  ;;  %v2774_v56 = vsel %vm2763_vm13, %v9016_v8, %v6810_v30 }
 0x3a7   : > { %v2311_v61 = vsel %vm1784_vm9, %v8816_v55, %v2066_v14 }
 0x3a8   : > { %3023 = vmatmul.mubr.f32.gmra.mrb[16].mxu1 %v2805_v32  ;;  %v9411_v17 = vsel %vm2314_vm11, %v2311_v61, %v2213_v25 }
 0x3a9   : > { %6333 = vmatprep.mubr.msk.f32.mxu1 %vm1784_vm9, %v2686_v40  ;;  %v2694_v2 = vpop.permute.xlu1 %2693  ;;  %v2312_v40 = vsel %vm1784_vm9, %v12059_v11, %v9364_v58  ;;  %v2486_v51 = vrot.slane %v9411_v17, 1  ;;  %v2662_v23 = vrot.slane %v9411_v17, 2 }
 0x3aa   : > { %v2688_v6 = vpop.permute.xlu0 %2687 }
 0x3ab   : > { %v2807_v28 = vsel %vm2796_vm12, %v2774_v56, %v2688_v6 }
 0x3ac   : > { %3028 = vmatmul.mubr.f32.gmra.mrb[18].mxu1 %v2806_v34 }
 0x3ad   : > { %6334 = vmatprep.mubr.msk.f32.mxu1 %vm1784_vm9, %v2688_v6  ;;  %v6819_v7 = vpop.permute.xlu1 %6818 }
 0x3ae   : > { %v2690_v26 = vpop.permute.xlu0 %2689  ;;  %v6820_v58 = vunpack.i.l.bf16 %v6819_v7  ;;  %v6821_v9 = vunpack.i.h.bf16 %v6819_v7 }
 0x3af   : > { %v2808_v50 = vsel %vm2796_vm12, %v2775_v13, %v2690_v26 }
 0x3b0   : > { %3033 = vmatmul.mubr.f32.gmra.mrb[20].mxu1 %v2807_v28  ;;  %v2778_v14 = vsel %vm2763_vm13, %v9101_v5, %v6820_v58  ;;  %v2779_v30 = vsel %vm2763_vm13, %v9097_v53, %v6821_v9 }
 0x3b1   : > { %6335 = vmatprep.mubr.msk.f32.mxu1 %vm1784_vm9, %v2690_v26  ;;  %v2070_v24 = vpop.permute.xlu1 %2069 }
 0x3b2   : > { %v6814_v35 = vpop.permute.xlu0 %6813  ;;  %v2313_v22 = vsel %vm1784_vm9, %v8785_v63, %v2070_v24 }
 0x3b3   : > { %v6815_v21 = vunpack.i.l.bf16 %v6814_v35  ;;  %v6816_v8 = vunpack.i.h.bf16 %v6814_v35 }
 0x3b4   : > { %3038 = vmatmul.mubr.f32.gmra.mrb[22].mxu1 %v2808_v50 }
 0x3b5   : > { %6336 = vmatprep.mubr.msk.f32.mxu1 %vm1784_vm9, %v2692_v0  ;;  %v2217_v42 = vpop.permute.xlu1 %2216  ;;  %v2776_v55 = vsel %vm2763_vm13, %v9078_v60, %v6815_v21  ;;  %v2777_v63 = vsel %vm2763_vm13, %v9074_v19, %v6816_v8 }
 0x3b6   : > { %v2215_v3 = vpop.permute.xlu0 %2214  ;;  %v2809_v59 = vsel %vm2796_vm12, %v2776_v55, %v2692_v0  ;;  %v2362_v54 = vsel %vm2314_vm11, %v2313_v22, %v2217_v42  ;;  %v2810_v4 = vsel %vm2796_vm12, %v2777_v63, %v2694_v2 }
 0x3b7   : > { %v9425_v12 = vsel %vm2314_vm11, %v2312_v40, %v2215_v3  ;;  %v2489_v31 = vrot.slane %v2362_v54, 1  ;;  %v2665_v57 = vrot.slane %v2362_v54, 2  ;;  %v3315_v54 = vld [vmem:[#allocation4 + $0x1a0] sm:$0xff] }
 0x3b8   : > { %v2487_v60 = vrot.slane %v9425_v12, 1  ;;  %v2663_v38 = vrot.slane %v9425_v12, 2  ;;  %3043 = vmatmul.mubr.f32.gmra.mrb[24].mxu1 %v2809_v59 }
 0x3b9   : > { %6337 = vmatprep.mubr.msk.f32.mxu1 %vm1784_vm9, %v2694_v2  ;;  %v2700_v45 = vpop.permute.xlu1 %2699 }
 0x3ba   : > { %v2696_v25 = vpop.permute.xlu0 %2695  ;;  %v2664_v29 = vsel %vm1171_vm5, %v2662_v23, %v2663_v38  ;;  %v2488_v27 = vsel %vm994_vm4, %v2486_v51, %v2487_v60  ;;  %v2666_v0 = vsel %vm1171_vm5, %v2663_v38, %v2665_v57  ;;  %v2490_v37 = vsel %vm994_vm4, %v2487_v60, %v2489_v31  ;;  %v3314_v23 = vld [vmem:[#allocation4 + $0x198] sm:$0xff] }
 0x3bb   : > { %2727 = vrot.lane.b32.xlu1 %v2664_v29, %s6942_s18  ;;  %2551 = vrot.lane.b32.xlu0 %v2488_v27, %s6943_s19  ;;  %v2811_v32 = vsel %vm2796_vm12, %v2778_v14, %v2696_v25  ;;  %v12060_v51 = vmov 0.0  }
 0x3bc   : > { %3048 = vmatmul.mubr.f32.gmra.mrb[26].mxu1 %v2810_v4  ;;  %3181 = vst.msk [vmem:[#allocation4 + $0x28] sm:$0x3] %vm3177_vm14, %v12060_v51  ;;  %3178 = vst.msk [vmem:[#allocation4 + $0x10] sm:$0x3] %vm3177_vm14, %v12060_v51 }
 0x3bd   : > { %6338 = vmatprep.mubr.msk.f32.mxu1 %vm1784_vm9, %v2696_v25  ;;  %v2702_v19 = vpop.permute.xlu1 %2701  ;;  %3184 = vst.msk [vmem:[#allocation4 + $0x40] sm:$0x3] %vm3177_vm14, %v12060_v51  ;;  %3187 = vst.msk [vmem:[#allocation4 + $0x58] sm:$0x3] %vm3177_vm14, %v12060_v51 }
 0x3be   : > { %v2698_v36 = vpop.permute.xlu0 %2697  ;;  %3190 = vst.msk [vmem:[#allocation4 + $0x70] sm:$0x3] %vm3177_vm14, %v12060_v51  ;;  %3193 = vst.msk [vmem:[#allocation4 + $0x88] sm:$0x3] %vm3177_vm14, %v12060_v51 }
 0x3bf   : > { %2729 = vrot.lane.b32.xlu1 %v2666_v0, %s6942_s18  ;;  %2553 = vrot.lane.b32.xlu0 %v2490_v37, %s6943_s19  ;;  %v2812_v6 = vsel %vm2796_vm12, %v2779_v30, %v2698_v36  ;;  %3196 = vst.msk [vmem:[#allocation4 + $0xa0] sm:$0x3] %vm3177_vm14, %v12060_v51  ;;  %3199 = vst.msk [vmem:[#allocation4 + $0xb8] sm:$0x3] %vm3177_vm14, %v12060_v51 }
 0x3c0   : > { %3053 = vmatmul.mubr.f32.gmra.mrb[28].mxu1 %v2811_v32  ;;  %3202 = vst.msk [vmem:[#allocation4 + $0xd0] sm:$0x3] %vm3177_vm14, %v12060_v51  ;;  %3205 = vst.msk [vmem:[#allocation4 + $0xe8] sm:$0x3] %vm3177_vm14, %v12060_v51 }
 0x3c1   : > { %6339 = vmatprep.mubr.msk.f32.mxu1 %vm1784_vm9, %v2698_v36  ;;  %v2704_v16 = vpop.permute.xlu1 %2703  ;;  %3208 = vst.msk [vmem:[#allocation4 + $0x100] sm:$0x3] %vm3177_vm14, %v12060_v51  ;;  %3211 = vst.msk [vmem:[#allocation4 + $0x118] sm:$0x3] %vm3177_vm14, %v12060_v51 }
 0x3c2   : > { %v2524_v2 = vpop.permute.xlu0 %2523  ;;  %3214 = vst.msk [vmem:[#allocation4 + $0x130] sm:$0x3] %vm3177_vm14, %v12060_v51  ;;  %3217 = vst.msk [vmem:[#allocation4 + $0x148] sm:$0x3] %vm3177_vm14, %v12060_v51 }
 0x3c3   : > { %v2780_v34 = vsel %vm2763_vm13, %v9160_v43, %v2524_v2  ;;  %3220 = vst.msk [vmem:[#allocation4 + $0x160] sm:$0x3] %vm3177_vm14, %v12060_v51  ;;  %3223 = vst.msk [vmem:[#allocation4 + $0x178] sm:$0x3] %vm3177_vm14, %v12060_v51  ;;  %3604 = vrot.lane.b32.xlu1 %v3315_v54, %s6944_s20  ;;  %3602 = vrot.lane.b32.xlu0 %v3314_v23, %s6944_s20 }
 0x3c4   : > { %3058 = vmatmul.mubr.f32.gmra.mrb[30].mxu1 %v2812_v6  ;;  %v2813_v18 = vsel %vm2796_vm12, %v2780_v34, %v2700_v45  ;;  %3226 = vst.msk [vmem:[#allocation4 + $0x190] sm:$0x3] %vm3177_vm14, %v12060_v51  ;;  %3229 = vst.msk [vmem:[#allocation4 + $0x1a8] sm:$0x3] %vm3177_vm14, %v12060_v51 }
 0x3c5   : > { %6340 = vmatprep.mubr.msk.f32.mxu1 %vm1784_vm9, %v2700_v45  ;;  %v2706_v5 = vpop.permute.xlu1 %2705 }
 0x3c6   : > { %v2526_v7 = vpop.permute.xlu0 %2525 }
 0x3c7   : > { %v2781_v26 = vsel %vm2763_vm13, %v9156_v46, %v2526_v7 }
 0x3c8   : > { %3063 = vmatmul.mubr.f32.gmra.mrb[32].mxu1 %v2813_v18  ;;  %v2814_v28 = vsel %vm2796_vm12, %v2781_v26, %v2702_v19  ;;  %v9556_v18 = vld [vmem:[%s11908_s4] ss:$0 sm:$0xff] }
 0x3c9   : > { %6341 = vmatprep.mubr.msk.f32.mxu1 %vm1784_vm9, %v2702_v19  ;;  %v2708_v56 = vpop.permute.xlu1 %2707 }
 0x3ca   : > { %v2528_v53 = vpop.permute.xlu0 %2527 }
 0x3cb   : > { %v2782_v43 = vsel %vm2763_vm13, %v9189_v10, %v2528_v53  ;;  %v3316_v45 = vld [vmem:[#allocation4 + $0x1a8] sm:$0x3] }
 0x3cc   : > { %3068 = vmatmul.mubr.f32.gmra.mrb[34].mxu1 %v2814_v28  ;;  %v2815_v35 = vsel %vm2796_vm12, %v2782_v43, %v2704_v16  ;;  %3606 = vrot.lane.b32.xlu1 %v3316_v45, %s6944_s20 }
 0x3cd   : > { %6342 = vmatprep.mubr.msk.f32.mxu1 %vm1784_vm9, %v2704_v16  ;;  %v2710_v61 = vpop.permute.xlu1 %2709 }
 0x3ce   : > { %v2530_v24 = vpop.permute.xlu0 %2529 }
 0x3cf   : > { %v2783_v46 = vsel %vm2763_vm13, %v9193_v44, %v2530_v24 }
 0x3d0   : > { %3073 = vmatmul.mubr.f32.gmra.mrb[36].mxu1 %v2815_v35  ;;  %v2816_v21 = vsel %vm2796_vm12, %v2783_v46, %v2706_v5 }
 0x3d1   : > { %6343 = vmatprep.mubr.msk.f32.mxu1 %vm1784_vm9, %v2706_v5  ;;  %v2712_v50 = vpop.permute.xlu1 %2711 }
 0x3d2   : > { %v2532_v13 = vpop.permute.xlu0 %2531 }
 0x3d3   : > { %v2784_v10 = vsel %vm2763_vm13, %v9223_v15, %v2532_v13 }
 0x3d4   : > { %3078 = vmatmul.mubr.f32.gmra.mrb[38].mxu1 %v2816_v21  ;;  %v2817_v42 = vsel %vm2796_vm12, %v2784_v10, %v2708_v56 }
 0x3d5   : > { %6344 = vmatprep.mubr.msk.f32.mxu1 %vm1784_vm9, %v2708_v56  ;;  %v2714_v44 = vpop.permute.xlu1 %2713 }
 0x3d6   : > { %v2534_v8 = vpop.permute.xlu0 %2533 }
 0x3d7   : > { %v2785_v55 = vsel %vm2763_vm13, %v9220_v33, %v2534_v8 }
 0x3d8   : > { %3083 = vmatmul.mubr.f32.gmra.mrb[40].mxu1 %v2817_v42  ;;  %v2818_v40 = vsel %vm2796_vm12, %v2785_v55, %v2710_v61 }
 0x3d9   : > { %6345 = vmatprep.mubr.msk.f32.mxu1 %vm1784_vm9, %v2710_v61  ;;  %v2716_v59 = vpop.permute.xlu1 %2715 }
 0x3da   : > { %v2536_v11 = vpop.permute.xlu0 %2535 }
 0x3db   : > { %v2786_v22 = vsel %vm2763_vm13, %v9247_v52, %v2536_v11 }
 0x3dc   : > { %3088 = vmatmul.mubr.f32.gmra.mrb[42].mxu1 %v2818_v40  ;;  %v2819_v3 = vsel %vm2796_vm12, %v2786_v22, %v2712_v50 }
 0x3dd   : > { %6346 = vmatprep.mubr.msk.f32.mxu1 %vm1784_vm9, %v2712_v50  ;;  %v2718_v38 = vpop.permute.xlu1 %2717 }
 0x3de   : > { %v2538_v15 = vpop.permute.xlu0 %2537 }
 0x3df   : > { %v2787_v33 = vsel %vm2763_vm13, %v9250_v39, %v2538_v15 }
 0x3e0   : > { %3093 = vmatmul.mubr.f32.gmra.mrb[44].mxu1 %v2819_v3  ;;  %v2820_v39 = vsel %vm2796_vm12, %v2787_v33, %v2714_v44 }
 0x3e1   : > { %6347 = vmatprep.mubr.msk.f32.mxu1 %vm1784_vm9, %v2714_v44 }
 0x3e2   : > { %v2540_v52 = vpop.permute.xlu0 %2539 }
 0x3e3   : > { %v2788_v60 = vsel %vm2763_vm13, %v9277_v1, %v2540_v52 }
 0x3e4   : > { %3098 = vmatmul.mubr.f32.gmra.mrb[46].mxu1 %v2820_v39  ;;  %v2821_v58 = vsel %vm2796_vm12, %v2788_v60, %v2716_v59  ;;  %v2720_v1 = vpop.permute.xlu1 %2719 }
 0x3e5   : > { %6348 = vmatprep.mubr.msk.f32.mxu1 %vm1784_vm9, %v2716_v59 }
 0x3e6   : > { %v2542_v63 = vpop.permute.xlu0 %2541 }
 0x3e7   : > { %v2789_v31 = vsel %vm2763_vm13, %v9274_v49, %v2542_v63 }
 0x3e8   : > { %3103 = vmatmul.mubr.f32.gmra.mrb[48].mxu1 %v2821_v58  ;;  %v2822_v25 = vsel %vm2796_vm12, %v2789_v31, %v2718_v38  ;;  %v2722_v19 = vpop.permute.xlu1 %2721 }
 0x3e9   : > { %6349 = vmatprep.mubr.msk.f32.mxu1 %vm1784_vm9, %v2718_v38 }
 0x3ea   : > { %v2544_v57 = vpop.permute.xlu0 %2543 }
 0x3eb   : > { %v2790_v29 = vsel %vm2763_vm13, %v9315_v62, %v2544_v57 }
 0x3ec   : > { %3108 = vmatmul.mubr.f32.gmra.mrb[50].mxu1 %v2822_v25  ;;  %v2823_v4 = vsel %vm2796_vm12, %v2790_v29, %v2720_v1 }
 0x3ed   : > { %6350 = vmatprep.mubr.msk.f32.mxu1 %vm1784_vm9, %v2720_v1 }
 0x3ee   : > { %v2546_v27 = vpop.permute.xlu0 %2545 }
 0x3ef   : > { %v2791_v49 = vsel %vm2763_vm13, %v9306_v20, %v2546_v27 }
 0x3f0   : > { %3113 = vmatmul.mubr.f32.gmra.mrb[52].mxu1 %v2823_v4  ;;  %v2824_v9 = vsel %vm2796_vm12, %v2791_v49, %v2722_v19 }
 0x3f1   : > { %6351 = vmatprep.mubr.msk.f32.mxu1 %vm1784_vm9, %v2722_v19 }
 0x3f4   : > { %3118 = vmatmul.mubr.f32.gmra.mrb[54].mxu1 %v2824_v9 }
 0x3f8   : > { %v2724_v36 = vpop.permute.xlu1 %2723  ;;  %v2548_v0 = vpop.permute.xlu0 %2547 }
 0x3f9   : > { %v2792_v62 = vsel %vm2763_vm13, %v9337_v47, %v2548_v0  ;;  %6352 = vmatprep.mubr.msk.f32.mxu1 %vm1784_vm9, %v2724_v36 }
 0x3fa   : > { %v2825_v37 = vsel %vm2796_vm12, %v2792_v62, %v2724_v36 }
 0x3fb   : > { %3123 = vmatmul.mubr.f32.gmra.mrb[56].mxu1 %v2825_v37 }
 0x40d   : > { %v2726_v14 = vpop.permute.xlu1 %2725  ;;  %v2550_v32 = vpop.permute.xlu0 %2549 }
 0x40e   : > { %v2793_v20 = vsel %vm2763_vm13, %v9344_v41, %v2550_v32  ;;  %6353 = vmatprep.mubr.msk.f32.mxu1 %vm1784_vm9, %v2726_v14 }
 0x40f   : > { %v2826_v16 = vsel %vm2796_vm12, %v2793_v20, %v2726_v14 }
 0x410   : > { %3128 = vmatmul.mubr.f32.gmra.mrb[58].mxu1 %v2826_v16 }
 0x42d   : > { %v2728_v2 = vpop.permute.xlu1 %2727  ;;  %v2552_v30 = vpop.permute.xlu0 %2551 }
 0x42e   : > { %v2794_v47 = vsel %vm2763_vm13, %v9411_v17, %v2552_v30  ;;  %6354 = vmatprep.mubr.msk.f32.mxu1 %vm1784_vm9, %v2728_v2 }
 0x42f   : > { %v2827_v6 = vsel %vm2796_vm12, %v2794_v47, %v2728_v2 }
 0x430   : > { %3133 = vmatmul.mubr.f32.gmra.mrb[60].mxu1 %v2827_v6 }
 0x431   : > { %v2730_v34 = vpop.permute.xlu1 %2729  ;;  %v2554_v5 = vpop.permute.xlu0 %2553 }
 0x432   : > { %v2795_v41 = vsel %vm2763_vm13, %v9425_v12, %v2554_v5  ;;  %6355 = vmatprep.mubr.msk.f32.mxu1 %vm1784_vm9, %v2730_v34 }
 0x433   : > { %v2828_v7 = vsel %vm2796_vm12, %v2795_v41, %v2730_v34 }
 0x434   : > { %3138 = vmatmul.mubr.f32.gmra.mrb[62].mxu1 %v2828_v7 }
 0x45a   : > { %v2984_v17 = vpop.f32.mrb[0].mxu1 }
 0x45b   : > { %v2985_v26 = vadd.f32 %v9556_v18, %v2984_v17  ;;  %v2986_v56 = vpop.f32.mrb[1].mxu1 }
 0x45d   : > { %v3143_v53 = vmax.f32 %v2985_v26, 0.0 }
 0x45e   : > { %v2989_v28 = vpop.f32.mrb[2].mxu1 }
 0x45f   : > { %3231 = vst.msk [vmem:[#allocation4 + $0x19] sm:$0xff] %vm2314_vm11, %v3143_v53  ;;  %v2990_v12 = vadd.f32 %v9556_v18, %v2989_v28  ;;  %v2991_v43 = vpop.f32.mrb[3].mxu1 }
 0x461   : > { %v3144_v61 = vmax.f32 %v2990_v12, 0.0 }
 0x462   : > { %v2994_v24 = vpop.f32.mrb[4].mxu1 }
 0x463   : > { %3232 = vst.msk [vmem:[#allocation4 + $0x21] sm:$0xff] %vm2314_vm11, %v3144_v61  ;;  %v2995_v35 = vadd.f32 %v9556_v18, %v2994_v24  ;;  %v2996_v46 = vpop.f32.mrb[5].mxu1 }
 0x465   : > { %v3145_v13 = vmax.f32 %v2995_v35, 0.0 }
 0x466   : > { %v2999_v21 = vpop.f32.mrb[6].mxu1  ;;  %v9563_v50 = vld [vmem:[#allocation4 + $0x18] sm:$0xff] }
 0x467   : > { %3233 = vst.msk [vmem:[#allocation4 + $0x31] sm:$0xff] %vm2314_vm11, %v3145_v13  ;;  %v3000_v10 = vadd.f32 %v9556_v18, %v2999_v21  ;;  %v3001_v8 = vpop.f32.mrb[7].mxu1  ;;  %3365 = vrot.lane.b32.xlu0 %v9563_v50, %s6940_s15 }
 0x469   : > { %v3146_v42 = vmax.f32 %v3000_v10, 0.0 }
 0x46a   : > { %v3004_v55 = vpop.f32.mrb[8].mxu1  ;;  %v9569_v44 = vld [vmem:[#allocation4 + $0x20] sm:$0xff]  ;;  %v9571_v11 = vld [vmem:[#allocation4 + $0x28] sm:$0x3] }
 0x46b   : > { %3234 = vst.msk [vmem:[#allocation4 + $0x39] sm:$0xff] %vm2314_vm11, %v3146_v42  ;;  %v3005_v40 = vadd.f32 %v9556_v18, %v3004_v55  ;;  %v3006_v22 = vpop.f32.mrb[9].mxu1  ;;  %3367 = vrot.lane.b32.xlu1 %v9569_v44, %s6940_s15  ;;  %3369 = vrot.lane.b32.xlu0 %v9571_v11, %s6940_s15 }
 0x46d   : > { %v3147_v15 = vmax.f32 %v3005_v40, 0.0 }
 0x46e   : > { %v3269_v3 = vld [vmem:[#allocation4 + $0x30] sm:$0xff] }
 0x46f   : > { %3235 = vst.msk [vmem:[#allocation4 + $0x49] sm:$0xff] %vm2314_vm11, %v3147_v15  ;;  %v3009_v59 = vpop.f32.mrb[10].mxu1  ;;  %3512 = vrot.lane.b32.xlu0 %v3269_v3, %s6944_s20 }
 0x470   : > { %v3010_v33 = vadd.f32 %v9556_v18, %v3009_v59  ;;  %v3011_v51 = vpop.f32.mrb[11].mxu1 }
 0x472   : > { %v3148_v52 = vmax.f32 %v3010_v33, 0.0  ;;  %v3270_v39 = vld [vmem:[#allocation4 + $0x38] sm:$0xff]  ;;  %v3271_v63 = vld [vmem:[#allocation4 + $0x40] sm:$0x3] }
 0x473   : > { %v3014_v54 = vpop.f32.mrb[12].mxu1  ;;  %3514 = vrot.lane.b32.xlu1 %v3270_v39, %s6944_s20  ;;  %3371 = vrot.lane.b32.xlu0 %v3269_v3, %s6940_s15 }
 0x474   : > { %3236 = vst.msk [vmem:[#allocation4 + $0x51] sm:$0xff] %vm2314_vm11, %v3148_v52  ;;  %v3015_v23 = vadd.f32 %v9556_v18, %v3014_v54  ;;  %v3016_v60 = vpop.f32.mrb[13].mxu1 }
 0x476   : > { %v3149_v38 = vmax.f32 %v3015_v23, 0.0  ;;  %v3272_v19 = vld [vmem:[#allocation4 + $0x48] sm:$0xff] }
 0x477   : > { %v3019_v58 = vpop.f32.mrb[14].mxu1  ;;  %3373 = vrot.lane.b32.xlu1 %v3270_v39, %s6940_s15  ;;  %3516 = vrot.lane.b32.xlu0 %v3271_v63, %s6944_s20 }
 0x478   : > { %3237 = vst.msk [vmem:[#allocation4 + $0x61] sm:$0xff] %vm2314_vm11, %v3149_v38  ;;  %v3020_v45 = vadd.f32 %v9556_v18, %v3019_v58  ;;  %v3021_v31 = vpop.f32.mrb[15].mxu1 }
 0x47a   : > { %v3150_v1 = vmax.f32 %v3020_v45, 0.0 }
 0x47b   : > { %v3024_v57 = vpop.f32.mrb[16].mxu1  ;;  %v3273_v25 = vld [vmem:[#allocation4 + $0x50] sm:$0xff]  ;;  %3375 = vrot.lane.b32.xlu0 %v3271_v63, %s6940_s15  ;;  %v3274_v9 = vld [vmem:[#allocation4 + $0x58] sm:$0x3] }
 0x47c   : > { %3238 = vst.msk [vmem:[#allocation4 + $0x69] sm:$0xff] %vm2314_vm11, %v3150_v1  ;;  %v3025_v29 = vadd.f32 %v9556_v18, %v3024_v57  ;;  %v3026_v27 = vpop.f32.mrb[17].mxu1  ;;  %3520 = vrot.lane.b32.xlu1 %v3273_v25, %s6944_s20 }
 0x47e   : > { %v3151_v4 = vmax.f32 %v3025_v29, 0.0 }
 0x47f   : > { %v3029_v49 = vpop.f32.mrb[18].mxu1  ;;  %3518 = vrot.lane.b32.xlu0 %v3272_v19, %s6944_s20  ;;  %v3275_v34 = vld [vmem:[#allocation4 + $0x60] sm:$0xff] }
 0x480   : > { %3239 = vst.msk [vmem:[#allocation4 + $0x79] sm:$0xff] %vm2314_vm11, %v3151_v4  ;;  %v3030_v36 = vadd.f32 %v9556_v18, %v3029_v49  ;;  %v3031_v0 = vpop.f32.mrb[19].mxu1  ;;  %3522 = vrot.lane.b32.xlu1 %v3274_v9, %s6944_s20 }
 0x482   : > { %v3152_v62 = vmax.f32 %v3030_v36, 0.0 }
 0x483   : > { %v3034_v37 = vpop.f32.mrb[20].mxu1  ;;  %3377 = vrot.lane.b32.xlu0 %v3272_v19, %s6940_s15  ;;  %v3276_v2 = vld [vmem:[#allocation4 + $0x68] sm:$0xff]  ;;  %v3277_v41 = vld [vmem:[#allocation4 + $0x70] sm:$0x3] }
 0x484   : > { %3240 = vst.msk [vmem:[#allocation4 + $0x81] sm:$0xff] %vm2314_vm11, %v3152_v62  ;;  %v3035_v14 = vadd.f32 %v9556_v18, %v3034_v37  ;;  %v3036_v32 = vpop.f32.mrb[21].mxu1  ;;  %3379 = vrot.lane.b32.xlu1 %v3273_v25, %s6940_s15 }
 0x486   : > { %v3153_v20 = vmax.f32 %v3035_v14, 0.0 }
 0x487   : > { %v3039_v16 = vpop.f32.mrb[22].mxu1  ;;  %3381 = vrot.lane.b32.xlu0 %v3274_v9, %s6940_s15  ;;  %v3278_v61 = vld [vmem:[#allocation4 + $0x78] sm:$0xff] }
 0x488   : > { %3241 = vst.msk [vmem:[#allocation4 + $0x91] sm:$0xff] %vm2314_vm11, %v3153_v20  ;;  %v3040_v30 = vadd.f32 %v9556_v18, %v3039_v16  ;;  %v3041_v47 = vpop.f32.mrb[23].mxu1  ;;  %3526 = vrot.lane.b32.xlu1 %v3276_v2, %s6944_s20 }
 0x48a   : > { %v3154_v6 = vmax.f32 %v3040_v30, 0.0 }
 0x48b   : > { %v3044_v5 = vpop.f32.mrb[24].mxu1  ;;  %3524 = vrot.lane.b32.xlu0 %v3275_v34, %s6944_s20  ;;  %v3279_v21 = vld [vmem:[#allocation4 + $0x80] sm:$0xff]  ;;  %v3280_v55 = vld [vmem:[#allocation4 + $0x88] sm:$0x3] }
 0x48c   : > { %3242 = vst.msk [vmem:[#allocation4 + $0x99] sm:$0xff] %vm2314_vm11, %v3154_v6  ;;  %v3045_v7 = vadd.f32 %v9556_v18, %v3044_v5  ;;  %v3046_v17 = vpop.f32.mrb[25].mxu1  ;;  %3528 = vrot.lane.b32.xlu1 %v3277_v41, %s6944_s20 }
 0x48e   : > { %v3155_v26 = vmax.f32 %v3045_v7, 0.0 }
 0x48f   : > { %v3049_v56 = vpop.f32.mrb[26].mxu1  ;;  %3383 = vrot.lane.b32.xlu0 %v3275_v34, %s6940_s15  ;;  %v3281_v33 = vld [vmem:[#allocation4 + $0x90] sm:$0xff] }
 0x490   : > { %3243 = vst.msk [vmem:[#allocation4 + $0xa9] sm:$0xff] %vm2314_vm11, %v3155_v26  ;;  %v3050_v53 = vadd.f32 %v9556_v18, %v3049_v56  ;;  %v3051_v28 = vpop.f32.mrb[27].mxu1  ;;  %3385 = vrot.lane.b32.xlu1 %v3276_v2, %s6940_s15 }
 0x492   : > { %v3156_v12 = vmax.f32 %v3050_v53, 0.0 }
 0x493   : > { %v3054_v43 = vpop.f32.mrb[28].mxu1  ;;  %3387 = vrot.lane.b32.xlu0 %v3277_v41, %s6940_s15  ;;  %v3283_v23 = vld [vmem:[#allocation4 + $0xa0] sm:$0x3]  ;;  %v3282_v58 = vld [vmem:[#allocation4 + $0x98] sm:$0xff] }
 0x494   : > { %3244 = vst.msk [vmem:[#allocation4 + $0xb1] sm:$0xff] %vm2314_vm11, %v3156_v12  ;;  %v3055_v24 = vadd.f32 %v9556_v18, %v3054_v43  ;;  %v3056_v35 = vpop.f32.mrb[29].mxu1  ;;  %3389 = vrot.lane.b32.xlu1 %v3278_v61, %s6940_s15 }
 0x496   : > { %v3157_v46 = vmax.f32 %v3055_v24, 0.0 }
 0x497   : > { %v3059_v13 = vpop.f32.mrb[30].mxu1  ;;  %3530 = vrot.lane.b32.xlu0 %v3278_v61, %s6944_s20  ;;  %v3284_v29 = vld [vmem:[#allocation4 + $0xa8] sm:$0xff] }
 0x498   : > { %3245 = vst.msk [vmem:[#allocation4 + $0xc1] sm:$0xff] %vm2314_vm11, %v3157_v46  ;;  %v3060_v10 = vadd.f32 %v9556_v18, %v3059_v13  ;;  %v3061_v8 = vpop.f32.mrb[31].mxu1  ;;  %3532 = vrot.lane.b32.xlu1 %v3279_v21, %s6944_s20 }
 0x49a   : > { %v3158_v42 = vmax.f32 %v3060_v10, 0.0 }
 0x49b   : > { %v3064_v40 = vpop.f32.mrb[32].mxu1  ;;  %3534 = vrot.lane.b32.xlu0 %v3280_v55, %s6944_s20  ;;  %v3285_v9 = vld [vmem:[#allocation4 + $0xb0] sm:$0xff]  ;;  %v3286_v37 = vld [vmem:[#allocation4 + $0xb8] sm:$0x3] }
 0x49c   : > { %3246 = vst.msk [vmem:[#allocation4 + $0xc9] sm:$0xff] %vm2314_vm11, %v3158_v42  ;;  %v3065_v22 = vadd.f32 %v9556_v18, %v3064_v40  ;;  %v3066_v15 = vpop.f32.mrb[33].mxu1  ;;  %3393 = vrot.lane.b32.xlu1 %v3280_v55, %s6940_s15 }
 0x49e   : > { %v3159_v3 = vmax.f32 %v3065_v22, 0.0 }
 0x49f   : > { %v3069_v59 = vpop.f32.mrb[34].mxu1  ;;  %3391 = vrot.lane.b32.xlu0 %v3279_v21, %s6940_s15  ;;  %v3287_v30 = vld [vmem:[#allocation4 + $0xc0] sm:$0xff] }
 0x4a0   : > { %3247 = vst.msk [vmem:[#allocation4 + $0xd9] sm:$0xff] %vm2314_vm11, %v3159_v3  ;;  %v3070_v51 = vadd.f32 %v9556_v18, %v3069_v59  ;;  %v3071_v52 = vpop.f32.mrb[35].mxu1  ;;  %3536 = vrot.lane.b32.xlu1 %v3281_v33, %s6944_s20 }
 0x4a2   : > { %v3160_v39 = vmax.f32 %v3070_v51, 0.0 }
 0x4a3   : > { %v3074_v54 = vpop.f32.mrb[36].mxu1  ;;  %3395 = vrot.lane.b32.xlu0 %v3281_v33, %s6940_s15  ;;  %v9654_v41 = vld [vmem:[#allocation4 + $0xd0] sm:$0x3]  ;;  %v3288_v56 = vld [vmem:[#allocation4 + $0xc8] sm:$0xff] }
 0x4a4   : > { %3248 = vst.msk [vmem:[#allocation4 + $0xe1] sm:$0xff] %vm2314_vm11, %v3160_v39  ;;  %v3075_v60 = vadd.f32 %v9556_v18, %v3074_v54  ;;  %v3076_v38 = vpop.f32.mrb[37].mxu1  ;;  %3540 = vrot.lane.b32.xlu1 %v3283_v23, %s6944_s20  ;;  %v9704_v54 = vpop.permute.xlu0 %3602 }
 0x4a6   : > { %v3161_v63 = vmax.f32 %v3075_v60, 0.0 }
 0x4a7   : > { %v3079_v45 = vpop.f32.mrb[38].mxu1  ;;  %3538 = vrot.lane.b32.xlu0 %v3282_v58, %s6944_s20 }
 0x4a8   : > { %3249 = vst.msk [vmem:[#allocation4 + $0xf1] sm:$0xff] %vm2314_vm11, %v3161_v63  ;;  %v3080_v31 = vadd.f32 %v9556_v18, %v3079_v45  ;;  %v3081_v1 = vpop.f32.mrb[39].mxu1  ;;  %3397 = vrot.lane.b32.xlu1 %v3282_v58, %s6940_s15 }
 0x4aa   : > { %v3162_v57 = vmax.f32 %v3080_v31, 0.0 }
 0x4ab   : > { %v3084_v25 = vpop.f32.mrb[40].mxu1  ;;  %3399 = vrot.lane.b32.xlu0 %v3283_v23, %s6940_s15  ;;  %v9708_v23 = vpop.permute.xlu1 %3604 }
 0x4ac   : > { %3250 = vst.msk [vmem:[#allocation4 + $0xf9] sm:$0xff] %vm2314_vm11, %v3162_v57  ;;  %v3085_v27 = vadd.f32 %v9556_v18, %v3084_v25  ;;  %v3086_v4 = vpop.f32.mrb[41].mxu1  ;;  %3401 = vrot.lane.b32.xlu1 %v3284_v29, %s6940_s15 }
 0x4ae   : > { %v3163_v19 = vmax.f32 %v3085_v27, 0.0 }
 0x4af   : > { %v3089_v49 = vpop.f32.mrb[42].mxu1  ;;  %3542 = vrot.lane.b32.xlu0 %v3284_v29, %s6944_s20  ;;  %v9720_v58 = vpop.permute.xlu1 %3606 }
 0x4b0   : > { %3251 = vst.msk [vmem:[#allocation4 + $0x109] sm:$0xff] %vm2314_vm11, %v3163_v19  ;;  %v3090_v36 = vadd.f32 %v9556_v18, %v3089_v49  ;;  %v3091_v0 = vpop.f32.mrb[43].mxu1  ;;  %3544 = vrot.lane.b32.xlu1 %v3285_v9, %s6944_s20 }
 0x4b2   : > { %v3164_v62 = vmax.f32 %v3090_v36, 0.0 }
 0x4b3   : > { %v3094_v14 = vpop.f32.mrb[44].mxu1  ;;  %3546 = vrot.lane.b32.xlu0 %v3286_v37, %s6944_s20 }
 0x4b4   : > { %3252 = vst.msk [vmem:[#allocation4 + $0x111] sm:$0xff] %vm2314_vm11, %v3164_v62  ;;  %v3095_v32 = vadd.f32 %v9556_v18, %v3094_v14  ;;  %v3096_v20 = vpop.f32.mrb[45].mxu1  ;;  %3405 = vrot.lane.b32.xlu1 %v3286_v37, %s6940_s15 }
 0x4b6   : > { %v3165_v16 = vmax.f32 %v3095_v32, 0.0 }
 0x4b7   : > { %v3099_v2 = vpop.f32.mrb[46].mxu1  ;;  %3403 = vrot.lane.b32.xlu0 %v3285_v9, %s6940_s15  ;;  %v9665_v61 = vld [vmem:[#allocation4 + $0x108] sm:$0xff] }
 0x4b8   : > { %3253 = vst.msk [vmem:[#allocation4 + $0x121] sm:$0xff] %vm2314_vm11, %v3165_v16  ;;  %v3100_v47 = vadd.f32 %v9556_v18, %v3099_v2  ;;  %v3101_v6 = vpop.f32.mrb[47].mxu1  ;;  %3548 = vrot.lane.b32.xlu1 %v3287_v30, %s6944_s20 }
 0x4b9   : > { %v4217_v6 = vld [vmem:[%s11909_s5] sm:$0xff] }
 0x4ba   : > { %v3166_v34 = vmax.f32 %v3100_v47, 0.0 }
 0x4bb   : > { %v3104_v5 = vpop.f32.mrb[48].mxu1  ;;  %3407 = vrot.lane.b32.xlu0 %v3287_v30, %s6940_s15  ;;  %v9667_v35 = vld [vmem:[#allocation4 + $0x110] sm:$0xff]  ;;  %v9675_v10 = vld [vmem:[#allocation4 + $0x118] sm:$0x3] }
 0x4bc   : > { %3254 = vst.msk [vmem:[#allocation4 + $0x129] sm:$0xff] %vm2314_vm11, %v3166_v34  ;;  %v3105_v7 = vadd.f32 %v9556_v18, %v3104_v5  ;;  %v3106_v17 = vpop.f32.mrb[49].mxu1  ;;  %3552 = vrot.lane.b32.xlu1 %v9654_v41, %s6944_s20  ;;  %v4218_v34 = vld [vmem:[%s11909_s5 + $0x8] sm:$0xff]  ;;  %v4219_v5 = vld [vmem:[%s11909_s5 + $0x10] sm:$0xff] }
 0x4bd   : > { %v6649_v17 = vpack.c.bf16 %v4218_v34, %v4217_v6 }
 0x4be   : > { %v3167_v26 = vmax.f32 %v3105_v7, 0.0 }
 0x4bf   : > { %v3109_v53 = vpop.f32.mrb[50].mxu1  ;;  %3550 = vrot.lane.b32.xlu0 %v3288_v56, %s6944_s20  ;;  %v9685_v15 = vld [vmem:[#allocation4 + $0x120] sm:$0xff]  ;;  %6747 = vmatpush1.bf16.msra.mxu1 %v6649_v17 }
 0x4c0   : > { %3255 = vst.msk [vmem:[#allocation4 + $0x139] sm:$0xff] %vm2314_vm11, %v3167_v26  ;;  %v3110_v28 = vadd.f32 %v9556_v18, %v3109_v53  ;;  %v3111_v12 = vpop.f32.mrb[51].mxu1  ;;  %3409 = vrot.lane.b32.xlu1 %v3288_v56, %s6940_s15  ;;  %v4220_v26 = vld [vmem:[%s11909_s5 + $0x18] sm:$0xff]  ;;  %6732 = vmatprep.subr.bf16.mxu1 %v12026_v48 }
 0x4c1   : > { %v6652_v56 = vpack.c.bf16 %v4220_v26, %v4219_v5  ;;  %6650 = vmatpush1.bf16.msra.mxu0 %v6649_v17  ;;  %v9810_v12 = vld [vmem:[#allocation4 + $0xe0] sm:$0xff] }
 0x4c2   : > { %v3168_v43 = vmax.f32 %v3110_v28, 0.0  ;;  %6651 = vmatprep.subr.bf16.mxu0 %v12026_v48 }
 0x4c3   : > { %v3114_v24 = vpop.f32.mrb[52].mxu1  ;;  %3425 = vrot.lane.b32.xlu0 %v9665_v61, %s6940_s15  ;;  %v9677_v42 = vld [vmem:[#allocation4 + $0x128] sm:$0xff]  ;;  %v9687_v3 = vld [vmem:[#allocation4 + $0x130] sm:$0x3]  ;;  %6748 = vmatpush1.bf16.msra.mxu1 %v6652_v56 }
 0x4c4   : > { %3256 = vst.msk [vmem:[#allocation4 + $0x141] sm:$0xff] %vm2314_vm11, %v3168_v43  ;;  %v3115_v46 = vadd.f32 %v9556_v18, %v3114_v24  ;;  %v3116_v13 = vpop.f32.mrb[53].mxu1  ;;  %3427 = vrot.lane.b32.xlu1 %v9667_v35, %s6940_s15  ;;  %6733 = vmatprep.subr.bf16.mxu1 %v12026_v48 }
 0x4c5   : > { %6653 = vmatpush1.bf16.msra.mxu0 %v6652_v56 }
 0x4c6   : > { %v3169_v21 = vmax.f32 %v3115_v46, 0.0  ;;  %6654 = vmatprep.subr.bf16.mxu0 %v12026_v48  ;;  %v3290_v46 = vld [vmem:[#allocation4 + $0xd8] sm:$0xff] }
 0x4c7   : > { %v3119_v8 = vpop.f32.mrb[54].mxu1  ;;  %3429 = vrot.lane.b32.xlu0 %v9675_v10, %s6940_s15  ;;  %v9710_v60 = vld [vmem:[#allocation4 + $0x138] sm:$0xff] }
 0x4c8   : > { %3257 = vst.msk [vmem:[#allocation4 + $0x151] sm:$0xff] %vm2314_vm11, %v3169_v21  ;;  %v3120_v55 = vadd.f32 %v9556_v18, %v3119_v8  ;;  %v3121_v40 = vpop.f32.mrb[55].mxu1  ;;  %3574 = vrot.lane.b32.xlu1 %v9677_v42, %s6944_s20  ;;  %v4221_v8 = vld [vmem:[%s11909_s5 + $0x20] sm:$0xff] }
 0x4ca   : > { %v3170_v22 = vmax.f32 %v3120_v55, 0.0  ;;  %v4222_v55 = vld [vmem:[%s11909_s5 + $0x28] sm:$0xff] }
 0x4cb   : > { %3572 = vrot.lane.b32.xlu0 %v9685_v15, %s6944_s20  ;;  %v9700_v39 = vld [vmem:[#allocation4 + $0x140] sm:$0xff]  ;;  %v9712_v38 = vld [vmem:[#allocation4 + $0x148] sm:$0x3] }
 0x4cc   : > { %3258 = vst.msk [vmem:[#allocation4 + $0x159] sm:$0xff] %vm2314_vm11, %v3170_v22  ;;  %3576 = vrot.lane.b32.xlu1 %v9687_v3, %s6944_s20  ;;  %v6655_v22 = vpack.c.bf16 %v4222_v55, %v4221_v8  ;;  %v4225_v8 = vld [vmem:[%s11909_s5 + $0x40] sm:$0xff]  ;;  %v4226_v55 = vld [vmem:[%s11909_s5 + $0x48] sm:$0xff] }
 0x4ce   : > { %v3124_v59 = vpop.f32.mrb[56].mxu1  ;;  %6749 = vmatpush1.bf16.msra.mxu1 %v6655_v22  ;;  %6656 = vmatpush1.bf16.msra.mxu0 %v6655_v22 }
 0x4cf   : > { %v3125_v33 = vadd.f32 %v9556_v18, %v3124_v59  ;;  %v3126_v51 = vpop.f32.mrb[57].mxu1  ;;  %3431 = vrot.lane.b32.xlu0 %v9685_v15, %s6940_s15  ;;  %v9738_v25 = vld [vmem:[#allocation4 + $0x150] sm:$0xff]  ;;  %6734 = vmatprep.subr.bf16.mxu1 %v12026_v48 }
 0x4d0   : > { %3433 = vrot.lane.b32.xlu1 %v9677_v42, %s6940_s15  ;;  %6657 = vmatprep.subr.bf16.mxu0 %v12026_v48 }
 0x4d1   : > { %v3171_v52 = vmax.f32 %v3125_v33, 0.0 }
 0x4d3   : > { %3259 = vst.msk [vmem:[#allocation4 + $0x169] sm:$0xff] %vm2314_vm11, %v3171_v52  ;;  %3435 = vrot.lane.b32.xlu0 %v9687_v3, %s6940_s15  ;;  %v9728_v31 = vld [vmem:[#allocation4 + $0x158] sm:$0xff]  ;;  %v9740_v27 = vld [vmem:[#allocation4 + $0x160] sm:$0x3] }
 0x4d4   : > { %3580 = vrot.lane.b32.xlu1 %v9700_v39, %s6944_s20 }
 0x4d7   : > { %3578 = vrot.lane.b32.xlu0 %v9710_v60, %s6944_s20 }
 0x4d8   : > { %3582 = vrot.lane.b32.xlu1 %v9712_v38, %s6944_s20 }
 0x4d9   : > { %v9718_v63 = vpop.permute.xlu0 %3365 }
 0x4da   : > { %v9766_v32 = vld [vmem:[#allocation4 + $0x168] sm:$0xff] }
 0x4db   : > { %3437 = vrot.lane.b32.xlu0 %v9710_v60, %s6940_s15 }
 0x4dc   : > { %3439 = vrot.lane.b32.xlu1 %v9700_v39, %s6940_s15 }
 0x4dd   : > { %v9726_v45 = vpop.permute.xlu0 %3369  ;;  %v9734_v1 = vpop.permute.xlu1 %3367 }
 0x4df   : > { %3441 = vrot.lane.b32.xlu0 %v9712_v38, %s6940_s15 }
 0x4e0   : > { %3586 = vrot.lane.b32.xlu1 %v9728_v31, %s6944_s20 }
 0x4e1   : > { %v9736_v57 = vpop.permute.xlu0 %3512 }
 0x4e3   : > { %v3129_v29 = vpop.f32.mrb[58].mxu1  ;;  %3584 = vrot.lane.b32.xlu0 %v9738_v25, %s6944_s20 }
 0x4e4   : > { %v3130_v4 = vadd.f32 %v9556_v18, %v3129_v29  ;;  %3588 = vrot.lane.b32.xlu1 %v9740_v27, %s6944_s20  ;;  %v3131_v19 = vpop.f32.mrb[59].mxu1 }
 0x4e5   : > { %v9747_v49 = vpop.permute.xlu1 %3514  ;;  %v9749_v9 = vpop.permute.xlu0 %3371  ;;  %v4224_v19 = vld [vmem:[%s11909_s5 + $0x38] sm:$0xff] }
 0x4e6   : > { %v3172_v36 = vmax.f32 %v3130_v4, 0.0  ;;  %v4223_v4 = vld [vmem:[%s11909_s5 + $0x30] sm:$0xff] }
 0x4e7   : > { %3443 = vrot.lane.b32.xlu0 %v9738_v25, %s6940_s15  ;;  %v6658_v6 = vpack.c.bf16 %v4224_v19, %v4223_v4 }
 0x4e8   : > { %3260 = vst.msk [vmem:[#allocation4 + $0x171] sm:$0xff] %vm2314_vm11, %v3172_v36  ;;  %3445 = vrot.lane.b32.xlu1 %v9728_v31, %s6940_s15 }
 0x4e9   : > { %v9756_v0 = vpop.permute.xlu1 %3373  ;;  %v9758_v62 = vpop.permute.xlu0 %3516  ;;  %6750 = vmatpush1.bf16.msra.mxu1 %v6658_v6  ;;  %6659 = vmatpush1.bf16.msra.mxu0 %v6658_v6  ;;  %v4229_v6 = vld [vmem:[%s11909_s5 + $0x60] sm:$0xff] }
 0x4ea   : > { %6735 = vmatprep.subr.bf16.mxu1 %v12026_v48  ;;  %6660 = vmatprep.subr.bf16.mxu0 %v12026_v48 }
 0x4eb   : > { %3447 = vrot.lane.b32.xlu0 %v9740_v27, %s6940_s15 }
 0x4ed   : > { %v9762_v37 = vpop.permute.xlu0 %3375 }
 0x4ee   : > { %v9764_v14 = vpop.permute.xlu1 %3520 }
 0x4ef   : > { %3590 = vrot.lane.b32.xlu0 %v9766_v32, %s6944_s20  ;;  %v9770_v20 = vld [vmem:[#allocation4 + $0x170] sm:$0xff]  ;;  %v9780_v30 = vld [vmem:[#allocation4 + $0x178] sm:$0x3] }
 0x4f0   : > { %3592 = vrot.lane.b32.xlu1 %v9770_v20, %s6944_s20 }
 0x4f1   : > { %v9774_v16 = vpop.permute.xlu0 %3518 }
 0x4f2   : > { %v9776_v2 = vpop.permute.xlu1 %3522 }
 0x4f3   : > { %3449 = vrot.lane.b32.xlu0 %v9766_v32, %s6940_s15 }
 0x4f4   : > { %3594 = vrot.lane.b32.xlu1 %v9780_v30, %s6944_s20 }
 0x4f5   : > { %v9784_v47 = vpop.permute.xlu0 %3377 }
 0x4f6   : > { %v9795_v7 = vpop.permute.xlu1 %3379 }
 0x4f7   : > { %3453 = vrot.lane.b32.xlu0 %v9780_v30, %s6940_s15 }
 0x4f8   : > { %3451 = vrot.lane.b32.xlu1 %v9770_v20, %s6940_s15 }
 0x4f9   : > { %v9804_v53 = vpop.permute.xlu0 %3381 }
 0x4fa   : > { %v9807_v28 = vpop.permute.xlu1 %3526 }
 0x4fc   : > { %3556 = vrot.lane.b32.xlu1 %v9810_v12, %s6944_s20 }
 0x4fd   : > { %v9814_v43 = vpop.permute.xlu0 %3524 }
 0x4fe   : > { %v9817_v24 = vpop.permute.xlu1 %3528 }
 0x500   : > { %3413 = vrot.lane.b32.xlu1 %v3290_v46, %s6940_s15 }
 0x501   : > { %v9821_v13 = vpop.permute.xlu0 %3383 }
 0x502   : > { %v9823_v21 = vpop.permute.xlu1 %3385 }
 0x503   : > { %v3134_v40 = vpop.f32.mrb[60].mxu1 }
 0x504   : > { %v3135_v59 = vadd.f32 %v9556_v18, %v3134_v40  ;;  %v3136_v33 = vpop.f32.mrb[61].mxu1 }
 0x505   : > { %v9832_v51 = vpop.permute.xlu0 %3387  ;;  %v4228_v33 = vld [vmem:[%s11909_s5 + $0x58] sm:$0xff] }
 0x506   : > { %v3173_v52 = vmax.f32 %v3135_v59, 0.0  ;;  %v9834_v29 = vpop.permute.xlu1 %3389  ;;  %v4227_v59 = vld [vmem:[%s11909_s5 + $0x50] sm:$0xff] }
 0x507   : > { %12061 = vst [vmem:[#allocation34_spill] sm:$0xff] %v9834_v29  ;;  %v3139_v36 = vpop.f32.mrb[62].mxu1  ;;  %v6664_v4 = vpack.c.bf16 %v4228_v33, %v4227_v59  ;;  %v4232_v59 = vld [vmem:[%s11909_s5 + $0x78] sm:$0xff] }
 0x508   : > { %3261 = vst.msk [vmem:[#allocation4 + $0x181] sm:$0xff] %vm2314_vm11, %v3173_v52  ;;  %v3140_v34 = vadd.f32 %v9556_v18, %v3139_v36  ;;  %v3141_v5 = vpop.f32.mrb[63].mxu1  ;;  %v6661_v18 = vpack.c.bf16 %v4226_v55, %v4225_v8 }
 0x509   : > { %v9846_v17 = vpop.permute.xlu0 %3530 }
 0x50a   : > { %v3174_v26 = vmax.f32 %v3140_v34, 0.0  ;;  %v9848_v56 = vpop.permute.xlu1 %3532  ;;  %6751 = vmatpush1.bf16.msra.mxu1 %v6661_v18  ;;  %6662 = vmatpush1.bf16.msra.mxu0 %v6661_v18  ;;  %v4230_v34 = vld [vmem:[%s11909_s5 + $0x68] sm:$0xff]  ;;  %v4231_v18 = vld [vmem:[%s11909_s5 + $0x70] sm:$0xff] }
 0x50b   : > { %6736 = vmatprep.subr.bf16.mxu1 %v12026_v48  ;;  %6663 = vmatprep.subr.bf16.mxu0 %v12026_v48 }
 0x50c   : > { %3262 = vst.msk [vmem:[#allocation4 + $0x189] sm:$0xff] %vm2314_vm11, %v3174_v26  ;;  %v6667_v26 = vpack.c.bf16 %v4230_v34, %v4229_v6  ;;  %v4233_v34 = vld [vmem:[%s11909_s5 + $0x80] sm:$0xff] }
 0x50d   : > { %v9859_v40 = vpop.permute.xlu0 %3534 }
 0x50e   : > { %v9861_v22 = vpop.permute.xlu1 %3393  ;;  %6752 = vmatpush1.bf16.msra.mxu1 %v6664_v4  ;;  %6665 = vmatpush1.bf16.msra.mxu0 %v6664_v4 }
 0x50f   : > { %12062 = vst [vmem:[#allocation9_spill] sm:$0xff] %v9861_v22  ;;  %v3311_v52 = vld [vmem:[#allocation4 + $0x180] sm:$0xff]  ;;  %6737 = vmatprep.subr.bf16.mxu1 %v12026_v48  ;;  %6666 = vmatprep.subr.bf16.mxu0 %v12026_v48 }
 0x510   : > { %3596 = vrot.lane.b32.xlu0 %v3311_v52, %s6944_s20 }
 0x511   : > { %v9872_v19 = vpop.permute.xlu0 %3391 }
 0x512   : > { %12063 = vst [vmem:[#allocation8_spill] sm:$0xff] %v9872_v19  ;;  %v9874_v36 = vpop.permute.xlu1 %3536  ;;  %6753 = vmatpush1.bf16.msra.mxu1 %v6667_v26  ;;  %6668 = vmatpush1.bf16.msra.mxu0 %v6667_v26  ;;  %v4234_v26 = vld [vmem:[%s11909_s5 + $0x88] sm:$0xff] }
 0x513   : > { %12064 = vst [vmem:[#allocation10_spill] sm:$0xff] %v9874_v36  ;;  %v3312_v5 = vld [vmem:[#allocation4 + $0x188] sm:$0xff]  ;;  %6738 = vmatprep.subr.bf16.mxu1 %v12026_v48  ;;  %6669 = vmatprep.subr.bf16.mxu0 %v12026_v48  ;;  %v3313_v33 = vld [vmem:[#allocation4 + $0x190] sm:$0x3] }
 0x514   : > { %3598 = vrot.lane.b32.xlu1 %v3312_v5, %s6944_s20  ;;  %3554 = vrot.lane.b32.xlu0 %v3290_v46, %s6944_s20  ;;  %v6670_v46 = vpack.c.bf16 %v4232_v59, %v4231_v18  ;;  %v6673_v18 = vpack.c.bf16 %v4234_v26, %v4233_v34  ;;  %v4236_v34 = vld [vmem:[%s11909_s5 + $0x98] sm:$0xff] }
 0x515   : > { %v9886_v8 = vpop.permute.xlu0 %3395 }
 0x516   : > { %12065 = vst [vmem:[#allocation12_spill] sm:$0xff] %v9886_v8  ;;  %v9888_v55 = vpop.permute.xlu1 %3540  ;;  %6754 = vmatpush1.bf16.msra.mxu1 %v6670_v46  ;;  %6671 = vmatpush1.bf16.msra.mxu0 %v6670_v46  ;;  %v3264_v46 = vld [vmem:[#allocation4 + $0x8] sm:$0xff]  ;;  %v4235_v8 = vld [vmem:[%s11909_s5 + $0x90] sm:$0xff] }
 0x517   : > { %12066 = vst [vmem:[#allocation35_spill] sm:$0xff] %v9888_v55  ;;  %6739 = vmatprep.subr.bf16.mxu1 %v12026_v48  ;;  %6672 = vmatprep.subr.bf16.mxu0 %v12026_v48  ;;  %v6676_v26 = vpack.c.bf16 %v4236_v34, %v4235_v8 }
 0x518   : > { %3600 = vrot.lane.b32.xlu1 %v3313_v33, %s6944_s20  ;;  %3455 = vrot.lane.b32.xlu0 %v3311_v52, %s6940_s15  ;;  %v3265_v52 = vld [vmem:[#allocation4 + $0x10] sm:$0x3] }
 0x519   : > { %v9900_v4 = vpop.permute.xlu0 %3538 }
 0x51a   : > { %12067 = vst [vmem:[#allocation7_spill] sm:$0xff] %v9900_v4  ;;  %v9902_v6 = vpop.permute.xlu1 %3397  ;;  %6755 = vmatpush1.bf16.msra.mxu1 %v6673_v18  ;;  %6674 = vmatpush1.bf16.msra.mxu0 %v6673_v18  ;;  %v3657_v18 = vsel %vm2314_vm11, %v3264_v46, %v9734_v1  ;;  %v4238_v1 = vld [vmem:[%s11909_s5 + $0xa8] sm:$0xff]  ;;  %v9956_v46 = vld [vmem:[#allocation4 + $0xf8] sm:$0xff] }
 0x51b   : > { %12068 = vst [vmem:[#allocation13_spill] sm:$0xff] %v9902_v6  ;;  %6740 = vmatprep.subr.bf16.mxu1 %v12026_v48  ;;  %6675 = vmatprep.subr.bf16.mxu0 %v12026_v48  ;;  %v9944_v8 = vsel %vm3704_vm15, %v3657_v18, %v9747_v49 }
 0x51c   : > { %3457 = vrot.lane.b32.xlu1 %v3312_v5, %s6940_s15  ;;  %3411 = vrot.lane.b32.xlu0 %v9654_v41, %s6940_s15  ;;  %v3658_v41 = vsel %vm2314_vm11, %v3265_v52, %v9726_v45  ;;  %v9928_v5 = vld [vmem:[#allocation4 + $0xe8] sm:$0x3]  ;;  %v3263_v45 = vld [vmem:[#allocation4] sm:$0xff] }
 0x51d   : > { %v9915_v59 = vpop.permute.xlu0 %3399  ;;  %v3656_v49 = vsel %vm2314_vm11, %v3263_v45, %v9718_v63  ;;  %v4240_v63 = vld [vmem:[%s11909_s5 + $0xb8] sm:$0xff]  ;;  %v9981_v45 = vld [vmem:[#allocation4 + $0xf0] sm:$0xff] }
 0x51e   : > { %12069 = vst [vmem:[#allocation15_spill] sm:$0xff] %v9915_v59  ;;  %v9917_v6 = vpop.permute.xlu1 %3401  ;;  %6756 = vmatpush1.bf16.msra.mxu1 %v6676_v26  ;;  %6677 = vmatpush1.bf16.msra.mxu0 %v6676_v26  ;;  %v9970_v26 = vsel %vm3704_vm15, %v3656_v49, %v9736_v57 }
 0x51f   : > { %12070 = vst [vmem:[#allocation14_spill] sm:$0xff] %v9917_v6  ;;  %v9933_v6 = vsel %vm3704_vm15, %v3658_v41, %v9758_v62  ;;  %6741 = vmatprep.subr.bf16.mxu1 %v12026_v48  ;;  %v4237_v62 = vld [vmem:[%s11909_s5 + $0xa0] sm:$0xff]  ;;  %6678 = vmatprep.subr.bf16.mxu0 %v12026_v48  ;;  %v3978_v41 = vrot.slane %v9944_v8, 2  ;;  %v3977_v57 = vrot.slane %v9970_v26, 2 }
 0x520   : > { %3459 = vrot.lane.b32.xlu1 %v3313_v33, %s6940_s15  ;;  %3558 = vrot.lane.b32.xlu0 %v9928_v5, %s6944_s20  ;;  %v3980_v33 = vrot.slane %v9933_v6, 2  ;;  %v6679_v34 = vpack.c.bf16 %v4238_v1, %v4237_v62 }
 0x521   : > { %v9940_v59 = vpop.permute.xlu0 %3542 }
 0x522   : > { %12071 = vst [vmem:[#allocation11_spill] sm:$0xff] %v9940_v59  ;;  %v9946_v52 = vpop.permute.xlu1 %3544  ;;  %6757 = vmatpush1.bf16.msra.mxu1 %v6679_v34  ;;  %6680 = vmatpush1.bf16.msra.mxu0 %v6679_v34  ;;  %v3981_v1 = vsel %vm1171_vm5, %v3978_v41, %v3980_v33  ;;  %v4241_v33 = vld [vmem:[%s11909_s5 + $0xc0] sm:$0xff]  ;;  %v4242_v34 = vld [vmem:[%s11909_s5 + $0xc8] sm:$0xff] }
 0x523   : > { %12072 = vst [vmem:[#allocation17_spill] sm:$0xff] %v9946_v52  ;;  %6742 = vmatprep.subr.bf16.mxu1 %v12026_v48  ;;  %6681 = vmatprep.subr.bf16.mxu0 %v12026_v48  ;;  %v10043_v52 = vld [vmem:[#allocation4 + $0x100] sm:$0x3] }
 0x524   : > { %3562 = vrot.lane.b32.xlu1 %v9956_v46, %s6944_s20  ;;  %3415 = vrot.lane.b32.xlu0 %v9810_v12, %s6940_s15  ;;  %v4239_v12 = vld [vmem:[%s11909_s5 + $0xb0] sm:$0xff] }
 0x525   : > { %v9966_v18 = vpop.permute.xlu0 %3546 }
 0x526   : > { %12073 = vst [vmem:[#allocation18_spill] sm:$0xff] %v9966_v18  ;;  %v9972_v62 = vpop.permute.xlu1 %3405  ;;  %v6682_v18 = vpack.c.bf16 %v4240_v63, %v4239_v12  ;;  %v3979_v12 = vsel %vm1171_vm5, %v3977_v57, %v3978_v41  ;;  %v6685_v63 = vpack.c.bf16 %v4242_v34, %v4241_v33  ;;  %v4244_v41 = vld [vmem:[%s11909_s5 + $0xd8] sm:$0xff]  ;;  %v4245_v34 = vld [vmem:[%s11909_s5 + $0xe0] sm:$0xff] }
 0x527   : > { %12074 = vst [vmem:[#allocation16_spill] sm:$0xff] %v9972_v62 }
 0x528   : > { %3560 = vrot.lane.b32.xlu0 %v9981_v45, %s6944_s20  ;;  %4059 = vrot.lane.b32.xlu1 %v3981_v1, %s6944_s20 }
 0x529   : > { %v9989_v49 = vpop.permute.xlu0 %3403  ;;  %6758 = vmatpush1.bf16.msra.mxu1 %v6682_v18  ;;  %6683 = vmatpush1.bf16.msra.mxu0 %v6682_v18 }
 0x52a   : > { %12075 = vst [vmem:[#allocation21_spill] sm:$0xff] %v9989_v49  ;;  %v9991_v62 = vpop.permute.xlu1 %3548  ;;  %6743 = vmatprep.subr.bf16.mxu1 %v12026_v48  ;;  %6684 = vmatprep.subr.bf16.mxu0 %v12026_v48  ;;  %v4243_v49 = vld [vmem:[%s11909_s5 + $0xd0] sm:$0xff] }
 0x52b   : > { %12076 = vst [vmem:[#allocation20_spill] sm:$0xff] %v9991_v62  ;;  %v6688_v18 = vpack.c.bf16 %v4244_v41, %v4243_v49 }
 0x52c   : > { %4057 = vrot.lane.b32.xlu0 %v3979_v12, %s6944_s20  ;;  %v4246_v12 = vld [vmem:[%s11909_s5 + $0xe8] sm:$0xff] }
 0x52d   : > { %v10003_v1 = vpop.permute.xlu0 %3407  ;;  %6759 = vmatpush1.bf16.msra.mxu1 %v6685_v63  ;;  %6686 = vmatpush1.bf16.msra.mxu0 %v6685_v63  ;;  %v6691_v63 = vpack.c.bf16 %v4246_v12, %v4245_v34 }
 0x52e   : > { %12077 = vst [vmem:[#allocation19_spill] sm:$0xff] %v10003_v1  ;;  %v10005_v62 = vpop.permute.xlu1 %3552  ;;  %6744 = vmatprep.subr.bf16.mxu1 %v12026_v48  ;;  %6687 = vmatprep.subr.bf16.mxu0 %v12026_v48  ;;  %v4248_v1 = vld [vmem:[%s11909_s5 + $0xf8] sm:$0xff] }
 0x52f   : > { %12078 = vst [vmem:[#allocation23_spill] sm:$0xff] %v10005_v62 }
 0x531   : > { %v10015_v57 = vpop.permute.xlu0 %3550  ;;  %6760 = vmatpush1.bf16.msra.mxu1 %v6688_v18  ;;  %6689 = vmatpush1.bf16.msra.mxu0 %v6688_v18 }
 0x532   : > { %12079 = vst [vmem:[#allocation24_spill] sm:$0xff] %v10015_v57  ;;  %v10017_v33 = vpop.permute.xlu1 %3409  ;;  %6745 = vmatprep.subr.bf16.mxu1 %v12026_v48  ;;  %6690 = vmatprep.subr.bf16.mxu0 %v12026_v48 }
 0x533   : > { %12080 = vst [vmem:[#allocation22_spill] sm:$0xff] %v10017_v33  ;;  %v4247_v33 = vld [vmem:[%s11909_s5 + $0xf0] sm:$0xff] }
 0x534   : > { %v6694_v62 = vpack.c.bf16 %v4248_v1, %v4247_v33 }
 0x535   : > { %v3426_v49 = vpop.permute.xlu0 %3425  ;;  %6761 = vmatpush1.bf16.msra.mxu1 %v6691_v63  ;;  %6692 = vmatpush1.bf16.msra.mxu0 %v6691_v63 }
 0x536   : > { %v3428_v41 = vpop.permute.xlu1 %3427  ;;  %6746 = vmatprep.subr.bf16.mxu1 %v12026_v48  ;;  %6693 = vmatprep.subr.bf16.mxu0 %v12026_v48  ;;  %v3686_v59 = vsel %vm2314_vm11, %v9981_v45, %v3426_v49 }
 0x537   : > { %v3687_v34 = vsel %vm2314_vm11, %v9956_v46, %v3428_v41 }
 0x539   : > { %v3430_v18 = vpop.permute.xlu0 %3429  ;;  %6762 = vmatpush1.bf16.msra.mxu1 %v6694_v62  ;;  %6695 = vmatpush1.bf16.msra.mxu0 %v6694_v62 }
 0x53a   : > { %v3575_v12 = vpop.permute.xlu1 %3574  ;;  %6704 = vmatprep.subr.bf16.mxu0 %v12026_v48  ;;  %v3688_v63 = vsel %vm2314_vm11, %v10043_v52, %v3430_v18 }
 0x53b   : > { %v10038_v57 = vsel %vm3704_vm15, %v3687_v34, %v3575_v12 }
 0x53c   : > { %v3852_v33 = vrot.slane %v10038_v57, 1  ;;  %v4028_v62 = vrot.slane %v10038_v57, 2 }
 0x53d   : > { %v3573_v1 = vpop.permute.xlu0 %3572 }
 0x53e   : > { %v3577_v55 = vpop.permute.xlu1 %3576  ;;  %v10049_v41 = vsel %vm3704_vm15, %v3686_v59, %v3573_v1 }
 0x53f   : > { %v3737_v34 = vsel %vm3704_vm15, %v3688_v63, %v3577_v55  ;;  %v3851_v12 = vrot.slane %v10049_v41, 1  ;;  %v4027_v49 = vrot.slane %v10049_v41, 2 }
 0x540   : > { %v3854_v48 = vrot.slane %v3737_v34, 1  ;;  %v4030_v22 = vrot.slane %v3737_v34, 2 }
 0x541   : > { %v3432_v36 = vpop.permute.xlu0 %3431  ;;  %v4029_v29 = vsel %vm1171_vm5, %v4027_v49, %v4028_v62  ;;  %v3853_v4 = vsel %vm994_vm4, %v3851_v12, %v3852_v33 }
 0x542   : > { %v3855_v18 = vsel %vm994_vm4, %v3852_v33, %v3854_v48  ;;  %v3434_v19 = vpop.permute.xlu1 %3433  ;;  %4097 = vrot.lane.b32.xlu1 %v4029_v29, %s6944_s20  ;;  %v4031_v1 = vsel %vm1171_vm5, %v4028_v62, %v4030_v22  ;;  %v3659_v48 = vsel %vm2314_vm11, %v9563_v50, %v9749_v9  ;;  %v3661_v29 = vsel %vm2314_vm11, %v9571_v11, %v9762_v37 }
 0x543   : > { %v6822_v59 = vpack.i.bf16 %v3855_v18, %v3853_v4  ;;  %v3690_v63 = vsel %vm2314_vm11, %v9667_v35, %v3434_v19  ;;  %v3660_v22 = vsel %vm2314_vm11, %v9569_v44, %v9756_v0  ;;  %v10078_v19 = vsel %vm3704_vm15, %v3661_v29, %v9776_v2 }
 0x544   : > { %v10082_v4 = vsel %vm3704_vm15, %v3659_v48, %v9774_v16  ;;  %v3689_v33 = vsel %vm2314_vm11, %v9665_v61, %v3432_v36  ;;  %v10090_v11 = vsel %vm3704_vm15, %v3660_v22, %v9764_v14  ;;  %v3809_v14 = vrot.slane %v10078_v19, 1 }
 0x545   : > { %6823 = vrot.lane.b32.xlu0 %v6822_v59, %s6942_s18  ;;  %v3436_v55 = vpop.permute.xlu0 %3435  ;;  %v3806_v62 = vrot.slane %v10082_v4, 1 }
 0x546   : > { %v3581_v34 = vpop.permute.xlu1 %3580  ;;  %4099 = vrot.lane.b32.xlu1 %v4031_v1, %s6944_s20  ;;  %v3691_v9 = vsel %vm2314_vm11, %v9675_v10, %v3436_v55 }
 0x547   : > { %v10065_v49 = vsel %vm3704_vm15, %v3690_v63, %v3581_v34  ;;  %v3807_v63 = vrot.slane %v10090_v11, 1 }
 0x548   : > { %v3857_v44 = vrot.slane %v10065_v49, 1  ;;  %v4033_v16 = vrot.slane %v10065_v49, 2 }
 0x549   : > { %3417 = vrot.lane.b32.xlu0 %v9928_v5, %s6940_s15  ;;  %v3579_v50 = vpop.permute.xlu0 %3578  ;;  %v3810_v22 = vsel %vm994_vm4, %v3807_v63, %v3809_v14 }
 0x54a   : > { %v3583_v0 = vpop.permute.xlu1 %3582  ;;  %v10096_v37 = vsel %vm3704_vm15, %v3689_v33, %v3579_v50  ;;  %v3808_v33 = vsel %vm994_vm4, %v3806_v62, %v3807_v63 }
 0x54b   : > { %v3740_v2 = vsel %vm3704_vm15, %v3691_v9, %v3583_v0  ;;  %v3856_v36 = vrot.slane %v10096_v37, 1  ;;  %v4032_v5 = vrot.slane %v10096_v37, 2 }
 0x54c   : > { %v3859_v12 = vrot.slane %v3740_v2, 1  ;;  %v4035_v18 = vrot.slane %v3740_v2, 2 }
 0x54d   : > { %v3438_v59 = vpop.permute.xlu0 %3437  ;;  %v4034_v55 = vsel %vm1171_vm5, %v4032_v5, %v4033_v16  ;;  %v3858_v1 = vsel %vm994_vm4, %v3856_v36, %v3857_v44  ;;  %v6837_v36 = vpack.i.bf16 %v3810_v22, %v3808_v33 }
 0x54e   : > { %v3860_v34 = vsel %vm994_vm4, %v3857_v44, %v3859_v12  ;;  %v3440_v48 = vpop.permute.xlu1 %3439  ;;  %4101 = vrot.lane.b32.xlu0 %v4034_v55, %s6944_s20  ;;  %v4036_v9 = vsel %vm1171_vm5, %v4033_v16, %v4035_v18  ;;  %v3692_v5 = vsel %vm2314_vm11, %v9685_v15, %v3438_v59 }
 0x54f   : > { %v6827_v29 = vpack.i.bf16 %v3860_v34, %v3858_v1  ;;  %v3693_v0 = vsel %vm2314_vm11, %v9677_v42, %v3440_v48 }
 0x551   : > { %6828 = vrot.lane.b32.xlu1 %v6827_v29, %s6942_s18  ;;  %v3442_v50 = vpop.permute.xlu0 %3441 }
 0x552   : > { %v3587_v2 = vpop.permute.xlu1 %3586  ;;  %4103 = vrot.lane.b32.xlu0 %v4036_v9, %s6944_s20  ;;  %v3694_v16 = vsel %vm2314_vm11, %v9687_v3, %v3442_v50 }
 0x553   : > { %v10117_v44 = vsel %vm3704_vm15, %v3693_v0, %v3587_v2 }
 0x554   : > { %v3862_v62 = vrot.slane %v10117_v44, 1  ;;  %v4038_v18 = vrot.slane %v10117_v44, 2 }
 0x555   : > { %6838 = vrot.lane.b32.xlu1 %v6837_v36, %s6942_s18  ;;  %v3585_v14 = vpop.permute.xlu0 %3584 }
 0x556   : > { %v3589_v12 = vpop.permute.xlu1 %3588  ;;  %v10126_v42 = vsel %vm3704_vm15, %v3692_v5, %v3585_v14 }
 0x557   : > { %v3743_v55 = vsel %vm3704_vm15, %v3694_v16, %v3589_v12  ;;  %v3861_v1 = vrot.slane %v10126_v42, 1  ;;  %v4037_v15 = vrot.slane %v10126_v42, 2 }
 0x558   : > { %v3864_v59 = vrot.slane %v3743_v55, 1  ;;  %v4040_v63 = vrot.slane %v3743_v55, 2 }
 0x559   : > { %v3444_v34 = vpop.permute.xlu0 %3443  ;;  %v4039_v48 = vsel %vm1171_vm5, %v4037_v15, %v4038_v18  ;;  %v3863_v29 = vsel %vm994_vm4, %v3861_v1, %v3862_v62 }
 0x55a   : > { %v3865_v3 = vsel %vm994_vm4, %v3862_v62, %v3864_v59  ;;  %4105 = vrot.lane.b32.xlu1 %v4039_v48, %s6944_s20  ;;  %v4041_v50 = vsel %vm1171_vm5, %v4038_v18, %v4040_v63  ;;  %v3446_v9 = vpop.permute.xlu1 %3445  ;;  %v3695_v0 = vsel %vm2314_vm11, %v9710_v60, %v3444_v34 }
 0x55b   : > { %v6832_v22 = vpack.i.bf16 %v3865_v3, %v3863_v29  ;;  %v3696_v36 = vsel %vm2314_vm11, %v9700_v39, %v3446_v9  ;;  %v4250_v9 = vld [vmem:[%s11909_s5 + $0x108] sm:$0xff] }
 0x55d   : > { %6833 = vrot.lane.b32.xlu0 %v6832_v22, %s6942_s18  ;;  %v3448_v33 = vpop.permute.xlu0 %3447 }
 0x55e   : > { %4107 = vrot.lane.b32.xlu1 %v4041_v50, %s6944_s20  ;;  %v3697_v60 = vsel %vm2314_vm11, %v9712_v38, %v3448_v33  ;;  %v4249_v50 = vld [vmem:[%s11909_s5 + $0x100] sm:$0xff] }
 0x561   : > { %3564 = vrot.lane.b32.xlu0 %v10043_v52, %s6944_s20  ;;  %v3591_v2 = vpop.permute.xlu0 %3590 }
 0x562   : > { %v10146_v5 = vsel %vm3704_vm15, %v3695_v0, %v3591_v2  ;;  %v3593_v14 = vpop.permute.xlu1 %3592  ;;  %v10177_v2 = vpack.c.bf16 %v4250_v9, %v4249_v50 }
 0x563   : > { %v4042_v62 = vrot.slane %v10146_v5, 2  ;;  %v10150_v16 = vsel %vm3704_vm15, %v3696_v36, %v3593_v14  ;;  %v3866_v18 = vrot.slane %v10146_v5, 1 }
 0x564   : > { %v4043_v12 = vrot.slane %v10150_v16, 2  ;;  %v3867_v55 = vrot.slane %v10150_v16, 1  ;;  %6697 = vmatprep.subr.bf16.mxu1 %v10177_v2 }
 0x565   : > { %v3450_v22 = vpop.permute.xlu0 %3449 }
 0x566   : > { %v3595_v1 = vpop.permute.xlu1 %3594  ;;  %v4044_v39 = vsel %vm1171_vm5, %v4042_v62, %v4043_v12  ;;  %v3868_v29 = vsel %vm994_vm4, %v3866_v18, %v3867_v55  ;;  %v3698_v36 = vsel %vm2314_vm11, %v9738_v25, %v3450_v22 }
 0x567   : > { %v3746_v15 = vsel %vm3704_vm15, %v3697_v60, %v3595_v1  ;;  %4109 = vrot.lane.b32.xlu0 %v4044_v39, %s6944_s20 }
 0x568   : > { %v3869_v59 = vrot.slane %v3746_v15, 1  ;;  %v4045_v63 = vrot.slane %v3746_v15, 2 }
 0x569   : > { %v3454_v0 = vpop.permute.xlu0 %3453 }
 0x56a   : > { %v3870_v34 = vsel %vm994_vm4, %v3867_v55, %v3869_v59  ;;  %v4046_v48 = vsel %vm1171_vm5, %v4043_v12, %v4045_v63  ;;  %v3452_v3 = vpop.permute.xlu1 %3451  ;;  %v3700_v39 = vsel %vm2314_vm11, %v9740_v27, %v3454_v0  ;;  %v3802_v0 = vrot.slane %v9944_v8, 1 }
 0x56b   : > { %4111 = vrot.lane.b32.xlu0 %v4046_v48, %s6944_s20  ;;  %v6842_v38 = vpack.i.bf16 %v3870_v34, %v3868_v29  ;;  %v3699_v62 = vsel %vm2314_vm11, %v9728_v31, %v3452_v3 }
 0x56d   : > { %6843 = vrot.lane.b32.xlu1 %v6842_v38, %s6942_s18 }
 0x56e   : > { %v10169_v33 = vpop.permute.xlu1 %3556 }
 0x571   : > { %3419 = vrot.lane.b32.xlu1 %v9981_v45, %s6940_s15 }
 0x572   : > { %v10180_v45 = vpop.permute.xlu1 %3413 }
 0x575   : > { %3566 = vrot.lane.b32.xlu1 %v9665_v61, %s6944_s20 }
 0x582   : > { %v3597_v61 = vpop.permute.xlu0 %3596 }
 0x583   : > { %v10185_v14 = vsel %vm3704_vm15, %v3698_v36, %v3597_v61  ;;  %v3982_v36 = vrot.slane %v10082_v4, 2 }
 0x584   : > { %v4047_v55 = vrot.slane %v10185_v14, 2  ;;  %v3871_v48 = vrot.slane %v10185_v14, 1 }
 0x586   : > { %v3599_v12 = vpop.permute.xlu1 %3598  ;;  %v10189_v60 = vpop.permute.xlu0 %3554 }
 0x587   : > { %v10192_v18 = vsel %vm3704_vm15, %v3699_v62, %v3599_v12 }
 0x588   : > { %v4048_v1 = vrot.slane %v10192_v18, 2  ;;  %v3872_v25 = vrot.slane %v10192_v18, 1 }
 0x58a   : > { %v3601_v15 = vpop.permute.xlu1 %3600  ;;  %v3456_v59 = vpop.permute.xlu0 %3455  ;;  %v4049_v63 = vsel %vm1171_vm5, %v4047_v55, %v4048_v1  ;;  %v3873_v9 = vsel %vm994_vm4, %v3871_v48, %v3872_v25  ;;  %v3804_v48 = vrot.slane %v9933_v6, 1  ;;  %v3985_v6 = vrot.slane %v10078_v19, 2 }
 0x58b   : > { %v3749_v31 = vsel %vm3704_vm15, %v3700_v39, %v3601_v15  ;;  %v3701_v34 = vsel %vm2314_vm11, %v9766_v32, %v3456_v59  ;;  %4113 = vrot.lane.b32.xlu1 %v4049_v63, %s6944_s20 }
 0x58c   : > { %v3874_v29 = vrot.slane %v3749_v31, 1  ;;  %v4050_v38 = vrot.slane %v3749_v31, 2  ;;  %v10208_v27 = vsel %vm3704_vm15, %v3701_v34, %v9704_v54  ;;  %v3801_v54 = vrot.slane %v9970_v26, 1 }
 0x58d   : > { %v3876_v12 = vrot.slane %v10208_v27, 1 }
 0x58e   : > { %v3875_v3 = vsel %vm994_vm4, %v3872_v25, %v3874_v29  ;;  %v3458_v22 = vpop.permute.xlu1 %3457  ;;  %v4051_v50 = vsel %vm1171_vm5, %v4048_v1, %v4050_v38  ;;  %v3983_v1 = vrot.slane %v10090_v11, 2  ;;  %v3803_v25 = vsel %vm994_vm4, %v3801_v54, %v3802_v0 }
 0x58f   : > { %v3702_v32 = vsel %vm2314_vm11, %v9770_v20, %v3458_v22  ;;  %4115 = vrot.lane.b32.xlu1 %v4051_v50, %s6944_s20  ;;  %v6847_v61 = vpack.i.bf16 %v3875_v3, %v3873_v9  ;;  %v3805_v3 = vsel %vm994_vm4, %v3802_v0, %v3804_v48  ;;  %v10244_v22 = vpop.permute.xlu0 %3411 }
 0x590   : > { %v10219_v62 = vsel %vm3704_vm15, %v3702_v32, %v9708_v23  ;;  %v3984_v59 = vsel %vm1171_vm5, %v3982_v36, %v3983_v1  ;;  %v6902_v32 = vld [vmem:[#allocation4 + $0x30] sm:$0xff]  ;;  %v3986_v19 = vsel %vm1171_vm5, %v3983_v1, %v3985_v6  ;;  %v6903_v36 = vld [vmem:[#allocation4 + $0x38] sm:$0xff] }
 0x591   : > { %v3877_v55 = vrot.slane %v10219_v62, 1  ;;  %6848 = vrot.lane.b32.xlu0 %v6847_v61, %s6942_s18  ;;  %v4053_v31 = vrot.slane %v10219_v62, 2  ;;  %v3663_v54 = vsel %vm2314_vm11, %v6903_v36, %v9795_v7 }
 0x592   : > { %v3460_v20 = vpop.permute.xlu1 %3459 }
 0x593   : > { %v3703_v39 = vsel %vm2314_vm11, %v9780_v30, %v3460_v20  ;;  %v3878_v15 = vsel %vm994_vm4, %v3876_v12, %v3877_v55  ;;  %v4052_v30 = vrot.slane %v10208_v27, 2  ;;  %v10256_v61 = vpop.permute.xlu0 %3558  ;;  %v6904_v12 = vld [vmem:[#allocation4 + $0x40] sm:$0x3] }
 0x594   : > { %v3752_v23 = vsel %vm3704_vm15, %v3703_v39, %v9720_v58  ;;  %v6852_v63 = vpack.i.bf16 %v3878_v15, %v3803_v25  ;;  %v6905_v39 = vld [vmem:[#allocation4 + $0x50] sm:$0xff] }
 0x595   : > { %v3879_v34 = vrot.slane %v3752_v23, 1  ;;  %4061 = vrot.lane.b32.xlu0 %v3984_v59, %s6944_s20  ;;  %v4055_v38 = vrot.slane %v3752_v23, 2  ;;  %v4054_v58 = vsel %vm1171_vm5, %v4052_v30, %v4053_v31  ;;  %v3666_v25 = vsel %vm2314_vm11, %v6905_v39, %v9823_v21  ;;  %v6910_v39 = vld [vmem:[#allocation4 + $0x70] sm:$0x3] }
 0x596   : > { %6853 = vrot.lane.b32.xlu1 %v6852_v63, %s6942_s18  ;;  %v10289_v59 = vsel %vm3704_vm15, %v3666_v25, %v9848_v56  ;;  %v10297_v21 = vpop.permute.xlu1 %3562  ;;  %v12085_v25 = vld [vmem:[#allocation9_spill] sm:$0xff] }
 0x597   : > { %v3880_v29 = vsel %vm994_vm4, %v3877_v55, %v3879_v34  ;;  %v4056_v9 = vsel %vm1171_vm5, %v4053_v31, %v4055_v38  ;;  %v10280_v20 = vpop.permute.xlu0 %3415  ;;  %v3817_v34 = vrot.slane %v10289_v59, 1 }
 0x598   : > { %v6857_v50 = vpack.i.bf16 %v3880_v29, %v3805_v3  ;;  %v6908_v3 = vld [vmem:[#allocation4 + $0x68] sm:$0xff] }
 0x599   : > { %3421 = vrot.lane.b32.xlu0 %v9956_v46, %s6940_s15  ;;  %v3662_v46 = vsel %vm2314_vm11, %v6902_v32, %v9784_v47  ;;  %v10266_v47 = vsel %vm3704_vm15, %v3663_v54, %v9807_v28  ;;  %v6909_v54 = vld [vmem:[#allocation4 + $0x60] sm:$0xff] }
 0x59a   : > { %4117 = vrot.lane.b32.xlu1 %v4054_v58, %s6944_s20  ;;  %v10254_v0 = vsel %vm3704_vm15, %v3662_v46, %v9814_v43  ;;  %v3664_v43 = vsel %vm2314_vm11, %v6904_v12, %v9804_v53  ;;  %v3812_v7 = vrot.slane %v10266_v47, 1  ;;  %v3988_v28 = vrot.slane %v10266_v47, 2  ;;  %v12083_v12 = vld [vmem:[#allocation34_spill] sm:$0xff] }
 0x59b   : > { %v3811_v55 = vrot.slane %v10254_v0, 1  ;;  %v3987_v1 = vrot.slane %v10254_v0, 2  ;;  %v10309_v38 = vpop.permute.xlu0 %3560 }
 0x59d   : > { %6858 = vrot.lane.b32.xlu0 %v6857_v50, %s6942_s18  ;;  %v3989_v63 = vsel %vm1171_vm5, %v3987_v1, %v3988_v28  ;;  %v12081_v50 = vld [vmem:[#allocation8_spill] sm:$0xff] }
 0x59e   : > { %4119 = vrot.lane.b32.xlu1 %v4056_v9, %s6944_s20  ;;  %v3669_v6 = vsel %vm2314_vm11, %v6908_v3, %v12081_v50  ;;  %v10316_v9 = vpop.permute.xlu1 %4059 }
 0x59f   : > { %v10332_v1 = vpop.permute.xlu0 %4057 }
 0x5a1   : > { %3568 = vrot.lane.b32.xlu0 %v9667_v35, %s6944_s20  ;;  %v3713_v35 = vsel %vm3704_vm15, %v3664_v43, %v9817_v24  ;;  %v6906_v24 = vld [vmem:[#allocation4 + $0x48] sm:$0xff]  ;;  %v3668_v43 = vsel %vm2314_vm11, %v6909_v54, %v12083_v12 }
 0x5a2   : > { %4063 = vrot.lane.b32.xlu1 %v3986_v19, %s6944_s20  ;;  %v3814_v53 = vrot.slane %v3713_v35, 1  ;;  %v3665_v15 = vsel %vm2314_vm11, %v6906_v24, %v9821_v13  ;;  %v3990_v23 = vrot.slane %v3713_v35, 2  ;;  %v6907_v13 = vld [vmem:[#allocation4 + $0x58] sm:$0x3]  ;;  %v12082_v19 = vld [vmem:[#allocation7_spill] sm:$0xff]  ;;  %v3670_v24 = vsel %vm2314_vm11, %v6910_v39, %v12085_v25 }
 0x5a3   : > { %v3667_v31 = vsel %vm2314_vm11, %v6907_v13, %v9832_v51  ;;  %v12090_v54 = vld [vmem:[#allocation11_spill] sm:$0xff] }
 0x5a4   : > { %v3815_v48 = vsel %vm994_vm4, %v3812_v7, %v3814_v53  ;;  %v3716_v29 = vsel %vm3704_vm15, %v3667_v31, %v9859_v40  ;;  %v3991_v58 = vsel %vm1171_vm5, %v3988_v28, %v3990_v23  ;;  %v10321_v40 = vsel %vm3704_vm15, %v3669_v6, %v12082_v19  ;;  %v4251_v6 = vld [vmem:[%s11909_s5 + $0x110] sm:$0xff] }
 0x5a5   : > { %3423 = vrot.lane.b32.xlu0 %v10043_v52, %s6940_s15  ;;  %v3813_v52 = vsel %vm994_vm4, %v3811_v55, %v3812_v7  ;;  %v3819_v51 = vrot.slane %v3716_v29, 1  ;;  %v3995_v46 = vrot.slane %v3716_v29, 2  ;;  %v12084_v55 = vld [vmem:[#allocation10_spill] sm:$0xff]  ;;  %v3822_v7 = vrot.slane %v10321_v40, 1  ;;  %v12089_v19 = vld [vmem:[#allocation17_spill] sm:$0xff] }
 0x5a6   : > { %3570 = vrot.lane.b32.xlu1 %v9675_v10, %s6944_s20  ;;  %v10293_v10 = vsel %vm3704_vm15, %v3665_v15, %v9846_v17  ;;  %v3993_v17 = vrot.slane %v10289_v59, 2  ;;  %v10330_v35 = vsel %vm3704_vm15, %v3668_v43, %v12084_v55  ;;  %v3998_v15 = vrot.slane %v10321_v40, 2  ;;  %v6912_v29 = vld [vmem:[#allocation4 + $0x80] sm:$0xff] }
 0x5a7   : > { %v3816_v56 = vrot.slane %v10293_v10, 1  ;;  %v3992_v30 = vrot.slane %v10293_v10, 2  ;;  %v3820_v53 = vsel %vm994_vm4, %v3817_v34, %v3819_v51  ;;  %v3821_v23 = vrot.slane %v10330_v35, 1 }
 0x5a8   : > { %v3997_v31 = vrot.slane %v10330_v35, 2 }
 0x5a9   : > { %3889 = vrot.lane.b32.xlu0 %v3813_v52, %s6942_s18  ;;  %v3818_v32 = vsel %vm994_vm4, %v3816_v56, %v3817_v34  ;;  %v3994_v36 = vsel %vm1171_vm5, %v3992_v30, %v3993_v17  ;;  %v3996_v52 = vsel %vm1171_vm5, %v3993_v17, %v3995_v46  ;;  %v6911_v34 = vld [vmem:[#allocation4 + $0x78] sm:$0xff]  ;;  %v12087_v56 = vld [vmem:[#allocation12_spill] sm:$0xff]  ;;  %v3823_v50 = vsel %vm994_vm4, %v3821_v23, %v3822_v7 }
 0x5aa   : > { %4065 = vrot.lane.b32.xlu1 %v3989_v63, %s6944_s20  ;;  %v12086_v63 = vld [vmem:[#allocation35_spill] sm:$0xff]  ;;  %v3999_v55 = vsel %vm1171_vm5, %v3997_v31, %v3998_v15 }
 0x5ab   : > { %v3719_v13 = vsel %vm3704_vm15, %v3670_v24, %v12086_v63  ;;  %v6913_v23 = vld [vmem:[#allocation4 + $0x88] sm:$0x3] }
 0x5ac   : > { %v3824_v46 = vrot.slane %v3719_v13, 1  ;;  %v4000_v25 = vrot.slane %v3719_v13, 2  ;;  %v12091_v63 = vld [vmem:[#allocation15_spill] sm:$0xff] }
 0x5ad   : > { %3891 = vrot.lane.b32.xlu0 %v3815_v48, %s6942_s18  ;;  %v3671_v48 = vsel %vm2314_vm11, %v6911_v34, %v12087_v56  ;;  %v3673_v34 = vsel %vm2314_vm11, %v6913_v23, %v12091_v63 }
 0x5ae   : > { %4067 = vrot.lane.b32.xlu1 %v3991_v58, %s6944_s20  ;;  %v12088_v58 = vld [vmem:[#allocation13_spill] sm:$0xff]  ;;  %v10365_v12 = vsel %vm3704_vm15, %v3671_v48, %v12090_v54  ;;  %v3825_v24 = vsel %vm994_vm4, %v3822_v7, %v3824_v46  ;;  %v12092_v7 = vld [vmem:[#allocation18_spill] sm:$0xff] }
 0x5af   : > { %v3672_v51 = vsel %vm2314_vm11, %v6912_v29, %v12088_v58  ;;  %v3826_v31 = vrot.slane %v10365_v12, 1  ;;  %v4002_v13 = vrot.slane %v10365_v12, 2  ;;  %v3722_v29 = vsel %vm3704_vm15, %v3673_v34, %v12092_v7 }
 0x5b0   : > { %v4001_v58 = vsel %vm1171_vm5, %v3998_v15, %v4000_v25  ;;  %v4005_v54 = vrot.slane %v3722_v29, 2  ;;  %v12094_v15 = vld [vmem:[#allocation24_spill] sm:$0xff] }
 0x5b1   : > { %3893 = vrot.lane.b32.xlu0 %v3818_v32, %s6942_s18  ;;  %v4252_v32 = vld [vmem:[%s11909_s5 + $0x118] sm:$0xff] }
 0x5b2   : > { %4069 = vrot.lane.b32.xlu1 %v3994_v36, %s6944_s20  ;;  %v10361_v36 = vsel %vm3704_vm15, %v3672_v51, %v12089_v19 }
 0x5b3   : > { %v3827_v56 = vrot.slane %v10361_v36, 1 }
 0x5b4   : > { %v10335_v28 = vpop.permute.xlu1 %4097 }
 0x5b5   : > { %3895 = vrot.lane.b32.xlu0 %v3820_v53, %s6942_s18  ;;  %v3828_v19 = vsel %vm994_vm4, %v3826_v31, %v3827_v56 }
 0x5b6   : > { %4071 = vrot.lane.b32.xlu1 %v3996_v52, %s6944_s20  ;;  %v6700_v52 = vpack.c.bf16 %v4252_v32, %v4251_v6  ;;  %v12093_v6 = vld [vmem:[#allocation21_spill] sm:$0xff] }
 0x5b7   : > { %v6824_v30 = vpop.permute.xlu0 %6823 }
 0x5b8   : > { %v6826_v3 = vunpack.i.h.bf16 %v6824_v30  ;;  %v6825_v17 = vunpack.i.l.bf16 %v6824_v30  ;;  %v10367_v43 = vpop.permute.xlu1 %4099 }
 0x5b9   : > { %3897 = vrot.lane.b32.xlu0 %v3823_v50, %s6942_s18  ;;  %v6914_v50 = vld [vmem:[#allocation4 + $0x98] sm:$0xff] }
 0x5ba   : > { %4073 = vrot.lane.b32.xlu1 %v3999_v55, %s6944_s20  ;;  %v4205_v53 = vsel %vm3704_vm15, %v6825_v17, %v10335_v28  ;;  %v4173_v39 = vsel %vm2796_vm12, %v10049_v41, %v6825_v17  ;;  %v4206_v30 = vsel %vm3704_vm15, %v6826_v3, %v10367_v43  ;;  %v4003_v41 = vrot.slane %v10361_v36, 2 }
 0x5bb   : > { %4488 = vmatprep.mubr.f32.mxu1 %v4205_v53  ;;  %v10381_v48 = vpop.permute.xlu0 %3417  ;;  %v4174_v51 = vsel %vm2796_vm12, %v10038_v57, %v6826_v3  ;;  %v3829_v17 = vrot.slane %v3722_v29, 1  ;;  %v3675_v32 = vsel %vm2314_vm11, %v6914_v50, %v12093_v6  ;;  %v12095_v3 = vld [vmem:[#allocation14_spill] sm:$0xff]  ;;  %v12097_v29 = vld [vmem:[#allocation16_spill] sm:$0xff]  ;;  %v12098_v6 = vld [vmem:[#allocation23_spill] sm:$0xff] }
 0x5bc   : > { %4489 = vmatmul.mubr.f32.vlgmr.msra.gmra.mrb[64].mxu1 %v4173_v39  ;;  %v10402_v55 = vsel %vm3704_vm15, %v3675_v32, %v12094_v15  ;;  %v4004_v57 = vsel %vm1171_vm5, %v4002_v13, %v4003_v41  ;;  %v12096_v39 = vld [vmem:[#allocation20_spill] sm:$0xff]  ;;  %v4006_v7 = vsel %vm1171_vm5, %v4003_v41, %v4005_v54 }
 0x5bd   : > { %4493 = vmatprep.mubr.f32.mxu1 %v4206_v30  ;;  %3899 = vrot.lane.b32.xlu0 %v3825_v24, %s6942_s18  ;;  %v3832_v23 = vrot.slane %v10402_v55, 1  ;;  %v3830_v31 = vsel %vm994_vm4, %v3827_v56, %v3829_v17  ;;  %v4008_v30 = vrot.slane %v10402_v55, 2  ;;  %v6917_v41 = vld [vmem:[#allocation4 + $0xa8] sm:$0xff] }
 0x5be   : > { %4075 = vrot.lane.b32.xlu1 %v4001_v58, %s6944_s20  ;;  %6699 = vmatpush3.bf16.msra.mxu1 %v10177_v2  ;;  %v6915_v2 = vld [vmem:[#allocation4 + $0x90] sm:$0xff] }
 0x5bf   : > { %6701 = vmatprep.subr.bf16.mxu1 %v6700_v52  ;;  %v3674_v53 = vsel %vm2314_vm11, %v6915_v2, %v12095_v3  ;;  %v6918_v3 = vld [vmem:[#allocation4 + $0xb0] sm:$0xff] }
 0x5c0   : > { %4494 = vmatmul.mubr.f32.gmra.mrb[66].mxu1 %v4174_v51  ;;  %v10397_v46 = vpop.permute.xlu0 %4101  ;;  %v10411_v25 = vsel %vm3704_vm15, %v3674_v53, %v12096_v39  ;;  %v12100_v53 = vld [vmem:[#allocation22_spill] sm:$0xff] }
 0x5c1   : > { %3901 = vrot.lane.b32.xlu0 %v3828_v19, %s6942_s18  ;;  %v3831_v51 = vrot.slane %v10411_v25, 1  ;;  %v4007_v17 = vrot.slane %v10411_v25, 2  ;;  %v12099_v19 = vld [vmem:[#allocation19_spill] sm:$0xff]  ;;  %v3678_v39 = vsel %vm2314_vm11, %v6918_v3, %v12100_v53 }
 0x5c2   : > { %4077 = vrot.lane.b32.xlu1 %v4004_v57, %s6944_s20  ;;  %6703 = vmatpush3.bf16.msra.mxu1 %v6700_v52  ;;  %v6916_v52 = vld [vmem:[#allocation4 + $0xa0] sm:$0x3]  ;;  %v3677_v54 = vsel %vm2314_vm11, %v6917_v41, %v12099_v19  ;;  %v6921_v19 = vld [vmem:[#allocation4 + $0xc8] sm:$0xff] }
 0x5c3   : > { %v6829_v24 = vpop.permute.xlu1 %6828  ;;  %v3676_v58 = vsel %vm2314_vm11, %v6916_v52, %v12097_v29  ;;  %v10435_v15 = vsel %vm3704_vm15, %v3677_v54, %v10189_v60  ;;  %v3833_v2 = vsel %vm994_vm4, %v3831_v51, %v3832_v23  ;;  %v10448_v60 = vsel %vm3704_vm15, %v3678_v39, %v10169_v33  ;;  %v6919_v29 = vld [vmem:[#allocation4 + $0xb8] sm:$0x3] }
 0x5c4   : > { %v6831_v63 = vunpack.i.h.bf16 %v6829_v24  ;;  %v6830_v34 = vunpack.i.l.bf16 %v6829_v24  ;;  %v10416_v13 = vpop.permute.xlu0 %4103  ;;  %v3725_v32 = vsel %vm3704_vm15, %v3676_v58, %v12098_v6  ;;  %v4009_v24 = vsel %vm1171_vm5, %v4007_v17, %v4008_v30 }
 0x5c5   : > { %3903 = vrot.lane.b32.xlu0 %v3830_v31, %s6942_s18  ;;  %v4010_v31 = vrot.slane %v3725_v32, 2  ;;  %v3679_v58 = vsel %vm2314_vm11, %v6919_v29, %v10244_v22  ;;  %v3837_v33 = vrot.slane %v10448_v60, 1  ;;  %v4013_v22 = vrot.slane %v10448_v60, 2 }
 0x5c6   : > { %4079 = vrot.lane.b32.xlu1 %v4006_v7, %s6944_s20  ;;  %v4207_v50 = vsel %vm3704_vm15, %v6830_v34, %v10397_v46  ;;  %v4175_v56 = vsel %vm2796_vm12, %v10096_v37, %v6830_v34  ;;  %v4208_v37 = vsel %vm3704_vm15, %v6831_v63, %v10416_v13  ;;  %v3834_v34 = vrot.slane %v3725_v32, 1 }
 0x5c7   : > { %4498 = vmatprep.mubr.f32.mxu1 %v4207_v50  ;;  %v10437_v57 = vpop.permute.xlu1 %6838  ;;  %v3836_v7 = vrot.slane %v10435_v15, 1  ;;  %v4176_v52 = vsel %vm2796_vm12, %v10065_v49, %v6831_v63  ;;  %v3728_v17 = vsel %vm3704_vm15, %v3679_v58, %v10256_v61  ;;  %v4011_v49 = vsel %vm1171_vm5, %v4008_v30, %v4010_v31  ;;  %v6920_v63 = vld [vmem:[#allocation4 + $0xc0] sm:$0xff] }
 0x5c8   : > { %4499 = vmatmul.mubr.f32.gmra.mrb[68].mxu1 %v4175_v56  ;;  %v3835_v50 = vsel %vm994_vm4, %v3832_v23, %v3834_v34  ;;  %v4012_v56 = vrot.slane %v10435_v15, 2  ;;  %v3680_v6 = vsel %vm2314_vm11, %v6920_v63, %v10180_v45  ;;  %v3839_v41 = vrot.slane %v3728_v17, 1  ;;  %v6922_v34 = vld [vmem:[#allocation4 + $0xd0] sm:$0x3] }
 0x5c9   : > { %4503 = vmatprep.mubr.f32.mxu1 %v4208_v37  ;;  %3905 = vrot.lane.b32.xlu0 %v3833_v2, %s6942_s18  ;;  %v3838_v32 = vsel %vm994_vm4, %v3836_v7, %v3837_v33  ;;  %v3681_v61 = vsel %vm2314_vm11, %v6921_v19, %v10280_v20  ;;  %v4015_v2 = vrot.slane %v3728_v17, 2  ;;  %v10474_v30 = vsel %vm3704_vm15, %v3680_v6, %v10309_v38 }
 0x5ca   : > { %4081 = vrot.lane.b32.xlu1 %v4009_v24, %s6944_s20  ;;  %v4014_v45 = vsel %vm1171_vm5, %v4012_v56, %v4013_v22  ;;  %v10487_v39 = vsel %vm3704_vm15, %v3681_v61, %v10297_v21  ;;  %v3841_v24 = vrot.slane %v10474_v30, 1  ;;  %v3682_v31 = vsel %vm2314_vm11, %v6922_v34, %v10381_v48 }
 0x5cb   : > { %v4016_v21 = vsel %vm1171_vm5, %v4013_v22, %v4015_v2  ;;  %v3842_v58 = vrot.slane %v10487_v39, 1  ;;  %v4018_v48 = vrot.slane %v10487_v39, 2 }
 0x5cc   : > { %4504 = vmatmul.mubr.f32.gmra.mrb[70].mxu1 %v4176_v52  ;;  %v10456_v51 = vpop.permute.xlu1 %4105  ;;  %v3840_v52 = vsel %vm994_vm4, %v3837_v33, %v3839_v41 }
 0x5cd   : > { %3907 = vrot.lane.b32.xlu0 %v3835_v50, %s6942_s18  ;;  %v3843_v33 = vsel %vm994_vm4, %v3841_v24, %v3842_v58 }
 0x5ce   : > { %4083 = vrot.lane.b32.xlu1 %v4011_v49, %s6944_s20 }
 0x5cf   : > { %v6834_v23 = vpop.permute.xlu0 %6833 }
 0x5d0   : > { %v6836_v54 = vunpack.i.h.bf16 %v6834_v23  ;;  %v6835_v37 = vunpack.i.l.bf16 %v6834_v23  ;;  %v10476_v3 = vpop.permute.xlu1 %4107 }
 0x5d1   : > { %3909 = vrot.lane.b32.xlu0 %v3838_v32, %s6942_s18 }
 0x5d2   : > { %4085 = vrot.lane.b32.xlu1 %v4014_v45, %s6944_s20  ;;  %v4209_v53 = vsel %vm3704_vm15, %v6835_v37, %v10456_v51  ;;  %v4177_v20 = vsel %vm2796_vm12, %v10126_v42, %v6835_v37  ;;  %v4210_v7 = vsel %vm3704_vm15, %v6836_v54, %v10476_v3  ;;  %v4017_v42 = vrot.slane %v10474_v30, 2 }
 0x5d3   : > { %v3565_v38 = vpop.permute.xlu0 %3564  ;;  %4508 = vmatprep.mubr.f32.mxu1 %v4209_v53  ;;  %v4178_v50 = vsel %vm2796_vm12, %v10117_v44, %v6836_v54 }
 0x5d4   : > { %4509 = vmatmul.mubr.f32.gmra.mrb[72].mxu1 %v4177_v20  ;;  %v3731_v29 = vsel %vm3704_vm15, %v3682_v31, %v3565_v38  ;;  %v4019_v49 = vsel %vm1171_vm5, %v4017_v42, %v4018_v48 }
 0x5d5   : > { %4513 = vmatprep.mubr.f32.mxu1 %v4210_v7  ;;  %3911 = vrot.lane.b32.xlu0 %v3840_v52, %s6942_s18  ;;  %v3844_v56 = vrot.slane %v3731_v29, 1  ;;  %v4020_v17 = vrot.slane %v3731_v29, 2 }
 0x5d6   : > { %4087 = vrot.lane.b32.xlu1 %v4016_v21, %s6944_s20 }
 0x5d7   : > { %v3845_v22 = vsel %vm994_vm4, %v3842_v58, %v3844_v56  ;;  %v4021_v6 = vsel %vm1171_vm5, %v4018_v48, %v4020_v17 }
 0x5d8   : > { %4514 = vmatmul.mubr.f32.gmra.mrb[74].mxu1 %v4178_v50 }
 0x5d9   : > { %3913 = vrot.lane.b32.xlu0 %v3843_v33, %s6942_s18  ;;  %v10509_v63 = vpop.permute.xlu0 %4109 }
 0x5da   : > { %4089 = vrot.lane.b32.xlu1 %v4019_v49, %s6944_s20  ;;  %v6923_v49 = vld [vmem:[#allocation4 + $0xd8] sm:$0xff] }
 0x5dd   : > { %3915 = vrot.lane.b32.xlu0 %v3845_v22, %s6942_s18  ;;  %v10518_v61 = vpop.permute.xlu0 %4111 }
 0x5de   : > { %4091 = vrot.lane.b32.xlu1 %v4021_v6, %s6944_s20 }
 0x5df   : > { %v6844_v44 = vpop.permute.xlu1 %6843 }
 0x5e0   : > { %v6846_v23 = vunpack.i.h.bf16 %v6844_v44  ;;  %v6845_v32 = vunpack.i.l.bf16 %v6844_v44 }
 0x5e2   : > { %v4211_v41 = vsel %vm3704_vm15, %v6845_v32, %v10509_v63  ;;  %v4179_v19 = vsel %vm2796_vm12, %v10146_v5, %v6845_v32  ;;  %v4212_v54 = vsel %vm3704_vm15, %v6846_v23, %v10518_v61  ;;  %v4180_v37 = vsel %vm2796_vm12, %v10150_v16, %v6846_v23 }
 0x5e3   : > { %4518 = vmatprep.mubr.f32.mxu1 %v4211_v41  ;;  %v3420_v2 = vpop.permute.xlu1 %3419 }
 0x5e4   : > { %4519 = vmatmul.mubr.f32.gmra.mrb[76].mxu1 %v4179_v19  ;;  %v3683_v22 = vsel %vm2314_vm11, %v6923_v49, %v3420_v2 }
 0x5e5   : > { %4523 = vmatprep.mubr.f32.mxu1 %v4212_v54  ;;  %v6924_v54 = vld [vmem:[#allocation4 + $0xe0] sm:$0xff] }
 0x5e7   : > { %v3567_v45 = vpop.permute.xlu1 %3566 }
 0x5e8   : > { %4524 = vmatmul.mubr.f32.gmra.mrb[78].mxu1 %v4180_v37  ;;  %v10553_v23 = vsel %vm3704_vm15, %v3683_v22, %v3567_v45 }
 0x5fd   : > { %v10524_v53 = vpop.permute.xlu1 %4113 }
 0x601   : > { %v10526_v38 = vpop.permute.xlu1 %4115 }
 0x603   : > { %v6849_v20 = vpop.permute.xlu0 %6848 }
 0x604   : > { %v6851_v5 = vunpack.i.h.bf16 %v6849_v20  ;;  %v6850_v24 = vunpack.i.l.bf16 %v6849_v20 }
 0x606   : > { %v4213_v34 = vsel %vm3704_vm15, %v6850_v24, %v10524_v53  ;;  %v4181_v31 = vsel %vm2796_vm12, %v10185_v14, %v6850_v24  ;;  %v4214_v52 = vsel %vm3704_vm15, %v6851_v5, %v10526_v38  ;;  %v4182_v48 = vsel %vm2796_vm12, %v10192_v18, %v6851_v5 }
 0x607   : > { %v10532_v7 = vpop.permute.xlu0 %4061  ;;  %4528 = vmatprep.mubr.f32.mxu1 %v4213_v34  ;;  %v4022_v24 = vrot.slane %v10553_v23, 2 }
 0x608   : > { %v6854_v16 = vpop.permute.xlu1 %6853  ;;  %4529 = vmatmul.mubr.f32.gmra.mrb[80].mxu1 %v4181_v31  ;;  %v6841_v31 = vunpack.i.h.bf16 %v10437_v57 }
 0x609   : > { %v6855_v42 = vunpack.i.l.bf16 %v6854_v16  ;;  %4533 = vmatprep.mubr.f32.mxu1 %v4214_v52  ;;  %v6856_v29 = vunpack.i.h.bf16 %v6854_v16 }
 0x60a   : > { %v4156_v49 = vsel %vm2796_vm12, %v10090_v11, %v6841_v31 }
 0x60b   : > { %v3422_v21 = vpop.permute.xlu0 %3421  ;;  %v4185_v58 = vsel %vm3704_vm15, %v6855_v42, %v10332_v1  ;;  %v4153_v14 = vsel %vm2796_vm12, %v9970_v26, %v6855_v42  ;;  %v4183_v17 = vsel %vm2796_vm12, %v10208_v27, %v6856_v29  ;;  %v6840_v26 = vunpack.i.l.bf16 %v10437_v57 }
 0x60c   : > { %v10542_v50 = vpop.permute.xlu1 %4117  ;;  %4388 = vmatprep.mubr.f32.mxu0 %v4185_v58  ;;  %4534 = vmatmul.mubr.f32.gmra.mrb[82].mxu1 %v4182_v48  ;;  %v3684_v37 = vsel %vm2314_vm11, %v6924_v54, %v3422_v21 }
 0x60d   : > { %4389 = vmatmul.mubr.f32.vlgmr.msra.gmra.mrb[32].mxu0 %v4153_v14  ;;  %v4215_v56 = vsel %vm3704_vm15, %v6856_v29, %v10542_v50  ;;  %v4187_v5 = vsel %vm3704_vm15, %v6840_v26, %v10532_v7  ;;  %v6925_v29 = vld [vmem:[#allocation4 + $0xe8] sm:$0x3]  ;;  %v4155_v48 = vsel %vm2796_vm12, %v10082_v4, %v6840_v26 }
 0x60e   : > { %4538 = vmatprep.mubr.f32.mxu1 %v4215_v56 }
 0x60f   : > { %v6859_v33 = vpop.permute.xlu0 %6858 }
 0x610   : > { %v6861_v18 = vunpack.i.h.bf16 %v6859_v33  ;;  %v6860_v6 = vunpack.i.l.bf16 %v6859_v33  ;;  %v10549_v44 = vpop.permute.xlu1 %4119  ;;  %4539 = vmatmul.mubr.f32.gmra.mrb[84].mxu1 %v4183_v17 }
 0x612   : > { %v4186_v32 = vsel %vm3704_vm15, %v6860_v6, %v10316_v9  ;;  %v4216_v41 = vsel %vm3704_vm15, %v6861_v18, %v10549_v44  ;;  %v4154_v27 = vsel %vm2796_vm12, %v9944_v8, %v6860_v6  ;;  %v4184_v19 = vsel %vm2796_vm12, %v10219_v62, %v6861_v18 }
 0x613   : > { %v3569_v2 = vpop.permute.xlu0 %3568  ;;  %4393 = vmatprep.mubr.f32.mxu0 %v4186_v32  ;;  %4543 = vmatprep.mubr.f32.mxu1 %v4216_v41  ;;  %v3846_v8 = vrot.slane %v10553_v23, 1 }
 0x614   : > { %v10565_v45 = vsel %vm3704_vm15, %v3684_v37, %v3569_v2  ;;  %v4064_v20 = vpop.permute.xlu1 %4063  ;;  %4394 = vmatmul.mubr.f32.gmra.mrb[34].mxu0 %v4154_v27  ;;  %4544 = vmatmul.mubr.f32.gmra.mrb[86].mxu1 %v4184_v19 }
 0x615   : > { %v3847_v62 = vrot.slane %v10565_v45, 1  ;;  %v4023_v34 = vrot.slane %v10565_v45, 2  ;;  %4398 = vmatprep.mubr.f32.mxu0 %v4187_v5  ;;  %6565 = vmatprep.mubr.msk.f32.mxu1 %vm2314_vm11, %v10332_v1  ;;  %v4188_v57 = vsel %vm3704_vm15, %v6841_v31, %v4064_v20 }
 0x617   : > { %v3424_v16 = vpop.permute.xlu0 %3423  ;;  %v4024_v52 = vsel %vm1171_vm5, %v4022_v24, %v4023_v34  ;;  %v3848_v42 = vsel %vm994_vm4, %v3846_v8, %v3847_v62 }
 0x618   : > { %v3685_v21 = vsel %vm2314_vm11, %v6925_v29, %v3424_v16  ;;  %v3571_v58 = vpop.permute.xlu1 %3570  ;;  %4093 = vrot.lane.b32.xlu1 %v4024_v52, %s6944_s20  ;;  %3917 = vrot.lane.b32.xlu0 %v3848_v42, %s6942_s18 }
 0x619   : > { %v3734_v1 = vsel %vm3704_vm15, %v3685_v21, %v3571_v58  ;;  %4399 = vmatmul.mubr.f32.gmra.mrb[36].mxu0 %v4155_v48  ;;  %6566 = vmatmul.mubr.msk.f32.vlgmr.msra.gmra.mrb[88].mxu1 %vm2314_vm11, %v10316_v9 }
 0x61a   : > { %v3849_v14 = vrot.slane %v3734_v1, 1  ;;  %v4025_v56 = vrot.slane %v3734_v1, 2  ;;  %4403 = vmatprep.mubr.f32.mxu0 %v4188_v57  ;;  %6568 = vmatprep.mubr.msk.f32.mxu1 %vm2314_vm11, %v10532_v7 }
 0x61b   : > { %v3890_v33 = vpop.permute.xlu0 %3889 }
 0x61c   : > { %v4066_v17 = vpop.permute.xlu1 %4065  ;;  %v4026_v4 = vsel %vm1171_vm5, %v4023_v34, %v4025_v56  ;;  %v3850_v22 = vsel %vm994_vm4, %v3847_v62, %v3849_v14  ;;  %v4157_v11 = vsel %vm2796_vm12, %v10254_v0, %v3890_v33 }
 0x61d   : > { %4404 = vmatmul.mubr.f32.gmra.mrb[38].mxu0 %v4156_v49  ;;  %6569 = vmatmul.mubr.msk.f32.gmra.mrb[90].mxu1 %vm2314_vm11, %v4064_v20  ;;  %v4189_v9 = vsel %vm3704_vm15, %v3890_v33, %v4066_v17 }
 0x61e   : > { %4095 = vrot.lane.b32.xlu1 %v4026_v4, %s6944_s20  ;;  %3919 = vrot.lane.b32.xlu0 %v3850_v22, %s6942_s18 }
 0x61f   : > { %6571 = vmatprep.mubr.msk.f32.mxu1 %vm2314_vm11, %v4066_v17  ;;  %4408 = vmatprep.mubr.f32.mxu0 %v4189_v9  ;;  %v3892_v7 = vpop.permute.xlu0 %3891 }
 0x620   : > { %v4068_v18 = vpop.permute.xlu1 %4067  ;;  %v4158_v41 = vsel %vm2796_vm12, %v10266_v47, %v3892_v7 }
 0x621   : > { %4409 = vmatmul.mubr.f32.gmra.mrb[40].mxu0 %v4157_v11  ;;  %6572 = vmatmul.mubr.msk.f32.gmra.mrb[92].mxu1 %vm2314_vm11, %v4068_v18  ;;  %v4190_v6 = vsel %vm3704_vm15, %v3892_v7, %v4068_v18 }
 0x622   : > { %4413 = vmatprep.mubr.f32.mxu0 %v4190_v6 }
 0x623   : > { %v3894_v26 = vpop.permute.xlu0 %3893 }
 0x624   : > { %v4070_v32 = vpop.permute.xlu1 %4069  ;;  %v4159_v0 = vsel %vm2796_vm12, %v10293_v10, %v3894_v26 }
 0x625   : > { %4414 = vmatmul.mubr.f32.gmra.mrb[42].mxu0 %v4158_v41  ;;  %6574 = vmatprep.mubr.msk.f32.mxu1 %vm2314_vm11, %v4070_v32  ;;  %v4191_v27 = vsel %vm3704_vm15, %v3894_v26, %v4070_v32 }
 0x626   : > { %4418 = vmatprep.mubr.f32.mxu0 %v4191_v27 }
 0x627   : > { %v3896_v19 = vpop.permute.xlu0 %3895 }
 0x628   : > { %v4072_v54 = vpop.permute.xlu1 %4071  ;;  %v4160_v47 = vsel %vm2796_vm12, %v10289_v59, %v3896_v19 }
 0x629   : > { %4419 = vmatmul.mubr.f32.gmra.mrb[44].mxu0 %v4159_v0  ;;  %6575 = vmatmul.mubr.msk.f32.gmra.mrb[94].mxu1 %vm2314_vm11, %v4072_v54  ;;  %v4192_v37 = vsel %vm3704_vm15, %v3896_v19, %v4072_v54 }
 0x62a   : > { %4423 = vmatprep.mubr.f32.mxu0 %v4192_v37 }
 0x62b   : > { %v3898_v2 = vpop.permute.xlu0 %3897 }
 0x62c   : > { %v4074_v20 = vpop.permute.xlu1 %4073  ;;  %v4161_v10 = vsel %vm2796_vm12, %v10330_v35, %v3898_v2 }
 0x62d   : > { %4424 = vmatmul.mubr.f32.gmra.mrb[46].mxu0 %v4160_v47  ;;  %6577 = vmatprep.mubr.msk.f32.mxu1 %vm2314_vm11, %v4074_v20  ;;  %v4193_v5 = vsel %vm3704_vm15, %v3898_v2, %v4074_v20 }
 0x62e   : > { %4428 = vmatprep.mubr.f32.mxu0 %v4193_v5 }
 0x62f   : > { %v3900_v8 = vpop.permute.xlu0 %3899 }
 0x630   : > { %v4076_v24 = vpop.permute.xlu1 %4075  ;;  %v4162_v59 = vsel %vm2796_vm12, %v10321_v40, %v3900_v8 }
 0x631   : > { %4429 = vmatmul.mubr.f32.gmra.mrb[48].mxu0 %v4161_v10  ;;  %6578 = vmatmul.mubr.msk.f32.gmra.mrb[96].mxu1 %vm2314_vm11, %v4076_v24  ;;  %v4194_v62 = vsel %vm3704_vm15, %v3900_v8, %v4076_v24 }
 0x632   : > { %4433 = vmatprep.mubr.f32.mxu0 %v4194_v62 }
 0x633   : > { %v3902_v34 = vpop.permute.xlu0 %3901 }
 0x634   : > { %v4078_v31 = vpop.permute.xlu1 %4077  ;;  %v4163_v35 = vsel %vm2796_vm12, %v10365_v12, %v3902_v34 }
 0x635   : > { %4434 = vmatmul.mubr.f32.gmra.mrb[50].mxu0 %v4162_v59  ;;  %6580 = vmatprep.mubr.msk.f32.mxu1 %vm2314_vm11, %v4078_v31  ;;  %v4195_v16 = vsel %vm3704_vm15, %v3902_v34, %v4078_v31 }
 0x636   : > { %4438 = vmatprep.mubr.f32.mxu0 %v4195_v16 }
 0x637   : > { %v3904_v52 = vpop.permute.xlu0 %3903 }
 0x638   : > { %v4080_v42 = vpop.permute.xlu1 %4079  ;;  %v4164_v40 = vsel %vm2796_vm12, %v10361_v36, %v3904_v52 }
 0x639   : > { %4439 = vmatmul.mubr.f32.gmra.mrb[52].mxu0 %v4163_v35  ;;  %6581 = vmatmul.mubr.msk.f32.gmra.mrb[98].mxu1 %vm2314_vm11, %v4080_v42  ;;  %v4196_v29 = vsel %vm3704_vm15, %v3904_v52, %v4080_v42  ;;  %v10711_v42 = vld [vmem:[%s11910_s6] ss:$0 sm:$0xff] }
 0x63a   : > { %4443 = vmatprep.mubr.f32.mxu0 %v4196_v29 }
 0x63b   : > { %v3906_v21 = vpop.permute.xlu0 %3905 }
 0x63c   : > { %v4082_v58 = vpop.permute.xlu1 %4081  ;;  %v4165_v12 = vsel %vm2796_vm12, %v10411_v25, %v3906_v21 }
 0x63d   : > { %4444 = vmatmul.mubr.f32.gmra.mrb[54].mxu0 %v4164_v40  ;;  %6583 = vmatprep.mubr.msk.f32.mxu1 %vm2314_vm11, %v4082_v58  ;;  %v4197_v48 = vsel %vm3704_vm15, %v3906_v21, %v4082_v58 }
 0x63e   : > { %4448 = vmatprep.mubr.f32.mxu0 %v4197_v48 }
 0x63f   : > { %v3908_v1 = vpop.permute.xlu0 %3907 }
 0x640   : > { %v4084_v57 = vpop.permute.xlu1 %4083  ;;  %v4166_v36 = vsel %vm2796_vm12, %v10402_v55, %v3908_v1 }
 0x641   : > { %4449 = vmatmul.mubr.f32.gmra.mrb[56].mxu0 %v4165_v12  ;;  %6584 = vmatmul.mubr.msk.f32.gmra.mrb[100].mxu1 %vm2314_vm11, %v4084_v57  ;;  %v4198_v14 = vsel %vm3704_vm15, %v3908_v1, %v4084_v57 }
 0x642   : > { %4453 = vmatprep.mubr.f32.mxu0 %v4198_v14 }
 0x643   : > { %v3910_v56 = vpop.permute.xlu0 %3909 }
 0x644   : > { %v4086_v33 = vpop.permute.xlu1 %4085  ;;  %v4167_v25 = vsel %vm2796_vm12, %v10435_v15, %v3910_v56 }
 0x645   : > { %4454 = vmatmul.mubr.f32.gmra.mrb[58].mxu0 %v4166_v36  ;;  %6586 = vmatprep.mubr.msk.f32.mxu1 %vm2314_vm11, %v4086_v33  ;;  %v4199_v17 = vsel %vm3704_vm15, %v3910_v56, %v4086_v33 }
 0x646   : > { %4458 = vmatprep.mubr.f32.mxu0 %v4199_v17 }
 0x647   : > { %v3912_v49 = vpop.permute.xlu0 %3911 }
 0x648   : > { %v4088_v4 = vpop.permute.xlu1 %4087  ;;  %v4168_v55 = vsel %vm2796_vm12, %v10448_v60, %v3912_v49 }
 0x649   : > { %4459 = vmatmul.mubr.f32.gmra.mrb[60].mxu0 %v4167_v25  ;;  %6587 = vmatmul.mubr.msk.f32.gmra.mrb[102].mxu1 %vm2314_vm11, %v4088_v4  ;;  %v4200_v22 = vsel %vm3704_vm15, %v3912_v49, %v4088_v4 }
 0x64a   : > { %4463 = vmatprep.mubr.f32.mxu0 %v4200_v22 }
 0x64b   : > { %v3914_v9 = vpop.permute.xlu0 %3913 }
 0x64c   : > { %v4090_v7 = vpop.permute.xlu1 %4089  ;;  %v4169_v15 = vsel %vm2796_vm12, %v10474_v30, %v3914_v9 }
 0x64d   : > { %4464 = vmatmul.mubr.f32.gmra.mrb[62].mxu0 %v4168_v55  ;;  %6589 = vmatprep.mubr.msk.f32.mxu1 %vm2314_vm11, %v4090_v7  ;;  %v4201_v18 = vsel %vm3704_vm15, %v3914_v9, %v4090_v7 }
 0x64e   : > { %4468 = vmatprep.mubr.f32.mxu0 %v4201_v18 }
 0x64f   : > { %v3916_v11 = vpop.permute.xlu0 %3915 }
 0x650   : > { %v4092_v6 = vpop.permute.xlu1 %4091  ;;  %v4170_v60 = vsel %vm2796_vm12, %v10487_v39, %v3916_v11 }
 0x651   : > { %4469 = vmatmul.mubr.f32.gmra.mrb[64].mxu0 %v4169_v15  ;;  %6590 = vmatmul.mubr.msk.f32.gmra.mrb[104].mxu1 %vm2314_vm11, %v4092_v6  ;;  %v4202_v26 = vsel %vm3704_vm15, %v3916_v11, %v4092_v6 }
 0x652   : > { %4473 = vmatprep.mubr.f32.mxu0 %v4202_v26 }
 0x655   : > { %4474 = vmatmul.mubr.f32.gmra.mrb[66].mxu0 %v4170_v60 }
 0x68a   : > { %v4094_v32 = vpop.permute.xlu1 %4093  ;;  %v3918_v41 = vpop.permute.xlu0 %3917 }
 0x68b   : > { %6592 = vmatprep.mubr.msk.f32.mxu1 %vm2314_vm11, %v4094_v32  ;;  %v4203_v27 = vsel %vm3704_vm15, %v3918_v41, %v4094_v32  ;;  %v4171_v19 = vsel %vm2796_vm12, %v10553_v23, %v3918_v41 }
 0x68c   : > { %4478 = vmatprep.mubr.f32.mxu0 %v4203_v27 }
 0x68d   : > { %4479 = vmatmul.mubr.f32.gmra.mrb[68].mxu0 %v4171_v19 }
 0x68f   : > { %v10656_v30 = vpop.f32.mrb[64].mxu1 }
 0x690   : > { %v4096_v54 = vpop.permute.xlu1 %4095  ;;  %v3920_v0 = vpop.permute.xlu0 %3919 }
 0x691   : > { %v4492_v37 = vpop.f32.mrb[65].mxu1  ;;  %6593 = vmatmul.mubr.msk.f32.gmra.mrb[106].mxu1 %vm2314_vm11, %v4096_v54  ;;  %v4204_v39 = vsel %vm3704_vm15, %v3920_v0, %v4096_v54  ;;  %v4172_v2 = vsel %vm2796_vm12, %v10565_v45, %v3920_v0 }
 0x692   : > { %4483 = vmatprep.mubr.f32.mxu0 %v4204_v39  ;;  %6595 = vmatprep.mubr.msk.f32.mxu1 %vm2314_vm11, %v10335_v28 }
 0x693   : > { %4484 = vmatmul.mubr.f32.gmra.mrb[70].mxu0 %v4172_v2  ;;  %v10664_v23 = vpop.f32.mrb[66].mxu1 }
 0x694   : > { %v4497_v20 = vpop.f32.mrb[67].mxu1 }
 0x695   : > { %6596 = vmatmul.mubr.msk.f32.gmra.mrb[108].mxu1 %vm2314_vm11, %v10367_v43 }
 0x696   : > { %6598 = vmatprep.mubr.msk.f32.mxu1 %vm2314_vm11, %v10397_v46 }
 0x699   : > { %6599 = vmatmul.mubr.msk.f32.gmra.mrb[110].mxu1 %vm2314_vm11, %v10416_v13 }
 0x69a   : > { %6601 = vmatprep.mubr.msk.f32.mxu1 %vm2314_vm11, %v10456_v51 }
 0x69b   : > { %v10674_v45 = vpop.f32.mrb[68].mxu1 }
 0x69c   : > { %v4502_v47 = vpop.f32.mrb[69].mxu1 }
 0x69d   : > { %6602 = vmatmul.mubr.msk.f32.gmra.mrb[112].mxu1 %vm2314_vm11, %v10476_v3 }
 0x69e   : > { %6604 = vmatprep.mubr.msk.f32.mxu1 %vm2314_vm11, %v10509_v63 }
 0x69f   : > { %v10680_v28 = vpop.f32.mrb[70].mxu1 }
 0x6a0   : > { %v4507_v43 = vpop.f32.mrb[71].mxu1 }
 0x6a1   : > { %6605 = vmatmul.mubr.msk.f32.gmra.mrb[114].mxu1 %vm2314_vm11, %v10518_v61 }
 0x6a2   : > { %6607 = vmatprep.mubr.msk.f32.mxu1 %vm2314_vm11, %v10524_v53 }
 0x6a5   : > { %6608 = vmatmul.mubr.msk.f32.gmra.mrb[116].mxu1 %vm2314_vm11, %v10526_v38 }
 0x6a6   : > { %6610 = vmatprep.mubr.msk.f32.mxu1 %vm2314_vm11, %v10542_v50 }
 0x6a7   : > { %v10690_v46 = vpop.f32.mrb[72].mxu1 }
 0x6a8   : > { %v4512_v13 = vpop.f32.mrb[73].mxu1 }
 0x6a9   : > { %6611 = vmatmul.mubr.msk.f32.gmra.mrb[118].mxu1 %vm2314_vm11, %v10549_v44 }
 0x6ab   : > { %v10694_v51 = vpop.f32.mrb[74].mxu1 }
 0x6ac   : > { %v4517_v3 = vpop.f32.mrb[75].mxu1 }
 0x6b7   : > { %v10696_v63 = vpop.f32.mrb[76].mxu1 }
 0x6b8   : > { %v4522_v61 = vpop.f32.mrb[77].mxu1 }
 0x6bb   : > { %v10698_v5 = vpop.f32.mrb[78].mxu1 }
 0x6bc   : > { %v4527_v53 = vpop.f32.mrb[79].mxu1 }
 0x6db   : > { %v10700_v8 = vpop.f32.mrb[80].mxu1 }
 0x6dc   : > { %v4532_v38 = vpop.f32.mrb[81].mxu1 }
 0x6df   : > { %v10702_v24 = vpop.f32.mrb[82].mxu1 }
 0x6e0   : > { %v4390_v50 = vpop.f32.mrb[32].mxu0  ;;  %v4537_v10 = vpop.f32.mrb[83].mxu1 }
 0x6e1   : > { %v4392_v62 = vpop.f32.mrb[33].mxu0  ;;  %v4391_v29 = vadd.f32 %v10711_v42, %v4390_v50 }
 0x6e3   : > { %v10704_v34 = vpop.f32.mrb[84].mxu1 }
 0x6e4   : > { %v4542_v44 = vpop.f32.mrb[85].mxu1 }
 0x6e7   : > { %v4395_v31 = vpop.f32.mrb[34].mxu0  ;;  %v10706_v59 = vpop.f32.mrb[86].mxu1 }
 0x6e8   : > { %v4397_v16 = vpop.f32.mrb[35].mxu0  ;;  %v4547_v52 = vpop.f32.mrb[87].mxu1  ;;  %v4396_v35 = vadd.f32 %v10711_v42, %v4395_v31 }
 0x6ec   : > { %v4400_v21 = vpop.f32.mrb[36].mxu0  ;;  %v6567_v58 = vpop.f32.mrb[88].mxu1 }
 0x6ed   : > { %v4621_v40 = vadd.f32 %v6567_v58, %v4396_v35  ;;  %v4402_v48 = vpop.f32.mrb[37].mxu0  ;;  %v4615_v1 = vpop.f32.mrb[89].mxu1  ;;  %v4401_v14 = vadd.f32 %v10711_v42, %v4400_v21 }
 0x6ee   : > { %v4616_v57 = vadd.f32 %v4615_v1, %v4391_v29 }
 0x6ef   : > { %v4775_v12 = vmax.f32 %v4621_v40, 0.0 }
 0x6f0   : > { %v4774_v56 = vmax.f32 %v4616_v57, 0.0  ;;  %v4405_v33 = vpop.f32.mrb[38].mxu0  ;;  %v6570_v36 = vpop.f32.mrb[90].mxu1 }
 0x6f1   : > { %4862 = vst.msk [vmem:[#allocation5 + $0x21] sm:$0xff] %vm1784_vm9, %v4775_v12  ;;  %v4406_v17 = vadd.f32 %v10711_v42, %v4405_v33  ;;  %v4407_v49 = vpop.f32.mrb[39].mxu0  ;;  %v4625_v4 = vpop.f32.mrb[91].mxu1 }
 0x6f2   : > { %4861 = vst.msk [vmem:[#allocation5 + $0x19] sm:$0xff] %vm1784_vm9, %v4774_v56  ;;  %v4626_v25 = vadd.f32 %v4625_v4, %v4401_v14 }
 0x6f3   : > { %v4631_v22 = vadd.f32 %v6570_v36, %v4406_v17 }
 0x6f4   : > { %v4776_v9 = vmax.f32 %v4626_v25, 0.0  ;;  %v4410_v7 = vpop.f32.mrb[40].mxu0  ;;  %v6573_v55 = vpop.f32.mrb[92].mxu1 }
 0x6f5   : > { %v4777_v18 = vmax.f32 %v4631_v22, 0.0  ;;  %v4411_v11 = vadd.f32 %v10711_v42, %v4410_v7  ;;  %v4412_v6 = vpop.f32.mrb[41].mxu0  ;;  %v4635_v15 = vpop.f32.mrb[93].mxu1 }
 0x6f6   : > { %4863 = vst.msk [vmem:[#allocation5 + $0x31] sm:$0xff] %vm1784_vm9, %v4776_v9 }
 0x6f7   : > { %4864 = vst.msk [vmem:[#allocation5 + $0x39] sm:$0xff] %vm1784_vm9, %v4777_v18  ;;  %v4636_v26 = vadd.f32 %v4635_v15, %v4411_v11 }
 0x6f8   : > { %v4415_v60 = vpop.f32.mrb[42].mxu0  ;;  %v10722_v32 = vld [vmem:[#allocation5 + $0x28] sm:$0x3] }
 0x6f9   : > { %v4778_v41 = vmax.f32 %v4636_v26, 0.0  ;;  %v4416_v27 = vadd.f32 %v10711_v42, %v4415_v60  ;;  %v4417_v19 = vpop.f32.mrb[43].mxu0  ;;  %4999 = vrot.lane.b32.xlu0 %v10722_v32, %s6939_s14  ;;  %v10727_v54 = vld [vmem:[#allocation5 + $0x20] sm:$0xff]  ;;  %v10732_v2 = vld [vmem:[#allocation5 + $0x18] sm:$0xff] }
 0x6fa   : > { %4997 = vrot.lane.b32.xlu1 %v10727_v54, %s6939_s14 }
 0x6fb   : > { %4865 = vst.msk [vmem:[#allocation5 + $0x49] sm:$0xff] %vm1784_vm9, %v4778_v41  ;;  %v4641_v0 = vadd.f32 %v6573_v55, %v4416_v27 }
 0x6fc   : > { %v4420_v37 = vpop.f32.mrb[44].mxu0  ;;  %v6576_v39 = vpop.f32.mrb[94].mxu1 }
 0x6fd   : > { %v4779_v20 = vmax.f32 %v4641_v0, 0.0  ;;  %v4421_v47 = vadd.f32 %v10711_v42, %v4420_v37  ;;  %v4422_v43 = vpop.f32.mrb[45].mxu0  ;;  %4995 = vrot.lane.b32.xlu0 %v10732_v2, %s6939_s14  ;;  %v4645_v13 = vpop.f32.mrb[95].mxu1  ;;  %v10750_v52 = vld [vmem:[#allocation5 + $0x30] sm:$0xff] }
 0x6fe   : > { %v10737_v3 = vld [vmem:[#allocation5 + $0x40] sm:$0x3]  ;;  %v10745_v62 = vld [vmem:[#allocation5 + $0x38] sm:$0xff] }
 0x6ff   : > { %4866 = vst.msk [vmem:[#allocation5 + $0x51] sm:$0xff] %vm1784_vm9, %v4779_v20  ;;  %v4646_v61 = vadd.f32 %v4645_v13, %v4421_v47  ;;  %5146 = vrot.lane.b32.xlu1 %v10737_v3, %s6940_s15 }
 0x700   : > { %v4425_v53 = vpop.f32.mrb[46].mxu0 }
 0x701   : > { %v4780_v38 = vmax.f32 %v4646_v61, 0.0  ;;  %v4426_v50 = vadd.f32 %v10711_v42, %v4425_v53  ;;  %v4427_v10 = vpop.f32.mrb[47].mxu0  ;;  %5005 = vrot.lane.b32.xlu0 %v10737_v3, %s6939_s14 }
 0x702   : > { %v10774_v55 = vld [vmem:[#allocation5 + $0x48] sm:$0xff] }
 0x703   : > { %4867 = vst.msk [vmem:[#allocation5 + $0x61] sm:$0xff] %vm1784_vm9, %v4780_v38  ;;  %v4651_v44 = vadd.f32 %v6576_v39, %v4426_v50  ;;  %5144 = vrot.lane.b32.xlu1 %v10745_v62, %s6940_s15 }
 0x704   : > { %v4430_v31 = vpop.f32.mrb[48].mxu0  ;;  %v6579_v16 = vpop.f32.mrb[96].mxu1 }
 0x705   : > { %v4781_v35 = vmax.f32 %v4651_v44, 0.0  ;;  %v4431_v29 = vadd.f32 %v10711_v42, %v4430_v31  ;;  %v4432_v21 = vpop.f32.mrb[49].mxu0  ;;  %5142 = vrot.lane.b32.xlu0 %v10750_v52, %s6940_s15  ;;  %v4655_v58 = vpop.f32.mrb[97].mxu1 }
 0x706   : > { %v10761_v14 = vld [vmem:[#allocation5 + $0x58] sm:$0x3]  ;;  %v10769_v22 = vld [vmem:[#allocation5 + $0x50] sm:$0xff] }
 0x707   : > { %4868 = vst.msk [vmem:[#allocation5 + $0x69] sm:$0xff] %vm1784_vm9, %v4781_v35  ;;  %v4656_v40 = vadd.f32 %v4655_v58, %v4431_v29  ;;  %5003 = vrot.lane.b32.xlu1 %v10745_v62, %s6939_s14 }
 0x708   : > { %v4435_v48 = vpop.f32.mrb[50].mxu0 }
 0x709   : > { %v4782_v1 = vmax.f32 %v4656_v40, 0.0  ;;  %v4436_v57 = vadd.f32 %v10711_v42, %v4435_v48  ;;  %v4437_v12 = vpop.f32.mrb[51].mxu0  ;;  %5001 = vrot.lane.b32.xlu0 %v10750_v52, %s6939_s14 }
 0x70a   : > { %v10798_v10 = vld [vmem:[#allocation5 + $0x60] sm:$0xff] }
 0x70b   : > { %4869 = vst.msk [vmem:[#allocation5 + $0x79] sm:$0xff] %vm1784_vm9, %v4782_v1  ;;  %v4661_v56 = vadd.f32 %v6579_v16, %v4436_v57  ;;  %5152 = vrot.lane.b32.xlu1 %v10761_v14, %s6940_s15 }
 0x70c   : > { %v4440_v33 = vpop.f32.mrb[52].mxu0  ;;  %v6582_v36 = vpop.f32.mrb[98].mxu1 }
 0x70d   : > { %v4783_v17 = vmax.f32 %v4661_v56, 0.0  ;;  %v4441_v49 = vadd.f32 %v10711_v42, %v4440_v33  ;;  %v4442_v4 = vpop.f32.mrb[53].mxu0  ;;  %5011 = vrot.lane.b32.xlu0 %v10761_v14, %s6939_s14  ;;  %v4665_v25 = vpop.f32.mrb[99].mxu1 }
 0x70e   : > { %v10785_v37 = vld [vmem:[#allocation5 + $0x70] sm:$0x3]  ;;  %v10793_v61 = vld [vmem:[#allocation5 + $0x68] sm:$0xff] }
 0x70f   : > { %4870 = vst.msk [vmem:[#allocation5 + $0x81] sm:$0xff] %vm1784_vm9, %v4783_v17  ;;  %v4666_v9 = vadd.f32 %v4665_v25, %v4441_v49  ;;  %5150 = vrot.lane.b32.xlu1 %v10769_v22, %s6940_s15 }
 0x710   : > { %v4445_v7 = vpop.f32.mrb[54].mxu0 }
 0x711   : > { %v4784_v18 = vmax.f32 %v4666_v9, 0.0  ;;  %v4446_v11 = vadd.f32 %v10711_v42, %v4445_v7  ;;  %v4447_v6 = vpop.f32.mrb[55].mxu0  ;;  %5148 = vrot.lane.b32.xlu0 %v10774_v55, %s6940_s15 }
 0x712   : > { %v10822_v7 = vld [vmem:[#allocation5 + $0x78] sm:$0xff] }
 0x713   : > { %4871 = vst.msk [vmem:[#allocation5 + $0x91] sm:$0xff] %vm1784_vm9, %v4784_v18  ;;  %v4671_v15 = vadd.f32 %v6582_v36, %v4446_v11  ;;  %5009 = vrot.lane.b32.xlu1 %v10769_v22, %s6939_s14 }
 0x714   : > { %v4450_v26 = vpop.f32.mrb[56].mxu0  ;;  %v6585_v60 = vpop.f32.mrb[100].mxu1 }
 0x715   : > { %v4785_v41 = vmax.f32 %v4671_v15, 0.0  ;;  %v4451_v27 = vadd.f32 %v10711_v42, %v4450_v26  ;;  %v4452_v19 = vpop.f32.mrb[57].mxu0  ;;  %5007 = vrot.lane.b32.xlu0 %v10774_v55, %s6939_s14  ;;  %v4675_v0 = vpop.f32.mrb[101].mxu1 }
 0x716   : > { %v10809_v1 = vld [vmem:[#allocation5 + $0x88] sm:$0x3]  ;;  %v10817_v4 = vld [vmem:[#allocation5 + $0x80] sm:$0xff] }
 0x717   : > { %4872 = vst.msk [vmem:[#allocation5 + $0x99] sm:$0xff] %vm1784_vm9, %v4785_v41  ;;  %v4676_v39 = vadd.f32 %v4675_v0, %v4451_v27  ;;  %5158 = vrot.lane.b32.xlu1 %v10785_v37, %s6940_s15 }
 0x718   : > { %v4455_v20 = vpop.f32.mrb[58].mxu0 }
 0x719   : > { %v4786_v47 = vmax.f32 %v4676_v39, 0.0  ;;  %v4456_v43 = vadd.f32 %v10711_v42, %v4455_v20  ;;  %v4457_v13 = vpop.f32.mrb[59].mxu0  ;;  %5017 = vrot.lane.b32.xlu0 %v10785_v37, %s6939_s14 }
 0x71a   : > { %v10843_v27 = vld [vmem:[#allocation5 + $0x90] sm:$0xff] }
 0x71b   : > { %4873 = vst.msk [vmem:[#allocation5 + $0xa9] sm:$0xff] %vm1784_vm9, %v4786_v47  ;;  %v4681_v53 = vadd.f32 %v6585_v60, %v4456_v43  ;;  %5156 = vrot.lane.b32.xlu1 %v10793_v61, %s6940_s15 }
 0x71c   : > { %v4460_v38 = vpop.f32.mrb[60].mxu0  ;;  %v6588_v50 = vpop.f32.mrb[102].mxu1 }
 0x71d   : > { %v4787_v44 = vmax.f32 %v4681_v53, 0.0  ;;  %v4461_v31 = vadd.f32 %v10711_v42, %v4460_v38  ;;  %v4462_v16 = vpop.f32.mrb[61].mxu0  ;;  %5154 = vrot.lane.b32.xlu0 %v10798_v10, %s6940_s15  ;;  %v4685_v35 = vpop.f32.mrb[103].mxu1 }
 0x71e   : > { %v10832_v60 = vld [vmem:[#allocation5 + $0xa0] sm:$0x3]  ;;  %v10839_v41 = vld [vmem:[#allocation5 + $0x98] sm:$0xff] }
 0x71f   : > { %4874 = vst.msk [vmem:[#allocation5 + $0xb1] sm:$0xff] %vm1784_vm9, %v4787_v44  ;;  %v4686_v29 = vadd.f32 %v4685_v35, %v4461_v31  ;;  %5015 = vrot.lane.b32.xlu1 %v10793_v61, %s6939_s14 }
 0x720   : > { %v4465_v21 = vpop.f32.mrb[62].mxu0 }
 0x721   : > { %v4788_v58 = vmax.f32 %v4686_v29, 0.0  ;;  %v4466_v40 = vadd.f32 %v10711_v42, %v4465_v21  ;;  %v4467_v48 = vpop.f32.mrb[63].mxu0  ;;  %5013 = vrot.lane.b32.xlu0 %v10798_v10, %s6939_s14 }
 0x722   : > { %v10861_v39 = vld [vmem:[#allocation5 + $0xa8] sm:$0xff] }
 0x723   : > { %4875 = vst.msk [vmem:[#allocation5 + $0xc1] sm:$0xff] %vm1784_vm9, %v4788_v58  ;;  %v4691_v57 = vadd.f32 %v6588_v50, %v4466_v40  ;;  %5164 = vrot.lane.b32.xlu1 %v10809_v1, %s6940_s15  ;;  %12103 = vst [vmem:[#allocation25_spill] sm:$0xff] %v10861_v39  ;;  %v4496_v58 = vadd.f32 %v10711_v42, %v10664_v23 }
 0x724   : > { %v4470_v12 = vpop.f32.mrb[64].mxu0  ;;  %v6591_v56 = vpop.f32.mrb[104].mxu1 }
 0x725   : > { %v4789_v33 = vmax.f32 %v4691_v57, 0.0  ;;  %v4471_v36 = vadd.f32 %v10711_v42, %v4470_v12  ;;  %v4472_v17 = vpop.f32.mrb[65].mxu0  ;;  %5023 = vrot.lane.b32.xlu0 %v10809_v1, %s6939_s14  ;;  %v4695_v49 = vpop.f32.mrb[105].mxu1  ;;  %v4491_v57 = vadd.f32 %v10711_v42, %v10656_v30 }
 0x726   : > { %v10851_v19 = vld [vmem:[#allocation5 + $0xb8] sm:$0x3]  ;;  %v10857_v0 = vld [vmem:[#allocation5 + $0xb0] sm:$0xff] }
 0x727   : > { %4876 = vst.msk [vmem:[#allocation5 + $0xc9] sm:$0xff] %vm1784_vm9, %v4789_v33  ;;  %v4696_v25 = vadd.f32 %v4695_v49, %v4471_v36  ;;  %5162 = vrot.lane.b32.xlu1 %v10817_v4, %s6940_s15  ;;  %12101 = vst [vmem:[#allocation27_spill] sm:$0xff] %v10851_v19 }
 0x728   : > { %v4475_v9 = vpop.f32.mrb[66].mxu0  ;;  %12102 = vst [vmem:[#allocation26_spill] sm:$0xff] %v10857_v0 }
 0x729   : > { %v4790_v18 = vmax.f32 %v4696_v25, 0.0  ;;  %v4476_v11 = vadd.f32 %v10711_v42, %v4475_v9  ;;  %v4477_v6 = vpop.f32.mrb[67].mxu0  ;;  %5160 = vrot.lane.b32.xlu0 %v10822_v7, %s6940_s15  ;;  %v4506_v25 = vadd.f32 %v10711_v42, %v10680_v28 }
 0x72a   : > { %v10879_v43 = vld [vmem:[#allocation5 + $0xc0] sm:$0xff] }
 0x72b   : > { %4877 = vst.msk [vmem:[#allocation5 + $0xd9] sm:$0xff] %vm1784_vm9, %v4790_v18  ;;  %v4701_v15 = vadd.f32 %v6591_v56, %v4476_v11  ;;  %5021 = vrot.lane.b32.xlu1 %v10817_v4, %s6939_s14  ;;  %12106 = vst [vmem:[#allocation30_spill] sm:$0xff] %v10879_v43  ;;  %v4501_v11 = vadd.f32 %v10711_v42, %v10674_v45  ;;  %v4511_v45 = vadd.f32 %v10711_v42, %v10690_v46 }
 0x72c   : > { %v4521_v46 = vadd.f32 %v10711_v42, %v10696_v63  ;;  %v4536_v63 = vadd.f32 %v10711_v42, %v10702_v24 }
 0x72d   : > { %v4791_v26 = vmax.f32 %v4701_v15, 0.0  ;;  %5019 = vrot.lane.b32.xlu0 %v10822_v7, %s6939_s14 }
 0x72e   : > { %v10869_v20 = vld [vmem:[#allocation5 + $0xd0] sm:$0x3]  ;;  %v10875_v47 = vld [vmem:[#allocation5 + $0xc8] sm:$0xff] }
 0x72f   : > { %4878 = vst.msk [vmem:[#allocation5 + $0xe1] sm:$0xff] %vm1784_vm9, %v4791_v26  ;;  %5170 = vrot.lane.b32.xlu1 %v10832_v60, %s6940_s15  ;;  %12104 = vst [vmem:[#allocation29_spill] sm:$0xff] %v10869_v20 }
 0x730   : > { %12105 = vst [vmem:[#allocation28_spill] sm:$0xff] %v10875_v47 }
 0x731   : > { %5029 = vrot.lane.b32.xlu0 %v10832_v60, %s6939_s14 }
 0x732   : > { %v10897_v38 = vld [vmem:[#allocation5 + $0xd8] sm:$0xff] }
 0x733   : > { %5168 = vrot.lane.b32.xlu1 %v10839_v41, %s6940_s15  ;;  %12109 = vst [vmem:[#allocation31_spill] sm:$0xff] %v10897_v38 }
 0x735   : > { %5166 = vrot.lane.b32.xlu0 %v10843_v27, %s6940_s15 }
 0x736   : > { %v10887_v13 = vld [vmem:[#allocation5 + $0xe8] sm:$0x3]  ;;  %v10893_v53 = vld [vmem:[#allocation5 + $0xe0] sm:$0xff] }
 0x737   : > { %5027 = vrot.lane.b32.xlu1 %v10839_v41, %s6939_s14  ;;  %12107 = vst [vmem:[#allocation33_spill] sm:$0xff] %v10887_v13  ;;  %12108 = vst [vmem:[#allocation32_spill] sm:$0xff] %v10893_v53 }
 0x739   : > { %5025 = vrot.lane.b32.xlu0 %v10843_v27, %s6939_s14 }
 0x73b   : > { %5176 = vrot.lane.b32.xlu1 %v10851_v19, %s6940_s15 }
 0x73d   : > { %5035 = vrot.lane.b32.xlu0 %v10851_v19, %s6939_s14 }
 0x73f   : > { %5174 = vrot.lane.b32.xlu1 %v10857_v0, %s6940_s15 }
 0x741   : > { %5172 = vrot.lane.b32.xlu0 %v10861_v39, %s6940_s15 }
 0x743   : > { %5033 = vrot.lane.b32.xlu1 %v10857_v0, %s6939_s14 }
 0x745   : > { %5031 = vrot.lane.b32.xlu0 %v10861_v39, %s6939_s14 }
 0x747   : > { %5182 = vrot.lane.b32.xlu1 %v10869_v20, %s6940_s15 }
 0x749   : > { %5041 = vrot.lane.b32.xlu0 %v10869_v20, %s6939_s14  ;;  %v4893_v20 = vld [vmem:[#allocation5] sm:$0xff] }
 0x74b   : > { %5180 = vrot.lane.b32.xlu1 %v10875_v47, %s6940_s15 }
 0x74d   : > { %5178 = vrot.lane.b32.xlu0 %v10879_v43, %s6940_s15 }
 0x74f   : > { %5039 = vrot.lane.b32.xlu1 %v10875_v47, %s6939_s14  ;;  %v5862_v47 = vld [vmem:[%s11911_s7 + $0x80] sm:$0xff] }
 0x751   : > { %5037 = vrot.lane.b32.xlu0 %v10879_v43, %s6939_s14 }
 0x753   : > { %5188 = vrot.lane.b32.xlu1 %v10887_v13, %s6940_s15 }
 0x755   : > { %5047 = vrot.lane.b32.xlu0 %v10887_v13, %s6939_s14 }
 0x757   : > { %5186 = vrot.lane.b32.xlu1 %v10893_v53, %s6940_s15 }
 0x759   : > { %5184 = vrot.lane.b32.xlu0 %v10897_v38, %s6940_s15 }
 0x75b   : > { %5043 = vrot.lane.b32.xlu1 %v10897_v38, %s6939_s14  ;;  %v5861_v38 = vld [vmem:[%s11911_s7 + $0x78] sm:$0xff] }
 0x75d   : > { %5045 = vrot.lane.b32.xlu0 %v10893_v53, %s6939_s14 }
 0x760   : > { %v4480_v50 = vpop.f32.mrb[68].mxu0 }
 0x761   : > { %v4482_v44 = vpop.f32.mrb[69].mxu0  ;;  %v4481_v31 = vadd.f32 %v10711_v42, %v4480_v50 }
 0x762   : > { %v4516_v44 = vadd.f32 %v10711_v42, %v10694_v51  ;;  %v4526_v51 = vadd.f32 %v10711_v42, %v10698_v5 }
 0x764   : > { %v6594_v16 = vpop.f32.mrb[106].mxu1 }
 0x765   : > { %v4705_v35 = vpop.f32.mrb[107].mxu1 }
 0x766   : > { %v4706_v29 = vadd.f32 %v4705_v35, %v4481_v31  ;;  %v4485_v21 = vpop.f32.mrb[70].mxu0 }
 0x767   : > { %v4486_v40 = vadd.f32 %v10711_v42, %v4485_v21  ;;  %v4487_v48 = vpop.f32.mrb[71].mxu0 }
 0x768   : > { %v4792_v12 = vmax.f32 %v4706_v29, 0.0  ;;  %v6597_v56 = vpop.f32.mrb[108].mxu1 }
 0x769   : > { %v4711_v33 = vadd.f32 %v6594_v16, %v4486_v40  ;;  %v4721_v36 = vadd.f32 %v6597_v56, %v4496_v58  ;;  %v4715_v17 = vpop.f32.mrb[109].mxu1 }
 0x76a   : > { %4879 = vst.msk [vmem:[#allocation5 + $0xf1] sm:$0xff] %vm1784_vm9, %v4792_v12  ;;  %v4716_v49 = vadd.f32 %v4715_v17, %v4491_v57 }
 0x76b   : > { %v4793_v9 = vmax.f32 %v4711_v33, 0.0  ;;  %v4795_v18 = vmax.f32 %v4721_v36, 0.0  ;;  %v10914_v23 = vpop.permute.xlu0 %4999 }
 0x76c   : > { %v4794_v6 = vmax.f32 %v4716_v49, 0.0  ;;  %v6600_v30 = vpop.f32.mrb[110].mxu1  ;;  %v10918_v15 = vpop.permute.xlu1 %4997 }
 0x76d   : > { %4880 = vst.msk [vmem:[#allocation5 + $0xf9] sm:$0xff] %vm1784_vm9, %v4793_v9  ;;  %4882 = vst.msk [vmem:[#allocation5 + $0x111] sm:$0xff] %vm1784_vm9, %v4795_v18  ;;  %v4731_v26 = vadd.f32 %v6600_v30, %v4506_v25  ;;  %v4725_v50 = vpop.f32.mrb[111].mxu1 }
 0x76e   : > { %4881 = vst.msk [vmem:[#allocation5 + $0x109] sm:$0xff] %vm1784_vm9, %v4794_v6  ;;  %v4726_v28 = vadd.f32 %v4725_v50, %v4501_v11  ;;  %v4531_v11 = vadd.f32 %v10711_v42, %v10700_v8 }
 0x76f   : > { %v4797_v31 = vmax.f32 %v4731_v26, 0.0  ;;  %v10925_v16 = vpop.permute.xlu0 %4995 }
 0x770   : > { %v4796_v35 = vmax.f32 %v4726_v28, 0.0  ;;  %v6603_v29 = vpop.f32.mrb[112].mxu1 }
 0x771   : > { %4884 = vst.msk [vmem:[#allocation5 + $0x129] sm:$0xff] %vm1784_vm9, %v4797_v31  ;;  %v4741_v21 = vadd.f32 %v6603_v29, %v4516_v44  ;;  %v4735_v58 = vpop.f32.mrb[113].mxu1  ;;  %v10930_v40 = vpop.permute.xlu1 %5146  ;;  %v10957_v50 = vld [vmem:[#allocation5 + $0xf0] sm:$0xff]  ;;  %v4546_v31 = vadd.f32 %v10711_v42, %v10706_v59  ;;  %v4541_v29 = vadd.f32 %v10711_v42, %v10704_v34 }
 0x772   : > { %4883 = vst.msk [vmem:[#allocation5 + $0x121] sm:$0xff] %vm1784_vm9, %v4796_v35  ;;  %v4736_v48 = vadd.f32 %v4735_v58, %v4511_v45  ;;  %12112 = vst [vmem:[#allocation7_spill] sm:$0xff] %v10957_v50 }
 0x773   : > { %v4799_v57 = vmax.f32 %v4741_v21, 0.0  ;;  %v10935_v12 = vpop.permute.xlu0 %5005 }
 0x774   : > { %v4798_v56 = vmax.f32 %v4736_v48, 0.0  ;;  %v6606_v33 = vpop.f32.mrb[114].mxu1  ;;  %v10939_v36 = vld [vmem:[#allocation5 + $0x100] sm:$0x3]  ;;  %v10955_v26 = vld [vmem:[#allocation5 + $0xf8] sm:$0xff] }
 0x775   : > { %12110 = vst [vmem:[#allocation36_spill] sm:$0xff] %v10939_v36  ;;  %4886 = vst.msk [vmem:[#allocation5 + $0x141] sm:$0xff] %vm1784_vm9, %v4799_v57  ;;  %v4751_v17 = vadd.f32 %v6606_v33, %v4526_v51  ;;  %v4745_v49 = vpop.f32.mrb[115].mxu1  ;;  %5053 = vrot.lane.b32.xlu1 %v10939_v36, %s6939_s14  ;;  %v10944_v25 = vpop.permute.xlu1 %5144  ;;  %5194 = vrot.lane.b32.xlu0 %v10939_v36, %s6940_s15  ;;  %v10983_v42 = vld [vmem:[#allocation5 + $0x118] sm:$0x3] }
 0x776   : > { %4885 = vst.msk [vmem:[#allocation5 + $0x139] sm:$0xff] %vm1784_vm9, %v4798_v56  ;;  %v4746_v5 = vadd.f32 %v4745_v49, %v4521_v46  ;;  %12111 = vst [vmem:[#allocation8_spill] sm:$0xff] %v10955_v26  ;;  %v10995_v49 = vld [vmem:[#allocation5 + $0x110] sm:$0xff] }
 0x777   : > { %v4801_v9 = vmax.f32 %v4751_v17, 0.0  ;;  %v10951_v18 = vpop.permute.xlu0 %5142  ;;  %12113 = vst [vmem:[#allocation34_spill] sm:$0xff] %v10983_v42  ;;  %12114 = vst [vmem:[#allocation10_spill] sm:$0xff] %v10995_v49 }
 0x778   : > { %v4800_v6 = vmax.f32 %v4746_v5, 0.0  ;;  %v6609_v30 = vpop.f32.mrb[116].mxu1  ;;  %v10997_v5 = vld [vmem:[#allocation5 + $0x108] sm:$0xff] }
 0x779   : > { %4888 = vst.msk [vmem:[#allocation5 + $0x159] sm:$0xff] %vm1784_vm9, %v4801_v9  ;;  %v4761_v28 = vadd.f32 %v6609_v30, %v4536_v63  ;;  %v4755_v44 = vpop.f32.mrb[117].mxu1  ;;  %5192 = vrot.lane.b32.xlu1 %v10955_v26, %s6940_s15  ;;  %v10962_v24 = vpop.permute.xlu1 %5003  ;;  %5190 = vrot.lane.b32.xlu0 %v10957_v50, %s6940_s15  ;;  %12115 = vst [vmem:[#allocation9_spill] sm:$0xff] %v10997_v5  ;;  %v11015_v30 = vld [vmem:[#allocation5 + $0x130] sm:$0x3] }
 0x77a   : > { %4887 = vst.msk [vmem:[#allocation5 + $0x151] sm:$0xff] %vm1784_vm9, %v4800_v6  ;;  %v4756_v8 = vadd.f32 %v4755_v44, %v4531_v11  ;;  %12116 = vst [vmem:[#allocation35_spill] sm:$0xff] %v11015_v30 }
 0x77b   : > { %v4803_v45 = vmax.f32 %v4761_v28, 0.0  ;;  %v10969_v35 = vpop.permute.xlu0 %5001 }
 0x77c   : > { %v4802_v21 = vmax.f32 %v4756_v8, 0.0  ;;  %v6612_v58 = vpop.f32.mrb[118].mxu1  ;;  %v5846_v8 = vld [vmem:[%s11911_s7] sm:$0xff] }
 0x77d   : > { %4890 = vst.msk [vmem:[#allocation5 + $0x171] sm:$0xff] %vm1784_vm9, %v4803_v45  ;;  %v4771_v48 = vadd.f32 %v6612_v58, %v4546_v31  ;;  %v4765_v51 = vpop.f32.mrb[119].mxu1  ;;  %5051 = vrot.lane.b32.xlu1 %v10955_v26, %s6939_s14  ;;  %v10976_v57 = vpop.permute.xlu1 %5152  ;;  %5049 = vrot.lane.b32.xlu0 %v10957_v50, %s6939_s14  ;;  %v5847_v31 = vld [vmem:[%s11911_s7 + $0x8] sm:$0xff]  ;;  %v11031_v45 = vld [vmem:[#allocation5 + $0x120] sm:$0xff] }
 0x77e   : > { %4889 = vst.msk [vmem:[#allocation5 + $0x169] sm:$0xff] %vm1784_vm9, %v4802_v21  ;;  %v4766_v59 = vadd.f32 %v4765_v51, %v4541_v29  ;;  %12117 = vst [vmem:[#allocation12_spill] sm:$0xff] %v11031_v45  ;;  %v11033_v29 = vld [vmem:[#allocation5 + $0x128] sm:$0xff]  ;;  %v6705_v21 = vpack.c.bf16 %v5847_v31, %v5846_v8  ;;  %v12119_v51 = vmov 0.0|0.0   ;;  %v5856_v50 = vld [vmem:[%s11911_s7 + $0x50] sm:$0xff] }
 0x77f   : > { %v4805_v46 = vmax.f32 %v4771_v48, 0.0  ;;  %v10981_v56 = vpop.permute.xlu0 %5011  ;;  %12118 = vst [vmem:[#allocation13_spill] sm:$0xff] %v11033_v29 }
 0x780   : > { %v4804_v34 = vmax.f32 %v4766_v59, 0.0  ;;  %6706 = vmatpush1.bf16.msra.mxu0 %v6705_v21  ;;  %v5848_v59 = vld [vmem:[%s11911_s7 + $0x10] sm:$0xff]  ;;  %v5850_v21 = vld [vmem:[%s11911_s7 + $0x20] sm:$0xff] }
 0x781   : > { %4892 = vst.msk [vmem:[#allocation5 + $0x189] sm:$0xff] %vm1784_vm9, %v4805_v46  ;;  %v10986_v33 = vpop.permute.xlu1 %5150  ;;  %5059 = vrot.lane.b32.xlu0 %v10983_v42, %s6939_s14  ;;  %5200 = vrot.lane.b32.xlu1 %v10983_v42, %s6940_s15  ;;  %v5849_v46 = vld [vmem:[%s11911_s7 + $0x18] sm:$0xff]  ;;  %v11084_v42 = vld [vmem:[#allocation5 + $0x138] sm:$0xff] }
 0x782   : > { %4891 = vst.msk [vmem:[#allocation5 + $0x181] sm:$0xff] %vm1784_vm9, %v4804_v34  ;;  %6707 = vmatprep.subr.bf16.mxu0 %v12119_v51  ;;  %v6708_v34 = vpack.c.bf16 %v5849_v46, %v5848_v59  ;;  %v5851_v59 = vld [vmem:[%s11911_s7 + $0x28] sm:$0xff]  ;;  %v11065_v46 = vld [vmem:[#allocation5 + $0x148] sm:$0x3]  ;;  %12122 = vst [vmem:[#allocation15_spill] sm:$0xff] %v11084_v42 }
 0x783   : > { %v10993_v17 = vpop.permute.xlu0 %5148  ;;  %12120 = vst [vmem:[#allocation17_spill] sm:$0xff] %v11065_v46  ;;  %v11135_v13 = vld [vmem:[#allocation5 + $0x158] sm:$0xff] }
 0x784   : > { %6709 = vmatpush1.bf16.msra.mxu0 %v6708_v34  ;;  %12125 = vst [vmem:[#allocation24_spill] sm:$0xff] %v11135_v13 }
 0x785   : > { %v10999_v63 = vpop.permute.xlu1 %5009  ;;  %5198 = vrot.lane.b32.xlu0 %v10995_v49, %s6940_s15  ;;  %5196 = vrot.lane.b32.xlu1 %v10997_v5, %s6940_s15  ;;  %v11165_v43 = vld [vmem:[#allocation5 + $0x170] sm:$0xff] }
 0x786   : > { %6710 = vmatprep.subr.bf16.mxu0 %v12119_v51  ;;  %12126 = vst [vmem:[#allocation14_spill] sm:$0xff] %v11165_v43 }
 0x787   : > { %v11005_v9 = vpop.permute.xlu0 %5007 }
 0x789   : > { %v11007_v11 = vpop.permute.xlu1 %5158  ;;  %5057 = vrot.lane.b32.xlu0 %v10995_v49, %s6939_s14  ;;  %5055 = vrot.lane.b32.xlu1 %v10997_v5, %s6939_s14 }
 0x78b   : > { %v11013_v6 = vpop.permute.xlu0 %5017 }
 0x78d   : > { %v11017_v28 = vpop.permute.xlu1 %5156  ;;  %5206 = vrot.lane.b32.xlu0 %v11015_v30, %s6940_s15  ;;  %5065 = vrot.lane.b32.xlu1 %v11015_v30, %s6939_s14  ;;  %v6711_v30 = vpack.c.bf16 %v5851_v59, %v5850_v21  ;;  %v5853_v21 = vld [vmem:[%s11911_s7 + $0x38] sm:$0xff]  ;;  %v11082_v59 = vld [vmem:[#allocation5 + $0x140] sm:$0xff] }
 0x78e   : > { %12121 = vst [vmem:[#allocation11_spill] sm:$0xff] %v11082_v59 }
 0x78f   : > { %v11023_v44 = vpop.permute.xlu0 %5154  ;;  %6712 = vmatpush1.bf16.msra.mxu0 %v6711_v30 }
 0x790   : > { %6713 = vmatprep.subr.bf16.mxu0 %v12119_v51 }
 0x791   : > { %v11035_v58 = vpop.permute.xlu1 %5015  ;;  %5202 = vrot.lane.b32.xlu0 %v11031_v45, %s6940_s15  ;;  %5204 = vrot.lane.b32.xlu1 %v11033_v29, %s6940_s15 }
 0x793   : > { %v11041_v48 = vpop.permute.xlu0 %5013 }
 0x795   : > { %v11050_v8 = vpop.permute.xlu1 %5164  ;;  %5061 = vrot.lane.b32.xlu0 %v11031_v45, %s6939_s14  ;;  %5063 = vrot.lane.b32.xlu1 %v11033_v29, %s6939_s14  ;;  %v5852_v29 = vld [vmem:[%s11911_s7 + $0x30] sm:$0xff] }
 0x796   : > { %v6714_v49 = vpack.c.bf16 %v5853_v21, %v5852_v29  ;;  %v5855_v29 = vld [vmem:[%s11911_s7 + $0x48] sm:$0xff] }
 0x797   : > { %v11056_v31 = vpop.permute.xlu0 %5023 }
 0x798   : > { %6715 = vmatpush1.bf16.msra.mxu0 %v6714_v49 }
 0x799   : > { %v11067_v45 = vpop.permute.xlu1 %5162  ;;  %5071 = vrot.lane.b32.xlu0 %v11065_v46, %s6939_s14  ;;  %5212 = vrot.lane.b32.xlu1 %v11065_v46, %s6940_s15  ;;  %v5854_v46 = vld [vmem:[%s11911_s7 + $0x40] sm:$0xff] }
 0x79a   : > { %6716 = vmatprep.subr.bf16.mxu0 %v12119_v51  ;;  %v6717_v21 = vpack.c.bf16 %v5855_v29, %v5854_v46  ;;  %v5857_v46 = vld [vmem:[%s11911_s7 + $0x58] sm:$0xff]  ;;  %v11116_v29 = vld [vmem:[#allocation5 + $0x160] sm:$0x3] }
 0x79b   : > { %v11073_v34 = vpop.permute.xlu0 %5160  ;;  %12123 = vst [vmem:[#allocation18_spill] sm:$0xff] %v11116_v29  ;;  %v6720_v26 = vpack.c.bf16 %v5857_v46, %v5856_v50  ;;  %v5859_v50 = vld [vmem:[%s11911_s7 + $0x68] sm:$0xff]  ;;  %v11133_v46 = vld [vmem:[#allocation5 + $0x150] sm:$0xff] }
 0x79c   : > { %6718 = vmatpush1.bf16.msra.mxu0 %v6717_v21  ;;  %12124 = vst [vmem:[#allocation21_spill] sm:$0xff] %v11133_v46 }
 0x79d   : > { %v11086_v5 = vpop.permute.xlu1 %5021  ;;  %5210 = vrot.lane.b32.xlu0 %v11082_v59, %s6940_s15  ;;  %5208 = vrot.lane.b32.xlu1 %v11084_v42, %s6940_s15 }
 0x79e   : > { %6719 = vmatprep.subr.bf16.mxu0 %v12119_v51 }
 0x79f   : > { %v11092_v30 = vpop.permute.xlu0 %5019 }
 0x7a0   : > { %6721 = vmatpush1.bf16.msra.mxu0 %v6720_v26  ;;  %v5860_v26 = vld [vmem:[%s11911_s7 + $0x70] sm:$0xff] }
 0x7a1   : > { %v11101_v36 = vpop.permute.xlu1 %5170  ;;  %5069 = vrot.lane.b32.xlu0 %v11082_v59, %s6939_s14  ;;  %5067 = vrot.lane.b32.xlu1 %v11084_v42, %s6939_s14  ;;  %v5858_v59 = vld [vmem:[%s11911_s7 + $0x60] sm:$0xff]  ;;  %v6726_v53 = vpack.c.bf16 %v5861_v38, %v5860_v26  ;;  %v5863_v38 = vld [vmem:[%s11911_s7 + $0x88] sm:$0xff]  ;;  %v5286_v26 = vsel %vm1784_vm9, %v4893_v20, %v10925_v16 }
 0x7a2   : > { %6722 = vmatprep.subr.bf16.mxu0 %v12119_v51 }
 0x7a3   : > { %v11107_v49 = vpop.permute.xlu0 %5029 }
 0x7a5   : > { %5218 = vrot.lane.b32.xlu0 %v11116_v29, %s6940_s15  ;;  %5077 = vrot.lane.b32.xlu1 %v11116_v29, %s6939_s14  ;;  %v11122_v21 = vpop.permute.xlu1 %5168  ;;  %v6723_v29 = vpack.c.bf16 %v5859_v50, %v5858_v59 }
 0x7a7   : > { %v11124_v42 = vpop.permute.xlu0 %5166  ;;  %6724 = vmatpush1.bf16.msra.mxu0 %v6723_v29  ;;  %v4894_v29 = vld [vmem:[#allocation5 + $0x8] sm:$0xff] }
 0x7a8   : > { %6725 = vmatprep.subr.bf16.mxu0 %v12119_v51  ;;  %v5287_v19 = vsel %vm1784_vm9, %v4894_v29, %v10918_v15 }
 0x7a9   : > { %5214 = vrot.lane.b32.xlu0 %v11133_v46, %s6940_s15  ;;  %5216 = vrot.lane.b32.xlu1 %v11135_v13, %s6940_s15  ;;  %v11148_v59 = vpop.permute.xlu1 %5027  ;;  %v11181_v20 = vsel %vm2314_vm11, %v5287_v19, %v10944_v25  ;;  %v11203_v25 = vld [vmem:[#allocation5 + $0x180] sm:$0xff] }
 0x7aa   : > { %12128 = vst [vmem:[#allocation16_spill] sm:$0xff] %v11181_v20  ;;  %v5431_v19 = vrot.slane %v11181_v20, 1 }
 0x7ab   : > { %v11150_v50 = vpop.permute.xlu0 %5025  ;;  %6727 = vmatpush1.bf16.msra.mxu0 %v6726_v53  ;;  %v4895_v53 = vld [vmem:[#allocation5 + $0x10] sm:$0x3] }
 0x7ac   : > { %6728 = vmatprep.subr.bf16.mxu0 %v12119_v51  ;;  %v11171_v51 = vsel %vm2314_vm11, %v5286_v26, %v10951_v18  ;;  %v5288_v18 = vsel %vm1784_vm9, %v4895_v53, %v10914_v23  ;;  %v11190_v26 = vld [vmem:[#allocation5 + $0x168] sm:$0xff]  ;;  %v5289_v23 = vsel %vm1784_vm9, %v10732_v2, %v10969_v35  ;;  %v5607_v2 = vrot.slane %v11181_v20, 2 }
 0x7ad   : > { %5073 = vrot.lane.b32.xlu0 %v11133_v46, %s6939_s14  ;;  %5075 = vrot.lane.b32.xlu1 %v11135_v13, %s6939_s14  ;;  %v11167_v46 = vld [vmem:[#allocation5 + $0x178] sm:$0x3]  ;;  %v6729_v13 = vpack.c.bf16 %v5863_v38, %v5862_v47  ;;  %12127 = vst [vmem:[#allocation20_spill] sm:$0xff] %v11171_v51  ;;  %v11183_v47 = vpop.permute.xlu1 %5176  ;;  %v5430_v38 = vrot.slane %v11171_v51, 1  ;;  %12129 = vst [vmem:[#allocation23_spill] sm:$0xff] %v11190_v26  ;;  %v5336_v0 = vsel %vm2314_vm11, %v5288_v18, %v10930_v40 }
 0x7ae   : > { %v5606_v15 = vrot.slane %v11171_v51, 2  ;;  %v11208_v40 = vsel %vm2314_vm11, %v5289_v23, %v10993_v17  ;;  %v5290_v35 = vsel %vm1784_vm9, %v10727_v54, %v10962_v24  ;;  %v5609_v20 = vrot.slane %v5336_v0, 2 }
 0x7af   : > { %6730 = vmatpush1.bf16.msra.mxu0 %v6729_v13  ;;  %v11185_v16 = vpop.permute.xlu0 %5035  ;;  %v5433_v13 = vrot.slane %v5336_v0, 1  ;;  %v5432_v29 = vsel %vm994_vm4, %v5430_v38, %v5431_v19  ;;  %v11225_v17 = vsel %vm2314_vm11, %v5290_v35, %v10986_v33  ;;  %v5435_v51 = vrot.slane %v11208_v40, 1 }
 0x7b0   : > { %v5436_v54 = vrot.slane %v11225_v17, 1  ;;  %v5292_v0 = vsel %vm1784_vm9, %v10750_v52, %v11005_v9 }
 0x7b1   : > { %5222 = vrot.lane.b32.xlu0 %v11165_v43, %s6940_s15  ;;  %5224 = vrot.lane.b32.xlu1 %v11167_v46, %s6940_s15  ;;  %v11210_v53 = vpop.permute.xlu1 %5174  ;;  %v5434_v38 = vsel %vm994_vm4, %v5431_v19, %v5433_v13  ;;  %v5611_v19 = vrot.slane %v11208_v40, 2 }
 0x7b2   : > { %v6862_v23 = vpack.i.bf16 %v5434_v38, %v5432_v29 }
 0x7b3   : > { %v11212_v18 = vpop.permute.xlu0 %5172 }
 0x7b5   : > { %5081 = vrot.lane.b32.xlu0 %v11165_v43, %s6939_s14  ;;  %5220 = vrot.lane.b32.xlu1 %v11190_v26, %s6940_s15  ;;  %v5291_v43 = vsel %vm1784_vm9, %v10722_v32, %v10935_v12  ;;  %v11237_v24 = vpop.permute.xlu1 %5033  ;;  %v5610_v32 = vsel %vm1171_vm5, %v5607_v2, %v5609_v20  ;;  %v5612_v20 = vrot.slane %v11225_v17, 2 }
 0x7b6   : > { %v5339_v39 = vsel %vm2314_vm11, %v5291_v43, %v10976_v57  ;;  %v5437_v43 = vsel %vm994_vm4, %v5435_v51, %v5436_v54  ;;  %v11249_v57 = vsel %vm2314_vm11, %v5292_v0, %v11023_v44  ;;  %v5294_v44 = vsel %vm1784_vm9, %v10737_v3, %v10981_v56 }
 0x7b7   : > { %v11239_v33 = vpop.permute.xlu0 %5031  ;;  %v5438_v12 = vrot.slane %v5339_v39, 1  ;;  %v5440_v51 = vrot.slane %v11249_v57, 1  ;;  %v5614_v29 = vrot.slane %v5339_v39, 2  ;;  %v5616_v35 = vrot.slane %v11249_v57, 2 }
 0x7b8   : > { %v5295_v39 = vsel %vm1784_vm9, %v10774_v55, %v11041_v48  ;;  %v5297_v0 = vsel %vm1784_vm9, %v10761_v14, %v11013_v6  ;;  %v5298_v14 = vsel %vm1784_vm9, %v10798_v10, %v11092_v30  ;;  %v11317_v6 = vld [vmem:[#allocation5 + $0x190] sm:$0x3]  ;;  %v5299_v10 = vsel %vm1784_vm9, %v10793_v61, %v11086_v5 }
 0x7b9   : > { %5226 = vrot.lane.b32.xlu0 %v11203_v25, %s6940_s15  ;;  %5079 = vrot.lane.b32.xlu1 %v11190_v26, %s6939_s14  ;;  %v5608_v26 = vsel %vm1171_vm5, %v5606_v15, %v5607_v2  ;;  %v5439_v13 = vsel %vm994_vm4, %v5436_v54, %v5438_v12  ;;  %v5613_v15 = vsel %vm1171_vm5, %v5611_v19, %v5612_v20 }
 0x7ba   : > { %v6867_v9 = vpack.i.bf16 %v5439_v13, %v5437_v43  ;;  %v5342_v2 = vsel %vm2314_vm11, %v5294_v44, %v11007_v11  ;;  %v5615_v3 = vsel %vm1171_vm5, %v5612_v20, %v5614_v29  ;;  %v4942_v11 = vld [vmem:[#allocation5 + $0x188] sm:$0xff] }
 0x7bb   : > { %v5443_v56 = vrot.slane %v5342_v2, 1 }
 0x7bd   : > { %6863 = vrot.lane.b32.xlu0 %v6862_v23, %s6943_s19  ;;  %5686 = vrot.lane.b32.xlu1 %v5608_v26, %s6942_s18  ;;  %v5293_v26 = vsel %vm1784_vm9, %v10745_v62, %v10999_v63  ;;  %v11270_v62 = vpop.permute.xlu1 %5182  ;;  %v11272_v63 = vpop.permute.xlu0 %5041  ;;  %v11285_v23 = vsel %vm2314_vm11, %v5295_v39, %v11073_v34 }
 0x7be   : > { %v11261_v52 = vsel %vm2314_vm11, %v5293_v26, %v11017_v28  ;;  %v5445_v43 = vrot.slane %v11285_v23, 1 }
 0x7bf   : > { %v5441_v28 = vrot.slane %v11261_v52, 1  ;;  %v5617_v54 = vrot.slane %v11261_v52, 2 }
 0x7c1   : > { %5083 = vrot.lane.b32.xlu0 %v11167_v46, %s6939_s14  ;;  %5688 = vrot.lane.b32.xlu1 %v5610_v32, %s6942_s18  ;;  %v5442_v38 = vsel %vm994_vm4, %v5440_v51, %v5441_v28  ;;  %v5296_v32 = vsel %vm1784_vm9, %v10769_v22, %v11035_v58  ;;  %v5444_v12 = vsel %vm994_vm4, %v5441_v28, %v5443_v56  ;;  %v11298_v48 = vpop.permute.xlu1 %5180  ;;  %v11300_v34 = vpop.permute.xlu0 %5178  ;;  %v5619_v22 = vrot.slane %v5342_v2, 2 }
 0x7c2   : > { %v11296_v55 = vsel %vm2314_vm11, %v5296_v32, %v11067_v45  ;;  %v6872_v19 = vpack.i.bf16 %v5444_v12, %v5442_v38  ;;  %v5618_v20 = vsel %vm1171_vm5, %v5616_v35, %v5617_v54  ;;  %v5345_v58 = vsel %vm2314_vm11, %v5297_v0, %v11050_v8 }
 0x7c3   : > { %v5446_v45 = vrot.slane %v11296_v55, 1  ;;  %v5620_v26 = vsel %vm1171_vm5, %v5617_v54, %v5619_v22  ;;  %v5448_v13 = vrot.slane %v5345_v58, 1  ;;  %v11322_v8 = vsel %vm2314_vm11, %v5298_v14, %v11124_v42 }
 0x7c4   : > { %v5622_v29 = vrot.slane %v11296_v55, 2  ;;  %v11338_v42 = vsel %vm2314_vm11, %v5299_v10, %v11122_v21  ;;  %v5300_v28 = vsel %vm1784_vm9, %v10785_v37, %v11056_v31  ;;  %v5624_v35 = vrot.slane %v5345_v58, 2 }
 0x7c5   : > { %5690 = vrot.lane.b32.xlu0 %v5613_v15, %s6942_s18  ;;  %6868 = vrot.lane.b32.xlu1 %v6867_v9, %s6943_s19  ;;  %v5621_v9 = vrot.slane %v11285_v23, 2  ;;  %v5447_v44 = vsel %vm994_vm4, %v5445_v43, %v5446_v45  ;;  %v11324_v51 = vpop.permute.xlu1 %5039  ;;  %v11326_v15 = vpop.permute.xlu0 %5037  ;;  %v5449_v30 = vsel %vm994_vm4, %v5446_v45, %v5448_v13  ;;  %v5348_v39 = vsel %vm2314_vm11, %v5300_v28, %v11101_v36 }
 0x7c6   : > { %v6877_v2 = vpack.i.bf16 %v5449_v30, %v5447_v44  ;;  %v5451_v61 = vrot.slane %v11338_v42, 1  ;;  %v5625_v37 = vsel %vm1171_vm5, %v5622_v29, %v5624_v35  ;;  %v5453_v31 = vrot.slane %v5348_v39, 1 }
 0x7c7   : > { %v5623_v56 = vsel %vm1171_vm5, %v5621_v9, %v5622_v29  ;;  %v5626_v38 = vrot.slane %v11322_v8, 2  ;;  %v5301_v54 = vsel %vm1784_vm9, %v10822_v7, %v11150_v50  ;;  %v5627_v12 = vrot.slane %v11338_v42, 2 }
 0x7c8   : > { %v11362_v32 = vsel %vm2314_vm11, %v5301_v54, %v11212_v18  ;;  %v5454_v0 = vsel %vm994_vm4, %v5451_v61, %v5453_v31  ;;  %v5303_v18 = vsel %vm1784_vm9, %v10809_v1, %v11107_v49  ;;  %v5304_v49 = vsel %vm1784_vm9, %v10843_v27, %v11239_v33 }
 0x7c9   : > { %5692 = vrot.lane.b32.xlu0 %v5615_v3, %s6942_s18  ;;  %5228 = vrot.lane.b32.xlu1 %v4942_v11, %s6940_s15  ;;  %v5450_v3 = vrot.slane %v11322_v8, 1  ;;  %v11350_v5 = vpop.permute.xlu1 %5188  ;;  %v11352_v21 = vpop.permute.xlu0 %5047  ;;  %v5455_v43 = vrot.slane %v11362_v32, 1  ;;  %v5351_v22 = vsel %vm2314_vm11, %v5303_v18, %v11183_v47  ;;  %v5631_v1 = vrot.slane %v11362_v32, 2 }
 0x7ca   : > { %v5458_v45 = vrot.slane %v5351_v22, 1  ;;  %v11393_v47 = vsel %vm2314_vm11, %v5304_v49, %v11300_v34  ;;  %v5305_v9 = vsel %vm1784_vm9, %v10839_v41, %v11237_v24  ;;  %v5634_v30 = vrot.slane %v5351_v22, 2 }
 0x7cb   : > { %v5452_v36 = vsel %vm994_vm4, %v5450_v3, %v5451_v61  ;;  %v11405_v27 = vsel %vm2314_vm11, %v5305_v9, %v11298_v48  ;;  %v5460_v29 = vrot.slane %v11393_v47, 1  ;;  %v4944_v48 = vld [vmem:[#allocation5 + $0x198] sm:$0xff]  ;;  %v5636_v3 = vrot.slane %v11393_v47, 2 }
 0x7cc   : > { %v6882_v50 = vpack.i.bf16 %v5454_v0, %v5452_v36  ;;  %v5461_v24 = vrot.slane %v11405_v27, 1  ;;  %v5637_v61 = vrot.slane %v11405_v27, 2 }
 0x7cd   : > { %6873 = vrot.lane.b32.xlu0 %v6872_v19, %s6943_s19  ;;  %5694 = vrot.lane.b32.xlu1 %v5618_v20, %s6942_s18  ;;  %v5302_v19 = vsel %vm1784_vm9, %v10817_v4, %v11148_v59  ;;  %v5629_v20 = vrot.slane %v5348_v39, 2  ;;  %v5187_v4 = vpop.permute.xlu1 %5186  ;;  %v5185_v59 = vpop.permute.xlu0 %5184 }
 0x7ce   : > { %v11373_v7 = vsel %vm2314_vm11, %v5302_v19, %v11210_v53  ;;  %v12132_v19 = vld [vmem:[#allocation27_spill] sm:$0xff]  ;;  %v5638_v18 = vsel %vm1171_vm5, %v5636_v3, %v5637_v61  ;;  %v4946_v3 = vld [vmem:[#allocation5 + $0x1a8] sm:$0x3] }
 0x7cf   : > { %v5456_v53 = vrot.slane %v11373_v7, 1  ;;  %v5630_v58 = vsel %vm1171_vm5, %v5627_v12, %v5629_v20  ;;  %v5632_v13 = vrot.slane %v11373_v7, 2  ;;  %v5309_v0 = vsel %vm1784_vm9, %v12132_v19, %v11272_v63  ;;  %v4945_v20 = vld [vmem:[#allocation5 + $0x1a0] sm:$0xff] }
 0x7d1   : > { %5230 = vrot.lane.b32.xlu0 %v11317_v6, %s6940_s15  ;;  %5696 = vrot.lane.b32.xlu1 %v5620_v26, %s6942_s18  ;;  %v5457_v26 = vsel %vm994_vm4, %v5455_v43, %v5456_v53  ;;  %v5459_v14 = vsel %vm994_vm4, %v5456_v53, %v5458_v45  ;;  %v5044_v33 = vpop.permute.xlu1 %5043  ;;  %v5046_v34 = vpop.permute.xlu0 %5045  ;;  %v5633_v10 = vsel %vm1171_vm5, %v5631_v1, %v5632_v13 }
 0x7d2   : > { %v6887_v44 = vpack.i.bf16 %v5459_v14, %v5457_v26  ;;  %v5357_v43 = vsel %vm2314_vm11, %v5309_v0, %v11350_v5  ;;  %v12134_v14 = vld [vmem:[#allocation28_spill] sm:$0xff] }
 0x7d5   : > { %5698 = vrot.lane.b32.xlu0 %v5623_v56, %s6942_s18  ;;  %6878 = vrot.lane.b32.xlu1 %v6877_v2, %s6943_s19  ;;  %v12130_v56 = vld [vmem:[#allocation25_spill] sm:$0xff] }
 0x7d6   : > { %v5307_v35 = vsel %vm1784_vm9, %v12130_v56, %v11326_v15 }
 0x7d7   : > { %v11426_v39 = vsel %vm2314_vm11, %v5307_v35, %v5185_v59  ;;  %v5468_v59 = vrot.slane %v5357_v43, 1 }
 0x7d8   : > { %v5641_v63 = vrot.slane %v11426_v39, 2 }
 0x7d9   : > { %5700 = vrot.lane.b32.xlu0 %v5625_v37, %s6942_s18  ;;  %5087 = vrot.lane.b32.xlu1 %v4942_v11, %s6939_s14  ;;  %v5628_v11 = vsel %vm1171_vm5, %v5626_v38, %v5627_v12  ;;  %v12131_v37 = vld [vmem:[#allocation26_spill] sm:$0xff] }
 0x7da   : > { %v5308_v31 = vsel %vm1784_vm9, %v12131_v37, %v11324_v51 }
 0x7db   : > { %v11436_v54 = vsel %vm2314_vm11, %v5308_v31, %v5187_v4  ;;  %v12136_v31 = vld [vmem:[#allocation32_spill] sm:$0xff] }
 0x7dc   : > { %v5642_v5 = vrot.slane %v11436_v54, 2 }
 0x7dd   : > { %6883 = vrot.lane.b32.xlu0 %v6882_v50, %s6943_s19  ;;  %5702 = vrot.lane.b32.xlu1 %v5628_v11, %s6942_s18  ;;  %v5465_v50 = vrot.slane %v11426_v39, 1  ;;  %v5466_v11 = vrot.slane %v11436_v54, 1 }
 0x7df   : > { %v5469_v45 = vsel %vm994_vm4, %v5466_v11, %v5468_v59 }
 0x7e1   : > { %5085 = vrot.lane.b32.xlu0 %v11203_v25, %s6939_s14  ;;  %5704 = vrot.lane.b32.xlu1 %v5630_v58, %s6942_s18  ;;  %v5306_v25 = vsel %vm1784_vm9, %v10832_v60, %v11185_v16  ;;  %v5635_v60 = vsel %vm1171_vm5, %v5632_v13, %v5634_v30  ;;  %v5467_v58 = vsel %vm994_vm4, %v5465_v50, %v5466_v11  ;;  %v12133_v13 = vld [vmem:[#allocation30_spill] sm:$0xff]  ;;  %v5644_v30 = vrot.slane %v5357_v43, 2 }
 0x7e2   : > { %v5354_v41 = vsel %vm2314_vm11, %v5306_v25, %v11270_v62  ;;  %v5462_v62 = vsel %vm994_vm4, %v5460_v29, %v5461_v24  ;;  %v6897_v26 = vpack.i.bf16 %v5469_v45, %v5467_v58  ;;  %v5310_v9 = vsel %vm1784_vm9, %v12133_v13, %v5044_v33  ;;  %v12139_v45 = vld [vmem:[#allocation8_spill] sm:$0xff]  ;;  %v12140_v13 = vld [vmem:[#allocation7_spill] sm:$0xff] }
 0x7e3   : > { %v5463_v16 = vrot.slane %v5354_v41, 1  ;;  %v5639_v51 = vrot.slane %v5354_v41, 2  ;;  %v5643_v25 = vsel %vm1171_vm5, %v5641_v63, %v5642_v5 }
 0x7e5   : > { %5706 = vrot.lane.b32.xlu0 %v5633_v10, %s6942_s18  ;;  %6888 = vrot.lane.b32.xlu1 %v6887_v44, %s6943_s19  ;;  %v5464_v38 = vsel %vm994_vm4, %v5461_v24, %v5463_v16  ;;  %v5640_v53 = vsel %vm1171_vm5, %v5637_v61, %v5639_v51  ;;  %v5311_v44 = vsel %vm1784_vm9, %v12134_v14, %v5046_v34 }
 0x7e6   : > { %v6892_v12 = vpack.i.bf16 %v5464_v38, %v5462_v62  ;;  %v5645_v34 = vsel %vm1171_vm5, %v5642_v5, %v5644_v30 }
 0x7e7   : > { %v11417_v2 = vpop.permute.xlu1 %5053  ;;  %v5195_v28 = vpop.permute.xlu0 %5194 }
 0x7e9   : > { %5708 = vrot.lane.b32.xlu0 %v5635_v60, %s6942_s18  ;;  %5232 = vrot.lane.b32.xlu1 %v4944_v48, %s6940_s15  ;;  %v12135_v60 = vld [vmem:[#allocation29_spill] sm:$0xff] }
 0x7ea   : > { %v5312_v16 = vsel %vm1784_vm9, %v12135_v60, %v11352_v21 }
 0x7eb   : > { %v5193_v15 = vpop.permute.xlu1 %5192  ;;  %v5191_v36 = vpop.permute.xlu0 %5190  ;;  %v5360_v56 = vsel %vm2314_vm11, %v5312_v16, %v5195_v28 }
 0x7ec   : > { %v11463_v29 = vsel %vm2314_vm11, %v5311_v44, %v5193_v15  ;;  %v11466_v10 = vsel %vm2314_vm11, %v5310_v9, %v5191_v36  ;;  %v12137_v15 = vld [vmem:[#allocation31_spill] sm:$0xff]  ;;  %v5473_v28 = vrot.slane %v5360_v56, 1  ;;  %v5649_v11 = vrot.slane %v5360_v56, 2 }
 0x7ed   : > { %6893 = vrot.lane.b32.xlu0 %v6892_v12, %s6943_s19  ;;  %5710 = vrot.lane.b32.xlu1 %v5638_v18, %s6942_s18  ;;  %v5471_v33 = vrot.slane %v11463_v29, 1  ;;  %v5470_v48 = vrot.slane %v11466_v10, 1  ;;  %v5647_v35 = vrot.slane %v11463_v29, 2  ;;  %v5646_v37 = vrot.slane %v11466_v10, 2 }
 0x7ef   : > { %v5052_v22 = vpop.permute.xlu1 %5051  ;;  %v5050_v4 = vpop.permute.xlu0 %5049  ;;  %v5474_v43 = vsel %vm994_vm4, %v5471_v33, %v5473_v28  ;;  %v5648_v51 = vsel %vm1171_vm5, %v5646_v37, %v5647_v35  ;;  %v5650_v58 = vsel %vm1171_vm5, %v5647_v35, %v5649_v11 }
 0x7f0   : > { %v5314_v38 = vsel %vm1784_vm9, %v12136_v31, %v5052_v22  ;;  %v5313_v36 = vsel %vm1784_vm9, %v12137_v15, %v5050_v4  ;;  %v12142_v15 = vld [vmem:[#allocation9_spill] sm:$0xff] }
 0x7f1   : > { %5234 = vrot.lane.b32.xlu0 %v4945_v20, %s6940_s15  ;;  %5712 = vrot.lane.b32.xlu1 %v5640_v53, %s6942_s18  ;;  %v12138_v20 = vld [vmem:[#allocation33_spill] sm:$0xff] }
 0x7f2   : > { %v5315_v22 = vsel %vm1784_vm9, %v12138_v20, %v11417_v2 }
 0x7f3   : > { %v11455_v1 = vpop.permute.xlu0 %5059  ;;  %v5201_v49 = vpop.permute.xlu1 %5200 }
 0x7f4   : > { %v5363_v4 = vsel %vm2314_vm11, %v5315_v22, %v5201_v49 }
 0x7f5   : > { %5714 = vrot.lane.b32.xlu0 %v5643_v25, %s6942_s18  ;;  %6898 = vrot.lane.b32.xlu1 %v6897_v26, %s6943_s19  ;;  %v5478_v44 = vrot.slane %v5363_v4, 1  ;;  %v5654_v16 = vrot.slane %v5363_v4, 2  ;;  %v12144_v4 = vld [vmem:[#allocation34_spill] sm:$0xff] }
 0x7f7   : > { %v5199_v41 = vpop.permute.xlu0 %5198  ;;  %v5197_v24 = vpop.permute.xlu1 %5196 }
 0x7f8   : > { %v11488_v12 = vsel %vm2314_vm11, %v5314_v38, %v5199_v41  ;;  %v11491_v21 = vsel %vm2314_vm11, %v5313_v36, %v5197_v24  ;;  %v12143_v36 = vld [vmem:[#allocation10_spill] sm:$0xff] }
 0x7f9   : > { %5716 = vrot.lane.b32.xlu0 %v5645_v34, %s6942_s18  ;;  %5089 = vrot.lane.b32.xlu1 %v11317_v6, %s6939_s14  ;;  %v5472_v6 = vsel %vm994_vm4, %v5470_v48, %v5471_v33  ;;  %v5476_v50 = vrot.slane %v11488_v12, 1  ;;  %v5475_v18 = vrot.slane %v11491_v21, 1  ;;  %v5652_v59 = vrot.slane %v11488_v12, 2  ;;  %v12141_v34 = vld [vmem:[#allocation36_spill] sm:$0xff] }
 0x7fa   : > { %v5651_v5 = vrot.slane %v11491_v21, 2  ;;  %v5318_v60 = vsel %vm1784_vm9, %v12141_v34, %v11455_v1 }
 0x7fb   : > { %v5058_v62 = vpop.permute.xlu0 %5057  ;;  %v5056_v61 = vpop.permute.xlu1 %5055  ;;  %v5477_v14 = vsel %vm994_vm4, %v5475_v18, %v5476_v50  ;;  %v5479_v48 = vsel %vm994_vm4, %v5476_v50, %v5478_v44  ;;  %v5655_v37 = vsel %vm1171_vm5, %v5652_v59, %v5654_v16  ;;  %v12147_v16 = vld [vmem:[#allocation35_spill] sm:$0xff] }
 0x7fc   : > { %v5317_v26 = vsel %vm1784_vm9, %v12139_v45, %v5058_v62  ;;  %v5316_v9 = vsel %vm1784_vm9, %v12140_v13, %v5056_v61  ;;  %v5653_v33 = vsel %vm1171_vm5, %v5651_v5, %v5652_v59 }
 0x7fd   : > { %5542 = vrot.lane.b32.xlu0 %v5472_v6, %s6943_s19  ;;  %5236 = vrot.lane.b32.xlu1 %v4946_v3, %s6940_s15 }
 0x7ff   : > { %v5207_v19 = vpop.permute.xlu0 %5206  ;;  %v5066_v0 = vpop.permute.xlu1 %5065 }
 0x800   : > { %v5366_v3 = vsel %vm2314_vm11, %v5318_v60, %v5207_v19  ;;  %v5321_v59 = vsel %vm1784_vm9, %v12144_v4, %v5066_v0  ;;  %v12148_v4 = vld [vmem:[#allocation11_spill] sm:$0xff] }
 0x801   : > { %5544 = vrot.lane.b32.xlu0 %v5474_v43, %s6943_s19  ;;  %5718 = vrot.lane.b32.xlu1 %v5648_v51, %s6942_s18  ;;  %v5483_v38 = vrot.slane %v5366_v3, 1  ;;  %v5659_v22 = vrot.slane %v5366_v3, 2 }
 0x803   : > { %v5203_v63 = vpop.permute.xlu0 %5202  ;;  %v5205_v53 = vpop.permute.xlu1 %5204 }
 0x804   : > { %v11514_v2 = vsel %vm2314_vm11, %v5316_v9, %v5203_v63  ;;  %v11517_v49 = vsel %vm2314_vm11, %v5317_v26, %v5205_v53 }
 0x805   : > { %5720 = vrot.lane.b32.xlu1 %v5650_v58, %s6942_s18  ;;  %5546 = vrot.lane.b32.xlu0 %v5477_v14, %s6943_s19  ;;  %v5480_v41 = vrot.slane %v11514_v2, 1  ;;  %v5481_v24 = vrot.slane %v11517_v49, 1  ;;  %v5656_v62 = vrot.slane %v11514_v2, 2  ;;  %v5657_v61 = vrot.slane %v11517_v49, 2 }
 0x807   : > { %v5062_v25 = vpop.permute.xlu0 %5061  ;;  %v5064_v30 = vpop.permute.xlu1 %5063  ;;  %v5482_v31 = vsel %vm994_vm4, %v5480_v41, %v5481_v24  ;;  %v5658_v43 = vsel %vm1171_vm5, %v5656_v62, %v5657_v61  ;;  %v5484_v51 = vsel %vm994_vm4, %v5481_v24, %v5483_v38  ;;  %v5660_v13 = vsel %vm1171_vm5, %v5657_v61, %v5659_v22  ;;  %v12145_v41 = vld [vmem:[#allocation13_spill] sm:$0xff] }
 0x808   : > { %v5319_v1 = vsel %vm1784_vm9, %v12142_v15, %v5062_v25  ;;  %v5320_v6 = vsel %vm1784_vm9, %v12143_v36, %v5064_v30 }
 0x809   : > { %5722 = vrot.lane.b32.xlu1 %v5653_v33, %s6942_s18  ;;  %5548 = vrot.lane.b32.xlu0 %v5479_v48, %s6943_s19  ;;  %v12146_v33 = vld [vmem:[#allocation12_spill] sm:$0xff] }
 0x80b   : > { %v5072_v56 = vpop.permute.xlu0 %5071  ;;  %v5213_v35 = vpop.permute.xlu1 %5212 }
 0x80c   : > { %v5369_v63 = vsel %vm2314_vm11, %v5321_v59, %v5213_v35  ;;  %v5324_v3 = vsel %vm1784_vm9, %v12147_v16, %v5072_v56 }
 0x80d   : > { %5724 = vrot.lane.b32.xlu1 %v5655_v37, %s6942_s18  ;;  %5550 = vrot.lane.b32.xlu0 %v5482_v31, %s6943_s19  ;;  %v5488_v9 = vrot.slane %v5369_v63, 1  ;;  %v5664_v30 = vrot.slane %v5369_v63, 2 }
 0x80f   : > { %v5211_v28 = vpop.permute.xlu0 %5210  ;;  %v5209_v19 = vpop.permute.xlu1 %5208 }
 0x810   : > { %v11542_v50 = vsel %vm2314_vm11, %v5320_v6, %v5211_v28  ;;  %v11545_v18 = vsel %vm2314_vm11, %v5319_v1, %v5209_v19 }
 0x811   : > { %v5486_v11 = vrot.slane %v11542_v50, 1  ;;  %v5485_v20 = vrot.slane %v11545_v18, 1  ;;  %5726 = vrot.lane.b32.xlu1 %v5658_v43, %s6942_s18  ;;  %5552 = vrot.lane.b32.xlu0 %v5484_v51, %s6943_s19  ;;  %v5662_v45 = vrot.slane %v11542_v50, 2  ;;  %v5661_v26 = vrot.slane %v11545_v18, 2 }
 0x813   : > { %v5070_v53 = vpop.permute.xlu0 %5069  ;;  %v5068_v58 = vpop.permute.xlu1 %5067  ;;  %v5487_v5 = vsel %vm994_vm4, %v5485_v20, %v5486_v11  ;;  %v5663_v0 = vsel %vm1171_vm5, %v5661_v26, %v5662_v45  ;;  %v5489_v25 = vsel %vm994_vm4, %v5486_v11, %v5488_v9  ;;  %v5665_v61 = vsel %vm1171_vm5, %v5662_v45, %v5664_v30 }
 0x814   : > { %v5323_v24 = vsel %vm1784_vm9, %v12145_v41, %v5070_v53  ;;  %v5322_v48 = vsel %vm1784_vm9, %v12146_v33, %v5068_v58  ;;  %v12149_v53 = vld [vmem:[#allocation17_spill] sm:$0xff] }
 0x815   : > { %5728 = vrot.lane.b32.xlu1 %v5660_v13, %s6942_s18  ;;  %5554 = vrot.lane.b32.xlu0 %v5487_v5, %s6943_s19  ;;  %v12150_v5 = vld [vmem:[#allocation15_spill] sm:$0xff] }
 0x817   : > { %v5219_v14 = vpop.permute.xlu0 %5218  ;;  %v5078_v44 = vpop.permute.xlu1 %5077 }
 0x818   : > { %v5372_v56 = vsel %vm2314_vm11, %v5324_v3, %v5219_v14  ;;  %v5327_v58 = vsel %vm1784_vm9, %v12149_v53, %v5078_v44 }
 0x819   : > { %5730 = vrot.lane.b32.xlu1 %v5663_v0, %s6942_s18  ;;  %5556 = vrot.lane.b32.xlu0 %v5489_v25, %s6943_s19  ;;  %v5493_v19 = vrot.slane %v5372_v56, 1  ;;  %v5669_v43 = vrot.slane %v5372_v56, 2 }
 0x81b   : > { %v5215_v34 = vpop.permute.xlu0 %5214  ;;  %v5217_v60 = vpop.permute.xlu1 %5216 }
 0x81c   : > { %v11573_v35 = vsel %vm2314_vm11, %v5322_v48, %v5215_v34  ;;  %v11576_v62 = vsel %vm2314_vm11, %v5323_v24, %v5217_v60 }
 0x81d   : > { %v5490_v37 = vrot.slane %v11573_v35, 1  ;;  %v5666_v31 = vrot.slane %v11573_v35, 2  ;;  %v5491_v38 = vrot.slane %v11576_v62, 1  ;;  %v5667_v15 = vrot.slane %v11576_v62, 2  ;;  %5732 = vrot.lane.b32.xlu1 %v5665_v61, %s6942_s18 }
 0x81f   : > { %v5074_v1 = vpop.permute.xlu0 %5073  ;;  %v5076_v36 = vpop.permute.xlu1 %5075  ;;  %v5492_v6 = vsel %vm994_vm4, %v5490_v37, %v5491_v38  ;;  %v5668_v28 = vsel %vm1171_vm5, %v5666_v31, %v5667_v15  ;;  %v5494_v20 = vsel %vm994_vm4, %v5491_v38, %v5493_v19  ;;  %v5670_v22 = vsel %vm1171_vm5, %v5667_v15, %v5669_v43  ;;  %v12151_v15 = vld [vmem:[#allocation20_spill] sm:$0xff]  ;;  %v12153_v43 = vld [vmem:[#allocation21_spill] sm:$0xff] }
 0x820   : > { %5558 = vrot.lane.b32.xlu0 %v5492_v6, %s6943_s19  ;;  %v5326_v59 = vsel %vm1784_vm9, %v12148_v4, %v5076_v36  ;;  %v5325_v45 = vsel %vm1784_vm9, %v12150_v5, %v5074_v1  ;;  %v12154_v5 = vld [vmem:[#allocation24_spill] sm:$0xff] }
 0x821   : > { %5734 = vrot.lane.b32.xlu1 %v5668_v28, %s6942_s18  ;;  %v12152_v28 = vld [vmem:[#allocation16_spill] sm:$0xff] }
 0x823   : > { %v5223_v51 = vpop.permute.xlu0 %5222  ;;  %v5225_v11 = vpop.permute.xlu1 %5224 }
 0x824   : > { %5560 = vrot.lane.b32.xlu0 %v5494_v20, %s6943_s19  ;;  %v11596_v63 = vsel %vm2314_vm11, %v5326_v59, %v5223_v51  ;;  %v5375_v9 = vsel %vm2314_vm11, %v5327_v58, %v5225_v11 }
 0x825   : > { %5736 = vrot.lane.b32.xlu1 %v5670_v22, %s6942_s18  ;;  %v5496_v0 = vrot.slane %v11596_v63, 1  ;;  %v5672_v25 = vrot.slane %v11596_v63, 2  ;;  %v5674_v24 = vrot.slane %v5375_v9, 2  ;;  %v5498_v60 = vrot.slane %v5375_v9, 1 }
 0x827   : > { %v5082_v26 = vpop.permute.xlu0 %5081  ;;  %v5221_v13 = vpop.permute.xlu1 %5220  ;;  %v5675_v61 = vsel %vm1171_vm5, %v5672_v25, %v5674_v24  ;;  %v5499_v38 = vsel %vm994_vm4, %v5496_v0, %v5498_v60 }
 0x828   : > { %v11604_v14 = vsel %vm2314_vm11, %v5325_v45, %v5221_v13  ;;  %v5329_v45 = vsel %vm1784_vm9, %v12154_v5, %v5082_v26 }
 0x829   : > { %v5495_v30 = vrot.slane %v11604_v14, 1  ;;  %v5671_v41 = vrot.slane %v11604_v14, 2 }
 0x82b   : > { %v5227_v44 = vpop.permute.xlu0 %5226  ;;  %v5080_v33 = vpop.permute.xlu1 %5079  ;;  %v5673_v48 = vsel %vm1171_vm5, %v5671_v41, %v5672_v25  ;;  %v5497_v34 = vsel %vm994_vm4, %v5495_v30, %v5496_v0 }
 0x82c   : > { %5738 = vrot.lane.b32.xlu1 %v5673_v48, %s6942_s18  ;;  %5562 = vrot.lane.b32.xlu0 %v5497_v34, %s6943_s19  ;;  %v5328_v51 = vsel %vm1784_vm9, %v12153_v43, %v5080_v33 }
 0x82d   : > { %v11630_v53 = vsel %vm2314_vm11, %v5328_v51, %v5227_v44 }
 0x82e   : > { %v5500_v41 = vrot.slane %v11630_v53, 1  ;;  %v5676_v24 = vrot.slane %v11630_v53, 2 }
 0x82f   : > { %v6864_v16 = vpop.permute.xlu0 %6863  ;;  %v5687_v3 = vpop.permute.xlu1 %5686 }
 0x830   : > { %v6866_v37 = vunpack.i.h.bf16 %v6864_v16  ;;  %v6865_v31 = vunpack.i.l.bf16 %v6864_v16  ;;  %6390 = vmatprep.mubr.msk.f32.mxu0 %vm1784_vm9, %v5687_v3  ;;  %5740 = vrot.lane.b32.xlu1 %v5675_v61, %s6942_s18  ;;  %v12155_v61 = vld [vmem:[#allocation18_spill] sm:$0xff] }
 0x831   : > { %5564 = vrot.lane.b32.xlu0 %v5499_v38, %s6943_s19 }
 0x832   : > { %v5782_v56 = vsel %vm2763_vm13, %v12151_v15, %v6865_v31  ;;  %v5783_v19 = vsel %vm2763_vm13, %v12152_v28, %v6866_v37 }
 0x833   : > { %v5814_v1 = vsel %vm2796_vm12, %v5782_v56, %v5687_v3  ;;  %v5084_v36 = vpop.permute.xlu0 %5083  ;;  %v5689_v6 = vpop.permute.xlu1 %5688 }
 0x834   : > { %6000 = vmatmul.mubr.f32.vlgmr.msra.gmra.mrb[72].mxu0 %v5814_v1  ;;  %v5815_v22 = vsel %vm2796_vm12, %v5783_v19, %v5689_v6  ;;  %v5330_v37 = vsel %vm1784_vm9, %v12155_v61, %v5084_v36 }
 0x835   : > { %6391 = vmatprep.mubr.msk.f32.mxu0 %vm1784_vm9, %v5689_v6 }
 0x837   : > { %v5691_v11 = vpop.permute.xlu0 %5690  ;;  %v6869_v20 = vpop.permute.xlu1 %6868 }
 0x838   : > { %v6871_v4 = vunpack.i.h.bf16 %v6869_v20  ;;  %v6870_v59 = vunpack.i.l.bf16 %v6869_v20  ;;  %6005 = vmatmul.mubr.f32.gmra.mrb[74].mxu0 %v5815_v22 }
 0x839   : > { %6392 = vmatprep.mubr.msk.f32.mxu0 %vm1784_vm9, %v5691_v11 }
 0x83a   : > { %v5784_v58 = vsel %vm2763_vm13, %v11208_v40, %v6870_v59  ;;  %v5785_v30 = vsel %vm2763_vm13, %v11225_v17, %v6871_v4 }
 0x83b   : > { %v5693_v13 = vpop.permute.xlu0 %5692  ;;  %v5229_v9 = vpop.permute.xlu1 %5228  ;;  %v5816_v0 = vsel %vm2796_vm12, %v5784_v58, %v5691_v11 }
 0x83c   : > { %v11638_v25 = vsel %vm2314_vm11, %v5329_v45, %v5229_v9  ;;  %6010 = vmatmul.mubr.f32.gmra.mrb[76].mxu0 %v5816_v0  ;;  %v5817_v48 = vsel %vm2796_vm12, %v5785_v30, %v5693_v13 }
 0x83d   : > { %v5501_v40 = vrot.slane %v11638_v25, 1  ;;  %v5677_v44 = vrot.slane %v11638_v25, 2  ;;  %6393 = vmatprep.mubr.msk.f32.mxu0 %vm1784_vm9, %v5693_v13 }
 0x83f   : > { %v6874_v26 = vpop.permute.xlu0 %6873  ;;  %v5695_v33 = vpop.permute.xlu1 %5694  ;;  %v5678_v34 = vsel %vm1171_vm5, %v5676_v24, %v5677_v44  ;;  %v5502_v60 = vsel %vm994_vm4, %v5500_v41, %v5501_v40 }
 0x840   : > { %v6876_v16 = vunpack.i.h.bf16 %v6874_v26  ;;  %v6875_v17 = vunpack.i.l.bf16 %v6874_v26  ;;  %6015 = vmatmul.mubr.f32.gmra.mrb[78].mxu0 %v5817_v48  ;;  %5742 = vrot.lane.b32.xlu1 %v5678_v34, %s6942_s18 }
 0x841   : > { %5566 = vrot.lane.b32.xlu0 %v5502_v60, %s6943_s19  ;;  %6394 = vmatprep.mubr.msk.f32.mxu0 %vm1784_vm9, %v5695_v33 }
 0x842   : > { %v5786_v3 = vsel %vm2763_vm13, %v11249_v57, %v6875_v17  ;;  %v5787_v1 = vsel %vm2763_vm13, %v11261_v52, %v6876_v16 }
 0x843   : > { %v5231_v31 = vpop.permute.xlu0 %5230  ;;  %v5697_v38 = vpop.permute.xlu1 %5696  ;;  %v5818_v15 = vsel %vm2796_vm12, %v5786_v3, %v5695_v33 }
 0x844   : > { %v5378_v56 = vsel %vm2314_vm11, %v5330_v37, %v5231_v31  ;;  %6020 = vmatmul.mubr.f32.gmra.mrb[80].mxu0 %v5818_v15  ;;  %v5819_v57 = vsel %vm2796_vm12, %v5787_v1, %v5697_v38 }
 0x845   : > { %v5503_v6 = vrot.slane %v5378_v56, 1  ;;  %v5679_v28 = vrot.slane %v5378_v56, 2  ;;  %6395 = vmatprep.mubr.msk.f32.mxu0 %vm1784_vm9, %v5697_v38  ;;  %v12156_v38 = vld [vmem:[#allocation23_spill] sm:$0xff]  ;;  %v12157_v56 = vld [vmem:[#allocation14_spill] sm:$0xff] }
 0x847   : > { %v5699_v19 = vpop.permute.xlu0 %5698  ;;  %v6879_v43 = vpop.permute.xlu1 %6878  ;;  %v5680_v36 = vsel %vm1171_vm5, %v5677_v44, %v5679_v28  ;;  %v5504_v51 = vsel %vm994_vm4, %v5501_v40, %v5503_v6 }
 0x848   : > { %v6881_v11 = vunpack.i.h.bf16 %v6879_v43  ;;  %v6880_v20 = vunpack.i.l.bf16 %v6879_v43  ;;  %6025 = vmatmul.mubr.f32.gmra.mrb[82].mxu0 %v5819_v57  ;;  %5744 = vrot.lane.b32.xlu1 %v5680_v36, %s6942_s18 }
 0x849   : > { %5568 = vrot.lane.b32.xlu0 %v5504_v51, %s6943_s19  ;;  %6396 = vmatprep.mubr.msk.f32.mxu0 %vm1784_vm9, %v5699_v19 }
 0x84a   : > { %v5788_v52 = vsel %vm2763_vm13, %v11285_v23, %v6880_v20  ;;  %v5789_v58 = vsel %vm2763_vm13, %v11296_v55, %v6881_v11 }
 0x84b   : > { %v5701_v22 = vpop.permute.xlu0 %5700  ;;  %v5088_v4 = vpop.permute.xlu1 %5087  ;;  %v5820_v59 = vsel %vm2796_vm12, %v5788_v52, %v5699_v19 }
 0x84c   : > { %6030 = vmatmul.mubr.f32.gmra.mrb[84].mxu0 %v5820_v59  ;;  %v5821_v13 = vsel %vm2796_vm12, %v5789_v58, %v5701_v22  ;;  %v5332_v1 = vsel %vm1784_vm9, %v12157_v56, %v5088_v4 }
 0x84d   : > { %6397 = vmatprep.mubr.msk.f32.mxu0 %vm1784_vm9, %v5701_v22 }
 0x84f   : > { %v6884_v5 = vpop.permute.xlu0 %6883  ;;  %v5703_v45 = vpop.permute.xlu1 %5702 }
 0x850   : > { %v6886_v9 = vunpack.i.h.bf16 %v6884_v5  ;;  %v6885_v0 = vunpack.i.l.bf16 %v6884_v5  ;;  %6035 = vmatmul.mubr.f32.gmra.mrb[86].mxu0 %v5821_v13 }
 0x851   : > { %6398 = vmatprep.mubr.msk.f32.mxu0 %vm1784_vm9, %v5703_v45 }
 0x852   : > { %v5790_v23 = vsel %vm2763_vm13, %v11322_v8, %v6885_v0  ;;  %v5791_v55 = vsel %vm2763_vm13, %v11338_v42, %v6886_v9 }
 0x853   : > { %v5086_v30 = vpop.permute.xlu0 %5085  ;;  %v5705_v41 = vpop.permute.xlu1 %5704  ;;  %v5822_v24 = vsel %vm2796_vm12, %v5790_v23, %v5703_v45 }
 0x854   : > { %6040 = vmatmul.mubr.f32.gmra.mrb[88].mxu0 %v5822_v24  ;;  %v5823_v26 = vsel %vm2796_vm12, %v5791_v55, %v5705_v41 }
 0x855   : > { %6399 = vmatprep.mubr.msk.f32.mxu0 %vm1784_vm9, %v5705_v41 }
 0x857   : > { %v5707_v40 = vpop.permute.xlu0 %5706  ;;  %v6889_v44 = vpop.permute.xlu1 %6888 }
 0x858   : > { %v6891_v33 = vunpack.i.h.bf16 %v6889_v44  ;;  %v6890_v48 = vunpack.i.l.bf16 %v6889_v44  ;;  %6045 = vmatmul.mubr.f32.gmra.mrb[90].mxu0 %v5823_v26 }
 0x859   : > { %6400 = vmatprep.mubr.msk.f32.mxu0 %vm1784_vm9, %v5707_v40 }
 0x85a   : > { %v5792_v8 = vsel %vm2763_vm13, %v11362_v32, %v6890_v48  ;;  %v5793_v42 = vsel %vm2763_vm13, %v11373_v7, %v6891_v33  ;;  %v5331_v32 = vsel %vm1784_vm9, %v12156_v38, %v5086_v30 }
 0x85b   : > { %v5709_v34 = vpop.permute.xlu0 %5708  ;;  %v5233_v60 = vpop.permute.xlu1 %5232  ;;  %v5824_v16 = vsel %vm2796_vm12, %v5792_v8, %v5707_v40 }
 0x85c   : > { %6050 = vmatmul.mubr.f32.gmra.mrb[92].mxu0 %v5824_v16  ;;  %v5825_v61 = vsel %vm2796_vm12, %v5793_v42, %v5709_v34  ;;  %v11695_v15 = vsel %vm2314_vm11, %v5331_v32, %v5233_v60 }
 0x85d   : > { %6401 = vmatprep.mubr.msk.f32.mxu0 %vm1784_vm9, %v5709_v34  ;;  %v5505_v36 = vrot.slane %v11695_v15, 1  ;;  %v5681_v51 = vrot.slane %v11695_v15, 2 }
 0x85f   : > { %v6894_v17 = vpop.permute.xlu0 %6893  ;;  %v5711_v3 = vpop.permute.xlu1 %5710 }
 0x860   : > { %v6896_v37 = vunpack.i.h.bf16 %v6894_v17  ;;  %v6895_v31 = vunpack.i.l.bf16 %v6894_v17  ;;  %6055 = vmatmul.mubr.f32.gmra.mrb[94].mxu0 %v5825_v61 }
 0x861   : > { %6402 = vmatprep.mubr.msk.f32.mxu0 %vm1784_vm9, %v5711_v3 }
 0x862   : > { %v5794_v7 = vsel %vm2763_vm13, %v11393_v47, %v6895_v31  ;;  %v5795_v57 = vsel %vm2763_vm13, %v11405_v27, %v6896_v37 }
 0x863   : > { %v5235_v6 = vpop.permute.xlu0 %5234  ;;  %v5713_v28 = vpop.permute.xlu1 %5712  ;;  %v5826_v19 = vsel %vm2796_vm12, %v5794_v7, %v5711_v3 }
 0x864   : > { %v11703_v43 = vsel %vm2314_vm11, %v5332_v1, %v5235_v6  ;;  %6060 = vmatmul.mubr.f32.gmra.mrb[96].mxu0 %v5826_v19  ;;  %v5827_v22 = vsel %vm2796_vm12, %v5795_v57, %v5713_v28 }
 0x865   : > { %v5506_v47 = vrot.slane %v11703_v43, 1  ;;  %v5682_v11 = vrot.slane %v11703_v43, 2  ;;  %6403 = vmatprep.mubr.msk.f32.mxu0 %vm1784_vm9, %v5713_v28 }
 0x867   : > { %v5715_v20 = vpop.permute.xlu0 %5714  ;;  %v6899_v52 = vpop.permute.xlu1 %6898  ;;  %v5683_v4 = vsel %vm1171_vm5, %v5681_v51, %v5682_v11  ;;  %v5507_v59 = vsel %vm994_vm4, %v5505_v36, %v5506_v47 }
 0x868   : > { %v6901_v58 = vunpack.i.h.bf16 %v6899_v52  ;;  %v6900_v27 = vunpack.i.l.bf16 %v6899_v52  ;;  %6065 = vmatmul.mubr.f32.gmra.mrb[98].mxu0 %v5827_v22  ;;  %5746 = vrot.lane.b32.xlu1 %v5683_v4, %s6942_s18 }
 0x869   : > { %5570 = vrot.lane.b32.xlu0 %v5507_v59, %s6943_s19  ;;  %6404 = vmatprep.mubr.msk.f32.mxu0 %vm1784_vm9, %v5715_v20 }
 0x86a   : > { %v5796_v5 = vsel %vm2763_vm13, %v11426_v39, %v6900_v27  ;;  %v5797_v0 = vsel %vm2763_vm13, %v11436_v54, %v6901_v58 }
 0x86b   : > { %v5717_v45 = vpop.permute.xlu0 %5716  ;;  %v5090_v13 = vpop.permute.xlu1 %5089  ;;  %v5828_v9 = vsel %vm2796_vm12, %v5796_v5, %v5715_v20 }
 0x86c   : > { %6070 = vmatmul.mubr.f32.gmra.mrb[100].mxu0 %v5828_v9  ;;  %v5333_v23 = vsel %vm1784_vm9, %v11167_v46, %v5090_v13  ;;  %v5829_v24 = vsel %vm2796_vm12, %v5797_v0, %v5717_v45 }
 0x86d   : > { %6405 = vmatprep.mubr.msk.f32.mxu0 %vm1784_vm9, %v5717_v45 }
 0x86f   : > { %v5543_v30 = vpop.permute.xlu0 %5542  ;;  %v5237_v41 = vpop.permute.xlu1 %5236 }
 0x870   : > { %v5381_v55 = vsel %vm2314_vm11, %v5333_v23, %v5237_v41  ;;  %6075 = vmatmul.mubr.f32.gmra.mrb[102].mxu0 %v5829_v24  ;;  %v5798_v44 = vsel %vm2763_vm13, %v11466_v10, %v5543_v30 }
 0x871   : > { %v5508_v39 = vrot.slane %v5381_v55, 1  ;;  %v5684_v40 = vrot.slane %v5381_v55, 2 }
 0x873   : > { %v5545_v26 = vpop.permute.xlu0 %5544  ;;  %v5719_v33 = vpop.permute.xlu1 %5718  ;;  %v5685_v54 = vsel %vm1171_vm5, %v5682_v11, %v5684_v40  ;;  %v5509_v48 = vsel %vm994_vm4, %v5506_v47, %v5508_v39 }
 0x874   : > { %6406 = vmatprep.mubr.msk.f32.mxu0 %vm1784_vm9, %v5719_v33  ;;  %5748 = vrot.lane.b32.xlu1 %v5685_v54, %s6942_s18  ;;  %v5830_v46 = vsel %vm2796_vm12, %v5798_v44, %v5719_v33  ;;  %v5799_v8 = vsel %vm2763_vm13, %v11463_v29, %v5545_v26  ;;  %v11796_v54 = vld [vmem:[#allocation6] ss:$0 sm:$0xff]  ;;  %s11804_s18 = scalar_lea.vmem %s11913_s9, %s6424_s13 }
 0x875   : > { %5572 = vrot.lane.b32.xlu0 %v5509_v48, %s6943_s19  ;;  %6080 = vmatmul.mubr.f32.gmra.mrb[104].mxu0 %v5830_v46 }
 0x877   : > { %v5547_v34 = vpop.permute.xlu0 %5546  ;;  %v5721_v10 = vpop.permute.xlu1 %5720 }
 0x878   : > { %6407 = vmatprep.mubr.msk.f32.mxu0 %vm1784_vm9, %v5721_v10  ;;  %v5831_v60 = vsel %vm2796_vm12, %v5799_v8, %v5721_v10  ;;  %v5800_v16 = vsel %vm2763_vm13, %v11491_v21, %v5547_v34 }
 0x879   : > { %6085 = vmatmul.mubr.f32.gmra.mrb[106].mxu0 %v5831_v60 }
 0x87b   : > { %v5549_v42 = vpop.permute.xlu0 %5548  ;;  %v5723_v17 = vpop.permute.xlu1 %5722 }
 0x87c   : > { %6408 = vmatprep.mubr.msk.f32.mxu0 %vm1784_vm9, %v5723_v17  ;;  %v5832_v3 = vsel %vm2796_vm12, %v5800_v16, %v5723_v17  ;;  %v5801_v29 = vsel %vm2763_vm13, %v11488_v12, %v5549_v42 }
 0x87d   : > { %6090 = vmatmul.mubr.f32.gmra.mrb[108].mxu0 %v5832_v3 }
 0x87f   : > { %v5551_v61 = vpop.permute.xlu0 %5550  ;;  %v5725_v37 = vpop.permute.xlu1 %5724 }
 0x880   : > { %6409 = vmatprep.mubr.msk.f32.mxu0 %vm1784_vm9, %v5725_v37  ;;  %v5833_v31 = vsel %vm2796_vm12, %v5801_v29, %v5725_v37  ;;  %v5802_v21 = vsel %vm2763_vm13, %v11514_v2, %v5551_v61 }
 0x881   : > { %6095 = vmatmul.mubr.f32.gmra.mrb[110].mxu0 %v5833_v31 }
 0x883   : > { %v5553_v38 = vpop.permute.xlu0 %5552  ;;  %v5727_v32 = vpop.permute.xlu1 %5726 }
 0x884   : > { %6410 = vmatprep.mubr.msk.f32.mxu0 %vm1784_vm9, %v5727_v32  ;;  %v5834_v7 = vsel %vm2796_vm12, %v5802_v21, %v5727_v32  ;;  %v5803_v12 = vsel %vm2763_vm13, %v11517_v49, %v5553_v38 }
 0x885   : > { %6100 = vmatmul.mubr.f32.gmra.mrb[112].mxu0 %v5834_v7 }
 0x887   : > { %v5729_v56 = vpop.permute.xlu1 %5728  ;;  %v5555_v1 = vpop.permute.xlu0 %5554 }
 0x888   : > { %6411 = vmatprep.mubr.msk.f32.mxu0 %vm1784_vm9, %v5729_v56  ;;  %v5835_v6 = vsel %vm2796_vm12, %v5803_v12, %v5729_v56  ;;  %v5804_v2 = vsel %vm2763_vm13, %v11545_v18, %v5555_v1 }
 0x889   : > { %6105 = vmatmul.mubr.f32.gmra.mrb[114].mxu0 %v5835_v6 }
 0x88b   : > { %v5731_v28 = vpop.permute.xlu1 %5730  ;;  %v5557_v19 = vpop.permute.xlu0 %5556 }
 0x88c   : > { %6412 = vmatprep.mubr.msk.f32.mxu0 %vm1784_vm9, %v5731_v28  ;;  %v5836_v57 = vsel %vm2796_vm12, %v5804_v2, %v5731_v28  ;;  %v5805_v49 = vsel %vm2763_vm13, %v11542_v50, %v5557_v19 }
 0x88d   : > { %6110 = vmatmul.mubr.f32.gmra.mrb[116].mxu0 %v5836_v57 }
 0x88f   : > { %v5733_v36 = vpop.permute.xlu1 %5732 }
 0x890   : > { %6413 = vmatprep.mubr.msk.f32.mxu0 %vm1784_vm9, %v5733_v36  ;;  %v5837_v51 = vsel %vm2796_vm12, %v5805_v49, %v5733_v36 }
 0x891   : > { %6115 = vmatmul.mubr.f32.gmra.mrb[118].mxu0 %v5837_v51 }
 0x892   : > { %v5559_v47 = vpop.permute.xlu0 %5558 }
 0x893   : > { %v5806_v18 = vsel %vm2763_vm13, %v11573_v35, %v5559_v47  ;;  %v5735_v11 = vpop.permute.xlu1 %5734 }
 0x894   : > { %6414 = vmatprep.mubr.msk.f32.mxu0 %vm1784_vm9, %v5735_v11  ;;  %v5838_v20 = vsel %vm2796_vm12, %v5806_v18, %v5735_v11 }
 0x895   : > { %6120 = vmatmul.mubr.f32.gmra.mrb[120].mxu0 %v5838_v20 }
 0x896   : > { %v5561_v52 = vpop.permute.xlu0 %5560 }
 0x897   : > { %v5807_v50 = vsel %vm2763_vm13, %v11576_v62, %v5561_v52  ;;  %v5737_v22 = vpop.permute.xlu1 %5736 }
 0x898   : > { %6415 = vmatprep.mubr.msk.f32.mxu0 %vm1784_vm9, %v5737_v22  ;;  %v5839_v4 = vsel %vm2796_vm12, %v5807_v50, %v5737_v22 }
 0x899   : > { %6125 = vmatmul.mubr.f32.gmra.mrb[122].mxu0 %v5839_v4 }
 0x89e   : > { %v5739_v59 = vpop.permute.xlu1 %5738  ;;  %v5563_v58 = vpop.permute.xlu0 %5562 }
 0x89f   : > { %v5808_v35 = vsel %vm2763_vm13, %v11604_v14, %v5563_v58  ;;  %6416 = vmatprep.mubr.msk.f32.mxu0 %vm1784_vm9, %v5739_v59 }
 0x8a0   : > { %v5840_v27 = vsel %vm2796_vm12, %v5808_v35, %v5739_v59 }
 0x8a1   : > { %6130 = vmatmul.mubr.f32.gmra.mrb[124].mxu0 %v5840_v27 }
 0x8a2   : > { %v5741_v5 = vpop.permute.xlu1 %5740 }
 0x8a3   : > { %v5565_v45 = vpop.permute.xlu0 %5564  ;;  %6417 = vmatprep.mubr.msk.f32.mxu0 %vm1784_vm9, %v5741_v5 }
 0x8a4   : > { %v5809_v62 = vsel %vm2763_vm13, %v11596_v63, %v5565_v45 }
 0x8a5   : > { %v5841_v13 = vsel %vm2796_vm12, %v5809_v62, %v5741_v5 }
 0x8a6   : > { %6135 = vmatmul.mubr.f32.gmra.mrb[126].mxu0 %v5841_v13 }
 0x8b2   : > { %v5743_v9 = vpop.permute.xlu1 %5742 }
 0x8b3   : > { %v5567_v0 = vpop.permute.xlu0 %5566  ;;  %6418 = vmatprep.mubr.msk.f32.mxu0 %vm1784_vm9, %v5743_v9 }
 0x8b4   : > { %v5810_v14 = vsel %vm2763_vm13, %v11630_v53, %v5567_v0 }
 0x8b5   : > { %v5842_v23 = vsel %vm2796_vm12, %v5810_v14, %v5743_v9 }
 0x8b6   : > { %6140 = vmatmul.mubr.f32.gmra.mrb[128].mxu0 %v5842_v23 }
 0x8ba   : > { %v5745_v30 = vpop.permute.xlu1 %5744 }
 0x8bb   : > { %v5569_v41 = vpop.permute.xlu0 %5568  ;;  %6419 = vmatprep.mubr.msk.f32.mxu0 %vm1784_vm9, %v5745_v30 }
 0x8bc   : > { %v5811_v63 = vsel %vm2763_vm13, %v11638_v25, %v5569_v41 }
 0x8bd   : > { %v5843_v24 = vsel %vm2796_vm12, %v5811_v63, %v5745_v30 }
 0x8be   : > { %6145 = vmatmul.mubr.f32.gmra.mrb[130].mxu0 %v5843_v24 }
 0x8da   : > { %v5747_v55 = vpop.permute.xlu1 %5746 }
 0x8db   : > { %v5571_v39 = vpop.permute.xlu0 %5570  ;;  %6420 = vmatprep.mubr.msk.f32.mxu0 %vm1784_vm9, %v5747_v55 }
 0x8dc   : > { %v5812_v53 = vsel %vm2763_vm13, %v11695_v15, %v5571_v39 }
 0x8dd   : > { %v5844_v40 = vsel %vm2796_vm12, %v5812_v53, %v5747_v55 }
 0x8de   : > { %6150 = vmatmul.mubr.f32.gmra.mrb[132].mxu0 %v5844_v40 }
 0x8e6   : > { %v5749_v44 = vpop.permute.xlu1 %5748 }
 0x8e7   : > { %v5573_v26 = vpop.permute.xlu0 %5572  ;;  %6421 = vmatprep.mubr.msk.f32.mxu0 %vm1784_vm9, %v5749_v44 }
 0x8e8   : > { %v5813_v25 = vsel %vm2763_vm13, %v11703_v43, %v5573_v26 }
 0x8e9   : > { %v5845_v33 = vsel %vm2796_vm12, %v5813_v25, %v5749_v44 }
 0x8ea   : > { %6155 = vmatmul.mubr.f32.gmra.mrb[134].mxu0 %v5845_v33 }
 0x907   : > { %v6001_v48 = vpop.f32.mrb[72].mxu0 }
 0x908   : > { %v6002_v46 = vadd.f32 %v11796_v54, %v6001_v48  ;;  %v6003_v8 = vpop.f32.mrb[73].mxu0 }
 0x90a   : > { %v6160_v15 = vmax.f32 %v6002_v46, 0.0 }
 0x90b   : > { %v6006_v43 = vpop.f32.mrb[74].mxu0 }
 0x90c   : > { %6193 = vst.msk [vmem:[%s11804_s18] sm:$0xff] %vm6192_vm0, %v6160_v15  ;;  %v6007_v34 = vadd.f32 %v11796_v54, %v6006_v43  ;;  %v6008_v10 = vpop.f32.mrb[75].mxu0 }
 0x90e   : > { %v6161_v60 = vmax.f32 %v6007_v34, 0.0 }
 0x90f   : > { %v6011_v16 = vpop.f32.mrb[76].mxu0 }
 0x910   : > { %6194 = vst.msk [vmem:[%s11804_s18 + $0x8] sm:$0xff] %vm6192_vm0, %v6161_v60  ;;  %v6012_v42 = vadd.f32 %v11796_v54, %v6011_v16  ;;  %v6013_v17 = vpop.f32.mrb[77].mxu0 }
 0x912   : > { %v6162_v3 = vmax.f32 %v6012_v42, 0.0 }
 0x913   : > { %v6016_v29 = vpop.f32.mrb[78].mxu0 }
 0x914   : > { %6195 = vst.msk [vmem:[%s11804_s18 + $0x10] sm:$0xff] %vm6192_vm0, %v6162_v3  ;;  %v6017_v61 = vadd.f32 %v11796_v54, %v6016_v29  ;;  %v6018_v37 = vpop.f32.mrb[79].mxu0 }
 0x916   : > { %v6163_v31 = vmax.f32 %v6017_v61, 0.0 }
 0x917   : > { %v6021_v21 = vpop.f32.mrb[80].mxu0 }
 0x918   : > { %6196 = vst.msk [vmem:[%s11804_s18 + $0x18] sm:$0xff] %vm6192_vm0, %v6163_v31  ;;  %v6022_v38 = vadd.f32 %v11796_v54, %v6021_v21  ;;  %v6023_v32 = vpop.f32.mrb[81].mxu0 }
 0x91a   : > { %v6164_v7 = vmax.f32 %v6022_v38, 0.0 }
 0x91b   : > { %v6026_v12 = vpop.f32.mrb[82].mxu0 }
 0x91c   : > { %6197 = vst.msk [vmem:[%s11804_s18 + $0x20] sm:$0xff] %vm6192_vm0, %v6164_v7  ;;  %v6027_v56 = vadd.f32 %v11796_v54, %v6026_v12  ;;  %v6028_v1 = vpop.f32.mrb[83].mxu0 }
 0x91e   : > { %v6165_v6 = vmax.f32 %v6027_v56, 0.0 }
 0x91f   : > { %v6031_v2 = vpop.f32.mrb[84].mxu0 }
 0x920   : > { %6198 = vst.msk [vmem:[%s11804_s18 + $0x28] sm:$0xff] %vm6192_vm0, %v6165_v6  ;;  %v6032_v28 = vadd.f32 %v11796_v54, %v6031_v2  ;;  %v6033_v19 = vpop.f32.mrb[85].mxu0 }
 0x922   : > { %v6166_v57 = vmax.f32 %v6032_v28, 0.0 }
 0x923   : > { %v6036_v49 = vpop.f32.mrb[86].mxu0 }
 0x924   : > { %6199 = vst.msk [vmem:[%s11804_s18 + $0x30] sm:$0xff] %vm6192_vm0, %v6166_v57  ;;  %v6037_v36 = vadd.f32 %v11796_v54, %v6036_v49  ;;  %v6038_v51 = vpop.f32.mrb[87].mxu0 }
 0x926   : > { %v6167_v47 = vmax.f32 %v6037_v36, 0.0 }
 0x927   : > { %v6041_v18 = vpop.f32.mrb[88].mxu0 }
 0x928   : > { %6200 = vst.msk [vmem:[%s11804_s18 + $0x38] sm:$0xff] %vm6192_vm0, %v6167_v47  ;;  %v6042_v11 = vadd.f32 %v11796_v54, %v6041_v18  ;;  %v6043_v20 = vpop.f32.mrb[89].mxu0 }
 0x92a   : > { %v6168_v52 = vmax.f32 %v6042_v11, 0.0 }
 0x92b   : > { %v6046_v50 = vpop.f32.mrb[90].mxu0 }
 0x92c   : > { %6201 = vst.msk [vmem:[%s11804_s18 + $0x40] sm:$0xff] %vm6192_vm0, %v6168_v52  ;;  %v6047_v22 = vadd.f32 %v11796_v54, %v6046_v50  ;;  %v6048_v4 = vpop.f32.mrb[91].mxu0 }
 0x92e   : > { %v6169_v59 = vmax.f32 %v6047_v22, 0.0 }
 0x92f   : > { %v6051_v58 = vpop.f32.mrb[92].mxu0 }
 0x930   : > { %6202 = vst.msk [vmem:[%s11804_s18 + $0x48] sm:$0xff] %vm6192_vm0, %v6169_v59  ;;  %v6052_v35 = vadd.f32 %v11796_v54, %v6051_v58  ;;  %v6053_v27 = vpop.f32.mrb[93].mxu0 }
 0x932   : > { %v6170_v5 = vmax.f32 %v6052_v35, 0.0 }
 0x933   : > { %v6056_v45 = vpop.f32.mrb[94].mxu0 }
 0x934   : > { %6203 = vst.msk [vmem:[%s11804_s18 + $0x50] sm:$0xff] %vm6192_vm0, %v6170_v5  ;;  %v6057_v62 = vadd.f32 %v11796_v54, %v6056_v45  ;;  %v6058_v13 = vpop.f32.mrb[95].mxu0 }
 0x936   : > { %v6171_v9 = vmax.f32 %v6057_v62, 0.0 }
 0x937   : > { %v6061_v0 = vpop.f32.mrb[96].mxu0 }
 0x938   : > { %6204 = vst.msk [vmem:[%s11804_s18 + $0x58] sm:$0xff] %vm6192_vm0, %v6171_v9  ;;  %v6062_v14 = vadd.f32 %v11796_v54, %v6061_v0  ;;  %v6063_v23 = vpop.f32.mrb[97].mxu0 }
 0x93a   : > { %v6172_v30 = vmax.f32 %v6062_v14, 0.0 }
 0x93b   : > { %v6066_v41 = vpop.f32.mrb[98].mxu0 }
 0x93c   : > { %6205 = vst.msk [vmem:[%s11804_s18 + $0x60] sm:$0xff] %vm6192_vm0, %v6172_v30  ;;  %v6067_v63 = vadd.f32 %v11796_v54, %v6066_v41  ;;  %v6068_v24 = vpop.f32.mrb[99].mxu0 }
 0x93e   : > { %v6173_v55 = vmax.f32 %v6067_v63, 0.0 }
 0x93f   : > { %v6071_v39 = vpop.f32.mrb[100].mxu0 }
 0x940   : > { %6206 = vst.msk [vmem:[%s11804_s18 + $0x68] sm:$0xff] %vm6192_vm0, %v6173_v55  ;;  %v6072_v53 = vadd.f32 %v11796_v54, %v6071_v39  ;;  %v6073_v40 = vpop.f32.mrb[101].mxu0 }
 0x942   : > { %v6174_v44 = vmax.f32 %v6072_v53, 0.0 }
 0x943   : > { %v6076_v26 = vpop.f32.mrb[102].mxu0 }
 0x944   : > { %6207 = vst.msk [vmem:[%s11804_s18 + $0x70] sm:$0xff] %vm6192_vm0, %v6174_v44  ;;  %v6077_v25 = vadd.f32 %v11796_v54, %v6076_v26  ;;  %v6078_v33 = vpop.f32.mrb[103].mxu0 }
 0x946   : > { %v6175_v48 = vmax.f32 %v6077_v25, 0.0 }
 0x948   : > { %6208 = vst.msk [vmem:[%s11804_s18 + $0x78] sm:$0xff] %vm6192_vm0, %v6175_v48  ;;  %v6081_v46 = vpop.f32.mrb[104].mxu0 }
 0x949   : > { %v6082_v8 = vadd.f32 %v11796_v54, %v6081_v46  ;;  %v6083_v15 = vpop.f32.mrb[105].mxu0 }
 0x94b   : > { %v6176_v43 = vmax.f32 %v6082_v8, 0.0 }
 0x94c   : > { %v6086_v34 = vpop.f32.mrb[106].mxu0 }
 0x94d   : > { %6209 = vst.msk [vmem:[%s11804_s18 + $0x80] sm:$0xff] %vm6192_vm0, %v6176_v43  ;;  %v6087_v10 = vadd.f32 %v11796_v54, %v6086_v34  ;;  %v6088_v60 = vpop.f32.mrb[107].mxu0 }
 0x94f   : > { %v6177_v16 = vmax.f32 %v6087_v10, 0.0 }
 0x950   : > { %v6091_v42 = vpop.f32.mrb[108].mxu0 }
 0x951   : > { %6210 = vst.msk [vmem:[%s11804_s18 + $0x88] sm:$0xff] %vm6192_vm0, %v6177_v16  ;;  %v6092_v17 = vadd.f32 %v11796_v54, %v6091_v42  ;;  %v6093_v3 = vpop.f32.mrb[109].mxu0 }
 0x953   : > { %v6178_v29 = vmax.f32 %v6092_v17, 0.0 }
 0x954   : > { %v6096_v61 = vpop.f32.mrb[110].mxu0 }
 0x955   : > { %6211 = vst.msk [vmem:[%s11804_s18 + $0x90] sm:$0xff] %vm6192_vm0, %v6178_v29  ;;  %v6097_v37 = vadd.f32 %v11796_v54, %v6096_v61  ;;  %v6098_v31 = vpop.f32.mrb[111].mxu0 }
 0x957   : > { %v6179_v21 = vmax.f32 %v6097_v37, 0.0 }
 0x958   : > { %v6101_v38 = vpop.f32.mrb[112].mxu0 }
 0x959   : > { %6212 = vst.msk [vmem:[%s11804_s18 + $0x98] sm:$0xff] %vm6192_vm0, %v6179_v21  ;;  %v6102_v32 = vadd.f32 %v11796_v54, %v6101_v38  ;;  %v6103_v7 = vpop.f32.mrb[113].mxu0 }
 0x95b   : > { %v6180_v12 = vmax.f32 %v6102_v32, 0.0 }
 0x95c   : > { %v6106_v56 = vpop.f32.mrb[114].mxu0 }
 0x95d   : > { %6213 = vst.msk [vmem:[%s11804_s18 + $0xa0] sm:$0xff] %vm6192_vm0, %v6180_v12  ;;  %v6107_v1 = vadd.f32 %v11796_v54, %v6106_v56  ;;  %v6108_v6 = vpop.f32.mrb[115].mxu0 }
 0x95f   : > { %v6181_v2 = vmax.f32 %v6107_v1, 0.0 }
 0x960   : > { %v6111_v28 = vpop.f32.mrb[116].mxu0 }
 0x961   : > { %6214 = vst.msk [vmem:[%s11804_s18 + $0xa8] sm:$0xff] %vm6192_vm0, %v6181_v2  ;;  %v6112_v19 = vadd.f32 %v11796_v54, %v6111_v28  ;;  %v6113_v57 = vpop.f32.mrb[117].mxu0 }
 0x963   : > { %v6182_v49 = vmax.f32 %v6112_v19, 0.0 }
 0x964   : > { %v6116_v36 = vpop.f32.mrb[118].mxu0 }
 0x965   : > { %6215 = vst.msk [vmem:[%s11804_s18 + $0xb0] sm:$0xff] %vm6192_vm0, %v6182_v49  ;;  %v6117_v51 = vadd.f32 %v11796_v54, %v6116_v36  ;;  %v6118_v47 = vpop.f32.mrb[119].mxu0 }
 0x967   : > { %v6183_v18 = vmax.f32 %v6117_v51, 0.0 }
 0x968   : > { %v6121_v11 = vpop.f32.mrb[120].mxu0 }
 0x969   : > { %6216 = vst.msk [vmem:[%s11804_s18 + $0xb8] sm:$0xff] %vm6192_vm0, %v6183_v18  ;;  %v6122_v20 = vadd.f32 %v11796_v54, %v6121_v11  ;;  %v6123_v52 = vpop.f32.mrb[121].mxu0 }
 0x96b   : > { %v6184_v50 = vmax.f32 %v6122_v20, 0.0 }
 0x96c   : > { %v6126_v22 = vpop.f32.mrb[122].mxu0 }
 0x96d   : > { %6217 = vst.msk [vmem:[%s11804_s18 + $0xc0] sm:$0xff] %vm6192_vm0, %v6184_v50  ;;  %v6127_v4 = vadd.f32 %v11796_v54, %v6126_v22  ;;  %v6128_v59 = vpop.f32.mrb[123].mxu0 }
 0x96f   : > { %v6185_v58 = vmax.f32 %v6127_v4, 0.0 }
 0x971   : > { %6218 = vst.msk [vmem:[%s11804_s18 + $0xc8] sm:$0xff] %vm6192_vm0, %v6185_v58 }
 0x974   : > { %v6131_v35 = vpop.f32.mrb[124].mxu0 }
 0x975   : > { %v6132_v27 = vadd.f32 %v11796_v54, %v6131_v35  ;;  %v6133_v5 = vpop.f32.mrb[125].mxu0 }
 0x977   : > { %v6186_v45 = vmax.f32 %v6132_v27, 0.0 }
 0x979   : > { %6219 = vst.msk [vmem:[%s11804_s18 + $0xd0] sm:$0xff] %vm6192_vm0, %v6186_v45  ;;  %v6136_v62 = vpop.f32.mrb[126].mxu0 }
 0x97a   : > { %v6137_v13 = vadd.f32 %v11796_v54, %v6136_v62  ;;  %v6138_v9 = vpop.f32.mrb[127].mxu0 }
 0x97c   : > { %v6187_v0 = vmax.f32 %v6137_v13, 0.0 }
 0x97e   : > { %6220 = vst.msk [vmem:[%s11804_s18 + $0xd8] sm:$0xff] %vm6192_vm0, %v6187_v0 }
 0x989   : > { %v6141_v14 = vpop.f32.mrb[128].mxu0 }
 0x98a   : > { %v6142_v23 = vadd.f32 %v11796_v54, %v6141_v14  ;;  %v6143_v30 = vpop.f32.mrb[129].mxu0 }
 0x98c   : > { %v6188_v41 = vmax.f32 %v6142_v23, 0.0 }
 0x98e   : > { %6221 = vst.msk [vmem:[%s11804_s18 + $0xe0] sm:$0xff] %vm6192_vm0, %v6188_v41 }
 0x991   : > { %v6146_v63 = vpop.f32.mrb[130].mxu0 }
 0x992   : > { %v6147_v24 = vadd.f32 %v11796_v54, %v6146_v63  ;;  %v6148_v55 = vpop.f32.mrb[131].mxu0 }
 0x994   : > { %v6189_v39 = vmax.f32 %v6147_v24, 0.0 }
 0x996   : > { %6222 = vst.msk [vmem:[%s11804_s18 + $0xe8] sm:$0xff] %vm6192_vm0, %v6189_v39 }
 0x9b1   : > { %v6151_v53 = vpop.f32.mrb[132].mxu0 }
 0x9b2   : > { %v6152_v40 = vadd.f32 %v11796_v54, %v6151_v53  ;;  %v6153_v44 = vpop.f32.mrb[133].mxu0 }
 0x9b4   : > { %v6190_v26 = vmax.f32 %v6152_v40, 0.0 }
 0x9b6   : > { %6223 = vst.msk [vmem:[%s11804_s18 + $0xf0] sm:$0xff] %vm6192_vm0, %v6190_v26 }
 0x9bd   : > { %v6156_v25 = vpop.f32.mrb[134].mxu0 }
 0x9be   : > { %v6157_v33 = vadd.f32 %v11796_v54, %v6156_v25  ;;  %v6158_v48 = vpop.f32.mrb[135].mxu0 }
 0x9c0   : > { %v6191_v46 = vmax.f32 %v6157_v33, 0.0 }
 0x9c2   : > { %6224 = vst.msk [vmem:[%s11804_s18 + $0xf8] sm:$0xff] %vm6192_vm0, %v6191_v46 }
 0x9c3 PF: > { %s21_s11 = sadd.s32 1, %s6932_s11  }
 0x9c4   : > { %p18_p4 = scmp.ge.s32.totalorder %s21_s11, 4  }
 0x9c6   :  { %20 = sbr.rel (!%p18_p4) target bundleno = 3 (0x3), region = 90 }

</bundles_post_ra>
